<compile_context>
chip_gen: v7x
topology: tpu7x:2x2x1
jax: 0.10.0
libtpu: 0.0.40
codegen_flags: <defaults>
</compile_context>

<pallas_src>
import functools

import jax
import jax.numpy as jnp
from jax.experimental import pallas as pl
from jax.experimental.pallas import tpu as pltpu

LN_EPS = 1e-5


# ---------------------------------------------------------------------------
# In-kernel helpers (f32 VPU/EUP math)
# ---------------------------------------------------------------------------
def _layernorm(x, gamma, beta):
    mu = jnp.mean(x, axis=-1, keepdims=True)
    var = jnp.mean((x - mu) ** 2, axis=-1, keepdims=True)
    return (x - mu) * jax.lax.rsqrt(var + LN_EPS) * gamma + beta


def _gelu_tanh(x):
    # tanh-form GELU (tanh rides the EUP slot).  Max |diff| vs the exact erf
    # GELU is ~3e-4 near |x|~2 and far smaller at the magnitudes seen here.
    c = 0.7978845608028654  # sqrt(2/pi)
    return 0.5 * x * (1.0 + jnp.tanh(c * (x + 0.044715 * x * x * x)))


# ---------------------------------------------------------------------------
# Fused kernel:  out = y + fc2(GELU(fc1(LN2(y)))),  y = x + proj(MHSA(LN1(x)))
# Block is (Rb, C) rows with Rb = TB * seq_len (whole sequences per block).
# ---------------------------------------------------------------------------
def _fused_block_kernel(x_ref,
                        g1_ref, b1_ref,
                        wqkv_ref, wo_ref, bo_ref,
                        g2_ref, b2_ref,
                        w1_ref, bf1_ref, w2_ref, bf2_ref,
                        o_ref, *, num_heads, seq_len):
    R, C = x_ref.shape
    S = seq_len
    TB = R // S
    hd = C // num_heads
    mm_dt = wqkv_ref.dtype                     # bf16 if wrapper casts weights

    x = x_ref[...].astype(jnp.float32)         # (R, C)

    # ---- LayerNorm 1 -> fused QKV matmul -> per-head attention -------------
    xn = _layernorm(x, g1_ref[...], b1_ref[...])
    qkv = jnp.dot(xn.astype(mm_dt), wqkv_ref[...],
                  preferred_element_type=jnp.float32)          # (R, 3C)
    qkv3 = qkv.reshape(TB, S, 3 * C)

    heads = []
    for h in range(num_heads):                 # nh is small; static unroll
        q = qkv3[:, :, h * hd:(h + 1) * hd].astype(mm_dt)              # (TB,S,hd)
        k = qkv3[:, :, C + h * hd:C + (h + 1) * hd].astype(mm_dt)
        v = qkv3[:, :, 2 * C + h * hd:2 * C + (h + 1) * hd].astype(mm_dt)
        # softmax scale is already folded into the Wq columns wrapper-side
        s = jnp.einsum("bqd,bkd->bqk", q, k,
                       preferred_element_type=jnp.float32)
        s = s - jnp.max(s, axis=-1, keepdims=True)
        p = jnp.exp(s)
        p = p * pl.reciprocal(jnp.sum(p, axis=-1, keepdims=True), approx=True)
        heads.append(jnp.einsum("bqk,bkd->bqd", p.astype(mm_dt), v,
                                preferred_element_type=jnp.float32))
    attn = jnp.concatenate(heads, axis=-1).reshape(R, C)

    # ---- single output projection + residual --------------------------------
    y = x + jnp.dot(attn.astype(mm_dt), wo_ref[...],
                    preferred_element_type=jnp.float32) + bo_ref[...]

    # ---- LayerNorm 2 -> MLP -> residual --------------------------------------
    yn = _layernorm(y, g2_ref[...], b2_ref[...])
    hid = jnp.dot(yn.astype(mm_dt), w1_ref[...],
                  preferred_element_type=jnp.float32) + bf1_ref[...]
    hid = _gelu_tanh(hid)
    z = y + jnp.dot(hid.astype(mm_dt), w2_ref[...],
                    preferred_element_type=jnp.float32) + bf2_ref[...]

    o_ref[...] = z.astype(o_ref.dtype)


# ---------------------------------------------------------------------------
# Block-size / grid heuristics
# ---------------------------------------------------------------------------
def _min_grid_for_device():
    """>=2 grid steps only on devices with two TensorCores per device."""
    try:
        kind = jax.devices()[0].device_kind.lower()
    except Exception:  # pragma: no cover
        return 1
    return 2 if any(t in kind for t in ("v7", "7x", "v4", "v5p")) else 1


def _pick_block_batch(num_seqs, seq_len, target_rows=2048, min_grid=1):
    """Largest divisor tb of num_seqs with tb*seq_len <= target_rows and at
    least `min_grid` grid steps; prefer 8-row-aligned blocks."""
    candidates = []
    for tb in range(1, num_seqs + 1):
        if num_seqs % tb:
            continue
        if tb * seq_len > max(target_rows, seq_len):
            continue
        if num_seqs // tb < min_grid:
            continue
        candidates.append(tb)
    if not candidates:
        return 1
    aligned = [tb for tb in candidates if (tb * seq_len) % 8 == 0]
    return max(aligned) if aligned else max(candidates)


# ---------------------------------------------------------------------------
# Wrapper: one fused pallas_call over (num_seqs, S, C)
# ---------------------------------------------------------------------------
def fused_attn_mlp(x, ln_attn, attn_p, ln_mlp, mlp_p, *, num_heads,
                   use_bf16=True, target_rows=2048):
    """x: (num_seqs, S, C).  Returns x after the fused attn + mlp residuals."""
    NS, S, C = x.shape
    hd = C // num_heads
    scale = float(hd) ** -0.5
    Hd = mlp_p["w1"].shape[1]

    # Fold the softmax scale into the Wq columns (one-off).
    wqkv = attn_p["wqkv"].at[:, :C].multiply(scale)            # (C, 3C)
    wo = attn_p["wproj"]                                       # (C, C)
    w1, w2 = mlp_p["w1"], mlp_p["w2"]
    if use_bf16:   # bf16 MXU operands, f32 accumulation
        wqkv = wqkv.astype(jnp.bfloat16)
        wo = wo.astype(jnp.bfloat16)
        w1 = w1.astype(jnp.bfloat16)
        w2 = w2.astype(jnp.bfloat16)

    tb = _pick_block_batch(NS, S, target_rows=target_rows,
                           min_grid=_min_grid_for_device())
    Rb = tb * S
    R_total = NS * S
    grid = (R_total // Rb,)

    xf = x.reshape(R_total, C)

    def _w(shape):
        nd = len(shape)
        return pl.BlockSpec(shape, lambda i, _nd=nd: (0,) * _nd)

    kernel = functools.partial(_fused_block_kernel,
                               num_heads=num_heads, seq_len=S)
    out = pl.pallas_call(
        kernel,
        out_shape=jax.ShapeDtypeStruct((R_total, C), x.dtype),
        grid=grid,
        in_specs=[
            pl.BlockSpec((Rb, C), lambda i: (i, 0)),           # x rows
            _w((1, C)), _w((1, C)),                            # LN1 gamma, beta
            _w((C, 3 * C)),                                    # fused Wqkv
            _w((C, C)), _w((1, C)),                            # Wproj, bproj
            _w((1, C)), _w((1, C)),                            # LN2 gamma, beta
            _w((C, Hd)), _w((1, Hd)),                          # fc1
            _w((Hd, C)), _w((1, C)),                           # fc2
        ],
        out_specs=pl.BlockSpec((Rb, C), lambda i: (i, 0)),
        compiler_params=pltpu.CompilerParams(
            dimension_semantics=("parallel",),
            vmem_limit_bytes=32 * 1024 * 1024),
    )(xf, ln_attn["gamma"], ln_attn["beta"], wqkv, wo, attn_p["bproj"],
      ln_mlp["gamma"], ln_mlp["beta"], w1, mlp_p["b1"], w2, mlp_p["b2"])
    return out.reshape(NS, S, C)


# ---------------------------------------------------------------------------
# MultiscaleBlock forward (drop / drop_path = 0 -> identity)
# ---------------------------------------------------------------------------
def multiscale_block_forward(x, params, *, num_heads, use_bf16=True):
    """x: (B, N, H, W) with W == dim."""
    B, N, H, W = x.shape
    p = params
    stage = functools.partial(fused_attn_mlp, num_heads=num_heads,
                              use_bf16=use_bf16)

    xf = x.reshape(B * N, H, W)
    if N == 1:
        xf = stage(xf, p["norm1"], p["attn"], p["norm2"], p["mlp"])
        return xf.reshape(B, N, H, W)

    # stage 1 (fused): attn over the H tokens, then mlp2
    xf = stage(xf, p["norm1"], p["attn"], p["norm4"], p["mlp2"])
    # multiscale layout (B, N, H, W) -> (B*H, N, W)
    xm = xf.reshape(B, N, H, W).transpose(0, 2, 1, 3).reshape(B * H, N, W)
    # stage 2 (fused): multiscale attn over the N scales, then mlp.
    # (The PyTorch module applies mlp(norm2(.)) after transposing back; mlp is
    #  strictly per-token so it commutes with the permutation.)
    xm = stage(xm, p["norm3"], p["attn_multiscale"], p["norm2"], p["mlp"])
    return xm.reshape(B, H, N, W).transpose(0, 2, 1, 3).reshape(B, N, H, W)


# ---------------------------------------------------------------------------
# Parameter construction (deterministic, synthetic)
# ---------------------------------------------------------------------------
def init_params(key, dim, mlp_ratio=4.0, dtype=jnp.float32):
    hidden = int(dim * mlp_ratio)
    keys = jax.random.split(key, 8)

    def lin(k, fan_in, fan_out):
        # weight stored already transposed: (fan_in, fan_out), used as x @ W
        return (0.02 * jax.random.normal(k, (fan_in, fan_out), dtype)).astype(dtype)

    def attn_params(k):
        k1, k2 = jax.random.split(k)
        return dict(wqkv=lin(k1, dim, 3 * dim),            # qkv_bias=False
                    wproj=lin(k2, dim, dim),
                    bproj=jnp.zeros((1, dim), dtype))

    def mlp_params(k):
        k1, k2 = jax.random.split(k)
        return dict(w1=lin(k1, dim, hidden), b1=jnp.zeros((1, hidden), dtype),
                    w2=lin(k2, hidden, dim), b2=jnp.zeros((1, dim), dtype))

    def ln_params():
        return dict(gamma=jnp.ones((1, dim), dtype), beta=jnp.zeros((1, dim), dtype))

    return dict(
        attn=attn_params(keys[0]),
        attn_multiscale=attn_params(keys[1]),
        mlp=mlp_params(keys[2]),
        mlp2=mlp_params(keys[3]),
        norm1=ln_params(), norm2=ln_params(), norm3=ln_params(), norm4=ln_params(),
    )


# ---------------------------------------------------------------------------
# Plain-JAX reference (mirrors the PyTorch module) for a correctness check
# ---------------------------------------------------------------------------
def _reference_forward(x, p, num_heads):
    def ln(x3, g, b):
        mu = jnp.mean(x3, -1, keepdims=True)
        var = jnp.mean((x3 - mu) ** 2, -1, keepdims=True)
        return (x3 - mu) / jnp.sqrt(var + LN_EPS) * g + b

    def attn(x3, ap):
        Bb, S, C = x3.shape
        hd = C // num_heads
        qkv = x3 @ ap["wqkv"]
        q, k, v = jnp.split(qkv, 3, axis=-1)
        q = q.reshape(Bb, S, num_heads, hd).transpose(0, 2, 1, 3)
        k = k.reshape(Bb, S, num_heads, hd).transpose(0, 2, 1, 3)
        v = v.reshape(Bb, S, num_heads, hd).transpose(0, 2, 1, 3)
        a = (q @ jnp.swapaxes(k, -1, -2)) * (hd ** -0.5)
        a = jax.nn.softmax(a, axis=-1)
        o = (a @ v).transpose(0, 2, 1, 3).reshape(Bb, S, C)
        return o @ ap["wproj"] + ap["bproj"]

    def mlp(x3, mp):
        h = jax.nn.gelu(x3 @ mp["w1"] + mp["b1"], approximate=False)
        return h @ mp["w2"] + mp["b2"]

    B, N, H, W = x.shape
    xf = x.reshape(B * N, H, W)
    xf = xf + attn(ln(xf, p["norm1"]["gamma"], p["norm1"]["beta"]), p["attn"])
    if N == 1:
        xf = xf + mlp(ln(xf, p["norm2"]["gamma"], p["norm2"]["beta"]), p["mlp"])
        return xf.reshape(B, N, H, W)
    xf = xf + mlp(ln(xf, p["norm4"]["gamma"], p["norm4"]["beta"]), p["mlp2"])
    xm = xf.reshape(B, N, H, W).transpose(0, 2, 1, 3).reshape(B * H, N, W)
    xm = xm + attn(ln(xm, p["norm3"]["gamma"], p["norm3"]["beta"]),
                   p["attn_multiscale"])
    xf = xm.reshape(B, H, N, W).transpose(0, 2, 1, 3).reshape(B * N, H, W)
    xf = xf + mlp(ln(xf, p["norm2"]["gamma"], p["norm2"]["beta"]), p["mlp"])
    return xf.reshape(B, N, H, W)


# ---------------------------------------------------------------------------
if __name__ == "__main__":
    B, N, H, W = 2, 4, 8, 32            # W = dim
    num_heads = 4

    key = jax.random.PRNGKey(0)
    kx, kp = jax.random.split(key)
    x = jax.random.normal(kx, (B, N, H, W), jnp.float32)
    params = init_params(kp, dim=W, mlp_ratio=4.0)

    fwd = jax.jit(functools.partial(multiscale_block_forward,
                                    num_heads=num_heads))
    out = fwd(x, params)
    jax.block_until_ready(out)
    assert out.shape == (B, N, H, W)

    # f32 reference at HIGHEST matmul precision, scoped locally (no global
    # config mutation).
    with jax.default_matmul_precision("highest"):
        ref = _reference_forward(x, params, num_heads)
    err = float(jnp.max(jnp.abs(out - ref)))
    assert err < 5e-3, f"max abs err vs reference: {err}"

    print("KERNEL_OK")
</pallas_src>

<mosaic_0001>
module attributes {stable_mosaic.version = 11 : i64} {
  func.func @_fused_block_kernel(%arg0: i32, %arg1: memref<64x32xf32, #tpu.memory_space<vmem>>, %arg2: memref<1x32xf32, #tpu.memory_space<vmem>>, %arg3: memref<1x32xf32, #tpu.memory_space<vmem>>, %arg4: memref<32x96xbf16, #tpu.memory_space<vmem>>, %arg5: memref<32x32xbf16, #tpu.memory_space<vmem>>, %arg6: memref<1x32xf32, #tpu.memory_space<vmem>>, %arg7: memref<1x32xf32, #tpu.memory_space<vmem>>, %arg8: memref<1x32xf32, #tpu.memory_space<vmem>>, %arg9: memref<32x128xbf16, #tpu.memory_space<vmem>>, %arg10: memref<1x128xf32, #tpu.memory_space<vmem>>, %arg11: memref<128x32xbf16, #tpu.memory_space<vmem>>, %arg12: memref<1x32xf32, #tpu.memory_space<vmem>>, %arg13: memref<64x32xf32, #tpu.memory_space<vmem>>) attributes {dimension_semantics = [#tpu.dimension_semantics<parallel>], iteration_bounds = array<i64: 1>, scalar_prefetch = 0 : i64, scratch_operands = 0 : i64, tpu.core_type = #tpu.core_type<tc>, window_params = [{transform_indices = @transform_0, window_bounds = array<i64: 64, 32>}, {pipeline_mode = #tpu.pipeline_mode<synchronous>, transform_indices = @transform_1, window_bounds = array<i64: 1, 32>}, {pipeline_mode = #tpu.pipeline_mode<synchronous>, transform_indices = @transform_2, window_bounds = array<i64: 1, 32>}, {pipeline_mode = #tpu.pipeline_mode<synchronous>, transform_indices = @transform_3, window_bounds = array<i64: 32, 96>}, {pipeline_mode = #tpu.pipeline_mode<synchronous>, transform_indices = @transform_4, window_bounds = array<i64: 32, 32>}, {pipeline_mode = #tpu.pipeline_mode<synchronous>, transform_indices = @transform_5, window_bounds = array<i64: 1, 32>}, {pipeline_mode = #tpu.pipeline_mode<synchronous>, transform_indices = @transform_6, window_bounds = array<i64: 1, 32>}, {pipeline_mode = #tpu.pipeline_mode<synchronous>, transform_indices = @transform_7, window_bounds = array<i64: 1, 32>}, {pipeline_mode = #tpu.pipeline_mode<synchronous>, transform_indices = @transform_8, window_bounds = array<i64: 32, 128>}, {pipeline_mode = #tpu.pipeline_mode<synchronous>, transform_indices = @transform_9, window_bounds = array<i64: 1, 128>}, {pipeline_mode = #tpu.pipeline_mode<synchronous>, transform_indices = @transform_10, window_bounds = array<i64: 128, 32>}, {pipeline_mode = #tpu.pipeline_mode<synchronous>, transform_indices = @transform_11, window_bounds = array<i64: 1, 32>}, {transform_indices = @transform_12, window_bounds = array<i64: 64, 32>}]} {
    %c0 = arith.constant 0 : index
    %c0_0 = arith.constant 0 : index
    %0 = vector.load %arg1[%c0, %c0_0] : memref<64x32xf32, #tpu.memory_space<vmem>>, vector<64x32xf32>
    %c0_1 = arith.constant 0 : index
    %c0_2 = arith.constant 0 : index
    %1 = vector.load %arg2[%c0_1, %c0_2] : memref<1x32xf32, #tpu.memory_space<vmem>>, vector<1x32xf32>
    %c0_3 = arith.constant 0 : index
    %c0_4 = arith.constant 0 : index
    %2 = vector.load %arg3[%c0_3, %c0_4] : memref<1x32xf32, #tpu.memory_space<vmem>>, vector<1x32xf32>
    %cst = arith.constant dense<0.000000e+00> : vector<64xf32>
    %3 = vector.multi_reduction <add>, %0, %cst [1] : vector<64x32xf32> to vector<64xf32>
    %4 = vector.shape_cast %3 : vector<64xf32> to vector<64x1xf32>
    %cst_5 = arith.constant 3.200000e+01 : f32
    %5 = vector.broadcast %cst_5 : f32 to vector<64x1xf32>
    %6 = arith.divf %4, %5 : vector<64x1xf32>
    %7 = vector.broadcast %6 : vector<64x1xf32> to vector<64x32xf32>
    %8 = arith.subf %0, %7 : vector<64x32xf32>
    %9 = arith.mulf %8, %8 : vector<64x32xf32>
    %cst_6 = arith.constant dense<0.000000e+00> : vector<64xf32>
    %10 = vector.multi_reduction <add>, %9, %cst_6 [1] : vector<64x32xf32> to vector<64xf32>
    %11 = vector.shape_cast %10 : vector<64xf32> to vector<64x1xf32>
    %cst_7 = arith.constant 3.200000e+01 : f32
    %12 = vector.broadcast %cst_7 : f32 to vector<64x1xf32>
    %13 = arith.divf %11, %12 : vector<64x1xf32>
    %14 = vector.broadcast %6 : vector<64x1xf32> to vector<64x32xf32>
    %15 = arith.subf %0, %14 : vector<64x32xf32>
    %cst_8 = arith.constant 9.99999974E-6 : f32
    %16 = vector.broadcast %cst_8 : f32 to vector<64x1xf32>
    %17 = arith.addf %13, %16 : vector<64x1xf32>
    %18 = math.rsqrt %17 : vector<64x1xf32>
    %19 = vector.broadcast %18 : vector<64x1xf32> to vector<64x32xf32>
    %20 = arith.mulf %15, %19 : vector<64x32xf32>
    %21 = vector.broadcast %1 : vector<1x32xf32> to vector<64x32xf32>
    %22 = arith.mulf %20, %21 : vector<64x32xf32>
    %23 = vector.broadcast %2 : vector<1x32xf32> to vector<64x32xf32>
    %24 = arith.addf %22, %23 : vector<64x32xf32>
    %25 = arith.truncf %24 : vector<64x32xf32> to vector<64x32xbf16>
    %c0_9 = arith.constant 0 : index
    %c0_10 = arith.constant 0 : index
    %26 = vector.load %arg4[%c0_9, %c0_10] : memref<32x96xbf16, #tpu.memory_space<vmem>>, vector<32x96xbf16>
    %cst_11 = arith.constant dense<0.000000e+00> : vector<64x96xf32>
    %27 = tpu.matmul %25, %26, %cst_11 {dimension_numbers = #tpu.dot_dimension_numbers<[1], [0], [0], [1], [0, 0, 1, 1], [], []>} : vector<64x32xbf16>, vector<32x96xbf16>, vector<64x96xf32> -> vector<64x96xf32>
    %28 = vector.shape_cast %27 : vector<64x96xf32> to vector<8x8x96xf32>
    %29 = vector.extract_strided_slice %28 {offsets = [0, 0, 0], sizes = [8, 8, 8], strides = [1, 1, 1]} : vector<8x8x96xf32> to vector<8x8x8xf32>
    %30 = arith.truncf %29 : vector<8x8x8xf32> to vector<8x8x8xbf16>
    %31 = vector.extract_strided_slice %28 {offsets = [0, 0, 32], sizes = [8, 8, 8], strides = [1, 1, 1]} : vector<8x8x96xf32> to vector<8x8x8xf32>
    %32 = arith.truncf %31 : vector<8x8x8xf32> to vector<8x8x8xbf16>
    %33 = vector.extract_strided_slice %28 {offsets = [0, 0, 64], sizes = [8, 8, 8], strides = [1, 1, 1]} : vector<8x8x96xf32> to vector<8x8x8xf32>
    %34 = arith.truncf %33 : vector<8x8x8xf32> to vector<8x8x8xbf16>
    "tpu.trace_start"() <{level = 10 : i32, message = "bqd,bkd->bqk"}> : () -> ()
    %cst_12 = arith.constant dense<0.000000e+00> : vector<8x8x8xf32>
    %35 = tpu.matmul %30, %32, %cst_12 {dimension_numbers = #tpu.dot_dimension_numbers<[2], [2], [1], [1], [0, 0, 0, 1, 1, 1], [0], [0]>} : vector<8x8x8xbf16>, vector<8x8x8xbf16>, vector<8x8x8xf32> -> vector<8x8x8xf32>
    "tpu.trace_stop"() : () -> ()
    %cst_13 = arith.constant dense<0xFF800000> : vector<8x8xf32>
    %36 = vector.multi_reduction <maximumf>, %35, %cst_13 [2] : vector<8x8x8xf32> to vector<8x8xf32>
    %37 = vector.shape_cast %36 : vector<8x8xf32> to vector<8x8x1xf32>
    %38 = vector.broadcast %37 : vector<8x8x1xf32> to vector<8x8x8xf32>
    %39 = arith.subf %35, %38 : vector<8x8x8xf32>
    %40 = math.exp %39 : vector<8x8x8xf32>
    %cst_14 = arith.constant dense<0.000000e+00> : vector<8x8xf32>
    %41 = vector.multi_reduction <add>, %40, %cst_14 [2] : vector<8x8x8xf32> to vector<8x8xf32>
    %42 = vector.shape_cast %41 : vector<8x8xf32> to vector<8x8x1xf32>
    %43 = tpu.reciprocal %42 {approx = true} : vector<8x8x1xf32> -> vector<8x8x1xf32>
    %44 = vector.broadcast %43 : vector<8x8x1xf32> to vector<8x8x8xf32>
    %45 = arith.mulf %40, %44 : vector<8x8x8xf32>
    %46 = arith.truncf %45 : vector<8x8x8xf32> to vector<8x8x8xbf16>
    "tpu.trace_start"() <{level = 10 : i32, message = "bqk,bkd->bqd"}> : () -> ()
    %cst_15 = arith.constant dense<0.000000e+00> : vector<8x8x8xf32>
    %47 = tpu.matmul %46, %34, %cst_15 {dimension_numbers = #tpu.dot_dimension_numbers<[2], [1], [1], [2], [0, 0, 0, 1, 1, 2], [0], [0]>} : vector<8x8x8xbf16>, vector<8x8x8xbf16>, vector<8x8x8xf32> -> vector<8x8x8xf32>
    "tpu.trace_stop"() : () -> ()
    %48 = vector.extract_strided_slice %28 {offsets = [0, 0, 8], sizes = [8, 8, 8], strides = [1, 1, 1]} : vector<8x8x96xf32> to vector<8x8x8xf32>
    %49 = arith.truncf %48 : vector<8x8x8xf32> to vector<8x8x8xbf16>
    %50 = vector.extract_strided_slice %28 {offsets = [0, 0, 40], sizes = [8, 8, 8], strides = [1, 1, 1]} : vector<8x8x96xf32> to vector<8x8x8xf32>
    %51 = arith.truncf %50 : vector<8x8x8xf32> to vector<8x8x8xbf16>
    %52 = vector.extract_strided_slice %28 {offsets = [0, 0, 72], sizes = [8, 8, 8], strides = [1, 1, 1]} : vector<8x8x96xf32> to vector<8x8x8xf32>
    %53 = arith.truncf %52 : vector<8x8x8xf32> to vector<8x8x8xbf16>
    "tpu.trace_start"() <{level = 10 : i32, message = "bqd,bkd->bqk"}> : () -> ()
    %cst_16 = arith.constant dense<0.000000e+00> : vector<8x8x8xf32>
    %54 = tpu.matmul %49, %51, %cst_16 {dimension_numbers = #tpu.dot_dimension_numbers<[2], [2], [1], [1], [0, 0, 0, 1, 1, 1], [0], [0]>} : vector<8x8x8xbf16>, vector<8x8x8xbf16>, vector<8x8x8xf32> -> vector<8x8x8xf32>
    "tpu.trace_stop"() : () -> ()
    %cst_17 = arith.constant dense<0xFF800000> : vector<8x8xf32>
    %55 = vector.multi_reduction <maximumf>, %54, %cst_17 [2] : vector<8x8x8xf32> to vector<8x8xf32>
    %56 = vector.shape_cast %55 : vector<8x8xf32> to vector<8x8x1xf32>
    %57 = vector.broadcast %56 : vector<8x8x1xf32> to vector<8x8x8xf32>
    %58 = arith.subf %54, %57 : vector<8x8x8xf32>
    %59 = math.exp %58 : vector<8x8x8xf32>
    %cst_18 = arith.constant dense<0.000000e+00> : vector<8x8xf32>
    %60 = vector.multi_reduction <add>, %59, %cst_18 [2] : vector<8x8x8xf32> to vector<8x8xf32>
    %61 = vector.shape_cast %60 : vector<8x8xf32> to vector<8x8x1xf32>
    %62 = tpu.reciprocal %61 {approx = true} : vector<8x8x1xf32> -> vector<8x8x1xf32>
    %63 = vector.broadcast %62 : vector<8x8x1xf32> to vector<8x8x8xf32>
    %64 = arith.mulf %59, %63 : vector<8x8x8xf32>
    %65 = arith.truncf %64 : vector<8x8x8xf32> to vector<8x8x8xbf16>
    "tpu.trace_start"() <{level = 10 : i32, message = "bqk,bkd->bqd"}> : () -> ()
    %cst_19 = arith.constant dense<0.000000e+00> : vector<8x8x8xf32>
    %66 = tpu.matmul %65, %53, %cst_19 {dimension_numbers = #tpu.dot_dimension_numbers<[2], [1], [1], [2], [0, 0, 0, 1, 1, 2], [0], [0]>} : vector<8x8x8xbf16>, vector<8x8x8xbf16>, vector<8x8x8xf32> -> vector<8x8x8xf32>
    "tpu.trace_stop"() : () -> ()
    %67 = vector.extract_strided_slice %28 {offsets = [0, 0, 16], sizes = [8, 8, 8], strides = [1, 1, 1]} : vector<8x8x96xf32> to vector<8x8x8xf32>
    %68 = arith.truncf %67 : vector<8x8x8xf32> to vector<8x8x8xbf16>
    %69 = vector.extract_strided_slice %28 {offsets = [0, 0, 48], sizes = [8, 8, 8], strides = [1, 1, 1]} : vector<8x8x96xf32> to vector<8x8x8xf32>
    %70 = arith.truncf %69 : vector<8x8x8xf32> to vector<8x8x8xbf16>
    %71 = vector.extract_strided_slice %28 {offsets = [0, 0, 80], sizes = [8, 8, 8], strides = [1, 1, 1]} : vector<8x8x96xf32> to vector<8x8x8xf32>
    %72 = arith.truncf %71 : vector<8x8x8xf32> to vector<8x8x8xbf16>
    "tpu.trace_start"() <{level = 10 : i32, message = "bqd,bkd->bqk"}> : () -> ()
    %cst_20 = arith.constant dense<0.000000e+00> : vector<8x8x8xf32>
    %73 = tpu.matmul %68, %70, %cst_20 {dimension_numbers = #tpu.dot_dimension_numbers<[2], [2], [1], [1], [0, 0, 0, 1, 1, 1], [0], [0]>} : vector<8x8x8xbf16>, vector<8x8x8xbf16>, vector<8x8x8xf32> -> vector<8x8x8xf32>
    "tpu.trace_stop"() : () -> ()
    %cst_21 = arith.constant dense<0xFF800000> : vector<8x8xf32>
    %74 = vector.multi_reduction <maximumf>, %73, %cst_21 [2] : vector<8x8x8xf32> to vector<8x8xf32>
    %75 = vector.shape_cast %74 : vector<8x8xf32> to vector<8x8x1xf32>
    %76 = vector.broadcast %75 : vector<8x8x1xf32> to vector<8x8x8xf32>
    %77 = arith.subf %73, %76 : vector<8x8x8xf32>
    %78 = math.exp %77 : vector<8x8x8xf32>
    %cst_22 = arith.constant dense<0.000000e+00> : vector<8x8xf32>
    %79 = vector.multi_reduction <add>, %78, %cst_22 [2] : vector<8x8x8xf32> to vector<8x8xf32>
    %80 = vector.shape_cast %79 : vector<8x8xf32> to vector<8x8x1xf32>
    %81 = tpu.reciprocal %80 {approx = true} : vector<8x8x1xf32> -> vector<8x8x1xf32>
    %82 = vector.broadcast %81 : vector<8x8x1xf32> to vector<8x8x8xf32>
    %83 = arith.mulf %78, %82 : vector<8x8x8xf32>
    %84 = arith.truncf %83 : vector<8x8x8xf32> to vector<8x8x8xbf16>
    "tpu.trace_start"() <{level = 10 : i32, message = "bqk,bkd->bqd"}> : () -> ()
    %cst_23 = arith.constant dense<0.000000e+00> : vector<8x8x8xf32>
    %85 = tpu.matmul %84, %72, %cst_23 {dimension_numbers = #tpu.dot_dimension_numbers<[2], [1], [1], [2], [0, 0, 0, 1, 1, 2], [0], [0]>} : vector<8x8x8xbf16>, vector<8x8x8xbf16>, vector<8x8x8xf32> -> vector<8x8x8xf32>
    "tpu.trace_stop"() : () -> ()
    %86 = vector.extract_strided_slice %28 {offsets = [0, 0, 24], sizes = [8, 8, 8], strides = [1, 1, 1]} : vector<8x8x96xf32> to vector<8x8x8xf32>
    %87 = arith.truncf %86 : vector<8x8x8xf32> to vector<8x8x8xbf16>
    %88 = vector.extract_strided_slice %28 {offsets = [0, 0, 56], sizes = [8, 8, 8], strides = [1, 1, 1]} : vector<8x8x96xf32> to vector<8x8x8xf32>
    %89 = arith.truncf %88 : vector<8x8x8xf32> to vector<8x8x8xbf16>
    %90 = vector.extract_strided_slice %28 {offsets = [0, 0, 88], sizes = [8, 8, 8], strides = [1, 1, 1]} : vector<8x8x96xf32> to vector<8x8x8xf32>
    %91 = arith.truncf %90 : vector<8x8x8xf32> to vector<8x8x8xbf16>
    "tpu.trace_start"() <{level = 10 : i32, message = "bqd,bkd->bqk"}> : () -> ()
    %cst_24 = arith.constant dense<0.000000e+00> : vector<8x8x8xf32>
    %92 = tpu.matmul %87, %89, %cst_24 {dimension_numbers = #tpu.dot_dimension_numbers<[2], [2], [1], [1], [0, 0, 0, 1, 1, 1], [0], [0]>} : vector<8x8x8xbf16>, vector<8x8x8xbf16>, vector<8x8x8xf32> -> vector<8x8x8xf32>
    "tpu.trace_stop"() : () -> ()
    %cst_25 = arith.constant dense<0xFF800000> : vector<8x8xf32>
    %93 = vector.multi_reduction <maximumf>, %92, %cst_25 [2] : vector<8x8x8xf32> to vector<8x8xf32>
    %94 = vector.shape_cast %93 : vector<8x8xf32> to vector<8x8x1xf32>
    %95 = vector.broadcast %94 : vector<8x8x1xf32> to vector<8x8x8xf32>
    %96 = arith.subf %92, %95 : vector<8x8x8xf32>
    %97 = math.exp %96 : vector<8x8x8xf32>
    %cst_26 = arith.constant dense<0.000000e+00> : vector<8x8xf32>
    %98 = vector.multi_reduction <add>, %97, %cst_26 [2] : vector<8x8x8xf32> to vector<8x8xf32>
    %99 = vector.shape_cast %98 : vector<8x8xf32> to vector<8x8x1xf32>
    %100 = tpu.reciprocal %99 {approx = true} : vector<8x8x1xf32> -> vector<8x8x1xf32>
    %101 = vector.broadcast %100 : vector<8x8x1xf32> to vector<8x8x8xf32>
    %102 = arith.mulf %97, %101 : vector<8x8x8xf32>
    %103 = arith.truncf %102 : vector<8x8x8xf32> to vector<8x8x8xbf16>
    "tpu.trace_start"() <{level = 10 : i32, message = "bqk,bkd->bqd"}> : () -> ()
    %cst_27 = arith.constant dense<0.000000e+00> : vector<8x8x8xf32>
    %104 = tpu.matmul %103, %91, %cst_27 {dimension_numbers = #tpu.dot_dimension_numbers<[2], [1], [1], [2], [0, 0, 0, 1, 1, 2], [0], [0]>} : vector<8x8x8xbf16>, vector<8x8x8xbf16>, vector<8x8x8xf32> -> vector<8x8x8xf32>
    "tpu.trace_stop"() : () -> ()
    %105 = tpu.concatenate %47, %66, %85, %104 in 2 : vector<8x8x8xf32>, vector<8x8x8xf32>, vector<8x8x8xf32>, vector<8x8x8xf32> -> vector<8x8x32xf32>
    %106 = vector.shape_cast %105 : vector<8x8x32xf32> to vector<64x32xf32>
    %107 = arith.truncf %106 : vector<64x32xf32> to vector<64x32xbf16>
    %c0_28 = arith.constant 0 : index
    %c0_29 = arith.constant 0 : index
    %108 = vector.load %arg5[%c0_28, %c0_29] : memref<32x32xbf16, #tpu.memory_space<vmem>>, vector<32x32xbf16>
    %cst_30 = arith.constant dense<0.000000e+00> : vector<64x32xf32>
    %109 = tpu.matmul %107, %108, %cst_30 {dimension_numbers = #tpu.dot_dimension_numbers<[1], [0], [0], [1], [0, 0, 1, 1], [], []>} : vector<64x32xbf16>, vector<32x32xbf16>, vector<64x32xf32> -> vector<64x32xf32>
    %110 = arith.addf %0, %109 : vector<64x32xf32>
    %c0_31 = arith.constant 0 : index
    %c0_32 = arith.constant 0 : index
    %111 = vector.load %arg6[%c0_31, %c0_32] : memref<1x32xf32, #tpu.memory_space<vmem>>, vector<1x32xf32>
    %112 = vector.broadcast %111 : vector<1x32xf32> to vector<64x32xf32>
    %113 = arith.addf %110, %112 : vector<64x32xf32>
    %c0_33 = arith.constant 0 : index
    %c0_34 = arith.constant 0 : index
    %114 = vector.load %arg7[%c0_33, %c0_34] : memref<1x32xf32, #tpu.memory_space<vmem>>, vector<1x32xf32>
    %c0_35 = arith.constant 0 : index
    %c0_36 = arith.constant 0 : index
    %115 = vector.load %arg8[%c0_35, %c0_36] : memref<1x32xf32, #tpu.memory_space<vmem>>, vector<1x32xf32>
    %cst_37 = arith.constant dense<0.000000e+00> : vector<64xf32>
    %116 = vector.multi_reduction <add>, %113, %cst_37 [1] : vector<64x32xf32> to vector<64xf32>
    %117 = vector.shape_cast %116 : vector<64xf32> to vector<64x1xf32>
    %cst_38 = arith.constant 3.200000e+01 : f32
    %118 = vector.broadcast %cst_38 : f32 to vector<64x1xf32>
    %119 = arith.divf %117, %118 : vector<64x1xf32>
    %120 = vector.broadcast %119 : vector<64x1xf32> to vector<64x32xf32>
    %121 = arith.subf %113, %120 : vector<64x32xf32>
    %122 = arith.mulf %121, %121 : vector<64x32xf32>
    %cst_39 = arith.constant dense<0.000000e+00> : vector<64xf32>
    %123 = vector.multi_reduction <add>, %122, %cst_39 [1] : vector<64x32xf32> to vector<64xf32>
    %124 = vector.shape_cast %123 : vector<64xf32> to vector<64x1xf32>
    %cst_40 = arith.constant 3.200000e+01 : f32
    %125 = vector.broadcast %cst_40 : f32 to vector<64x1xf32>
    %126 = arith.divf %124, %125 : vector<64x1xf32>
    %127 = vector.broadcast %119 : vector<64x1xf32> to vector<64x32xf32>
    %128 = arith.subf %113, %127 : vector<64x32xf32>
    %cst_41 = arith.constant 9.99999974E-6 : f32
    %129 = vector.broadcast %cst_41 : f32 to vector<64x1xf32>
    %130 = arith.addf %126, %129 : vector<64x1xf32>
    %131 = math.rsqrt %130 : vector<64x1xf32>
    %132 = vector.broadcast %131 : vector<64x1xf32> to vector<64x32xf32>
    %133 = arith.mulf %128, %132 : vector<64x32xf32>
    %134 = vector.broadcast %114 : vector<1x32xf32> to vector<64x32xf32>
    %135 = arith.mulf %133, %134 : vector<64x32xf32>
    %136 = vector.broadcast %115 : vector<1x32xf32> to vector<64x32xf32>
    %137 = arith.addf %135, %136 : vector<64x32xf32>
    %138 = arith.truncf %137 : vector<64x32xf32> to vector<64x32xbf16>
    %c0_42 = arith.constant 0 : index
    %c0_43 = arith.constant 0 : index
    %139 = vector.load %arg9[%c0_42, %c0_43] : memref<32x128xbf16, #tpu.memory_space<vmem>>, vector<32x128xbf16>
    %cst_44 = arith.constant dense<0.000000e+00> : vector<64x128xf32>
    %140 = tpu.matmul %138, %139, %cst_44 {dimension_numbers = #tpu.dot_dimension_numbers<[1], [0], [0], [1], [0, 0, 1, 1], [], []>} : vector<64x32xbf16>, vector<32x128xbf16>, vector<64x128xf32> -> vector<64x128xf32>
    %c0_45 = arith.constant 0 : index
    %c0_46 = arith.constant 0 : index
    %141 = vector.load %arg10[%c0_45, %c0_46] : memref<1x128xf32, #tpu.memory_space<vmem>>, vector<1x128xf32>
    %142 = vector.broadcast %141 : vector<1x128xf32> to vector<64x128xf32>
    %143 = arith.addf %140, %142 : vector<64x128xf32>
    %cst_47 = arith.constant 5.000000e-01 : f32
    %144 = vector.broadcast %cst_47 : f32 to vector<64x128xf32>
    %145 = arith.mulf %144, %143 : vector<64x128xf32>
    %cst_48 = arith.constant 4.471500e-02 : f32
    %146 = vector.broadcast %cst_48 : f32 to vector<64x128xf32>
    %147 = arith.mulf %146, %143 : vector<64x128xf32>
    %148 = arith.mulf %147, %143 : vector<64x128xf32>
    %149 = arith.mulf %148, %143 : vector<64x128xf32>
    %150 = arith.addf %143, %149 : vector<64x128xf32>
    %cst_49 = arith.constant 0.797884583 : f32
    %151 = vector.broadcast %cst_49 : f32 to vector<64x128xf32>
    %152 = arith.mulf %151, %150 : vector<64x128xf32>
    %153 = math.tanh %152 : vector<64x128xf32>
    %cst_50 = arith.constant 1.000000e+00 : f32
    %154 = vector.broadcast %cst_50 : f32 to vector<64x128xf32>
    %155 = arith.addf %154, %153 : vector<64x128xf32>
    %156 = arith.mulf %145, %155 : vector<64x128xf32>
    %157 = arith.truncf %156 : vector<64x128xf32> to vector<64x128xbf16>
    %c0_51 = arith.constant 0 : index
    %c0_52 = arith.constant 0 : index
    %158 = vector.load %arg11[%c0_51, %c0_52] : memref<128x32xbf16, #tpu.memory_space<vmem>>, vector<128x32xbf16>
    %cst_53 = arith.constant dense<0.000000e+00> : vector<64x32xf32>
    %159 = tpu.matmul %157, %158, %cst_53 {dimension_numbers = #tpu.dot_dimension_numbers<[1], [0], [0], [1], [0, 0, 1, 1], [], []>} : vector<64x128xbf16>, vector<128x32xbf16>, vector<64x32xf32> -> vector<64x32xf32>
    %160 = arith.addf %113, %159 : vector<64x32xf32>
    %c0_54 = arith.constant 0 : index
    %c0_55 = arith.constant 0 : index
    %161 = vector.load %arg12[%c0_54, %c0_55] : memref<1x32xf32, #tpu.memory_space<vmem>>, vector<1x32xf32>
    %162 = vector.broadcast %161 : vector<1x32xf32> to vector<64x32xf32>
    %163 = arith.addf %160, %162 : vector<64x32xf32>
    %c0_56 = arith.constant 0 : index
    %c0_57 = arith.constant 0 : index
    %164 = vector.load %arg13[%c0_56, %c0_57] : memref<64x32xf32, #tpu.memory_space<vmem>>, vector<64x32xf32>
    tpu.vector_store %arg13[%c0_56, %c0_57], %163 {strides = array<i32>} : memref<64x32xf32, #tpu.memory_space<vmem>>, vector<64x32xf32>,
    return
  }
  func.func @transform_0(%arg0: i32) -> (i32, i32) {
    %c0_i32 = arith.constant 0 : i32
    %c0_i32_0 = arith.constant 0 : i32
    return %arg0, %c0_i32 : i32, i32
  }
  func.func @transform_1(%arg0: i32) -> (i32, i32) {
    %c0_i32 = arith.constant 0 : i32
    %c0_i32_0 = arith.constant 0 : i32
    %c0_i32_1 = arith.constant 0 : i32
    return %c0_i32, %c0_i32_0 : i32, i32
  }
  func.func @transform_2(%arg0: i32) -> (i32, i32) {
    %c0_i32 = arith.constant 0 : i32
    %c0_i32_0 = arith.constant 0 : i32
    %c0_i32_1 = arith.constant 0 : i32
    return %c0_i32, %c0_i32_0 : i32, i32
  }
  func.func @transform_3(%arg0: i32) -> (i32, i32) {
    %c0_i32 = arith.constant 0 : i32
    %c0_i32_0 = arith.constant 0 : i32
    %c0_i32_1 = arith.constant 0 : i32
    return %c0_i32, %c0_i32_0 : i32, i32
  }
  func.func @transform_4(%arg0: i32) -> (i32, i32) {
    %c0_i32 = arith.constant 0 : i32
    %c0_i32_0 = arith.constant 0 : i32
    %c0_i32_1 = arith.constant 0 : i32
    return %c0_i32, %c0_i32_0 : i32, i32
  }
  func.func @transform_5(%arg0: i32) -> (i32, i32) {
    %c0_i32 = arith.constant 0 : i32
    %c0_i32_0 = arith.constant 0 : i32
    %c0_i32_1 = arith.constant 0 : i32
    return %c0_i32, %c0_i32_0 : i32, i32
  }
  func.func @transform_6(%arg0: i32) -> (i32, i32) {
    %c0_i32 = arith.constant 0 : i32
    %c0_i32_0 = arith.constant 0 : i32
    %c0_i32_1 = arith.constant 0 : i32
    return %c0_i32, %c0_i32_0 : i32, i32
  }
  func.func @transform_7(%arg0: i32) -> (i32, i32) {
    %c0_i32 = arith.constant 0 : i32
    %c0_i32_0 = arith.constant 0 : i32
    %c0_i32_1 = arith.constant 0 : i32
    return %c0_i32, %c0_i32_0 : i32, i32
  }
  func.func @transform_8(%arg0: i32) -> (i32, i32) {
    %c0_i32 = arith.constant 0 : i32
    %c0_i32_0 = arith.constant 0 : i32
    %c0_i32_1 = arith.constant 0 : i32
    return %c0_i32, %c0_i32_0 : i32, i32
  }
  func.func @transform_9(%arg0: i32) -> (i32, i32) {
    %c0_i32 = arith.constant 0 : i32
    %c0_i32_0 = arith.constant 0 : i32
    %c0_i32_1 = arith.constant 0 : i32
    return %c0_i32, %c0_i32_0 : i32, i32
  }
  func.func @transform_10(%arg0: i32) -> (i32, i32) {
    %c0_i32 = arith.constant 0 : i32
    %c0_i32_0 = arith.constant 0 : i32
    %c0_i32_1 = arith.constant 0 : i32
    return %c0_i32, %c0_i32_0 : i32, i32
  }
  func.func @transform_11(%arg0: i32) -> (i32, i32) {
    %c0_i32 = arith.constant 0 : i32
    %c0_i32_0 = arith.constant 0 : i32
    %c0_i32_1 = arith.constant 0 : i32
    return %c0_i32, %c0_i32_0 : i32, i32
  }
  func.func @transform_12(%arg0: i32) -> (i32, i32) {
    %c0_i32 = arith.constant 0 : i32
    %c0_i32_0 = arith.constant 0 : i32
    return %arg0, %c0_i32 : i32, i32
  }
}

module attributes {stable_mosaic.version = 11 : i64} {
  func.func @_fused_block_kernel(%arg0: i32, %arg1: memref<64x32xf32, #tpu.memory_space<vmem>>, %arg2: memref<1x32xf32, #tpu.memory_space<vmem>>, %arg3: memref<1x32xf32, #tpu.memory_space<vmem>>, %arg4: memref<32x96xbf16, #tpu.memory_space<vmem>>, %arg5: memref<32x32xbf16, #tpu.memory_space<vmem>>, %arg6: memref<1x32xf32, #tpu.memory_space<vmem>>, %arg7: memref<1x32xf32, #tpu.memory_space<vmem>>, %arg8: memref<1x32xf32, #tpu.memory_space<vmem>>, %arg9: memref<32x128xbf16, #tpu.memory_space<vmem>>, %arg10: memref<1x128xf32, #tpu.memory_space<vmem>>, %arg11: memref<128x32xbf16, #tpu.memory_space<vmem>>, %arg12: memref<1x32xf32, #tpu.memory_space<vmem>>, %arg13: memref<64x32xf32, #tpu.memory_space<vmem>>) attributes {dimension_semantics = [#tpu.dimension_semantics<parallel>], iteration_bounds = array<i64: 1>, scalar_prefetch = 0 : i64, scratch_operands = 0 : i64, tpu.core_type = #tpu.core_type<tc>, window_params = [{transform_indices = @transform_0, window_bounds = array<i64: 64, 32>}, {pipeline_mode = #tpu.pipeline_mode<synchronous>, transform_indices = @transform_1, window_bounds = array<i64: 1, 32>}, {pipeline_mode = #tpu.pipeline_mode<synchronous>, transform_indices = @transform_2, window_bounds = array<i64: 1, 32>}, {pipeline_mode = #tpu.pipeline_mode<synchronous>, transform_indices = @transform_3, window_bounds = array<i64: 32, 96>}, {pipeline_mode = #tpu.pipeline_mode<synchronous>, transform_indices = @transform_4, window_bounds = array<i64: 32, 32>}, {pipeline_mode = #tpu.pipeline_mode<synchronous>, transform_indices = @transform_5, window_bounds = array<i64: 1, 32>}, {pipeline_mode = #tpu.pipeline_mode<synchronous>, transform_indices = @transform_6, window_bounds = array<i64: 1, 32>}, {pipeline_mode = #tpu.pipeline_mode<synchronous>, transform_indices = @transform_7, window_bounds = array<i64: 1, 32>}, {pipeline_mode = #tpu.pipeline_mode<synchronous>, transform_indices = @transform_8, window_bounds = array<i64: 32, 128>}, {pipeline_mode = #tpu.pipeline_mode<synchronous>, transform_indices = @transform_9, window_bounds = array<i64: 1, 128>}, {pipeline_mode = #tpu.pipeline_mode<synchronous>, transform_indices = @transform_10, window_bounds = array<i64: 128, 32>}, {pipeline_mode = #tpu.pipeline_mode<synchronous>, transform_indices = @transform_11, window_bounds = array<i64: 1, 32>}, {transform_indices = @transform_12, window_bounds = array<i64: 64, 32>}]} {
    %c0 = arith.constant 0 : index
    %c0_0 = arith.constant 0 : index
    %0 = vector.load %arg1[%c0, %c0_0] : memref<64x32xf32, #tpu.memory_space<vmem>>, vector<64x32xf32>
    %c0_1 = arith.constant 0 : index
    %c0_2 = arith.constant 0 : index
    %1 = vector.load %arg2[%c0_1, %c0_2] : memref<1x32xf32, #tpu.memory_space<vmem>>, vector<1x32xf32>
    %c0_3 = arith.constant 0 : index
    %c0_4 = arith.constant 0 : index
    %2 = vector.load %arg3[%c0_3, %c0_4] : memref<1x32xf32, #tpu.memory_space<vmem>>, vector<1x32xf32>
    %cst = arith.constant dense<0.000000e+00> : vector<64xf32>
    %3 = vector.multi_reduction <add>, %0, %cst [1] : vector<64x32xf32> to vector<64xf32>
    %4 = vector.shape_cast %3 : vector<64xf32> to vector<64x1xf32>
    %cst_5 = arith.constant 3.200000e+01 : f32
    %5 = vector.broadcast %cst_5 : f32 to vector<64x1xf32>
    %6 = arith.divf %4, %5 : vector<64x1xf32>
    %7 = vector.broadcast %6 : vector<64x1xf32> to vector<64x32xf32>
    %8 = arith.subf %0, %7 : vector<64x32xf32>
    %9 = arith.mulf %8, %8 : vector<64x32xf32>
    %cst_6 = arith.constant dense<0.000000e+00> : vector<64xf32>
    %10 = vector.multi_reduction <add>, %9, %cst_6 [1] : vector<64x32xf32> to vector<64xf32>
    %11 = vector.shape_cast %10 : vector<64xf32> to vector<64x1xf32>
    %cst_7 = arith.constant 3.200000e+01 : f32
    %12 = vector.broadcast %cst_7 : f32 to vector<64x1xf32>
    %13 = arith.divf %11, %12 : vector<64x1xf32>
    %14 = vector.broadcast %6 : vector<64x1xf32> to vector<64x32xf32>
    %15 = arith.subf %0, %14 : vector<64x32xf32>
    %cst_8 = arith.constant 9.99999974E-6 : f32
    %16 = vector.broadcast %cst_8 : f32 to vector<64x1xf32>
    %17 = arith.addf %13, %16 : vector<64x1xf32>
    %18 = math.rsqrt %17 : vector<64x1xf32>
    %19 = vector.broadcast %18 : vector<64x1xf32> to vector<64x32xf32>
    %20 = arith.mulf %15, %19 : vector<64x32xf32>
    %21 = vector.broadcast %1 : vector<1x32xf32> to vector<64x32xf32>
    %22 = arith.mulf %20, %21 : vector<64x32xf32>
    %23 = vector.broadcast %2 : vector<1x32xf32> to vector<64x32xf32>
    %24 = arith.addf %22, %23 : vector<64x32xf32>
    %25 = arith.truncf %24 : vector<64x32xf32> to vector<64x32xbf16>
    %c0_9 = arith.constant 0 : index
    %c0_10 = arith.constant 0 : index
    %26 = vector.load %arg4[%c0_9, %c0_10] : memref<32x96xbf16, #tpu.memory_space<vmem>>, vector<32x96xbf16>
    %cst_11 = arith.constant dense<0.000000e+00> : vector<64x96xf32>
    %27 = tpu.matmul %25, %26, %cst_11 {dimension_numbers = #tpu.dot_dimension_numbers<[1], [0], [0], [1], [0, 0, 1, 1], [], []>} : vector<64x32xbf16>, vector<32x96xbf16>, vector<64x96xf32> -> vector<64x96xf32>
    %28 = vector.shape_cast %27 : vector<64x96xf32> to vector<16x4x96xf32>
    %29 = vector.extract_strided_slice %28 {offsets = [0, 0, 0], sizes = [16, 4, 8], strides = [1, 1, 1]} : vector<16x4x96xf32> to vector<16x4x8xf32>
    %30 = arith.truncf %29 : vector<16x4x8xf32> to vector<16x4x8xbf16>
    %31 = vector.extract_strided_slice %28 {offsets = [0, 0, 32], sizes = [16, 4, 8], strides = [1, 1, 1]} : vector<16x4x96xf32> to vector<16x4x8xf32>
    %32 = arith.truncf %31 : vector<16x4x8xf32> to vector<16x4x8xbf16>
    %33 = vector.extract_strided_slice %28 {offsets = [0, 0, 64], sizes = [16, 4, 8], strides = [1, 1, 1]} : vector<16x4x96xf32> to vector<16x4x8xf32>
    %34 = arith.truncf %33 : vector<16x4x8xf32> to vector<16x4x8xbf16>
    "tpu.trace_start"() <{level = 10 : i32, message = "bqd,bkd->bqk"}> : () -> ()
    %cst_12 = arith.constant dense<0.000000e+00> : vector<16x4x4xf32>
    %35 = tpu.matmul %30, %32, %cst_12 {dimension_numbers = #tpu.dot_dimension_numbers<[2], [2], [1], [1], [0, 0, 0, 1, 1, 1], [0], [0]>} : vector<16x4x8xbf16>, vector<16x4x8xbf16>, vector<16x4x4xf32> -> vector<16x4x4xf32>
    "tpu.trace_stop"() : () -> ()
    %cst_13 = arith.constant dense<0xFF800000> : vector<16x4xf32>
    %36 = vector.multi_reduction <maximumf>, %35, %cst_13 [2] : vector<16x4x4xf32> to vector<16x4xf32>
    %37 = vector.shape_cast %36 : vector<16x4xf32> to vector<16x4x1xf32>
    %38 = vector.broadcast %37 : vector<16x4x1xf32> to vector<16x4x4xf32>
    %39 = arith.subf %35, %38 : vector<16x4x4xf32>
    %40 = math.exp %39 : vector<16x4x4xf32>
    %cst_14 = arith.constant dense<0.000000e+00> : vector<16x4xf32>
    %41 = vector.multi_reduction <add>, %40, %cst_14 [2] : vector<16x4x4xf32> to vector<16x4xf32>
    %42 = vector.shape_cast %41 : vector<16x4xf32> to vector<16x4x1xf32>
    %43 = tpu.reciprocal %42 {approx = true} : vector<16x4x1xf32> -> vector<16x4x1xf32>
    %44 = vector.broadcast %43 : vector<16x4x1xf32> to vector<16x4x4xf32>
    %45 = arith.mulf %40, %44 : vector<16x4x4xf32>
    %46 = arith.truncf %45 : vector<16x4x4xf32> to vector<16x4x4xbf16>
    "tpu.trace_start"() <{level = 10 : i32, message = "bqk,bkd->bqd"}> : () -> ()
    %cst_15 = arith.constant dense<0.000000e+00> : vector<16x4x8xf32>
    %47 = tpu.matmul %46, %34, %cst_15 {dimension_numbers = #tpu.dot_dimension_numbers<[2], [1], [1], [2], [0, 0, 0, 1, 1, 2], [0], [0]>} : vector<16x4x4xbf16>, vector<16x4x8xbf16>, vector<16x4x8xf32> -> vector<16x4x8xf32>
    "tpu.trace_stop"() : () -> ()
    %48 = vector.extract_strided_slice %28 {offsets = [0, 0, 8], sizes = [16, 4, 8], strides = [1, 1, 1]} : vector<16x4x96xf32> to vector<16x4x8xf32>
    %49 = arith.truncf %48 : vector<16x4x8xf32> to vector<16x4x8xbf16>
    %50 = vector.extract_strided_slice %28 {offsets = [0, 0, 40], sizes = [16, 4, 8], strides = [1, 1, 1]} : vector<16x4x96xf32> to vector<16x4x8xf32>
    %51 = arith.truncf %50 : vector<16x4x8xf32> to vector<16x4x8xbf16>
    %52 = vector.extract_strided_slice %28 {offsets = [0, 0, 72], sizes = [16, 4, 8], strides = [1, 1, 1]} : vector<16x4x96xf32> to vector<16x4x8xf32>
    %53 = arith.truncf %52 : vector<16x4x8xf32> to vector<16x4x8xbf16>
    "tpu.trace_start"() <{level = 10 : i32, message = "bqd,bkd->bqk"}> : () -> ()
    %cst_16 = arith.constant dense<0.000000e+00> : vector<16x4x4xf32>
    %54 = tpu.matmul %49, %51, %cst_16 {dimension_numbers = #tpu.dot_dimension_numbers<[2], [2], [1], [1], [0, 0, 0, 1, 1, 1], [0], [0]>} : vector<16x4x8xbf16>, vector<16x4x8xbf16>, vector<16x4x4xf32> -> vector<16x4x4xf32>
    "tpu.trace_stop"() : () -> ()
    %cst_17 = arith.constant dense<0xFF800000> : vector<16x4xf32>
    %55 = vector.multi_reduction <maximumf>, %54, %cst_17 [2] : vector<16x4x4xf32> to vector<16x4xf32>
    %56 = vector.shape_cast %55 : vector<16x4xf32> to vector<16x4x1xf32>
    %57 = vector.broadcast %56 : vector<16x4x1xf32> to vector<16x4x4xf32>
    %58 = arith.subf %54, %57 : vector<16x4x4xf32>
    %59 = math.exp %58 : vector<16x4x4xf32>
    %cst_18 = arith.constant dense<0.000000e+00> : vector<16x4xf32>
    %60 = vector.multi_reduction <add>, %59, %cst_18 [2] : vector<16x4x4xf32> to vector<16x4xf32>
    %61 = vector.shape_cast %60 : vector<16x4xf32> to vector<16x4x1xf32>
    %62 = tpu.reciprocal %61 {approx = true} : vector<16x4x1xf32> -> vector<16x4x1xf32>
    %63 = vector.broadcast %62 : vector<16x4x1xf32> to vector<16x4x4xf32>
    %64 = arith.mulf %59, %63 : vector<16x4x4xf32>
    %65 = arith.truncf %64 : vector<16x4x4xf32> to vector<16x4x4xbf16>
    "tpu.trace_start"() <{level = 10 : i32, message = "bqk,bkd->bqd"}> : () -> ()
    %cst_19 = arith.constant dense<0.000000e+00> : vector<16x4x8xf32>
    %66 = tpu.matmul %65, %53, %cst_19 {dimension_numbers = #tpu.dot_dimension_numbers<[2], [1], [1], [2], [0, 0, 0, 1, 1, 2], [0], [0]>} : vector<16x4x4xbf16>, vector<16x4x8xbf16>, vector<16x4x8xf32> -> vector<16x4x8xf32>
    "tpu.trace_stop"() : () -> ()
    %67 = vector.extract_strided_slice %28 {offsets = [0, 0, 16], sizes = [16, 4, 8], strides = [1, 1, 1]} : vector<16x4x96xf32> to vector<16x4x8xf32>
    %68 = arith.truncf %67 : vector<16x4x8xf32> to vector<16x4x8xbf16>
    %69 = vector.extract_strided_slice %28 {offsets = [0, 0, 48], sizes = [16, 4, 8], strides = [1, 1, 1]} : vector<16x4x96xf32> to vector<16x4x8xf32>
    %70 = arith.truncf %69 : vector<16x4x8xf32> to vector<16x4x8xbf16>
    %71 = vector.extract_strided_slice %28 {offsets = [0, 0, 80], sizes = [16, 4, 8], strides = [1, 1, 1]} : vector<16x4x96xf32> to vector<16x4x8xf32>
    %72 = arith.truncf %71 : vector<16x4x8xf32> to vector<16x4x8xbf16>
    "tpu.trace_start"() <{level = 10 : i32, message = "bqd,bkd->bqk"}> : () -> ()
    %cst_20 = arith.constant dense<0.000000e+00> : vector<16x4x4xf32>
    %73 = tpu.matmul %68, %70, %cst_20 {dimension_numbers = #tpu.dot_dimension_numbers<[2], [2], [1], [1], [0, 0, 0, 1, 1, 1], [0], [0]>} : vector<16x4x8xbf16>, vector<16x4x8xbf16>, vector<16x4x4xf32> -> vector<16x4x4xf32>
    "tpu.trace_stop"() : () -> ()
    %cst_21 = arith.constant dense<0xFF800000> : vector<16x4xf32>
    %74 = vector.multi_reduction <maximumf>, %73, %cst_21 [2] : vector<16x4x4xf32> to vector<16x4xf32>
    %75 = vector.shape_cast %74 : vector<16x4xf32> to vector<16x4x1xf32>
    %76 = vector.broadcast %75 : vector<16x4x1xf32> to vector<16x4x4xf32>
    %77 = arith.subf %73, %76 : vector<16x4x4xf32>
    %78 = math.exp %77 : vector<16x4x4xf32>
    %cst_22 = arith.constant dense<0.000000e+00> : vector<16x4xf32>
    %79 = vector.multi_reduction <add>, %78, %cst_22 [2] : vector<16x4x4xf32> to vector<16x4xf32>
    %80 = vector.shape_cast %79 : vector<16x4xf32> to vector<16x4x1xf32>
    %81 = tpu.reciprocal %80 {approx = true} : vector<16x4x1xf32> -> vector<16x4x1xf32>
    %82 = vector.broadcast %81 : vector<16x4x1xf32> to vector<16x4x4xf32>
    %83 = arith.mulf %78, %82 : vector<16x4x4xf32>
    %84 = arith.truncf %83 : vector<16x4x4xf32> to vector<16x4x4xbf16>
    "tpu.trace_start"() <{level = 10 : i32, message = "bqk,bkd->bqd"}> : () -> ()
    %cst_23 = arith.constant dense<0.000000e+00> : vector<16x4x8xf32>
    %85 = tpu.matmul %84, %72, %cst_23 {dimension_numbers = #tpu.dot_dimension_numbers<[2], [1], [1], [2], [0, 0, 0, 1, 1, 2], [0], [0]>} : vector<16x4x4xbf16>, vector<16x4x8xbf16>, vector<16x4x8xf32> -> vector<16x4x8xf32>
    "tpu.trace_stop"() : () -> ()
    %86 = vector.extract_strided_slice %28 {offsets = [0, 0, 24], sizes = [16, 4, 8], strides = [1, 1, 1]} : vector<16x4x96xf32> to vector<16x4x8xf32>
    %87 = arith.truncf %86 : vector<16x4x8xf32> to vector<16x4x8xbf16>
    %88 = vector.extract_strided_slice %28 {offsets = [0, 0, 56], sizes = [16, 4, 8], strides = [1, 1, 1]} : vector<16x4x96xf32> to vector<16x4x8xf32>
    %89 = arith.truncf %88 : vector<16x4x8xf32> to vector<16x4x8xbf16>
    %90 = vector.extract_strided_slice %28 {offsets = [0, 0, 88], sizes = [16, 4, 8], strides = [1, 1, 1]} : vector<16x4x96xf32> to vector<16x4x8xf32>
    %91 = arith.truncf %90 : vector<16x4x8xf32> to vector<16x4x8xbf16>
    "tpu.trace_start"() <{level = 10 : i32, message = "bqd,bkd->bqk"}> : () -> ()
    %cst_24 = arith.constant dense<0.000000e+00> : vector<16x4x4xf32>
    %92 = tpu.matmul %87, %89, %cst_24 {dimension_numbers = #tpu.dot_dimension_numbers<[2], [2], [1], [1], [0, 0, 0, 1, 1, 1], [0], [0]>} : vector<16x4x8xbf16>, vector<16x4x8xbf16>, vector<16x4x4xf32> -> vector<16x4x4xf32>
    "tpu.trace_stop"() : () -> ()
    %cst_25 = arith.constant dense<0xFF800000> : vector<16x4xf32>
    %93 = vector.multi_reduction <maximumf>, %92, %cst_25 [2] : vector<16x4x4xf32> to vector<16x4xf32>
    %94 = vector.shape_cast %93 : vector<16x4xf32> to vector<16x4x1xf32>
    %95 = vector.broadcast %94 : vector<16x4x1xf32> to vector<16x4x4xf32>
    %96 = arith.subf %92, %95 : vector<16x4x4xf32>
    %97 = math.exp %96 : vector<16x4x4xf32>
    %cst_26 = arith.constant dense<0.000000e+00> : vector<16x4xf32>
    %98 = vector.multi_reduction <add>, %97, %cst_26 [2] : vector<16x4x4xf32> to vector<16x4xf32>
    %99 = vector.shape_cast %98 : vector<16x4xf32> to vector<16x4x1xf32>
    %100 = tpu.reciprocal %99 {approx = true} : vector<16x4x1xf32> -> vector<16x4x1xf32>
    %101 = vector.broadcast %100 : vector<16x4x1xf32> to vector<16x4x4xf32>
    %102 = arith.mulf %97, %101 : vector<16x4x4xf32>
    %103 = arith.truncf %102 : vector<16x4x4xf32> to vector<16x4x4xbf16>
    "tpu.trace_start"() <{level = 10 : i32, message = "bqk,bkd->bqd"}> : () -> ()
    %cst_27 = arith.constant dense<0.000000e+00> : vector<16x4x8xf32>
    %104 = tpu.matmul %103, %91, %cst_27 {dimension_numbers = #tpu.dot_dimension_numbers<[2], [1], [1], [2], [0, 0, 0, 1, 1, 2], [0], [0]>} : vector<16x4x4xbf16>, vector<16x4x8xbf16>, vector<16x4x8xf32> -> vector<16x4x8xf32>
    "tpu.trace_stop"() : () -> ()
    %105 = tpu.concatenate %47, %66, %85, %104 in 2 : vector<16x4x8xf32>, vector<16x4x8xf32>, vector<16x4x8xf32>, vector<16x4x8xf32> -> vector<16x4x32xf32>
    %106 = vector.shape_cast %105 : vector<16x4x32xf32> to vector<64x32xf32>
    %107 = arith.truncf %106 : vector<64x32xf32> to vector<64x32xbf16>
    %c0_28 = arith.constant 0 : index
    %c0_29 = arith.constant 0 : index
    %108 = vector.load %arg5[%c0_28, %c0_29] : memref<32x32xbf16, #tpu.memory_space<vmem>>, vector<32x32xbf16>
    %cst_30 = arith.constant dense<0.000000e+00> : vector<64x32xf32>
    %109 = tpu.matmul %107, %108, %cst_30 {dimension_numbers = #tpu.dot_dimension_numbers<[1], [0], [0], [1], [0, 0, 1, 1], [], []>} : vector<64x32xbf16>, vector<32x32xbf16>, vector<64x32xf32> -> vector<64x32xf32>
    %110 = arith.addf %0, %109 : vector<64x32xf32>
    %c0_31 = arith.constant 0 : index
    %c0_32 = arith.constant 0 : index
    %111 = vector.load %arg6[%c0_31, %c0_32] : memref<1x32xf32, #tpu.memory_space<vmem>>, vector<1x32xf32>
    %112 = vector.broadcast %111 : vector<1x32xf32> to vector<64x32xf32>
    %113 = arith.addf %110, %112 : vector<64x32xf32>
    %c0_33 = arith.constant 0 : index
    %c0_34 = arith.constant 0 : index
    %114 = vector.load %arg7[%c0_33, %c0_34] : memref<1x32xf32, #tpu.memory_space<vmem>>, vector<1x32xf32>
    %c0_35 = arith.constant 0 : index
    %c0_36 = arith.constant 0 : index
    %115 = vector.load %arg8[%c0_35, %c0_36] : memref<1x32xf32, #tpu.memory_space<vmem>>, vector<1x32xf32>
    %cst_37 = arith.constant dense<0.000000e+00> : vector<64xf32>
    %116 = vector.multi_reduction <add>, %113, %cst_37 [1] : vector<64x32xf32> to vector<64xf32>
    %117 = vector.shape_cast %116 : vector<64xf32> to vector<64x1xf32>
    %cst_38 = arith.constant 3.200000e+01 : f32
    %118 = vector.broadcast %cst_38 : f32 to vector<64x1xf32>
    %119 = arith.divf %117, %118 : vector<64x1xf32>
    %120 = vector.broadcast %119 : vector<64x1xf32> to vector<64x32xf32>
    %121 = arith.subf %113, %120 : vector<64x32xf32>
    %122 = arith.mulf %121, %121 : vector<64x32xf32>
    %cst_39 = arith.constant dense<0.000000e+00> : vector<64xf32>
    %123 = vector.multi_reduction <add>, %122, %cst_39 [1] : vector<64x32xf32> to vector<64xf32>
    %124 = vector.shape_cast %123 : vector<64xf32> to vector<64x1xf32>
    %cst_40 = arith.constant 3.200000e+01 : f32
    %125 = vector.broadcast %cst_40 : f32 to vector<64x1xf32>
    %126 = arith.divf %124, %125 : vector<64x1xf32>
    %127 = vector.broadcast %119 : vector<64x1xf32> to vector<64x32xf32>
    %128 = arith.subf %113, %127 : vector<64x32xf32>
    %cst_41 = arith.constant 9.99999974E-6 : f32
    %129 = vector.broadcast %cst_41 : f32 to vector<64x1xf32>
    %130 = arith.addf %126, %129 : vector<64x1xf32>
    %131 = math.rsqrt %130 : vector<64x1xf32>
    %132 = vector.broadcast %131 : vector<64x1xf32> to vector<64x32xf32>
    %133 = arith.mulf %128, %132 : vector<64x32xf32>
    %134 = vector.broadcast %114 : vector<1x32xf32> to vector<64x32xf32>
    %135 = arith.mulf %133, %134 : vector<64x32xf32>
    %136 = vector.broadcast %115 : vector<1x32xf32> to vector<64x32xf32>
    %137 = arith.addf %135, %136 : vector<64x32xf32>
    %138 = arith.truncf %137 : vector<64x32xf32> to vector<64x32xbf16>
    %c0_42 = arith.constant 0 : index
    %c0_43 = arith.constant 0 : index
    %139 = vector.load %arg9[%c0_42, %c0_43] : memref<32x128xbf16, #tpu.memory_space<vmem>>, vector<32x128xbf16>
    %cst_44 = arith.constant dense<0.000000e+00> : vector<64x128xf32>
    %140 = tpu.matmul %138, %139, %cst_44 {dimension_numbers = #tpu.dot_dimension_numbers<[1], [0], [0], [1], [0, 0, 1, 1], [], []>} : vector<64x32xbf16>, vector<32x128xbf16>, vector<64x128xf32> -> vector<64x128xf32>
    %c0_45 = arith.constant 0 : index
    %c0_46 = arith.constant 0 : index
    %141 = vector.load %arg10[%c0_45, %c0_46] : memref<1x128xf32, #tpu.memory_space<vmem>>, vector<1x128xf32>
    %142 = vector.broadcast %141 : vector<1x128xf32> to vector<64x128xf32>
    %143 = arith.addf %140, %142 : vector<64x128xf32>
    %cst_47 = arith.constant 5.000000e-01 : f32
    %144 = vector.broadcast %cst_47 : f32 to vector<64x128xf32>
    %145 = arith.mulf %144, %143 : vector<64x128xf32>
    %cst_48 = arith.constant 4.471500e-02 : f32
    %146 = vector.broadcast %cst_48 : f32 to vector<64x128xf32>
    %147 = arith.mulf %146, %143 : vector<64x128xf32>
    %148 = arith.mulf %147, %143 : vector<64x128xf32>
    %149 = arith.mulf %148, %143 : vector<64x128xf32>
    %150 = arith.addf %143, %149 : vector<64x128xf32>
    %cst_49 = arith.constant 0.797884583 : f32
    %151 = vector.broadcast %cst_49 : f32 to vector<64x128xf32>
    %152 = arith.mulf %151, %150 : vector<64x128xf32>
    %153 = math.tanh %152 : vector<64x128xf32>
    %cst_50 = arith.constant 1.000000e+00 : f32
    %154 = vector.broadcast %cst_50 : f32 to vector<64x128xf32>
    %155 = arith.addf %154, %153 : vector<64x128xf32>
    %156 = arith.mulf %145, %155 : vector<64x128xf32>
    %157 = arith.truncf %156 : vector<64x128xf32> to vector<64x128xbf16>
    %c0_51 = arith.constant 0 : index
    %c0_52 = arith.constant 0 : index
    %158 = vector.load %arg11[%c0_51, %c0_52] : memref<128x32xbf16, #tpu.memory_space<vmem>>, vector<128x32xbf16>
    %cst_53 = arith.constant dense<0.000000e+00> : vector<64x32xf32>
    %159 = tpu.matmul %157, %158, %cst_53 {dimension_numbers = #tpu.dot_dimension_numbers<[1], [0], [0], [1], [0, 0, 1, 1], [], []>} : vector<64x128xbf16>, vector<128x32xbf16>, vector<64x32xf32> -> vector<64x32xf32>
    %160 = arith.addf %113, %159 : vector<64x32xf32>
    %c0_54 = arith.constant 0 : index
    %c0_55 = arith.constant 0 : index
    %161 = vector.load %arg12[%c0_54, %c0_55] : memref<1x32xf32, #tpu.memory_space<vmem>>, vector<1x32xf32>
    %162 = vector.broadcast %161 : vector<1x32xf32> to vector<64x32xf32>
    %163 = arith.addf %160, %162 : vector<64x32xf32>
    %c0_56 = arith.constant 0 : index
    %c0_57 = arith.constant 0 : index
    %164 = vector.load %arg13[%c0_56, %c0_57] : memref<64x32xf32, #tpu.memory_space<vmem>>, vector<64x32xf32>
    tpu.vector_store %arg13[%c0_56, %c0_57], %163 {strides = array<i32>} : memref<64x32xf32, #tpu.memory_space<vmem>>, vector<64x32xf32>,
    return
  }
  func.func @transform_0(%arg0: i32) -> (i32, i32) {
    %c0_i32 = arith.constant 0 : i32
    %c0_i32_0 = arith.constant 0 : i32
    return %arg0, %c0_i32 : i32, i32
  }
  func.func @transform_1(%arg0: i32) -> (i32, i32) {
    %c0_i32 = arith.constant 0 : i32
    %c0_i32_0 = arith.constant 0 : i32
    %c0_i32_1 = arith.constant 0 : i32
    return %c0_i32, %c0_i32_0 : i32, i32
  }
  func.func @transform_2(%arg0: i32) -> (i32, i32) {
    %c0_i32 = arith.constant 0 : i32
    %c0_i32_0 = arith.constant 0 : i32
    %c0_i32_1 = arith.constant 0 : i32
    return %c0_i32, %c0_i32_0 : i32, i32
  }
  func.func @transform_3(%arg0: i32) -> (i32, i32) {
    %c0_i32 = arith.constant 0 : i32
    %c0_i32_0 = arith.constant 0 : i32
    %c0_i32_1 = arith.constant 0 : i32
    return %c0_i32, %c0_i32_0 : i32, i32
  }
  func.func @transform_4(%arg0: i32) -> (i32, i32) {
    %c0_i32 = arith.constant 0 : i32
    %c0_i32_0 = arith.constant 0 : i32
    %c0_i32_1 = arith.constant 0 : i32
    return %c0_i32, %c0_i32_0 : i32, i32
  }
  func.func @transform_5(%arg0: i32) -> (i32, i32) {
    %c0_i32 = arith.constant 0 : i32
    %c0_i32_0 = arith.constant 0 : i32
    %c0_i32_1 = arith.constant 0 : i32
    return %c0_i32, %c0_i32_0 : i32, i32
  }
  func.func @transform_6(%arg0: i32) -> (i32, i32) {
    %c0_i32 = arith.constant 0 : i32
    %c0_i32_0 = arith.constant 0 : i32
    %c0_i32_1 = arith.constant 0 : i32
    return %c0_i32, %c0_i32_0 : i32, i32
  }
  func.func @transform_7(%arg0: i32) -> (i32, i32) {
    %c0_i32 = arith.constant 0 : i32
    %c0_i32_0 = arith.constant 0 : i32
    %c0_i32_1 = arith.constant 0 : i32
    return %c0_i32, %c0_i32_0 : i32, i32
  }
  func.func @transform_8(%arg0: i32) -> (i32, i32) {
    %c0_i32 = arith.constant 0 : i32
    %c0_i32_0 = arith.constant 0 : i32
    %c0_i32_1 = arith.constant 0 : i32
    return %c0_i32, %c0_i32_0 : i32, i32
  }
  func.func @transform_9(%arg0: i32) -> (i32, i32) {
    %c0_i32 = arith.constant 0 : i32
    %c0_i32_0 = arith.constant 0 : i32
    %c0_i32_1 = arith.constant 0 : i32
    return %c0_i32, %c0_i32_0 : i32, i32
  }
  func.func @transform_10(%arg0: i32) -> (i32, i32) {
    %c0_i32 = arith.constant 0 : i32
    %c0_i32_0 = arith.constant 0 : i32
    %c0_i32_1 = arith.constant 0 : i32
    return %c0_i32, %c0_i32_0 : i32, i32
  }
  func.func @transform_11(%arg0: i32) -> (i32, i32) {
    %c0_i32 = arith.constant 0 : i32
    %c0_i32_0 = arith.constant 0 : i32
    %c0_i32_1 = arith.constant 0 : i32
    return %c0_i32, %c0_i32_0 : i32, i32
  }
  func.func @transform_12(%arg0: i32) -> (i32, i32) {
    %c0_i32 = arith.constant 0 : i32
    %c0_i32_0 = arith.constant 0 : i32
    return %arg0, %c0_i32 : i32, i32
  }
}

</mosaic_0001>

<bundles_post_ra>
// kernel: multiscale_block_forward.2
= control target key start
LH: loop header
LB: loop body
LE: loop exit
PB: predicated region body
PF: predicated region fallthrough
CT: control target
= control target key end

     0   :  { %vm52_vm0 = vcmask 261120   ;;  %vm5499_vm1 = vmmov 0   ;;  %vm294_vm2 = vcmask 64512   ;;  %vm785_vm3 = vcmask 1043456   ;;  %s5502_s26 = smov 88   ;;  %s5503_s27 = smov 120   ;;  %s6783_s0 = inlined_call_operand.vmem [shape: f32[64,32], index: 0, kind: input, shape index: {}]   ;;  %s6784_s3 = inlined_call_operand.vmem [shape: bf16[32,96], index: 3, kind: input, shape index: {}]   ;;  %s6785_s1 = inlined_call_operand.vmem [shape: f32[1,32], index: 1, kind: input, shape index: {}]   ;;  %s6786_s2 = inlined_call_operand.vmem [shape: f32[1,32], index: 2, kind: input, shape index: {}]   ;;  %s6787_s4 = inlined_call_operand.vmem [shape: bf16[32,32], index: 4, kind: input, shape index: {}]   ;;  %s6788_s5 = inlined_call_operand.vmem [shape: f32[1,32], index: 5, kind: input, shape index: {}]   ;;  %s6789_s8 = inlined_call_operand.vmem [shape: bf16[32,128], index: 8, kind: input, shape index: {}]   ;;  %s6790_s6 = inlined_call_operand.vmem [shape: f32[1,32], index: 6, kind: input, shape index: {}]   ;;  %s6791_s7 = inlined_call_operand.vmem [shape: f32[1,32], index: 7, kind: input, shape index: {}]   ;;  %s6792_s10 = inlined_call_operand.vmem [shape: bf16[128,32], index: 10, kind: input, shape index: {}]   ;;  %s6793_s9 = inlined_call_operand.vmem [shape: f32[1,128], index: 9, kind: input, shape index: {}]   ;;  %s6794_s11 = inlined_call_operand.vmem [shape: f32[1,32], index: 11, kind: input, shape index: {}]   ;;  %s6795_s12 = inlined_call_operand.vmem [shape: f32[64,32], index: 12, kind: output, shape index: {}]  }
   0x1   :  { %v42_v0 = vld [vmem:[%s6783_s0] sm:$0xff]  ;;  %v44_v1 = vld [vmem:[%s6783_s0 + $0x10] sm:$0xff]  ;;  %v43_v2 = vld [vmem:[%s6783_s0 + $0x8] sm:$0xff]  ;;  %s5504_s28 = smov 56   ;;  %s5505_s29 = smov 80   ;;  %vm3909_vm4 = vcmask 130048  }
   0x2   :  { %v53_v3 = vsel %vm52_vm0, %v42_v0, 0.0  ;;  %v59_v4 = vsel %vm52_vm0, %v44_v1, 0.0  ;;  %v45_v5 = vld [vmem:[%s6783_s0 + $0x18] sm:$0xff]  ;;  %v56_v6 = vsel %vm52_vm0, %v43_v2, 0.0  ;;  %v46_v8 = vld [vmem:[%s6783_s0 + $0x20] sm:$0xff]  ;;  %v47_v9 = vld [vmem:[%s6783_s0 + $0x28] sm:$0xff] }
   0x3   :  { %54 = vadd.xlane.f32.xlu0 %v53_v3  ;;  %60 = vadd.xlane.f32.xlu1 %v59_v4  ;;  %v62_v7 = vsel %vm52_vm0, %v45_v5, 0.0  ;;  %v65_v10 = vsel %vm52_vm0, %v46_v8, 0.0  ;;  %v68_v11 = vsel %vm52_vm0, %v47_v9, 0.0  ;;  %v48_v12 = vld [vmem:[%s6783_s0 + $0x30] sm:$0xff]  ;;  %v49_v13 = vld [vmem:[%s6783_s0 + $0x38] sm:$0xff]  ;;  %v5300_v56 = vld [vmem:[%s6784_s3] sm:$0xff]  }
   0x4   :  { %v71_v14 = vsel %vm52_vm0, %v48_v12, 0.0  ;;  %v74_v15 = vsel %vm52_vm0, %v49_v13, 0.0  ;;  %v5301_v57 = vld [vmem:[%s6784_s3 + $0x8] sm:$0xff]   ;;  %4780 = vmatprep.subr.bf16.mxu1 %v5300_v56  ;;  %s5506_s30 = smov 112   ;;  %s5507_s13 = smov 48   ;;  %vm3918_vm5 = vcmask 195584  }
   0x5   :  { %4781 = vmatpush3.bf16.msra.mxu1 %v5300_v56  ;;  %s5508_s14 = smov 72   ;;  %s5509_s15 = smov 104  }
   0x6   :  { %4782 = vmatprep.subr.bf16.mxu1 %v5301_v57  ;;  %s5510_s16 = smov 40   ;;  %s5511_s17 = smov 8  }
   0x7   :  { %57 = vadd.xlane.f32.xlu0 %v56_v6  ;;  %63 = vadd.xlane.f32.xlu1 %v62_v7  ;;  %s5512_s18 = smov 16   ;;  %s5513_s21 = smov 24  }
   0x9   :  { %4783 = vmatpush3.bf16.msra.mxu1 %v5301_v57 }
   0xb   :  { %66 = vadd.xlane.f32.xlu0 %v65_v10  ;;  %69 = vadd.xlane.f32.xlu1 %v68_v11 }
   0xf   :  { %72 = vadd.xlane.f32.xlu0 %v71_v14  ;;  %75 = vadd.xlane.f32.xlu1 %v74_v15 }
  0x90   :  { %v55_v16 = vpop.xlane.xlu0 %54  ;;  %v61_v17 = vpop.xlane.xlu1 %60 }
  0x91   :  { %v78_v18 = vmul.f32 0.03125, %v55_v16  ;;  %v80_v19 = vmul.f32 0.03125, %v61_v17 }
  0x93   :  { %v5611_v20 = vsub.f32 %v42_v0, %v78_v18  ;;  %v5613_v21 = vsub.f32 %v44_v1, %v80_v19  ;;  %v4525_v19 = vld [vmem:[%s6785_s1] ss:$0 sm:$0xff]  ;;  %s5500_s1 = smov 96  }
  0x94   :  { %v58_v22 = vpop.xlane.xlu0 %57  ;;  %v64_v23 = vpop.xlane.xlu1 %63 }
  0x95   :  { %v79_v24 = vmul.f32 0.03125, %v58_v22  ;;  %v81_v25 = vmul.f32 0.03125, %v64_v23  ;;  %v94_v26 = vmul.f32 %v5611_v20, %v5611_v20  ;;  %v96_v27 = vmul.f32 %v5613_v21, %v5613_v21 }
  0x97   :  { %v5619_v28 = vsub.f32 %v43_v2, %v79_v24  ;;  %v5621_v29 = vsub.f32 %v45_v5, %v81_v25  ;;  %v102_v30 = vsel %vm52_vm0, %v94_v26, 0.0  ;;  %v108_v33 = vsel %vm52_vm0, %v96_v27, 0.0  ;;  %v4526_v27 = vld [vmem:[%s6786_s2] ss:$0 sm:$0xff]  ;;  %s5501_s2 = smov 64  }
  0x98   :  { %103 = vadd.xlane.f32.xlu0 %v102_v30  ;;  %v67_v31 = vpop.xlane.xlu0 %66  ;;  %v70_v32 = vpop.xlane.xlu1 %69 }
  0x99   :  { %v82_v34 = vmul.f32 0.03125, %v67_v31  ;;  %v83_v35 = vmul.f32 0.03125, %v70_v32  ;;  %v95_v36 = vmul.f32 %v5619_v28, %v5619_v28  ;;  %v97_v37 = vmul.f32 %v5621_v29, %v5621_v29 }
  0x9b   :  { %v5629_v38 = vsub.f32 %v46_v8, %v82_v34  ;;  %v5631_v39 = vsub.f32 %v47_v9, %v83_v35  ;;  %v105_v40 = vsel %vm52_vm0, %v95_v36, 0.0  ;;  %v111_v43 = vsel %vm52_vm0, %v97_v37, 0.0 }
  0x9c   :  { %109 = vadd.xlane.f32.xlu0 %v108_v33  ;;  %106 = vadd.xlane.f32.xlu1 %v105_v40  ;;  %v73_v41 = vpop.xlane.xlu0 %72  ;;  %v76_v42 = vpop.xlane.xlu1 %75 }
  0x9d   :  { %v84_v44 = vmul.f32 0.03125, %v73_v41  ;;  %v85_v45 = vmul.f32 0.03125, %v76_v42  ;;  %v98_v46 = vmul.f32 %v5629_v38, %v5629_v38  ;;  %v99_v47 = vmul.f32 %v5631_v39, %v5631_v39 }
  0x9f   :  { %v5639_v48 = vsub.f32 %v48_v12, %v84_v44  ;;  %v5641_v49 = vsub.f32 %v49_v13, %v85_v45  ;;  %v114_v50 = vsel %vm52_vm0, %v98_v46, 0.0  ;;  %v117_v51 = vsel %vm52_vm0, %v99_v47, 0.0 }
  0xa0   :  { %112 = vadd.xlane.f32.xlu1 %v111_v43  ;;  %115 = vadd.xlane.f32.xlu0 %v114_v50 }
  0xa1   :  { %v100_v52 = vmul.f32 %v5639_v48, %v5639_v48  ;;  %v101_v53 = vmul.f32 %v5641_v49, %v5641_v49 }
  0xa3   :  { %v120_v54 = vsel %vm52_vm0, %v100_v52, 0.0  ;;  %v123_v55 = vsel %vm52_vm0, %v101_v53, 0.0 }
  0xa4   :  { %118 = vadd.xlane.f32.xlu1 %v117_v51  ;;  %121 = vadd.xlane.f32.xlu0 %v120_v54 }
  0xa8   :  { %124 = vadd.xlane.f32.xlu1 %v123_v55 }
 0x125   :  { %v104_v58 = vpop.xlane.xlu0 %103 }
 0x126   :  { %v126_v59 = vmul.f32 0.03125, %v104_v58 }
 0x128   :  { %v134_v60 = vadd.f32 1e-05, %v126_v59 }
 0x129   :  { %v107_v61 = vpop.xlane.xlu1 %106  ;;  %v110_v62 = vpop.xlane.xlu0 %109 }
 0x12a   :  { %5314 = vrsqrt.f32 %v134_v60  ;;  %v127_v63 = vmul.f32 0.03125, %v107_v61  ;;  %v128_v0 = vmul.f32 0.03125, %v110_v62 }
 0x12c   :  { %v135_v1 = vadd.f32 1e-05, %v127_v63  ;;  %v136_v2 = vadd.f32 1e-05, %v128_v0 }
 0x12d   :  { %v113_v3 = vpop.xlane.xlu1 %112  ;;  %v116_v4 = vpop.xlane.xlu0 %115 }
 0x12e   :  { %5316 = vrsqrt.f32 %v135_v1  ;;  %v129_v5 = vmul.f32 0.03125, %v113_v3  ;;  %v130_v6 = vmul.f32 0.03125, %v116_v4 }
 0x12f   :  { %5318 = vrsqrt.f32 %v136_v2 }
 0x130   :  { %v137_v7 = vadd.f32 1e-05, %v129_v5  ;;  %v138_v8 = vadd.f32 1e-05, %v130_v6 }
 0x131   :  { %v119_v9 = vpop.xlane.xlu1 %118  ;;  %v122_v10 = vpop.xlane.xlu0 %121 }
 0x132   :  { %5320 = vrsqrt.f32 %v137_v7  ;;  %v131_v11 = vmul.f32 0.03125, %v119_v9  ;;  %v132_v12 = vmul.f32 0.03125, %v122_v10 }
 0x133   :  { %5322 = vrsqrt.f32 %v138_v8 }
 0x134   :  { %v5315_v13 = vpop.eup %5314  ;;  %v139_v14 = vadd.f32 1e-05, %v131_v11  ;;  %v140_v15 = vadd.f32 1e-05, %v132_v12 }
 0x135   :  { %v125_v16 = vpop.xlane.xlu1 %124  ;;  %v150_v17 = vmul.f32 %v5315_v13, %v5611_v20 }
 0x136   :  { %5324 = vrsqrt.f32 %v139_v14  ;;  %v133_v18 = vmul.f32 0.03125, %v125_v16 }
 0x137   :  { %5326 = vrsqrt.f32 %v140_v15  ;;  %v164_v26 = vmul.f32 %v4525_v19, %v150_v17 }
 0x138   :  { %v5317_v22 = vpop.eup %5316  ;;  %v141_v23 = vadd.f32 1e-05, %v133_v18 }
 0x139   :  { %v5319_v24 = vpop.eup %5318  ;;  %v151_v25 = vmul.f32 %v5317_v22, %v5619_v28  ;;  %v178_v33 = vadd.f32 %v4526_v27, %v164_v26 }
 0x13a   :  { %5328 = vrsqrt.f32 %v141_v23  ;;  %v152_v20 = vmul.f32 %v5319_v24, %v5613_v21 }
 0x13b   :  { %v165_v30 = vmul.f32 %v4525_v19, %v151_v25 }
 0x13c   :  { %v5321_v31 = vpop.eup %5320  ;;  %v166_v36 = vmul.f32 %v4525_v19, %v152_v20 }
 0x13d   :  { %v5323_v32 = vpop.eup %5322  ;;  %v179_v34 = vadd.f32 %v4526_v27, %v165_v30  ;;  %v153_v35 = vmul.f32 %v5321_v31, %v5621_v29 }
 0x13e   :  { %v154_v37 = vmul.f32 %v5323_v32, %v5629_v38  ;;  %v180_v43 = vadd.f32 %v4526_v27, %v166_v36 }
 0x13f   :  { %v186_v40 = vpack.c.bf16 %v179_v34, %v178_v33  ;;  %v167_v28 = vmul.f32 %v4525_v19, %v153_v35 }
 0x140   :  { %v5325_v41 = vpop.eup %5324  ;;  %v168_v45 = vmul.f32 %v4525_v19, %v154_v37 }
 0x141   :  { %v5327_v42 = vpop.eup %5326  ;;  %4784 = vmatprep.mubr.msk.bf16.mxu1 %vm52_vm0, %v186_v40  ;;  %v181_v44 = vadd.f32 %v4526_v27, %v167_v28  ;;  %v155_v21 = vmul.f32 %v5325_v41, %v5631_v39 }
 0x142   :  { %v156_v46 = vmul.f32 %v5327_v42, %v5639_v48  ;;  %v182_v29 = vadd.f32 %v4526_v27, %v168_v45  ;;  %v5498_v48 = vmov 0.0  }
 0x143   :  { %v187_v47 = vpack.c.bf16 %v181_v44, %v180_v43  ;;  %v169_v50 = vmul.f32 %v4525_v19, %v155_v21  ;;  %4792 = vmatprep.subr.bf16.mxu1 %v5498_v48  ;;  %4804 = vmatprep.subr.bf16.mxu0 %v5498_v48 }
 0x144   :  { %v5329_v51 = vpop.eup %5328  ;;  %v170_v53 = vmul.f32 %v4525_v19, %v156_v46  ;;  %4806 = vmatprep.mubr.msk.bf16.mxu0 %vm5499_vm1, %v5498_v48 }
 0x145   :  { %4785 = vmatmul.mubr.msk.bf16.vlgmr.msra.gmra.mrb[0].mxu1 %vm52_vm0, %v187_v47  ;;  %v183_v38 = vadd.f32 %v4526_v27, %v169_v50  ;;  %v157_v52 = vmul.f32 %v5329_v51, %v5641_v49 }
 0x146   :  { %v184_v56 = vadd.f32 %v4526_v27, %v170_v53 }
 0x147   :  { %v188_v54 = vpack.c.bf16 %v183_v38, %v182_v29  ;;  %v171_v55 = vmul.f32 %v4525_v19, %v157_v52 }
 0x149   :  { %4788 = vmatprep.mubr.msk.bf16.mxu1 %vm52_vm0, %v188_v54  ;;  %v185_v57 = vadd.f32 %v4526_v27, %v171_v55 }
 0x14b   :  { %v189_v39 = vpack.c.bf16 %v185_v57, %v184_v56 }
 0x14d   :  { %4789 = vmatmul.mubr.msk.bf16.gmra.mrb[4].mxu1 %vm52_vm0, %v189_v39 }
 0x14e   :  { %4794 = vmatprep.mubr.msk.bf16.mxu1 %vm5499_vm1, %v5498_v48 }
 0x218   :  { %v4786_v49 = vpop.f32.mrb[0].mxu1 }
 0x219   :  { %v252_v58 = vpop.f32.mrb[1].mxu1  ;;  %v5687_v63 = vpack.c.bf16 %v4786_v49, %v4786_v49 }
 0x21a   :  { %v5681_v59 = vpack.c.bf16 %v252_v58, %v252_v58  ;;  %v4787_v60 = vpop.f32.mrb[2].mxu1 }
 0x21b   :  { %v255_v61 = vpop.f32.mrb[3].mxu1  ;;  %v5692_v5 = vpack.c.bf16 %v4787_v60, %v4787_v60 }
 0x21c   :  { %v5683_v62 = vpack.c.bf16 %v255_v61, %v255_v61  ;;  %292 = vrot.lane.b32.xlu0 %v5681_v59, %s5500_s1 }
 0x21e   :  { %342 = vrot.lane.b32.xlu1 %v5683_v62, %s5500_s1 }
 0x220   :  { %v4790_v0 = vpop.f32.mrb[4].mxu1 }
 0x221   :  { %v268_v1 = vpop.f32.mrb[5].mxu1  ;;  %v5695_v6 = vpack.c.bf16 %v4790_v0, %v4790_v0 }
 0x222   :  { %v5689_v2 = vpack.c.bf16 %v268_v1, %v268_v1  ;;  %391 = vrot.lane.b32.xlu1 %v5687_v63, %s5500_s1  ;;  %v4791_v3 = vpop.f32.mrb[6].mxu1 }
 0x223   :  { %v271_v4 = vpop.f32.mrb[7].mxu1  ;;  %v5702_v8 = vpack.c.bf16 %v4791_v3, %v4791_v3 }
 0x224   :  { %489 = vrot.lane.b32.xlu0 %v5689_v2, %s5500_s1  ;;  %v5698_v7 = vpack.c.bf16 %v271_v4, %v271_v4 }
 0x226   :  { %440 = vrot.lane.b32.xlu1 %v5692_v5, %s5500_s1 }
 0x228   :  { %587 = vrot.lane.b32.xlu0 %v5695_v6, %s5500_s1 }
 0x22a   :  { %538 = vrot.lane.b32.xlu1 %v5698_v7, %s5500_s1 }
 0x22c   :  { %780 = vrot.lane.b32.xlu0 %v5681_v59, %s5501_s2 }
 0x22e   :  { %636 = vrot.lane.b32.xlu1 %v5702_v8, %s5500_s1 }
 0x232   :  { %829 = vrot.lane.b32.xlu1 %v5683_v62, %s5501_s2 }
 0x236   :  { %877 = vrot.lane.b32.xlu1 %v5687_v63, %s5501_s2 }
 0x23a   :  { %925 = vrot.lane.b32.xlu1 %v5692_v5, %s5501_s2 }
 0x28e   :  { %v293_v9 = vpop.permute.xlu0 %292 }
 0x28f   :  { %v299_v10 = vsel %vm294_vm2, %v293_v9, 0 }
 0x290   :  { %v343_v11 = vpop.permute.xlu1 %342  ;;  %4793 = vmatpush3.bf16.xpose.msra.mxu1 %v299_v10 }
 0x291   :  { %4798 = vmatprep.subr.bf16.mxu1 %v5498_v48  ;;  %v348_v14 = vsel %vm294_vm2, %v343_v11, 0 }
 0x294   :  { %v392_v12 = vpop.permute.xlu1 %391 }
 0x295   :  { %v397_v13 = vsel %vm294_vm2, %v392_v12, 0 }
 0x296   :  { %4805 = vmatpush3.bf16.xpose.msra.mxu0 %v397_v13  ;;  %v490_v15 = vpop.permute.xlu0 %489 }
 0x297   :  { %4795 = vmatmul.mubr.msk.bf16.vlgmr.msra.gmra.mrb[8].mxu1 %vm294_vm2, %v5681_v59  ;;  %4816 = vmatprep.subr.bf16.mxu0 %v5498_v48  ;;  %v495_v17 = vsel %vm294_vm2, %v490_v15, 0 }
 0x298   :  { %4799 = vmatpush3.bf16.xpose.msra.mxu1 %v348_v14  ;;  %4800 = vmatprep.mubr.msk.bf16.mxu1 %vm5499_vm1, %v5498_v48  ;;  %v441_v16 = vpop.permute.xlu1 %440 }
 0x299   :  { %4810 = vmatprep.subr.bf16.mxu1 %v5498_v48  ;;  %v446_v18 = vsel %vm294_vm2, %v441_v16, 0 }
 0x29a   :  { %v588_v19 = vpop.permute.xlu0 %587 }
 0x29b   :  { %v593_v23 = vsel %vm294_vm2, %v588_v19, 0 }
 0x29c   :  { %v539_v22 = vpop.permute.xlu1 %538 }
 0x29d   :  { %4807 = vmatmul.mubr.msk.bf16.vlgmr.msra.gmra.mrb[0].mxu0 %vm294_vm2, %v5687_v63  ;;  %v544_v24 = vsel %vm294_vm2, %v539_v22, 0 }
 0x29e   :  { %4817 = vmatpush3.bf16.xpose.msra.mxu0 %v495_v17  ;;  %4818 = vmatprep.mubr.msk.bf16.mxu0 %vm5499_vm1, %v5498_v48  ;;  %v781_v25 = vpop.permute.xlu0 %780 }
 0x29f   :  { %4801 = vmatmul.mubr.msk.bf16.vlgmr.msra.gmra.mrb[12].mxu1 %vm294_vm2, %v5683_v62  ;;  %4828 = vmatprep.subr.bf16.mxu0 %v5498_v48  ;;  %v787_v27 = vsel %vm785_vm3, %v781_v25, 0 }
 0x2a0   :  { %4811 = vmatpush3.bf16.xpose.msra.mxu1 %v446_v18  ;;  %4812 = vmatprep.mubr.msk.bf16.mxu1 %vm5499_vm1, %v5498_v48  ;;  %v637_v26 = vpop.permute.xlu1 %636 }
 0x2a1   :  { %4822 = vmatprep.subr.bf16.mxu1 %v5498_v48  ;;  %v642_v20 = vsel %vm294_vm2, %v637_v26, 0 }
 0x2a4   :  { %v830_v30 = vpop.permute.xlu1 %829 }
 0x2a5   :  { %4819 = vmatmul.mubr.msk.bf16.vlgmr.msra.gmra.mrb[4].mxu0 %vm294_vm2, %v5689_v2  ;;  %v835_v31 = vsel %vm785_vm3, %v830_v30, 0 }
 0x2a6   :  { %4829 = vmatpush3.bf16.xpose.msra.mxu0 %v593_v23  ;;  %4830 = vmatprep.mubr.msk.bf16.mxu0 %vm5499_vm1, %v5498_v48 }
 0x2a7   :  { %4813 = vmatmul.mubr.msk.bf16.vlgmr.msra.gmra.mrb[16].mxu1 %vm294_vm2, %v5692_v5  ;;  %4840 = vmatprep.subr.bf16.mxu0 %v5498_v48 }
 0x2a8   :  { %4823 = vmatpush3.bf16.xpose.msra.mxu1 %v544_v24  ;;  %4824 = vmatprep.mubr.msk.bf16.mxu1 %vm5499_vm1, %v5498_v48  ;;  %v5783_v14 = vpop.permute.xlu1 %877 }
 0x2a9   :  { %4834 = vmatprep.subr.bf16.mxu1 %v5498_v48 }
 0x2ac   :  { %v5785_v15 = vpop.permute.xlu1 %925 }
 0x2ad   :  { %4831 = vmatmul.mubr.msk.bf16.vlgmr.msra.gmra.mrb[8].mxu0 %vm294_vm2, %v5695_v6 }
 0x2ae   :  { %4841 = vmatpush3.bf16.msra.mxu0 %v787_v27  ;;  %4842 = vmatprep.mubr.msk.bf16.mxu0 %vm5499_vm1, %v5498_v48 }
 0x2af   :  { %4825 = vmatmul.mubr.msk.bf16.vlgmr.msra.gmra.mrb[20].mxu1 %vm294_vm2, %v5698_v7  ;;  %4852 = vmatprep.subr.bf16.mxu0 %v5498_v48 }
 0x2b0   :  { %4835 = vmatpush3.bf16.xpose.msra.mxu1 %v642_v20  ;;  %4836 = vmatprep.mubr.msk.bf16.mxu1 %vm5499_vm1, %v5498_v48 }
 0x2b1   :  { %4846 = vmatprep.subr.bf16.mxu1 %v5498_v48 }
 0x2b7   :  { %4837 = vmatmul.mubr.msk.bf16.vlgmr.msra.gmra.mrb[24].mxu1 %vm294_vm2, %v5702_v8 }
 0x2b8   :  { %4847 = vmatpush3.bf16.msra.mxu1 %v835_v31  ;;  %4848 = vmatprep.mubr.msk.bf16.mxu1 %vm5499_vm1, %v5498_v48 }
 0x2b9   :  { %4858 = vmatprep.subr.bf16.mxu1 %v5498_v48 }
 0x36a   :  { %v335_v32 = vpop.f32.mrb[8].mxu1 }
 0x36b   :  { %v4796_v33 = vpop.f32.mrb[9].mxu1  ;;  %v684_v46 = vsel %vm294_vm2, %v335_v32, -inf }
 0x36c   :  { %v338_v34 = vpop.f32.mrb[10].mxu1 }
 0x36d   :  { %v4797_v35 = vpop.f32.mrb[11].mxu1 }
 0x370   :  { %v433_v36 = vpop.f32.mrb[0].mxu0 }
 0x371   :  { %v4808_v37 = vpop.f32.mrb[1].mxu0  ;;  %v690_v40 = vsel %vm294_vm2, %v433_v36, -inf }
 0x372   :  { %v436_v28 = vpop.f32.mrb[2].mxu0  ;;  %691 = vmax.xlane.f32.xlu0 %v690_v40  ;;  %v384_v41 = vpop.f32.mrb[12].mxu1 }
 0x373   :  { %v4802_v42 = vpop.f32.mrb[13].mxu1  ;;  %v4809_v43 = vpop.f32.mrb[3].mxu0  ;;  %v687_v44 = vsel %vm294_vm2, %v384_v41, -inf }
 0x374   :  { %688 = vmax.xlane.f32.xlu1 %v687_v44  ;;  %v387_v21 = vpop.f32.mrb[14].mxu1 }
 0x375   :  { %v4803_v45 = vpop.f32.mrb[15].mxu1 }
 0x376   :  { %685 = vmax.xlane.f32.xlu0 %v684_v46 }
 0x378   :  { %v531_v47 = vpop.f32.mrb[4].mxu0 }
 0x379   :  { %v4820_v50 = vpop.f32.mrb[5].mxu0  ;;  %v696_v51 = vsel %vm294_vm2, %v531_v47, -inf }
 0x37a   :  { %v5769_v29 = vpop.f32.mrb[16].mxu1  ;;  %697 = vmax.xlane.f32.xlu0 %v696_v51  ;;  %v534_v38 = vpop.f32.mrb[6].mxu0 }
 0x37b   :  { %v4814_v52 = vpop.f32.mrb[17].mxu1  ;;  %v4821_v53 = vpop.f32.mrb[7].mxu0  ;;  %v693_v56 = vsel %vm294_vm2, %v5769_v29, -inf }
 0x37c   :  { %v485_v54 = vpop.f32.mrb[18].mxu1 }
 0x37d   :  { %v4815_v55 = vpop.f32.mrb[19].mxu1 }
 0x37e   :  { %694 = vmax.xlane.f32.xlu0 %v693_v56 }
 0x380   :  { %v629_v57 = vpop.f32.mrb[8].mxu0 }
 0x381   :  { %v4832_v39 = vpop.f32.mrb[9].mxu0  ;;  %v702_v49 = vsel %vm294_vm2, %v629_v57, -inf }
 0x382   :  { %v580_v58 = vpop.f32.mrb[20].mxu1  ;;  %703 = vmax.xlane.f32.xlu0 %v702_v49  ;;  %v632_v60 = vpop.f32.mrb[10].mxu0 }
 0x383   :  { %v4826_v61 = vpop.f32.mrb[21].mxu1  ;;  %v4833_v0 = vpop.f32.mrb[11].mxu0  ;;  %v699_v12 = vsel %vm294_vm2, %v580_v58, -inf }
 0x384   :  { %v583_v1 = vpop.f32.mrb[22].mxu1 }
 0x385   :  { %1021 = vrot.lane.b32.xlu1 %v5698_v7, %s5501_s2  ;;  %v4827_v3 = vpop.f32.mrb[23].mxu1 }
 0x38a   :  { %v5776_v4 = vpop.f32.mrb[24].mxu1 }
 0x38b   :  { %v4838_v9 = vpop.f32.mrb[25].mxu1  ;;  %v705_v13 = vsel %vm294_vm2, %v5776_v4, -inf }
 0x38c   :  { %v681_v10 = vpop.f32.mrb[26].mxu1 }
 0x38d   :  { %v4839_v11 = vpop.f32.mrb[27].mxu1 }
 0x398   :  { %973 = vrot.lane.b32.xlu0 %v5689_v2, %s5501_s2 }
 0x3a9   :  { %700 = vmax.xlane.f32.xlu1 %v699_v12  ;;  %v931_v12 = vsel %vm785_vm3, %v5785_v15, 0 }
 0x3ad   :  { %706 = vmax.xlane.f32.xlu1 %v705_v13 }
 0x3ff   :  { %v692_v16 = vpop.xlane.xlu0 %691 }
 0x400   :  { %v710_v17 = vsub.f32 %v433_v36, %v692_v16 }
 0x401   :  { %v689_v18 = vpop.xlane.xlu1 %688 }
 0x402   :  { %v720_v19 = vmul.f32 1.442695, %v710_v17  ;;  %v709_v22 = vsub.f32 %v384_v41, %v689_v18  ;;  %v883_v17 = vsel %vm785_vm3, %v5783_v14, 0 }
 0x403   :  { %v686_v23 = vpop.xlane.xlu0 %685 }
 0x404   :  { %5330 = vpow2.f32 %v720_v19  ;;  %v718_v24 = vmul.f32 1.442695, %v709_v22  ;;  %v708_v25 = vsub.f32 %v335_v32, %v686_v23 }
 0x405   :  { %v5808_v42 = vpop.permute.xlu1 %1021 }
 0x406   :  { %5332 = vpow2.f32 %v718_v24  ;;  %v716_v26 = vmul.f32 1.442695, %v708_v25 }
 0x407   :  { %v698_v27 = vpop.xlane.xlu0 %697 }
 0x408   :  { %5334 = vpow2.f32 %v716_v26  ;;  %v712_v20 = vsub.f32 %v531_v47, %v698_v27 }
 0x40a   :  { %v724_v30 = vmul.f32 1.442695, %v712_v20 }
 0x40b   :  { %v695_v28 = vpop.xlane.xlu0 %694 }
 0x40c   :  { %5336 = vpow2.f32 %v724_v30  ;;  %v711_v41 = vsub.f32 %v5769_v29, %v695_v28 }
 0x40e   :  { %v5787_v31 = vpop.eup %5330  ;;  %v722_v44 = vmul.f32 1.442695, %v711_v41 }
 0x40f   :  { %v738_v33 = vsel %vm294_vm2, %v5787_v31, 0.0  ;;  %v704_v43 = vpop.xlane.xlu0 %703 }
 0x410   :  { %v5791_v34 = vpop.eup %5332  ;;  %739 = vadd.xlane.f32.xlu0 %v738_v33  ;;  %v714_v45 = vsub.f32 %v629_v57, %v704_v43  ;;  %5338 = vpow2.f32 %v722_v44 }
 0x411   :  { %v735_v35 = vsel %vm294_vm2, %v5791_v34, 0.0 }
 0x412   :  { %v5795_v36 = vpop.eup %5334  ;;  %736 = vadd.xlane.f32.xlu1 %v735_v35  ;;  %v728_v50 = vmul.f32 1.442695, %v714_v45 }
 0x413   :  { %v732_v32 = vsel %vm294_vm2, %v5795_v36, 0.0 }
 0x414   :  { %733 = vadd.xlane.f32.xlu0 %v732_v32 }
 0x416   :  { %v5799_v37 = vpop.eup %5336 }
 0x417   :  { %v744_v40 = vsel %vm294_vm2, %v5799_v37, 0.0 }
 0x418   :  { %745 = vadd.xlane.f32.xlu0 %v744_v40 }
 0x41a   :  { %v5810_v51 = vpop.eup %5338 }
 0x41b   :  { %v741_v38 = vsel %vm294_vm2, %v5810_v51, 0.0 }
 0x423   :  { %1117 = vrot.lane.b32.xlu1 %v5702_v8, %s5501_s2 }
 0x42e   :  { %1069 = vrot.lane.b32.xlu0 %v5695_v6, %s5501_s2 }
 0x436   :  { %v701_v21 = vpop.xlane.xlu1 %700 }
 0x437   :  { %v713_v46 = vsub.f32 %v580_v58, %v701_v21  ;;  %v974_v58 = vpop.permute.xlu0 %973 }
 0x438   :  { %v979_v19 = vsel %vm785_vm3, %v974_v58, 0 }
 0x439   :  { %v726_v47 = vmul.f32 1.442695, %v713_v46 }
 0x43a   :  { %v707_v55 = vpop.xlane.xlu1 %706 }
 0x43b   :  { %5340 = vpow2.f32 %v726_v47  ;;  %v715_v56 = vsub.f32 %v5776_v4, %v707_v55 }
 0x43c   :  { %5342 = vpow2.f32 %v728_v50 }
 0x43d   :  { %v730_v57 = vmul.f32 1.442695, %v715_v56 }
 0x43f   :  { %5344 = vpow2.f32 %v730_v57 }
 0x445   :  { %v5814_v52 = vpop.eup %5340 }
 0x446   :  { %v5816_v29 = vpop.eup %5342  ;;  %v747_v53 = vsel %vm294_vm2, %v5814_v52, 0.0 }
 0x447   :  { %742 = vadd.xlane.f32.xlu1 %v741_v38  ;;  %v750_v54 = vsel %vm294_vm2, %v5816_v29, 0.0 }
 0x449   :  { %v5836_v39 = vpop.eup %5344 }
 0x44a   :  { %v753_v49 = vsel %vm294_vm2, %v5836_v39, 0.0 }
 0x44b   :  { %748 = vadd.xlane.f32.xlu1 %v747_v53 }
 0x44d   :  { %751 = vadd.xlane.f32.xlu0 %v750_v54 }
 0x45c   :  { %1217 = vrot.lane.b32.xlu1 %v5683_v62, %s5502_s26 }
 0x463   :  { %1167 = vrot.lane.b32.xlu0 %v5681_v59, %s5502_s26 }
 0x467   :  { %1165 = vrot.lane.b32.xlu0 %v5681_v59, %s5503_s27 }
 0x46b   :  { %1267 = vrot.lane.b32.xlu0 %v5687_v63, %s5502_s26 }
 0x46f   :  { %1265 = vrot.lane.b32.xlu0 %v5687_v63, %s5503_s27 }
 0x473   :  { %1367 = vrot.lane.b32.xlu0 %v5689_v2, %s5502_s26 }
 0x477   :  { %1365 = vrot.lane.b32.xlu0 %v5689_v2, %s5503_s27 }
 0x47b   :  { %1467 = vrot.lane.b32.xlu0 %v5695_v6, %s5502_s26 }
 0x47f   :  { %1465 = vrot.lane.b32.xlu0 %v5695_v6, %s5503_s27 }
 0x480   :  { %754 = vadd.xlane.f32.xlu1 %v753_v49 }
 0x483   :  { %1661 = vrot.lane.b32.xlu0 %v5681_v59, %s5504_s28 }
 0x491   :  { %1215 = vrot.lane.b32.xlu1 %v5683_v62, %s5503_s27 }
 0x495   :  { %1317 = vrot.lane.b32.xlu1 %v5692_v5, %s5502_s26 }
 0x499   :  { %1315 = vrot.lane.b32.xlu1 %v5692_v5, %s5503_s27 }
 0x49d   :  { %1417 = vrot.lane.b32.xlu1 %v5698_v7, %s5502_s26  ;;  %v740_v60 = vpop.xlane.xlu0 %739 }
 0x49f   :  { %v737_v61 = vpop.xlane.xlu1 %736 }
 0x4a0   :  { %5346 = vrcp.f32 %v737_v61 }
 0x4a1   :  { %1415 = vrot.lane.b32.xlu1 %v5698_v7, %s5503_s27  ;;  %v734_v0 = vpop.xlane.xlu0 %733 }
 0x4a2   :  { %5348 = vrcp.f32 %v734_v0 }
 0x4a3   :  { %5350 = vrcp.f32 %v740_v60  ;;  %v1118_v26 = vpop.permute.xlu1 %1117 }
 0x4a4   :  { %v1123_v46 = vsel %vm785_vm3, %v1118_v26, 0 }
 0x4a5   :  { %1517 = vrot.lane.b32.xlu1 %v5702_v8, %s5502_s26  ;;  %v746_v3 = vpop.xlane.xlu0 %745 }
 0x4a6   :  { %5352 = vrcp.f32 %v746_v3 }
 0x4a9   :  { %1515 = vrot.lane.b32.xlu1 %v5702_v8, %s5503_s27  ;;  %v1070_v23 = vpop.permute.xlu0 %1069 }
 0x4aa   :  { %v5347_v1 = vpop.eup %5346  ;;  %v1075_v25 = vsel %vm785_vm3, %v1070_v23, 0 }
 0x4ab   :  { %v765_v4 = vmul.f32 %v5347_v1, %v5791_v34 }
 0x4ac   :  { %v5349_v9 = vpop.eup %5348 }
 0x4ad   :  { %1709 = vrot.lane.b32.xlu1 %v5683_v62, %s5504_s28  ;;  %v773_v10 = vpack.c.bf16 %v765_v4, %v765_v4  ;;  %v764_v11 = vmul.f32 %v5349_v9, %v5795_v36  ;;  %v5351_v16 = vpop.eup %5350 }
 0x4ae   :  { %v766_v15 = vmul.f32 %v5351_v16, %v5787_v31 }
 0x4af   :  { %4849 = vmatmul.mubr.msk.bf16.vlgmr.msra.gmra.mrb[28].mxu1 %vm294_vm2, %v773_v10  ;;  %v772_v13 = vpack.c.bf16 %v764_v11, %v764_v11 }
 0x4b0   :  { %4859 = vmatpush3.bf16.msra.mxu1 %v931_v12  ;;  %4860 = vmatprep.mubr.msk.bf16.mxu1 %vm5499_vm1, %v5498_v48  ;;  %v774_v18 = vpack.c.bf16 %v766_v15, %v766_v15  ;;  %v5353_v14 = vpop.eup %5352 }
 0x4b1   :  { %1757 = vrot.lane.b32.xlu1 %v5687_v63, %s5504_s28  ;;  %4843 = vmatmul.mubr.msk.bf16.vlgmr.msra.gmra.mrb[12].mxu0 %vm294_vm2, %v772_v13  ;;  %v768_v22 = vmul.f32 %v5353_v14, %v5799_v37  ;;  %v1027_v37 = vsel %vm785_vm3, %v5808_v42, 0 }
 0x4b2   :  { %4853 = vmatpush3.bf16.msra.mxu0 %v883_v17  ;;  %4854 = vmatprep.mubr.msk.bf16.mxu0 %vm5499_vm1, %v5498_v48 }
 0x4b3   :  { %4864 = vmatprep.subr.bf16.mxu0 %v5498_v48  ;;  %4870 = vmatprep.subr.bf16.mxu1 %v5498_v48  ;;  %v776_v24 = vpack.c.bf16 %v768_v22, %v768_v22 }
 0x4b5   :  { %1805 = vrot.lane.b32.xlu1 %v5692_v5, %s5504_s28 }
 0x4b9   :  { %4855 = vmatmul.mubr.msk.bf16.vlgmr.msra.gmra.mrb[16].mxu0 %vm294_vm2, %v774_v18 }
 0x4ba   :  { %4865 = vmatpush3.bf16.msra.mxu0 %v979_v19  ;;  %4866 = vmatprep.mubr.msk.bf16.mxu0 %vm5499_vm1, %v5498_v48 }
 0x4bb   :  { %4876 = vmatprep.subr.bf16.mxu0 %v5498_v48 }
 0x4c1   :  { %4867 = vmatmul.mubr.msk.bf16.vlgmr.msra.gmra.mrb[20].mxu0 %vm294_vm2, %v776_v24 }
 0x4c2   :  { %4877 = vmatpush3.bf16.msra.mxu0 %v1075_v25  ;;  %4878 = vmatprep.mubr.msk.bf16.mxu0 %vm5499_vm1, %v5498_v48 }
 0x4c3   :  { %4888 = vmatprep.subr.bf16.mxu0 %v5498_v48 }
 0x4d4   :  { %v743_v27 = vpop.xlane.xlu1 %742 }
 0x4d5   :  { %5354 = vrcp.f32 %v743_v27 }
 0x4d8   :  { %v749_v20 = vpop.xlane.xlu1 %748 }
 0x4d9   :  { %5356 = vrcp.f32 %v749_v20 }
 0x4da   :  { %v752_v30 = vpop.xlane.xlu0 %751 }
 0x4db   :  { %5358 = vrcp.f32 %v752_v30 }
 0x4dc   :  { %v1218_v55 = vpop.permute.xlu1 %1217 }
 0x4dd   :  { %v1223_v3 = vsel %vm294_vm2, %v1218_v55, 0 }
 0x4de   :  { %v1168_v31 = vpop.permute.xlu0 %1167 }
 0x4df   :  { %v5355_v33 = vpop.eup %5354  ;;  %v1173_v21 = vsel %vm294_vm2, %v1168_v31, 0 }
 0x4e0   :  { %v767_v34 = vmul.f32 %v5355_v33, %v5810_v51 }
 0x4e2   :  { %v1166_v35 = vpop.permute.xlu0 %1165  ;;  %v775_v36 = vpack.c.bf16 %v767_v34, %v767_v34 }
 0x4e3   :  { %v5357_v32 = vpop.eup %5356 }
 0x4e4   :  { %4861 = vmatmul.mubr.msk.bf16.vlgmr.msra.gmra.mrb[32].mxu1 %vm294_vm2, %v775_v36  ;;  %v769_v43 = vmul.f32 %v5357_v32, %v5814_v52 }
 0x4e5   :  { %v5359_v40 = vpop.eup %5358  ;;  %4871 = vmatpush3.bf16.msra.mxu1 %v1027_v37  ;;  %4872 = vmatprep.mubr.msk.bf16.mxu1 %vm5499_vm1, %v5498_v48 }
 0x4e6   :  { %v1268_v28 = vpop.permute.xlu0 %1267  ;;  %v770_v41 = vmul.f32 %v5359_v40, %v5816_v29  ;;  %4882 = vmatprep.subr.bf16.mxu1 %v5498_v48  ;;  %v777_v45 = vpack.c.bf16 %v769_v43, %v769_v43 }
 0x4e7   :  { %v1273_v50 = vsel %vm294_vm2, %v1268_v28, 0 }
 0x4e8   :  { %v778_v44 = vpack.c.bf16 %v770_v41, %v770_v41 }
 0x4ea   :  { %4879 = vmatmul.mubr.msk.bf16.vlgmr.msra.gmra.mrb[24].mxu0 %vm294_vm2, %v778_v44  ;;  %v1266_v42 = vpop.permute.xlu0 %1265 }
 0x4eb   :  { %4889 = vmatpush3.bf16.xpose.msra.mxu0 %v1173_v21  ;;  %4890 = vmatprep.mubr.msk.bf16.mxu0 %vm5499_vm1, %v5498_v48 }
 0x4ec   :  { %4873 = vmatmul.mubr.msk.bf16.vlgmr.msra.gmra.mrb[36].mxu1 %vm294_vm2, %v777_v45  ;;  %4900 = vmatprep.subr.bf16.mxu0 %v5498_v48 }
 0x4ed   :  { %4883 = vmatpush3.bf16.msra.mxu1 %v1123_v46  ;;  %4884 = vmatprep.mubr.msk.bf16.mxu1 %vm5499_vm1, %v5498_v48 }
 0x4ee   :  { %4894 = vmatprep.subr.bf16.mxu1 %v5498_v48  ;;  %v1368_v47 = vpop.permute.xlu0 %1367 }
 0x4ef   :  { %v1373_v38 = vsel %vm294_vm2, %v1368_v47, 0 }
 0x4f2   :  { %4891 = vmatmul.mubr.msk.bf16.vlgmr.msra.gmra.mrb[28].mxu0 %vm294_vm2, %v1166_v35  ;;  %v1366_v51 = vpop.permute.xlu0 %1365 }
 0x4f3   :  { %4901 = vmatpush3.bf16.xpose.msra.mxu0 %v1273_v50  ;;  %4902 = vmatprep.mubr.msk.bf16.mxu0 %vm5499_vm1, %v5498_v48 }
 0x4f4   :  { %4912 = vmatprep.subr.bf16.mxu0 %v5498_v48 }
 0x4f6   :  { %v1468_v52 = vpop.permute.xlu0 %1467 }
 0x4f7   :  { %v1473_v53 = vsel %vm294_vm2, %v1468_v52, 0 }
 0x4fa   :  { %4903 = vmatmul.mubr.msk.bf16.vlgmr.msra.gmra.mrb[32].mxu0 %vm294_vm2, %v1266_v42  ;;  %v1466_v29 = vpop.permute.xlu0 %1465 }
 0x4fb   :  { %4913 = vmatpush3.bf16.xpose.msra.mxu0 %v1373_v38  ;;  %4914 = vmatprep.mubr.msk.bf16.mxu0 %vm5499_vm1, %v5498_v48 }
 0x4fc   :  { %4924 = vmatprep.subr.bf16.mxu0 %v5498_v48 }
 0x4fe   :  { %v1662_v54 = vpop.permute.xlu0 %1661 }
 0x4ff   :  { %v1667_v56 = vsel %vm785_vm3, %v1662_v54, 0 }
 0x502   :  { %4915 = vmatmul.mubr.msk.bf16.vlgmr.msra.gmra.mrb[36].mxu0 %vm294_vm2, %v1366_v51 }
 0x503   :  { %4925 = vmatpush3.bf16.xpose.msra.mxu0 %v1473_v53  ;;  %4926 = vmatprep.mubr.msk.bf16.mxu0 %vm5499_vm1, %v5498_v48 }
 0x504   :  { %4936 = vmatprep.subr.bf16.mxu0 %v5498_v48 }
 0x50a   :  { %4927 = vmatmul.mubr.msk.bf16.vlgmr.msra.gmra.mrb[40].mxu0 %vm294_vm2, %v1466_v29 }
 0x50b   :  { %4937 = vmatpush3.bf16.msra.mxu0 %v1667_v56  ;;  %4938 = vmatprep.mubr.msk.bf16.mxu0 %vm5499_vm1, %v5498_v48 }
 0x50c   :  { %4948 = vmatprep.subr.bf16.mxu0 %v5498_v48 }
 0x50d   :  { %v755_v57 = vpop.xlane.xlu1 %754 }
 0x50e   :  { %5360 = vrcp.f32 %v755_v57 }
 0x511   :  { %v1216_v49 = vpop.permute.xlu1 %1215 }
 0x515   :  { %v1318_v58 = vpop.permute.xlu1 %1317 }
 0x516   :  { %v1323_v9 = vsel %vm294_vm2, %v1318_v58, 0 }
 0x518   :  { %v5361_v60 = vpop.eup %5360 }
 0x519   :  { %v771_v61 = vmul.f32 %v5361_v60, %v5836_v39  ;;  %v1316_v1 = vpop.permute.xlu1 %1315 }
 0x51b   :  { %v779_v0 = vpack.c.bf16 %v771_v61, %v771_v61 }
 0x51d   :  { %4885 = vmatmul.mubr.msk.bf16.vlgmr.msra.gmra.mrb[40].mxu1 %vm294_vm2, %v779_v0  ;;  %v1418_v4 = vpop.permute.xlu1 %1417 }
 0x51e   :  { %4895 = vmatpush3.bf16.xpose.msra.mxu1 %v1223_v3  ;;  %4896 = vmatprep.mubr.msk.bf16.mxu1 %vm5499_vm1, %v5498_v48  ;;  %v1423_v10 = vsel %vm294_vm2, %v1418_v4, 0 }
 0x51f   :  { %4906 = vmatprep.subr.bf16.mxu1 %v5498_v48 }
 0x521   :  { %v1416_v39 = vpop.permute.xlu1 %1415 }
 0x525   :  { %4897 = vmatmul.mubr.msk.bf16.vlgmr.msra.gmra.mrb[44].mxu1 %vm294_vm2, %v1216_v49  ;;  %v1518_v11 = vpop.permute.xlu1 %1517 }
 0x526   :  { %4907 = vmatpush3.bf16.xpose.msra.mxu1 %v1323_v9  ;;  %4908 = vmatprep.mubr.msk.bf16.mxu1 %vm5499_vm1, %v5498_v48  ;;  %v1523_v13 = vsel %vm294_vm2, %v1518_v11, 0 }
 0x527   :  { %4918 = vmatprep.subr.bf16.mxu1 %v5498_v48 }
 0x529   :  { %v1516_v12 = vpop.permute.xlu1 %1515 }
 0x52d   :  { %4909 = vmatmul.mubr.msk.bf16.vlgmr.msra.gmra.mrb[48].mxu1 %vm294_vm2, %v1316_v1  ;;  %v1710_v16 = vpop.permute.xlu1 %1709 }
 0x52e   :  { %4919 = vmatpush3.bf16.xpose.msra.mxu1 %v1423_v10  ;;  %4920 = vmatprep.mubr.msk.bf16.mxu1 %vm5499_vm1, %v5498_v48  ;;  %v1715_v17 = vsel %vm785_vm3, %v1710_v16, 0 }
 0x52f   :  { %4930 = vmatprep.subr.bf16.mxu1 %v5498_v48 }
 0x535   :  { %4921 = vmatmul.mubr.msk.bf16.vlgmr.msra.gmra.mrb[52].mxu1 %vm294_vm2, %v1416_v39 }
 0x536   :  { %4931 = vmatpush3.bf16.xpose.msra.mxu1 %v1523_v13  ;;  %4932 = vmatprep.mubr.msk.bf16.mxu1 %vm5499_vm1, %v5498_v48 }
 0x537   :  { %4942 = vmatprep.subr.bf16.mxu1 %v5498_v48 }
 0x53d   :  { %4933 = vmatmul.mubr.msk.bf16.vlgmr.msra.gmra.mrb[56].mxu1 %vm294_vm2, %v1516_v12 }
 0x53e   :  { %4943 = vmatpush3.bf16.msra.mxu1 %v1715_v17  ;;  %4944 = vmatprep.mubr.msk.bf16.mxu1 %vm5499_vm1, %v5498_v48 }
 0x53f   :  { %4954 = vmatprep.subr.bf16.mxu1 %v5498_v48 }
 0x582   :  { %v5950_v15 = vpop.f32.mrb[28].mxu1 }
 0x583   :  { %v4850_v18 = vpop.f32.mrb[29].mxu1 }
 0x584   :  { %v5952_v14 = vpop.f32.mrb[12].mxu0  ;;  %v874_v19 = vpop.f32.mrb[30].mxu1 }
 0x585   :  { %v4844_v22 = vpop.f32.mrb[13].mxu0  ;;  %v4851_v23 = vpop.f32.mrb[31].mxu1 }
 0x586   :  { %v826_v24 = vpop.f32.mrb[14].mxu0 }
 0x587   :  { %v4845_v25 = vpop.f32.mrb[15].mxu0 }
 0x58c   :  { %v5954_v26 = vpop.f32.mrb[16].mxu0 }
 0x58d   :  { %v4856_v27 = vpop.f32.mrb[17].mxu0 }
 0x58e   :  { %v922_v20 = vpop.f32.mrb[18].mxu0 }
 0x58f   :  { %v4857_v30 = vpop.f32.mrb[19].mxu0 }
 0x594   :  { %v5956_v31 = vpop.f32.mrb[20].mxu0 }
 0x595   :  { %v4868_v33 = vpop.f32.mrb[21].mxu0 }
 0x596   :  { %v1018_v34 = vpop.f32.mrb[22].mxu0 }
 0x597   :  { %v4869_v35 = vpop.f32.mrb[23].mxu0 }
 0x5b7   :  { %v5958_v36 = vpop.f32.mrb[32].mxu1 }
 0x5b8   :  { %v4862_v32 = vpop.f32.mrb[33].mxu1 }
 0x5b9   :  { %v970_v37 = vpop.f32.mrb[34].mxu1 }
 0x5ba   :  { %v4863_v40 = vpop.f32.mrb[35].mxu1 }
 0x5bd   :  { %v5960_v28 = vpop.f32.mrb[24].mxu0 }
 0x5be   :  { %v4880_v41 = vpop.f32.mrb[25].mxu0 }
 0x5bf   :  { %v5962_v43 = vpop.f32.mrb[36].mxu1  ;;  %v1114_v44 = vpop.f32.mrb[26].mxu0 }
 0x5c0   :  { %v4874_v21 = vpop.f32.mrb[37].mxu1  ;;  %v4881_v42 = vpop.f32.mrb[27].mxu0 }
 0x5c1   :  { %v1066_v45 = vpop.f32.mrb[38].mxu1 }
 0x5c2   :  { %v4875_v46 = vpop.f32.mrb[39].mxu1 }
 0x5c5   :  { %v1209_v47 = vpop.f32.mrb[28].mxu0 }
 0x5c6   :  { %v4892_v50 = vpop.f32.mrb[29].mxu0  ;;  %v1565_v51 = vsel %vm294_vm2, %v1209_v47, -inf }
 0x5c7   :  { %1566 = vmax.xlane.f32.xlu0 %v1565_v51  ;;  %v1212_v38 = vpop.f32.mrb[30].mxu0 }
 0x5c8   :  { %v4893_v52 = vpop.f32.mrb[31].mxu0 }
 0x5cd   :  { %v1309_v29 = vpop.f32.mrb[32].mxu0 }
 0x5ce   :  { %v4904_v53 = vpop.f32.mrb[33].mxu0  ;;  %v1571_v54 = vsel %vm294_vm2, %v1309_v29, -inf }
 0x5cf   :  { %1572 = vmax.xlane.f32.xlu0 %v1571_v54  ;;  %v1312_v55 = vpop.f32.mrb[34].mxu0 }
 0x5d0   :  { %v4905_v56 = vpop.f32.mrb[35].mxu0  ;;  %v1758_v55 = vpop.permute.xlu1 %1757 }
 0x5d5   :  { %v5966_v57 = vpop.f32.mrb[36].mxu0 }
 0x5d6   :  { %v4916_v49 = vpop.f32.mrb[37].mxu0  ;;  %v1577_v25 = vsel %vm294_vm2, %v5966_v57, -inf }
 0x5d7   :  { %v1412_v58 = vpop.f32.mrb[38].mxu0 }
 0x5d8   :  { %v4917_v60 = vpop.f32.mrb[39].mxu0 }
 0x5dd   :  { %v5968_v61 = vpop.f32.mrb[40].mxu0 }
 0x5de   :  { %v4928_v0 = vpop.f32.mrb[41].mxu0  ;;  %v1583_v33 = vsel %vm294_vm2, %v5968_v61, -inf }
 0x5df   :  { %v1512_v1 = vpop.f32.mrb[42].mxu0 }
 0x5e0   :  { %v4929_v3 = vpop.f32.mrb[43].mxu0 }
 0x5f0   :  { %v5970_v4 = vpop.f32.mrb[40].mxu1 }
 0x5f1   :  { %v4886_v9 = vpop.f32.mrb[41].mxu1 }
 0x5f2   :  { %v1162_v39 = vpop.f32.mrb[42].mxu1 }
 0x5f3   :  { %v4887_v10 = vpop.f32.mrb[43].mxu1 }
 0x5f8   :  { %v1259_v11 = vpop.f32.mrb[44].mxu1 }
 0x5f9   :  { %v4898_v12 = vpop.f32.mrb[45].mxu1  ;;  %v1568_v13 = vsel %vm294_vm2, %v1259_v11, -inf }
 0x5fa   :  { %1569 = vmax.xlane.f32.xlu1 %v1568_v13  ;;  %v1262_v16 = vpop.f32.mrb[46].mxu1 }
 0x5fb   :  { %v4899_v17 = vpop.f32.mrb[47].mxu1 }
 0x600   :  { %v1359_v18 = vpop.f32.mrb[48].mxu1 }
 0x601   :  { %v4910_v19 = vpop.f32.mrb[49].mxu1  ;;  %v1574_v22 = vsel %vm294_vm2, %v1359_v18, -inf }
 0x602   :  { %v1362_v23 = vpop.f32.mrb[50].mxu1  ;;  %1575 = vmax.xlane.f32.xlu0 %v1574_v22 }
 0x603   :  { %v4911_v24 = vpop.f32.mrb[51].mxu1 }
 0x606   :  { %1578 = vmax.xlane.f32.xlu0 %v1577_v25 }
 0x608   :  { %v1459_v27 = vpop.f32.mrb[52].mxu1 }
 0x609   :  { %v4922_v20 = vpop.f32.mrb[53].mxu1  ;;  %v1580_v30 = vsel %vm294_vm2, %v1459_v27, -inf }
 0x60a   :  { %1581 = vmax.xlane.f32.xlu1 %v1580_v30  ;;  %v1462_v34 = vpop.f32.mrb[54].mxu1  ;;  %1584 = vmax.xlane.f32.xlu0 %v1583_v33 }
 0x60b   :  { %v4923_v35 = vpop.f32.mrb[55].mxu1 }
 0x610   :  { %v5979_v32 = vpop.f32.mrb[56].mxu1 }
 0x611   :  { %v4934_v37 = vpop.f32.mrb[57].mxu1  ;;  %v1586_v44 = vsel %vm294_vm2, %v5979_v32, -inf }
 0x612   :  { %v1562_v40 = vpop.f32.mrb[58].mxu1 }
 0x613   :  { %v4935_v41 = vpop.f32.mrb[59].mxu1 }
 0x61b   :  { %1901 = vrot.lane.b32.xlu1 %v5698_v7, %s5504_s28 }
 0x620   :  { %1853 = vrot.lane.b32.xlu0 %v5689_v2, %s5504_s28 }
 0x63f   :  { %1587 = vmax.xlane.f32.xlu1 %v1586_v44 }
 0x654   :  { %v1567_v21 = vpop.xlane.xlu0 %1566 }
 0x655   :  { %v1589_v42 = vsub.f32 %v1209_v47, %v1567_v21  ;;  %v5995_v47 = vpop.permute.xlu1 %1805 }
 0x657   :  { %v1597_v45 = vmul.f32 1.442695, %v1589_v42  ;;  %v1763_v42 = vsel %vm785_vm3, %v1758_v55, 0 }
 0x659   :  { %5362 = vpow2.f32 %v1597_v45 }
 0x65c   :  { %v1573_v46 = vpop.xlane.xlu0 %1572 }
 0x65d   :  { %v1591_v50 = vsub.f32 %v1309_v29, %v1573_v46 }
 0x65f   :  { %v1601_v51 = vmul.f32 1.442695, %v1591_v50 }
 0x661   :  { %5364 = vpow2.f32 %v1601_v51 }
 0x663   :  { %v5987_v38 = vpop.eup %5362 }
 0x664   :  { %v1613_v52 = vsel %vm294_vm2, %v5987_v38, 0.0 }
 0x665   :  { %1614 = vadd.xlane.f32.xlu0 %v1613_v52 }
 0x66b   :  { %v5991_v53 = vpop.eup %5364 }
 0x66c   :  { %v1619_v54 = vsel %vm294_vm2, %v5991_v53, 0.0 }
 0x66d   :  { %1620 = vadd.xlane.f32.xlu0 %v1619_v54 }
 0x687   :  { %v1570_v56 = vpop.xlane.xlu1 %1569 }
 0x688   :  { %v1590_v49 = vsub.f32 %v1259_v11, %v1570_v56 }
 0x68a   :  { %v1599_v29 = vmul.f32 1.442695, %v1590_v49 }
 0x68c   :  { %5366 = vpow2.f32 %v1599_v29  ;;  %v1811_v29 = vsel %vm785_vm3, %v5995_v47, 0 }
 0x68f   :  { %v1576_v58 = vpop.xlane.xlu0 %1575 }
 0x690   :  { %v1592_v60 = vsub.f32 %v1359_v18, %v1576_v58 }
 0x692   :  { %v1603_v0 = vmul.f32 1.442695, %v1592_v60 }
 0x693   :  { %v1579_v1 = vpop.xlane.xlu0 %1578 }
 0x694   :  { %5368 = vpow2.f32 %v1603_v0  ;;  %v1593_v3 = vsub.f32 %v5966_v57, %v1579_v1 }
 0x696   :  { %v5998_v9 = vpop.eup %5366  ;;  %v1605_v39 = vmul.f32 1.442695, %v1593_v3 }
 0x697   :  { %v1616_v10 = vsel %vm294_vm2, %v5998_v9, 0.0  ;;  %v1582_v57 = vpop.xlane.xlu1 %1581  ;;  %v1585_v18 = vpop.xlane.xlu0 %1584 }
 0x698   :  { %5370 = vpow2.f32 %v1605_v39  ;;  %1617 = vadd.xlane.f32.xlu1 %v1616_v10  ;;  %v1594_v17 = vsub.f32 %v1459_v27, %v1582_v57  ;;  %v1595_v22 = vsub.f32 %v5968_v61, %v1585_v18 }
 0x69a   :  { %v1607_v19 = vmul.f32 1.442695, %v1594_v17  ;;  %v1609_v23 = vmul.f32 1.442695, %v1595_v22 }
 0x69b   :  { %v6025_v61 = vpop.permute.xlu1 %1901  ;;  %v1854_v27 = vpop.permute.xlu0 %1853 }
 0x69c   :  { %5372 = vpow2.f32 %v1607_v19  ;;  %v1907_v47 = vsel %vm785_vm3, %v6025_v61, 0 }
 0x69d   :  { %5374 = vpow2.f32 %v1609_v23 }
 0x69e   :  { %v6002_v12 = vpop.eup %5368 }
 0x69f   :  { %v1622_v11 = vsel %vm294_vm2, %v6002_v12, 0.0 }
 0x6a0   :  { %1623 = vadd.xlane.f32.xlu1 %v1622_v11 }
 0x6a2   :  { %v6006_v13 = vpop.eup %5370 }
 0x6a3   :  { %v1625_v16 = vsel %vm294_vm2, %v6006_v13, 0.0 }
 0x6a4   :  { %1626 = vadd.xlane.f32.xlu0 %v1625_v16 }
 0x6a6   :  { %v6015_v24 = vpop.eup %5372 }
 0x6a7   :  { %v1628_v25 = vsel %vm294_vm2, %v6015_v24, 0.0  ;;  %v6019_v20 = vpop.eup %5374 }
 0x6a8   :  { %v1631_v30 = vsel %vm294_vm2, %v6019_v20, 0.0 }
 0x6b1   :  { %1997 = vrot.lane.b32.xlu1 %v5702_v8, %s5504_s28 }
 0x6ba   :  { %1949 = vrot.lane.b32.xlu0 %v5695_v6, %s5504_s28 }
 0x6cc   :  { %v1588_v33 = vpop.xlane.xlu1 %1587 }
 0x6cd   :  { %v1596_v35 = vsub.f32 %v5979_v32, %v1588_v33 }
 0x6cf   :  { %v1611_v37 = vmul.f32 1.442695, %v1596_v35 }
 0x6d5   :  { %1629 = vadd.xlane.f32.xlu1 %v1628_v25 }
 0x6d9   :  { %1632 = vadd.xlane.f32.xlu0 %v1631_v30 }
 0x6e6   :  { %2097 = vrot.lane.b32.xlu1 %v5683_v62, %s5505_s29 }
 0x6ef   :  { %2047 = vrot.lane.b32.xlu0 %v5681_v59, %s5505_s29 }
 0x6f2   :  { %v1615_v34 = vpop.xlane.xlu0 %1614 }
 0x6f3   :  { %5376 = vrcp.f32 %v1615_v34  ;;  %2045 = vrot.lane.b32.xlu0 %v5681_v59, %s5506_s30 }
 0x6f7   :  { %2147 = vrot.lane.b32.xlu0 %v5687_v63, %s5505_s29 }
 0x6fa   :  { %v1621_v40 = vpop.xlane.xlu0 %1620 }
 0x6fb   :  { %5378 = vrcp.f32 %v1621_v40  ;;  %2145 = vrot.lane.b32.xlu0 %v5687_v63, %s5506_s30 }
 0x6fc   :  { %5380 = vpow2.f32 %v1611_v37 }
 0x6fd   :  { %v5377_v41 = vpop.eup %5376 }
 0x6fe   :  { %v1645_v44 = vmul.f32 %v5377_v41, %v5987_v38  ;;  %v1859_v38 = vsel %vm785_vm3, %v1854_v27, 0 }
 0x6ff   :  { %2247 = vrot.lane.b32.xlu0 %v5689_v2, %s5505_s29 }
 0x700   :  { %v1653_v21 = vpack.c.bf16 %v1645_v44, %v1645_v44 }
 0x702   :  { %4939 = vmatmul.mubr.msk.bf16.vlgmr.msra.gmra.mrb[44].mxu0 %vm294_vm2, %v1653_v21 }
 0x703   :  { %4949 = vmatpush3.bf16.msra.mxu0 %v1763_v42  ;;  %2245 = vrot.lane.b32.xlu0 %v5689_v2, %s5506_s30 }
 0x704   :  { %4950 = vmatprep.mubr.msk.bf16.mxu0 %vm5499_vm1, %v5498_v48  ;;  %4960 = vmatprep.subr.bf16.mxu0 %v5498_v48 }
 0x705   :  { %v5379_v32 = vpop.eup %5378 }
 0x706   :  { %v6046_v45 = vpop.eup %5380  ;;  %v1647_v46 = vmul.f32 %v5379_v32, %v5991_v53 }
 0x707   :  { %2347 = vrot.lane.b32.xlu0 %v5695_v6, %s5505_s29  ;;  %v1634_v51 = vsel %vm294_vm2, %v6046_v45, 0.0 }
 0x708   :  { %v1655_v50 = vpack.c.bf16 %v1647_v46, %v1647_v46 }
 0x70a   :  { %1635 = vadd.xlane.f32.xlu1 %v1634_v51  ;;  %4951 = vmatmul.mubr.msk.bf16.vlgmr.msra.gmra.mrb[48].mxu0 %vm294_vm2, %v1655_v50 }
 0x70b   :  { %4961 = vmatpush3.bf16.msra.mxu0 %v1859_v38  ;;  %2345 = vrot.lane.b32.xlu0 %v5695_v6, %s5506_s30 }
 0x70c   :  { %4962 = vmatprep.mubr.msk.bf16.mxu0 %vm5499_vm1, %v5498_v48  ;;  %4972 = vmatprep.subr.bf16.mxu0 %v5498_v48 }
 0x70f   :  { %2541 = vrot.lane.b32.xlu0 %v5681_v59, %s5507_s13 }
 0x71b   :  { %2095 = vrot.lane.b32.xlu1 %v5683_v62, %s5506_s30 }
 0x71f   :  { %2197 = vrot.lane.b32.xlu1 %v5692_v5, %s5505_s29 }
 0x723   :  { %2195 = vrot.lane.b32.xlu1 %v5692_v5, %s5506_s30 }
 0x725   :  { %v1618_v52 = vpop.xlane.xlu1 %1617 }
 0x726   :  { %5382 = vrcp.f32 %v1618_v52 }
 0x727   :  { %2297 = vrot.lane.b32.xlu1 %v5698_v7, %s5505_s29 }
 0x72b   :  { %2295 = vrot.lane.b32.xlu1 %v5698_v7, %s5506_s30 }
 0x72d   :  { %v1624_v53 = vpop.xlane.xlu1 %1623 }
 0x72e   :  { %5384 = vrcp.f32 %v1624_v53 }
 0x72f   :  { %2397 = vrot.lane.b32.xlu1 %v5702_v8, %s5505_s29 }
 0x730   :  { %v5383_v54 = vpop.eup %5382 }
 0x731   :  { %v1627_v55 = vpop.xlane.xlu0 %1626  ;;  %v1646_v56 = vmul.f32 %v5383_v54, %v5998_v9 }
 0x732   :  { %5386 = vrcp.f32 %v1627_v55 }
 0x733   :  { %2395 = vrot.lane.b32.xlu1 %v5702_v8, %s5506_s30  ;;  %v1654_v49 = vpack.c.bf16 %v1646_v56, %v1646_v56 }
 0x735   :  { %4945 = vmatmul.mubr.msk.bf16.vlgmr.msra.gmra.mrb[60].mxu1 %vm294_vm2, %v1654_v49  ;;  %v1950_v9 = vpop.permute.xlu0 %1949 }
 0x736   :  { %4955 = vmatpush3.bf16.msra.mxu1 %v1811_v29  ;;  %4956 = vmatprep.mubr.msk.bf16.mxu1 %vm5499_vm1, %v5498_v48  ;;  %v1955_v10 = vsel %vm785_vm3, %v1950_v9, 0 }
 0x737   :  { %2589 = vrot.lane.b32.xlu1 %v5683_v62, %s5507_s13  ;;  %4966 = vmatprep.subr.bf16.mxu1 %v5498_v48 }
 0x738   :  { %v5385_v58 = vpop.eup %5384 }
 0x739   :  { %v1648_v60 = vmul.f32 %v5385_v58, %v6002_v12  ;;  %v1998_v12 = vpop.permute.xlu1 %1997 }
 0x73a   :  { %v2003_v23 = vsel %vm785_vm3, %v1998_v12, 0 }
 0x73b   :  { %2637 = vrot.lane.b32.xlu1 %v5687_v63, %s5507_s13  ;;  %v1656_v0 = vpack.c.bf16 %v1648_v60, %v1648_v60 }
 0x73c   :  { %v5387_v1 = vpop.eup %5386 }
 0x73d   :  { %4957 = vmatmul.mubr.msk.bf16.vlgmr.msra.gmra.mrb[64].mxu1 %vm294_vm2, %v1656_v0  ;;  %v1649_v3 = vmul.f32 %v5387_v1, %v6006_v13 }
 0x73e   :  { %4967 = vmatpush3.bf16.msra.mxu1 %v1907_v47  ;;  %4968 = vmatprep.mubr.msk.bf16.mxu1 %vm5499_vm1, %v5498_v48 }
 0x73f   :  { %2685 = vrot.lane.b32.xlu1 %v5692_v5, %s5507_s13  ;;  %v1657_v39 = vpack.c.bf16 %v1649_v3, %v1649_v3  ;;  %4978 = vmatprep.subr.bf16.mxu1 %v5498_v48 }
 0x741   :  { %4963 = vmatmul.mubr.msk.bf16.vlgmr.msra.gmra.mrb[52].mxu0 %vm294_vm2, %v1657_v39 }
 0x742   :  { %4973 = vmatpush3.bf16.msra.mxu0 %v1955_v10  ;;  %4974 = vmatprep.mubr.msk.bf16.mxu0 %vm5499_vm1, %v5498_v48 }
 0x743   :  { %4984 = vmatprep.subr.bf16.mxu0 %v5498_v48 }
 0x762   :  { %v1630_v11 = vpop.xlane.xlu1 %1629 }
 0x763   :  { %5388 = vrcp.f32 %v1630_v11 }
 0x766   :  { %v1633_v13 = vpop.xlane.xlu0 %1632  ;;  %v2098_v44 = vpop.permute.xlu1 %2097 }
 0x767   :  { %5390 = vrcp.f32 %v1633_v13  ;;  %v2103_v54 = vsel %vm294_vm2, %v2098_v44, 0 }
 0x76a   :  { %v2048_v16 = vpop.permute.xlu0 %2047 }
 0x76b   :  { %v2053_v27 = vsel %vm294_vm2, %v2048_v16, 0 }
 0x76d   :  { %v5389_v57 = vpop.eup %5388 }
 0x76e   :  { %v2046_v17 = vpop.permute.xlu0 %2045  ;;  %v1650_v18 = vmul.f32 %v5389_v57, %v6015_v24 }
 0x770   :  { %v1658_v19 = vpack.c.bf16 %v1650_v18, %v1650_v18 }
 0x771   :  { %v5391_v22 = vpop.eup %5390 }
 0x772   :  { %4969 = vmatmul.mubr.msk.bf16.vlgmr.msra.gmra.mrb[68].mxu1 %vm294_vm2, %v1658_v19  ;;  %v2148_v25 = vpop.permute.xlu0 %2147  ;;  %v1651_v30 = vmul.f32 %v5391_v22, %v6019_v20 }
 0x773   :  { %4979 = vmatpush3.bf16.msra.mxu1 %v2003_v23  ;;  %4980 = vmatprep.mubr.msk.bf16.mxu1 %vm5499_vm1, %v5498_v48  ;;  %v2153_v20 = vsel %vm294_vm2, %v2148_v25, 0 }
 0x774   :  { %v1659_v61 = vpack.c.bf16 %v1651_v30, %v1651_v30  ;;  %4990 = vmatprep.subr.bf16.mxu1 %v5498_v48 }
 0x776   :  { %4975 = vmatmul.mubr.msk.bf16.vlgmr.msra.gmra.mrb[56].mxu0 %vm294_vm2, %v1659_v61  ;;  %v2146_v24 = vpop.permute.xlu0 %2145 }
 0x777   :  { %4985 = vmatpush3.bf16.xpose.msra.mxu0 %v2053_v27  ;;  %4986 = vmatprep.mubr.msk.bf16.mxu0 %vm5499_vm1, %v5498_v48 }
 0x778   :  { %4996 = vmatprep.subr.bf16.mxu0 %v5498_v48 }
 0x77a   :  { %v2248_v33 = vpop.permute.xlu0 %2247 }
 0x77b   :  { %v2253_v35 = vsel %vm294_vm2, %v2248_v33, 0 }
 0x77e   :  { %4987 = vmatmul.mubr.msk.bf16.vlgmr.msra.gmra.mrb[60].mxu0 %vm294_vm2, %v2046_v17  ;;  %v2246_v34 = vpop.permute.xlu0 %2245 }
 0x77f   :  { %4997 = vmatpush3.bf16.xpose.msra.mxu0 %v2153_v20  ;;  %4998 = vmatprep.mubr.msk.bf16.mxu0 %vm5499_vm1, %v5498_v48 }
 0x780   :  { %5008 = vmatprep.subr.bf16.mxu0 %v5498_v48 }
 0x782   :  { %v2348_v37 = vpop.permute.xlu0 %2347 }
 0x783   :  { %v2353_v41 = vsel %vm294_vm2, %v2348_v37, 0 }
 0x786   :  { %4999 = vmatmul.mubr.msk.bf16.vlgmr.msra.gmra.mrb[64].mxu0 %vm294_vm2, %v2146_v24  ;;  %v2346_v40 = vpop.permute.xlu0 %2345 }
 0x787   :  { %5009 = vmatpush3.bf16.xpose.msra.mxu0 %v2253_v35  ;;  %5010 = vmatprep.mubr.msk.bf16.mxu0 %vm5499_vm1, %v5498_v48 }
 0x788   :  { %5020 = vmatprep.subr.bf16.mxu0 %v5498_v48 }
 0x78a   :  { %v2542_v21 = vpop.permute.xlu0 %2541 }
 0x78b   :  { %v2547_v42 = vsel %vm785_vm3, %v2542_v21, 0 }
 0x78e   :  { %5011 = vmatmul.mubr.msk.bf16.vlgmr.msra.gmra.mrb[68].mxu0 %vm294_vm2, %v2246_v34 }
 0x78f   :  { %5021 = vmatpush3.bf16.xpose.msra.mxu0 %v2353_v41  ;;  %5022 = vmatprep.mubr.msk.bf16.mxu0 %vm5499_vm1, %v5498_v48 }
 0x790   :  { %5032 = vmatprep.subr.bf16.mxu0 %v5498_v48 }
 0x796   :  { %5023 = vmatmul.mubr.msk.bf16.vlgmr.msra.gmra.mrb[72].mxu0 %vm294_vm2, %v2346_v40 }
 0x797   :  { %5033 = vmatpush3.bf16.msra.mxu0 %v2547_v42  ;;  %v1636_v32 = vpop.xlane.xlu1 %1635  ;;  %5034 = vmatprep.mubr.msk.bf16.mxu0 %vm5499_vm1, %v5498_v48 }
 0x798   :  { %5392 = vrcp.f32 %v1636_v32  ;;  %5044 = vmatprep.subr.bf16.mxu0 %v5498_v48 }
 0x79b   :  { %v2096_v46 = vpop.permute.xlu1 %2095 }
 0x79f   :  { %v2198_v50 = vpop.permute.xlu1 %2197 }
 0x7a0   :  { %v2203_v56 = vsel %vm294_vm2, %v2198_v50, 0 }
 0x7a2   :  { %v5393_v51 = vpop.eup %5392 }
 0x7a3   :  { %v1652_v38 = vmul.f32 %v5393_v51, %v6046_v45  ;;  %v2196_v53 = vpop.permute.xlu1 %2195 }
 0x7a5   :  { %v1660_v52 = vpack.c.bf16 %v1652_v38, %v1652_v38 }
 0x7a7   :  { %4981 = vmatmul.mubr.msk.bf16.vlgmr.msra.gmra.mrb[72].mxu1 %vm294_vm2, %v1660_v52  ;;  %v2298_v55 = vpop.permute.xlu1 %2297 }
 0x7a8   :  { %4991 = vmatpush3.bf16.xpose.msra.mxu1 %v2103_v54  ;;  %4992 = vmatprep.mubr.msk.bf16.mxu1 %vm5499_vm1, %v5498_v48  ;;  %v2303_v49 = vsel %vm294_vm2, %v2298_v55, 0 }
 0x7a9   :  { %5002 = vmatprep.subr.bf16.mxu1 %v5498_v48 }
 0x7ab   :  { %v2296_v45 = vpop.permute.xlu1 %2295 }
 0x7af   :  { %4993 = vmatmul.mubr.msk.bf16.vlgmr.msra.gmra.mrb[76].mxu1 %vm294_vm2, %v2096_v46  ;;  %v2398_v29 = vpop.permute.xlu1 %2397 }
 0x7b0   :  { %5003 = vmatpush3.bf16.xpose.msra.mxu1 %v2203_v56  ;;  %5004 = vmatprep.mubr.msk.bf16.mxu1 %vm5499_vm1, %v5498_v48  ;;  %v2403_v60 = vsel %vm294_vm2, %v2398_v29, 0 }
 0x7b1   :  { %5014 = vmatprep.subr.bf16.mxu1 %v5498_v48 }
 0x7b3   :  { %v2396_v58 = vpop.permute.xlu1 %2395 }
 0x7b7   :  { %5005 = vmatmul.mubr.msk.bf16.vlgmr.msra.gmra.mrb[80].mxu1 %vm294_vm2, %v2196_v53  ;;  %v2590_v0 = vpop.permute.xlu1 %2589 }
 0x7b8   :  { %5015 = vmatpush3.bf16.xpose.msra.mxu1 %v2303_v49  ;;  %5016 = vmatprep.mubr.msk.bf16.mxu1 %vm5499_vm1, %v5498_v48  ;;  %v2595_v1 = vsel %vm785_vm3, %v2590_v0, 0 }
 0x7b9   :  { %5026 = vmatprep.subr.bf16.mxu1 %v5498_v48 }
 0x7bf   :  { %5017 = vmatmul.mubr.msk.bf16.vlgmr.msra.gmra.mrb[84].mxu1 %vm294_vm2, %v2296_v45 }
 0x7c0   :  { %5027 = vmatpush3.bf16.xpose.msra.mxu1 %v2403_v60  ;;  %5028 = vmatprep.mubr.msk.bf16.mxu1 %vm5499_vm1, %v5498_v48 }
 0x7c1   :  { %5038 = vmatprep.subr.bf16.mxu1 %v5498_v48 }
 0x7c7   :  { %5029 = vmatmul.mubr.msk.bf16.vlgmr.msra.gmra.mrb[88].mxu1 %vm294_vm2, %v2396_v58 }
 0x7c8   :  { %5039 = vmatpush3.bf16.msra.mxu1 %v2595_v1  ;;  %5040 = vmatprep.mubr.msk.bf16.mxu1 %vm5499_vm1, %v5498_v48 }
 0x7c9   :  { %5050 = vmatprep.subr.bf16.mxu1 %v5498_v48 }
 0x7d5   :  { %v6160_v47 = vpop.f32.mrb[44].mxu0 }
 0x7d6   :  { %v4940_v3 = vpop.f32.mrb[45].mxu0 }
 0x7d7   :  { %v1706_v9 = vpop.f32.mrb[46].mxu0 }
 0x7d8   :  { %v4941_v39 = vpop.f32.mrb[47].mxu0 }
 0x7dd   :  { %v6162_v10 = vpop.f32.mrb[48].mxu0 }
 0x7de   :  { %v4952_v12 = vpop.f32.mrb[49].mxu0 }
 0x7df   :  { %v1802_v11 = vpop.f32.mrb[50].mxu0 }
 0x7e0   :  { %v4953_v13 = vpop.f32.mrb[51].mxu0 }
 0x808   :  { %v6164_v16 = vpop.f32.mrb[60].mxu1 }
 0x809   :  { %v5240_v57 = vpack.i.bf16 %v6164_v16, %v6160_v47  ;;  %v4946_v17 = vpop.f32.mrb[61].mxu1 }
 0x80a   :  { %v1754_v18 = vpop.f32.mrb[62].mxu1 }
 0x80b   :  { %v4947_v19 = vpop.f32.mrb[63].mxu1 }
 0x810   :  { %v6168_v22 = vpop.f32.mrb[64].mxu1 }
 0x811   :  { %v5245_v23 = vpack.i.bf16 %v6168_v22, %v6162_v10  ;;  %v4958_v25 = vpop.f32.mrb[65].mxu1 }
 0x812   :  { %v1850_v30 = vpop.f32.mrb[66].mxu1 }
 0x813   :  { %v4959_v61 = vpop.f32.mrb[67].mxu1 }
 0x814   :  { %v6172_v27 = vpop.f32.mrb[52].mxu0 }
 0x815   :  { %v4964_v24 = vpop.f32.mrb[53].mxu0 }
 0x816   :  { %v1898_v33 = vpop.f32.mrb[54].mxu0 }
 0x817   :  { %v4965_v20 = vpop.f32.mrb[55].mxu0 }
 0x845   :  { %v6174_v34 = vpop.f32.mrb[68].mxu1 }
 0x846   :  { %v5260_v35 = vpack.i.bf16 %v6174_v34, %v6172_v27  ;;  %v4970_v37 = vpop.f32.mrb[69].mxu1 }
 0x847   :  { %v1946_v40 = vpop.f32.mrb[70].mxu1 }
 0x848   :  { %v4971_v41 = vpop.f32.mrb[71].mxu1 }
 0x849   :  { %v6178_v44 = vpop.f32.mrb[56].mxu0 }
 0x84a   :  { %v4976_v21 = vpop.f32.mrb[57].mxu0 }
 0x84b   :  { %v1994_v42 = vpop.f32.mrb[58].mxu0 }
 0x84c   :  { %v4977_v32 = vpop.f32.mrb[59].mxu0 }
 0x851   :  { %v2089_v46 = vpop.f32.mrb[60].mxu0 }
 0x852   :  { %v4988_v50 = vpop.f32.mrb[61].mxu0  ;;  %v2445_v51 = vsel %vm294_vm2, %v2089_v46, -inf }
 0x853   :  { %2446 = vmax.xlane.f32.xlu0 %v2445_v51  ;;  %v2092_v38 = vpop.f32.mrb[62].mxu0 }
 0x854   :  { %v4989_v52 = vpop.f32.mrb[63].mxu0 }
 0x859   :  { %v2189_v53 = vpop.f32.mrb[64].mxu0 }
 0x85a   :  { %v5000_v54 = vpop.f32.mrb[65].mxu0  ;;  %v2451_v55 = vsel %vm294_vm2, %v2189_v53, -inf }
 0x85b   :  { %2452 = vmax.xlane.f32.xlu0 %v2451_v55  ;;  %v2192_v56 = vpop.f32.mrb[66].mxu0 }
 0x85c   :  { %v5001_v45 = vpop.f32.mrb[67].mxu0 }
 0x861   :  { %v6182_v49 = vpop.f32.mrb[68].mxu0 }
 0x862   :  { %v5012_v29 = vpop.f32.mrb[69].mxu0  ;;  %v2457_v41 = vsel %vm294_vm2, %v6182_v49, -inf }
 0x863   :  { %v2292_v58 = vpop.f32.mrb[70].mxu0 }
 0x864   :  { %v5013_v60 = vpop.f32.mrb[71].mxu0 }
 0x869   :  { %v6184_v0 = vpop.f32.mrb[72].mxu0 }
 0x86a   :  { %v5024_v1 = vpop.f32.mrb[73].mxu0  ;;  %v2463_v50 = vsel %vm294_vm2, %v6184_v0, -inf }
 0x86b   :  { %v2392_v3 = vpop.f32.mrb[74].mxu0 }
 0x86c   :  { %v5025_v9 = vpop.f32.mrb[75].mxu0 }
 0x87a   :  { %v6186_v39 = vpop.f32.mrb[72].mxu1 }
 0x87b   :  { %v5265_v12 = vpack.i.bf16 %v6186_v39, %v6178_v44  ;;  %v4982_v11 = vpop.f32.mrb[73].mxu1 }
 0x87c   :  { %v2042_v13 = vpop.f32.mrb[74].mxu1 }
 0x87d   :  { %v4983_v17 = vpop.f32.mrb[75].mxu1 }
 0x882   :  { %v2139_v18 = vpop.f32.mrb[76].mxu1 }
 0x883   :  { %v4994_v19 = vpop.f32.mrb[77].mxu1  ;;  %v2448_v25 = vsel %vm294_vm2, %v2139_v18, -inf }
 0x884   :  { %2449 = vmax.xlane.f32.xlu1 %v2448_v25  ;;  %v2142_v30 = vpop.f32.mrb[78].mxu1  ;;  %v2638_v25 = vpop.permute.xlu1 %2637 }
 0x885   :  { %v4995_v61 = vpop.f32.mrb[79].mxu1 }
 0x88a   :  { %v2239_v24 = vpop.f32.mrb[80].mxu1 }
 0x88b   :  { %v5006_v33 = vpop.f32.mrb[81].mxu1  ;;  %v2454_v20 = vsel %vm294_vm2, %v2239_v24, -inf }
 0x88c   :  { %v2242_v37 = vpop.f32.mrb[82].mxu1  ;;  %2455 = vmax.xlane.f32.xlu0 %v2454_v20 }
 0x88d   :  { %v5007_v40 = vpop.f32.mrb[83].mxu1 }
 0x890   :  { %2458 = vmax.xlane.f32.xlu0 %v2457_v41 }
 0x892   :  { %v2339_v21 = vpop.f32.mrb[84].mxu1 }
 0x893   :  { %v5018_v42 = vpop.f32.mrb[85].mxu1  ;;  %v2460_v32 = vsel %vm294_vm2, %v2339_v21, -inf }
 0x894   :  { %2461 = vmax.xlane.f32.xlu1 %v2460_v32  ;;  %v2342_v51 = vpop.f32.mrb[86].mxu1  ;;  %2464 = vmax.xlane.f32.xlu0 %v2463_v50 }
 0x895   :  { %v5019_v38 = vpop.f32.mrb[87].mxu1 }
 0x89a   :  { %v6197_v52 = vpop.f32.mrb[88].mxu1 }
 0x89b   :  { %v5030_v54 = vpop.f32.mrb[89].mxu1  ;;  %v2466_v45 = vsel %vm294_vm2, %v6197_v52, -inf }
 0x89c   :  { %v2442_v55 = vpop.f32.mrb[90].mxu1 }
 0x89d   :  { %v5031_v56 = vpop.f32.mrb[91].mxu1 }
 0x8a5   :  { %2781 = vrot.lane.b32.xlu1 %v5698_v7, %s5507_s13 }
 0x8aa   :  { %2733 = vrot.lane.b32.xlu0 %v5689_v2, %s5507_s13 }
 0x8c9   :  { %2467 = vmax.xlane.f32.xlu1 %v2466_v45 }
 0x8e0   :  { %v2447_v29 = vpop.xlane.xlu0 %2446 }
 0x8e1   :  { %v2469_v58 = vsub.f32 %v2089_v46, %v2447_v29  ;;  %v6213_v46 = vpop.permute.xlu1 %2685 }
 0x8e3   :  { %v2477_v60 = vmul.f32 1.442695, %v2469_v58 }
 0x8e5   :  { %5394 = vpow2.f32 %v2477_v60 }
 0x8e8   :  { %v2453_v1 = vpop.xlane.xlu0 %2452 }
 0x8e9   :  { %v2471_v3 = vsub.f32 %v2189_v53, %v2453_v1 }
 0x8eb   :  { %v2481_v9 = vmul.f32 1.442695, %v2471_v3 }
 0x8ed   :  { %5396 = vpow2.f32 %v2481_v9 }
 0x8ef   :  { %v6205_v11 = vpop.eup %5394 }
 0x8f0   :  { %v2493_v13 = vsel %vm294_vm2, %v6205_v11, 0.0 }
 0x8f1   :  { %2494 = vadd.xlane.f32.xlu0 %v2493_v13 }
 0x8f7   :  { %v6209_v17 = vpop.eup %5396 }
 0x8f8   :  { %v2499_v19 = vsel %vm294_vm2, %v6209_v17, 0.0 }
 0x8f9   :  { %2500 = vadd.xlane.f32.xlu0 %v2499_v19 }
 0x911   :  { %v2450_v30 = vpop.xlane.xlu1 %2449 }
 0x912   :  { %v2470_v61 = vsub.f32 %v2139_v18, %v2450_v30 }
 0x914   :  { %v2479_v53 = vmul.f32 1.442695, %v2470_v61 }
 0x916   :  { %5398 = vpow2.f32 %v2479_v53 }
 0x919   :  { %v2456_v33 = vpop.xlane.xlu0 %2455 }
 0x91a   :  { %v2472_v20 = vsub.f32 %v2239_v24, %v2456_v33 }
 0x91c   :  { %v2483_v37 = vmul.f32 1.442695, %v2472_v20 }
 0x91d   :  { %v2459_v40 = vpop.xlane.xlu0 %2458 }
 0x91e   :  { %5400 = vpow2.f32 %v2483_v37  ;;  %v2473_v41 = vsub.f32 %v6182_v49, %v2459_v40 }
 0x920   :  { %v6216_v42 = vpop.eup %5398  ;;  %v2485_v32 = vmul.f32 1.442695, %v2473_v41 }
 0x921   :  { %v2496_v50 = vsel %vm294_vm2, %v6216_v42, 0.0  ;;  %v2462_v49 = vpop.xlane.xlu1 %2461  ;;  %v2465_v55 = vpop.xlane.xlu0 %2464 }
 0x922   :  { %5402 = vpow2.f32 %v2485_v32  ;;  %2497 = vadd.xlane.f32.xlu1 %v2496_v50  ;;  %v2474_v54 = vsub.f32 %v2339_v21, %v2462_v49  ;;  %v2475_v45 = vsub.f32 %v6184_v0, %v2465_v55  ;;  %v2691_v55 = vsel %vm785_vm3, %v6213_v46, 0 }
 0x924   :  { %v2487_v56 = vmul.f32 1.442695, %v2474_v54  ;;  %v2489_v29 = vmul.f32 1.442695, %v2475_v45 }
 0x925   :  { %v6243_v0 = vpop.permute.xlu1 %2781  ;;  %v2734_v21 = vpop.permute.xlu0 %2733 }
 0x926   :  { %5404 = vpow2.f32 %v2487_v56  ;;  %v2739_v32 = vsel %vm785_vm3, %v2734_v21, 0 }
 0x927   :  { %5406 = vpow2.f32 %v2489_v29 }
 0x928   :  { %v6220_v51 = vpop.eup %5400 }
 0x929   :  { %v2502_v18 = vsel %vm294_vm2, %v6220_v51, 0.0 }
 0x92a   :  { %2503 = vadd.xlane.f32.xlu1 %v2502_v18 }
 0x92c   :  { %v6224_v24 = vpop.eup %5402 }
 0x92d   :  { %v2505_v38 = vsel %vm294_vm2, %v6224_v24, 0.0 }
 0x92e   :  { %2506 = vadd.xlane.f32.xlu0 %v2505_v38 }
 0x930   :  { %v6233_v58 = vpop.eup %5404 }
 0x931   :  { %v2508_v60 = vsel %vm294_vm2, %v6233_v58, 0.0  ;;  %v6237_v1 = vpop.eup %5406 }
 0x932   :  { %v2511_v3 = vsel %vm294_vm2, %v6237_v1, 0.0 }
 0x93b   :  { %2877 = vrot.lane.b32.xlu1 %v5702_v8, %s5507_s13 }
 0x944   :  { %2829 = vrot.lane.b32.xlu0 %v5695_v6, %s5507_s13 }
 0x956   :  { %v2468_v9 = vpop.xlane.xlu1 %2467 }
 0x957   :  { %v2476_v13 = vsub.f32 %v6197_v52, %v2468_v9  ;;  %v2643_v52 = vsel %vm785_vm3, %v2638_v25, 0 }
 0x959   :  { %v2491_v30 = vmul.f32 1.442695, %v2476_v13 }
 0x95f   :  { %2509 = vadd.xlane.f32.xlu1 %v2508_v60  ;;  %v2787_v60 = vsel %vm785_vm3, %v6243_v0, 0 }
 0x963   :  { %2512 = vadd.xlane.f32.xlu0 %v2511_v3 }
 0x970   :  { %2977 = vrot.lane.b32.xlu1 %v5683_v62, %s5508_s14 }
 0x979   :  { %2927 = vrot.lane.b32.xlu0 %v5681_v59, %s5508_s14 }
 0x97d   :  { %2925 = vrot.lane.b32.xlu0 %v5681_v59, %s5509_s15 }
 0x97e   :  { %v2495_v19 = vpop.xlane.xlu0 %2494 }
 0x97f   :  { %5408 = vrcp.f32 %v2495_v19 }
 0x980   :  { %5410 = vpow2.f32 %v2491_v30 }
 0x981   :  { %3027 = vrot.lane.b32.xlu0 %v5687_v63, %s5508_s14 }
 0x985   :  { %3025 = vrot.lane.b32.xlu0 %v5687_v63, %s5509_s15 }
 0x986   :  { %v2501_v61 = vpop.xlane.xlu0 %2500 }
 0x987   :  { %5412 = vrcp.f32 %v2501_v61 }
 0x989   :  { %v5409_v53 = vpop.eup %5408  ;;  %3127 = vrot.lane.b32.xlu0 %v5689_v2, %s5508_s14 }
 0x98a   :  { %v2525_v33 = vmul.f32 %v5409_v53, %v6205_v11  ;;  %v6263_v37 = vpop.eup %5410 }
 0x98b   :  { %v2514_v41 = vsel %vm294_vm2, %v6263_v37, 0.0 }
 0x98c   :  { %v2533_v20 = vpack.c.bf16 %v2525_v33, %v2525_v33 }
 0x98d   :  { %3125 = vrot.lane.b32.xlu0 %v5689_v2, %s5509_s15 }
 0x98e   :  { %5035 = vmatmul.mubr.msk.bf16.vlgmr.msra.gmra.mrb[76].mxu0 %vm294_vm2, %v2533_v20 }
 0x98f   :  { %5045 = vmatpush3.bf16.msra.mxu0 %v2643_v52  ;;  %5046 = vmatprep.mubr.msk.bf16.mxu0 %vm5499_vm1, %v5498_v48 }
 0x990   :  { %5056 = vmatprep.subr.bf16.mxu0 %v5498_v48 }
 0x991   :  { %v5413_v40 = vpop.eup %5412  ;;  %3227 = vrot.lane.b32.xlu0 %v5695_v6, %s5508_s14 }
 0x992   :  { %v2527_v11 = vmul.f32 %v5413_v40, %v6209_v17 }
 0x994   :  { %2515 = vadd.xlane.f32.xlu1 %v2514_v41  ;;  %v2535_v25 = vpack.c.bf16 %v2527_v11, %v2527_v11 }
 0x995   :  { %3225 = vrot.lane.b32.xlu0 %v5695_v6, %s5509_s15 }
 0x996   :  { %5047 = vmatmul.mubr.msk.bf16.vlgmr.msra.gmra.mrb[80].mxu0 %vm294_vm2, %v2535_v25 }
 0x997   :  { %5057 = vmatpush3.bf16.msra.mxu0 %v2739_v32  ;;  %5058 = vmatprep.mubr.msk.bf16.mxu0 %vm5499_vm1, %v5498_v48 }
 0x998   :  { %5068 = vmatprep.subr.bf16.mxu0 %v5498_v48 }
 0x9a5   :  { %2975 = vrot.lane.b32.xlu1 %v5683_v62, %s5509_s15 }
 0x9a9   :  { %3077 = vrot.lane.b32.xlu1 %v5692_v5, %s5508_s14 }
 0x9ad   :  { %3075 = vrot.lane.b32.xlu1 %v5692_v5, %s5509_s15 }
 0x9af   :  { %v2498_v17 = vpop.xlane.xlu1 %2497 }
 0x9b0   :  { %5414 = vrcp.f32 %v2498_v17 }
 0x9b1   :  { %3177 = vrot.lane.b32.xlu1 %v5698_v7, %s5508_s14 }
 0x9b5   :  { %3175 = vrot.lane.b32.xlu1 %v5698_v7, %s5509_s15 }
 0x9b7   :  { %v2504_v50 = vpop.xlane.xlu1 %2503 }
 0x9b8   :  { %5416 = vrcp.f32 %v2504_v50 }
 0x9b9   :  { %3277 = vrot.lane.b32.xlu1 %v5702_v8, %s5508_s14 }
 0x9ba   :  { %v5415_v18 = vpop.eup %5414 }
 0x9bb   :  { %v2526_v38 = vmul.f32 %v5415_v18, %v6216_v42  ;;  %v2507_v49 = vpop.xlane.xlu0 %2506 }
 0x9bc   :  { %5418 = vrcp.f32 %v2507_v49 }
 0x9bd   :  { %3275 = vrot.lane.b32.xlu1 %v5702_v8, %s5509_s15  ;;  %v2534_v54 = vpack.c.bf16 %v2526_v38, %v2526_v38 }
 0x9bf   :  { %5041 = vmatmul.mubr.msk.bf16.vlgmr.msra.gmra.mrb[92].mxu1 %vm294_vm2, %v2534_v54  ;;  %v2830_v46 = vpop.permute.xlu0 %2829 }
 0x9c0   :  { %5051 = vmatpush3.bf16.msra.mxu1 %v2691_v55  ;;  %5052 = vmatprep.mubr.msk.bf16.mxu1 %vm5499_vm1, %v5498_v48  ;;  %v2835_v9 = vsel %vm785_vm3, %v2830_v46, 0 }
 0x9c1   :  { %5062 = vmatprep.subr.bf16.mxu1 %v5498_v48 }
 0x9c2   :  { %v5417_v56 = vpop.eup %5416 }
 0x9c3   :  { %v2528_v42 = vmul.f32 %v5417_v56, %v6220_v51  ;;  %v2878_v51 = vpop.permute.xlu1 %2877 }
 0x9c4   :  { %v2883_v20 = vsel %vm785_vm3, %v2878_v51, 0 }
 0x9c5   :  { %v2536_v45 = vpack.c.bf16 %v2528_v42, %v2528_v42 }
 0x9c6   :  { %v5419_v29 = vpop.eup %5418 }
 0x9c7   :  { %v2529_v3 = vmul.f32 %v5419_v29, %v6224_v24  ;;  %5053 = vmatmul.mubr.msk.bf16.vlgmr.msra.gmra.mrb[96].mxu1 %vm294_vm2, %v2536_v45 }
 0x9c8   :  { %5063 = vmatpush3.bf16.msra.mxu1 %v2787_v60  ;;  %5064 = vmatprep.mubr.msk.bf16.mxu1 %vm5499_vm1, %v5498_v48 }
 0x9c9   :  { %v2537_v21 = vpack.c.bf16 %v2529_v3, %v2529_v3  ;;  %5074 = vmatprep.subr.bf16.mxu1 %v5498_v48 }
 0x9cb   :  { %5059 = vmatmul.mubr.msk.bf16.vlgmr.msra.gmra.mrb[84].mxu0 %vm294_vm2, %v2537_v21 }
 0x9cc   :  { %5069 = vmatpush3.bf16.msra.mxu0 %v2835_v9  ;;  %5070 = vmatprep.mubr.msk.bf16.mxu0 %vm5499_vm1, %v5498_v48 }
 0x9cd   :  { %5080 = vmatprep.subr.bf16.mxu0 %v5498_v48 }
 0x9ec   :  { %v2510_v24 = vpop.xlane.xlu1 %2509 }
 0x9ed   :  { %5420 = vrcp.f32 %v2510_v24 }
 0x9f0   :  { %v2513_v0 = vpop.xlane.xlu0 %2512  ;;  %v2978_v38 = vpop.permute.xlu1 %2977 }
 0x9f1   :  { %5422 = vrcp.f32 %v2513_v0  ;;  %v2983_v60 = vsel %vm294_vm2, %v2978_v38, 0 }
 0x9f4   :  { %v2928_v13 = vpop.permute.xlu0 %2927 }
 0x9f5   :  { %v2933_v41 = vsel %vm294_vm2, %v2928_v13, 0 }
 0x9f7   :  { %v5421_v19 = vpop.eup %5420 }
 0x9f8   :  { %v2530_v30 = vmul.f32 %v5421_v19, %v6233_v58  ;;  %v2926_v61 = vpop.permute.xlu0 %2925 }
 0x9fa   :  { %v2538_v53 = vpack.c.bf16 %v2530_v30, %v2530_v30 }
 0x9fb   :  { %v5423_v33 = vpop.eup %5422 }
 0x9fc   :  { %v2531_v52 = vmul.f32 %v5423_v33, %v6237_v1  ;;  %5065 = vmatmul.mubr.msk.bf16.vlgmr.msra.gmra.mrb[100].mxu1 %vm294_vm2, %v2538_v53  ;;  %v3028_v40 = vpop.permute.xlu0 %3027 }
 0x9fd   :  { %5075 = vmatpush3.bf16.msra.mxu1 %v2883_v20  ;;  %5076 = vmatprep.mubr.msk.bf16.mxu1 %vm5499_vm1, %v5498_v48  ;;  %v3033_v1 = vsel %vm294_vm2, %v3028_v40, 0 }
 0x9fe   :  { %v2539_v11 = vpack.c.bf16 %v2531_v52, %v2531_v52  ;;  %5086 = vmatprep.subr.bf16.mxu1 %v5498_v48 }
 0xa00   :  { %5071 = vmatmul.mubr.msk.bf16.vlgmr.msra.gmra.mrb[88].mxu0 %vm294_vm2, %v2539_v11  ;;  %v3026_v58 = vpop.permute.xlu0 %3025 }
 0xa01   :  { %5081 = vmatpush3.bf16.xpose.msra.mxu0 %v2933_v41  ;;  %5082 = vmatprep.mubr.msk.bf16.mxu0 %vm5499_vm1, %v5498_v48 }
 0xa02   :  { %5092 = vmatprep.subr.bf16.mxu0 %v5498_v48 }
 0xa04   :  { %v3128_v25 = vpop.permute.xlu0 %3127 }
 0xa05   :  { %v3133_v17 = vsel %vm294_vm2, %v3128_v25, 0 }
 0xa08   :  { %5083 = vmatmul.mubr.msk.bf16.vlgmr.msra.gmra.mrb[92].mxu0 %vm294_vm2, %v2926_v61  ;;  %v3126_v32 = vpop.permute.xlu0 %3125 }
 0xa09   :  { %5093 = vmatpush3.bf16.xpose.msra.mxu0 %v3033_v1  ;;  %5094 = vmatprep.mubr.msk.bf16.mxu0 %vm5499_vm1, %v5498_v48 }
 0xa0a   :  { %5104 = vmatprep.subr.bf16.mxu0 %v5498_v48 }
 0xa0c   :  { %v3228_v50 = vpop.permute.xlu0 %3227 }
 0xa0d   :  { %v3233_v18 = vsel %vm294_vm2, %v3228_v50, 0 }
 0xa10   :  { %5095 = vmatmul.mubr.msk.bf16.vlgmr.msra.gmra.mrb[96].mxu0 %vm294_vm2, %v3026_v58  ;;  %v3226_v49 = vpop.permute.xlu0 %3225 }
 0xa11   :  { %5105 = vmatpush3.bf16.xpose.msra.mxu0 %v3133_v17  ;;  %5106 = vmatprep.mubr.msk.bf16.mxu0 %vm5499_vm1, %v5498_v48 }
 0xa12   :  { %5116 = vmatprep.subr.bf16.mxu0 %v5498_v48 }
 0xa18   :  { %5107 = vmatmul.mubr.msk.bf16.vlgmr.msra.gmra.mrb[100].mxu0 %vm294_vm2, %v3126_v32 }
 0xa19   :  { %5117 = vmatpush3.bf16.xpose.msra.mxu0 %v3233_v18  ;;  %5118 = vmatprep.mubr.msk.bf16.mxu0 %vm5499_vm1, %v5498_v48 }
 0xa1a   :  { %5128 = vmatprep.subr.bf16.mxu0 %v5498_v48 }
 0xa20   :  { %5119 = vmatmul.mubr.msk.bf16.vlgmr.msra.gmra.mrb[104].mxu0 %vm294_vm2, %v3226_v49 }
 0xa21   :  { %v2516_v54 = vpop.xlane.xlu1 %2515  ;;  %5130 = vmatprep.mubr.msk.bf16.mxu0 %vm5499_vm1, %v5498_v48 }
 0xa22   :  { %5424 = vrcp.f32 %v2516_v54 }
 0xa25   :  { %v2976_v55 = vpop.permute.xlu1 %2975 }
 0xa29   :  { %v3078_v45 = vpop.permute.xlu1 %3077 }
 0xa2a   :  { %v3083_v46 = vsel %vm294_vm2, %v3078_v45, 0 }
 0xa2c   :  { %v5425_v56 = vpop.eup %5424 }
 0xa2d   :  { %v2532_v42 = vmul.f32 %v5425_v56, %v6263_v37  ;;  %v3076_v3 = vpop.permute.xlu1 %3075 }
 0xa2f   :  { %v2540_v29 = vpack.c.bf16 %v2532_v42, %v2532_v42 }
 0xa31   :  { %5077 = vmatmul.mubr.msk.bf16.vlgmr.msra.gmra.mrb[104].mxu1 %vm294_vm2, %v2540_v29  ;;  %v3178_v21 = vpop.permute.xlu1 %3177 }
 0xa32   :  { %5087 = vmatpush3.bf16.xpose.msra.mxu1 %v2983_v60  ;;  %5088 = vmatprep.mubr.msk.bf16.mxu1 %vm5499_vm1, %v5498_v48  ;;  %v3183_v9 = vsel %vm294_vm2, %v3178_v21, 0 }
 0xa33   :  { %5098 = vmatprep.subr.bf16.mxu1 %v5498_v48 }
 0xa35   :  { %v3176_v37 = vpop.permute.xlu1 %3175 }
 0xa39   :  { %5089 = vmatmul.mubr.msk.bf16.vlgmr.msra.gmra.mrb[108].mxu1 %vm294_vm2, %v2976_v55  ;;  %v3278_v51 = vpop.permute.xlu1 %3277 }
 0xa3a   :  { %5099 = vmatpush3.bf16.xpose.msra.mxu1 %v3083_v46  ;;  %5100 = vmatprep.mubr.msk.bf16.mxu1 %vm5499_vm1, %v5498_v48  ;;  %v3283_v24 = vsel %vm294_vm2, %v3278_v51, 0 }
 0xa3b   :  { %5110 = vmatprep.subr.bf16.mxu1 %v5498_v48 }
 0xa3d   :  { %v3276_v0 = vpop.permute.xlu1 %3275 }
 0xa41   :  { %5101 = vmatmul.mubr.msk.bf16.vlgmr.msra.gmra.mrb[112].mxu1 %vm294_vm2, %v3076_v3 }
 0xa42   :  { %5111 = vmatpush3.bf16.xpose.msra.mxu1 %v3183_v9  ;;  %5112 = vmatprep.mubr.msk.bf16.mxu1 %vm5499_vm1, %v5498_v48 }
 0xa43   :  { %5122 = vmatprep.subr.bf16.mxu1 %v5498_v48 }
 0xa49   :  { %5113 = vmatmul.mubr.msk.bf16.vlgmr.msra.gmra.mrb[116].mxu1 %vm294_vm2, %v3176_v37 }
 0xa4a   :  { %5123 = vmatpush3.bf16.xpose.msra.mxu1 %v3283_v24  ;;  %5124 = vmatprep.mubr.msk.bf16.mxu1 %vm5499_vm1, %v5498_v48 }
 0xa4b   :  { %5134 = vmatprep.subr.bf16.mxu1 %v5498_v48 }
 0xa51   :  { %5125 = vmatmul.mubr.msk.bf16.vlgmr.msra.gmra.mrb[120].mxu1 %vm294_vm2, %v3276_v0 }
 0xa52   :  { %5136 = vmatprep.mubr.msk.bf16.mxu1 %vm5499_vm1, %v5498_v48 }
 0xa61   :  { %v6366_v13 = vpop.f32.mrb[76].mxu0 }
 0xa62   :  { %v5036_v19 = vpop.f32.mrb[77].mxu0 }
 0xa63   :  { %v2586_v30 = vpop.f32.mrb[78].mxu0 }
 0xa64   :  { %v5037_v61 = vpop.f32.mrb[79].mxu0 }
 0xa69   :  { %v6368_v53 = vpop.f32.mrb[80].mxu0 }
 0xa6a   :  { %v5048_v33 = vpop.f32.mrb[81].mxu0 }
 0xa6b   :  { %v2682_v20 = vpop.f32.mrb[82].mxu0 }
 0xa6c   :  { %v5049_v52 = vpop.f32.mrb[83].mxu0 }
 0xa92   :  { %v6370_v40 = vpop.f32.mrb[92].mxu1 }
 0xa93   :  { %v5250_v11 = vpack.i.bf16 %v6370_v40, %v6366_v13  ;;  %v5042_v41 = vpop.f32.mrb[93].mxu1 }
 0xa94   :  { %v2634_v58 = vpop.f32.mrb[94].mxu1 }
 0xa95   :  { %v5043_v1 = vpop.f32.mrb[95].mxu1 }
 0xa9a   :  { %v6374_v25 = vpop.f32.mrb[96].mxu1 }
 0xa9b   :  { %v5255_v32 = vpack.i.bf16 %v6374_v25, %v6368_v53  ;;  %v5054_v17 = vpop.f32.mrb[97].mxu1 }
 0xa9c   :  { %v2730_v50 = vpop.f32.mrb[98].mxu1 }
 0xa9d   :  { %v5055_v18 = vpop.f32.mrb[99].mxu1 }
 0xa9e   :  { %v6378_v38 = vpop.f32.mrb[84].mxu0 }
 0xa9f   :  { %v5060_v49 = vpop.f32.mrb[85].mxu0 }
 0xaa0   :  { %v2778_v54 = vpop.f32.mrb[86].mxu0 }
 0xaa1   :  { %v5061_v55 = vpop.f32.mrb[87].mxu0 }
 0xacf   :  { %v6380_v56 = vpop.f32.mrb[100].mxu1 }
 0xad0   :  { %v5275_v42 = vpack.i.bf16 %v6380_v56, %v6378_v38  ;;  %v5066_v45 = vpop.f32.mrb[101].mxu1 }
 0xad1   :  { %v2826_v29 = vpop.f32.mrb[102].mxu1 }
 0xad2   :  { %v5067_v60 = vpop.f32.mrb[103].mxu1 }
 0xad3   :  { %v6384_v3 = vpop.f32.mrb[88].mxu0 }
 0xad4   :  { %v5072_v46 = vpop.f32.mrb[89].mxu0 }
 0xad5   :  { %v2874_v21 = vpop.f32.mrb[90].mxu0 }
 0xad6   :  { %v5073_v37 = vpop.f32.mrb[91].mxu0 }
 0xadb   :  { %v2969_v9 = vpop.f32.mrb[92].mxu0 }
 0xadc   :  { %v5084_v51 = vpop.f32.mrb[93].mxu0  ;;  %v3325_v24 = vsel %vm294_vm2, %v2969_v9, -inf }
 0xadd   :  { %3326 = vmax.xlane.f32.xlu0 %v3325_v24  ;;  %v2972_v0 = vpop.f32.mrb[94].mxu0 }
 0xade   :  { %v5085_v19 = vpop.f32.mrb[95].mxu0 }
 0xae3   :  { %v3069_v30 = vpop.f32.mrb[96].mxu0 }
 0xae4   :  { %v5096_v61 = vpop.f32.mrb[97].mxu0  ;;  %v3331_v33 = vsel %vm294_vm2, %v3069_v30, -inf }
 0xae5   :  { %3332 = vmax.xlane.f32.xlu0 %v3331_v33  ;;  %v3072_v20 = vpop.f32.mrb[98].mxu0 }
 0xae6   :  { %v5097_v52 = vpop.f32.mrb[99].mxu0 }
 0xaeb   :  { %v6388_v41 = vpop.f32.mrb[100].mxu0 }
 0xaec   :  { %v5108_v58 = vpop.f32.mrb[101].mxu0 }
 0xaed   :  { %v3172_v1 = vpop.f32.mrb[102].mxu0  ;;  %v3337_v58 = vsel %vm294_vm2, %v6388_v41, -inf }
 0xaee   :  { %v5109_v17 = vpop.f32.mrb[103].mxu0 }
 0xaf3   :  { %v6390_v50 = vpop.f32.mrb[104].mxu0 }
 0xaf4   :  { %v5120_v18 = vpop.f32.mrb[105].mxu0 }
 0xaf5   :  { %v3272_v49 = vpop.f32.mrb[106].mxu0 }
 0xaf6   :  { %v5121_v54 = vpop.f32.mrb[107].mxu0  ;;  %v3343_v49 = vsel %vm294_vm2, %v6390_v50, -inf }
 0xb04   :  { %v6392_v55 = vpop.f32.mrb[104].mxu1 }
 0xb05   :  { %v5285_v45 = vpack.i.bf16 %v6392_v55, %v6384_v3  ;;  %v5078_v29 = vpop.f32.mrb[105].mxu1 }
 0xb06   :  { %v2922_v60 = vpop.f32.mrb[106].mxu1 }
 0xb07   :  { %v5079_v46 = vpop.f32.mrb[107].mxu1 }
 0xb0c   :  { %v3019_v21 = vpop.f32.mrb[108].mxu1 }
 0xb0d   :  { %v5090_v37 = vpop.f32.mrb[109].mxu1  ;;  %v3328_v51 = vsel %vm294_vm2, %v3019_v21, -inf }
 0xb0e   :  { %3329 = vmax.xlane.f32.xlu1 %v3328_v51  ;;  %v3022_v24 = vpop.f32.mrb[110].mxu1 }
 0xb0f   :  { %v5091_v0 = vpop.f32.mrb[111].mxu1 }
 0xb14   :  { %v6397_v19 = vpop.f32.mrb[112].mxu1 }
 0xb15   :  { %v5102_v61 = vpop.f32.mrb[113].mxu1  ;;  %v3334_v33 = vsel %vm294_vm2, %v6397_v19, -inf }
 0xb16   :  { %v3122_v20 = vpop.f32.mrb[114].mxu1  ;;  %3335 = vmax.xlane.f32.xlu0 %v3334_v33 }
 0xb17   :  { %v5103_v52 = vpop.f32.mrb[115].mxu1 }
 0xb1a   :  { %3338 = vmax.xlane.f32.xlu0 %v3337_v58 }
 0xb1c   :  { %v6403_v1 = vpop.f32.mrb[116].mxu1 }
 0xb1d   :  { %v5114_v17 = vpop.f32.mrb[117].mxu1  ;;  %v3340_v18 = vsel %vm294_vm2, %v6403_v1, -inf }
 0xb1e   :  { %3341 = vmax.xlane.f32.xlu1 %v3340_v18  ;;  %v3222_v54 = vpop.f32.mrb[118].mxu1  ;;  %3344 = vmax.xlane.f32.xlu0 %v3343_v49 }
 0xb1f   :  { %v5115_v29 = vpop.f32.mrb[119].mxu1 }
 0xb24   :  { %v6409_v60 = vpop.f32.mrb[120].mxu1 }
 0xb25   :  { %v5126_v46 = vpop.f32.mrb[121].mxu1  ;;  %v3346_v24 = vsel %vm294_vm2, %v6409_v60, -inf }
 0xb26   :  { %v3322_v37 = vpop.f32.mrb[122].mxu1 }
 0xb27   :  { %v5127_v51 = vpop.f32.mrb[123].mxu1 }
 0xb2f   :  { %3469 = vrot.lane.b32.xlu1 %v5683_v62, %s5510_s16 }
 0xb33   :  { %3517 = vrot.lane.b32.xlu1 %v5687_v63, %s5510_s16 }
 0xb34   :  { %3421 = vrot.lane.b32.xlu0 %v5681_v59, %s5510_s16 }
 0xb57   :  { %3347 = vmax.xlane.f32.xlu1 %v3346_v24 }
 0xb68   :  { %3565 = vrot.lane.b32.xlu1 %v5692_v5, %s5510_s16 }
 0xb6a   :  { %v3327_v0 = vpop.xlane.xlu0 %3326 }
 0xb6b   :  { %v3349_v61 = vsub.f32 %v2969_v9, %v3327_v0 }
 0xb6d   :  { %v3357_v33 = vmul.f32 1.442695, %v3349_v61 }
 0xb6f   :  { %5426 = vpow2.f32 %v3357_v33 }
 0xb72   :  { %v3333_v20 = vpop.xlane.xlu0 %3332 }
 0xb73   :  { %v3351_v52 = vsub.f32 %v3069_v30, %v3333_v20 }
 0xb75   :  { %v3361_v62 = vmul.f32 1.442695, %v3351_v52 }
 0xb77   :  { %5428 = vpow2.f32 %v3361_v62 }
 0xb79   :  { %v6421_v58 = vpop.eup %5426 }
 0xb7a   :  { %v3373_v59 = vsel %vm294_vm2, %v6421_v58, 0.0 }
 0xb7b   :  { %3374 = vadd.xlane.f32.xlu0 %v3373_v59 }
 0xb81   :  { %v6425_v63 = vpop.eup %5428 }
 0xb82   :  { %v3379_v17 = vsel %vm294_vm2, %v6425_v63, 0.0 }
 0xb83   :  { %3380 = vadd.xlane.f32.xlu0 %v3379_v17 }
 0xb99   :  { %3613 = vrot.lane.b32.xlu0 %v5689_v2, %s5510_s16 }
 0xb9b   :  { %v3330_v5 = vpop.xlane.xlu1 %3329 }
 0xb9c   :  { %v3350_v9 = vsub.f32 %v3019_v21, %v3330_v5 }
 0xb9e   :  { %v3359_v30 = vmul.f32 1.442695, %v3350_v9 }
 0xba0   :  { %5430 = vpow2.f32 %v3359_v30 }
 0xba3   :  { %v3336_v18 = vpop.xlane.xlu0 %3335 }
 0xba4   :  { %v3352_v59 = vsub.f32 %v6397_v19, %v3336_v18 }
 0xba6   :  { %v3363_v17 = vmul.f32 1.442695, %v3352_v59 }
 0xba7   :  { %v3339_v49 = vpop.xlane.xlu0 %3338 }
 0xba8   :  { %v3353_v54 = vsub.f32 %v6388_v41, %v3339_v49 }
 0xbaa   :  { %v6432_v29 = vpop.eup %5430  ;;  %v3365_v46 = vmul.f32 1.442695, %v3353_v54 }
 0xbab   :  { %v3342_v37 = vpop.xlane.xlu1 %3341  ;;  %v3345_v51 = vpop.xlane.xlu0 %3344  ;;  %v3376_v24 = vsel %vm294_vm2, %v6432_v29, 0.0 }
 0xbac   :  { %5432 = vpow2.f32 %v3365_v46  ;;  %v3355_v0 = vsub.f32 %v6390_v50, %v3345_v51  ;;  %3377 = vadd.xlane.f32.xlu1 %v3376_v24  ;;  %v3354_v5 = vsub.f32 %v6403_v1, %v3342_v37 }
 0xbae   :  { %v3369_v2 = vmul.f32 1.442695, %v3355_v0  ;;  %v3367_v9 = vmul.f32 1.442695, %v3354_v5 }
 0xbaf   :  { %v3470_v21 = vpop.permute.xlu1 %3469  ;;  %v3422_v61 = vpop.permute.xlu0 %3421 }
 0xbb0   :  { %v3475_v33 = vsel %vm785_vm3, %v3470_v21, 0  ;;  %v3427_v20 = vsel %vm785_vm3, %v3422_v61, 0  ;;  %5434 = vpow2.f32 %v3369_v2 }
 0xbb1   :  { %5129 = vmatpush3.bf16.msra.mxu0 %v3427_v20  ;;  %5135 = vmatpush3.bf16.msra.mxu1 %v3475_v33  ;;  %5436 = vpow2.f32 %v3363_v17 }
 0xbb2   :  { %5140 = vmatprep.subr.bf16.mxu0 %v5498_v48  ;;  %5146 = vmatprep.subr.bf16.mxu1 %v5498_v48  ;;  %5438 = vpow2.f32 %v3367_v9 }
 0xbb3   :  { %v3518_v19 = vpop.permute.xlu1 %3517 }
 0xbb4   :  { %v3523_v30 = vsel %vm785_vm3, %v3518_v19, 0 }
 0xbb6   :  { %v6441_v41 = vpop.eup %5432 }
 0xbb7   :  { %v3385_v50 = vsel %vm294_vm2, %v6441_v41, 0.0 }
 0xbb8   :  { %3386 = vadd.xlane.f32.xlu0 %v3385_v50 }
 0xbba   :  { %v6445_v52 = vpop.eup %5434 }
 0xbbb   :  { %v3391_v62 = vsel %vm294_vm2, %v6445_v52, 0.0 }
 0xbbc   :  { %3392 = vadd.xlane.f32.xlu0 %v3391_v62 }
 0xbbd   :  { %3661 = vrot.lane.b32.xlu1 %v5698_v7, %s5510_s16  ;;  %v6462_v7 = vpop.eup %5436 }
 0xbbe   :  { %v6469_v1 = vpop.eup %5438 }
 0xbbf   :  { %v3388_v16 = vsel %vm294_vm2, %v6469_v1, 0.0 }
 0xbd2   :  { %3709 = vrot.lane.b32.xlu0 %v5695_v6, %s5510_s16  ;;  %v3382_v6 = vsel %vm294_vm2, %v6462_v7, 0.0 }
 0xbd6   :  { %5241 = vrot.lane.b32.xlu0 %v5240_v57, %s5511_s17 }
 0xbda   :  { %5251 = vrot.lane.b32.xlu0 %v5250_v11, %s5512_s18 }
 0xbde   :  { %5261 = vrot.lane.b32.xlu0 %v5260_v35, %s5511_s17 }
 0xbe1   :  { %3383 = vadd.xlane.f32.xlu1 %v3382_v6 }
 0xbe4   :  { %v3348_v47 = vpop.xlane.xlu1 %3347 }
 0xbe5   :  { %v3356_v57 = vsub.f32 %v6409_v60, %v3348_v47  ;;  %3389 = vadd.xlane.f32.xlu1 %v3388_v16 }
 0xbe7   :  { %v3371_v13 = vmul.f32 1.442695, %v3356_v57 }
 0xbe9   :  { %5440 = vpow2.f32 %v3371_v13 }
 0xbf3   :  { %v6474_v40 = vpop.eup %5440 }
 0xbf4   :  { %v3394_v27 = vsel %vm294_vm2, %v6474_v40, 0.0 }
 0xbf5   :  { %3395 = vadd.xlane.f32.xlu1 %v3394_v27 }
 0xc06   :  { %3757 = vrot.lane.b32.xlu1 %v5702_v8, %s5510_s16 }
 0xc08   :  { %v3375_v34 = vpop.xlane.xlu0 %3374 }
 0xc09   :  { %5442 = vrcp.f32 %v3375_v34 }
 0xc0a   :  { %5246 = vrot.lane.b32.xlu1 %v5245_v23, %s5511_s17 }
 0xc0e   :  { %5256 = vrot.lane.b32.xlu1 %v5255_v32, %s5512_s18 }
 0xc10   :  { %v3381_v35 = vpop.xlane.xlu0 %3380 }
 0xc11   :  { %5444 = vrcp.f32 %v3381_v35 }
 0xc12   :  { %5266 = vrot.lane.b32.xlu1 %v5265_v12, %s5511_s17  ;;  %v3566_v12 = vpop.permute.xlu1 %3565 }
 0xc13   :  { %v5443_v11 = vpop.eup %5442  ;;  %v3571_v18 = vsel %vm785_vm3, %v3566_v12, 0 }
 0xc14   :  { %v3405_v8 = vmul.f32 %v5443_v11, %v6421_v58  ;;  %v3614_v23 = vpop.permute.xlu0 %3613 }
 0xc15   :  { %v3619_v39 = vsel %vm785_vm3, %v3614_v23, 0 }
 0xc16   :  { %v3413_v60 = vpack.c.bf16 %v3405_v8, %v3405_v8  ;;  %v5302_v8 = vld [vmem:[%s6787_s4] sm:$0xff]  }
 0xc18   :  { %5131 = vmatmul.mubr.msk.bf16.vlgmr.msra.gmra.mrb[108].mxu0 %vm294_vm2, %v3413_v60 }
 0xc19   :  { %5141 = vmatpush3.bf16.msra.mxu0 %v3523_v30  ;;  %5142 = vmatprep.mubr.msk.bf16.mxu0 %vm5499_vm1, %v5498_v48 }
 0xc1a   :  { %5152 = vmatprep.subr.bf16.mxu0 %v5498_v48 }
 0xc1b   :  { %v5445_v10 = vpop.eup %5444 }
 0xc1c   :  { %v3407_v22 = vmul.f32 %v5445_v10, %v6425_v63 }
 0xc1e   :  { %v3415_v44 = vpack.c.bf16 %v3407_v22, %v3407_v22 }
 0xc20   :  { %5143 = vmatmul.mubr.msk.bf16.vlgmr.msra.gmra.mrb[112].mxu0 %vm294_vm2, %v3415_v44 }
 0xc21   :  { %5153 = vmatpush3.bf16.msra.mxu0 %v3619_v39  ;;  %5154 = vmatprep.mubr.msk.bf16.mxu0 %vm5499_vm1, %v5498_v48 }
 0xc22   :  { %5164 = vmatprep.subr.bf16.mxu0 %v5498_v48 }
 0xc39   :  { %v3378_v53 = vpop.xlane.xlu1 %3377 }
 0xc3a   :  { %5446 = vrcp.f32 %v3378_v53 }
 0xc3d   :  { %v3662_v21 = vpop.permute.xlu1 %3661 }
 0xc3e   :  { %v3667_v59 = vsel %vm785_vm3, %v3662_v21, 0 }
 0xc44   :  { %v5447_v25 = vpop.eup %5446 }
 0xc45   :  { %v3406_v32 = vmul.f32 %v5447_v25, %v6432_v29  ;;  %v3387_v58 = vpop.xlane.xlu0 %3386 }
 0xc46   :  { %5448 = vrcp.f32 %v3387_v58  ;;  %v5303_v58 = vld [vmem:[%s6787_s4 + $0x8] sm:$0xff]  }
 0xc47   :  { %v3414_v63 = vpack.c.bf16 %v3406_v32, %v3406_v32 }
 0xc49   :  { %5137 = vmatmul.mubr.msk.bf16.vlgmr.msra.gmra.mrb[124].mxu1 %vm294_vm2, %v3414_v63  ;;  %v3393_v49 = vpop.xlane.xlu0 %3392 }
 0xc4a   :  { %5147 = vmatpush3.bf16.msra.mxu1 %v3571_v18  ;;  %5148 = vmatprep.mubr.msk.bf16.mxu1 %vm5499_vm1, %v5498_v48  ;;  %5450 = vrcp.f32 %v3393_v49 }
 0xc4b   :  { %5158 = vmatprep.subr.bf16.mxu1 %v5498_v48 }
 0xc4d   :  { %v3710_v37 = vpop.permute.xlu0 %3709 }
 0xc4e   :  { %v3715_v24 = vsel %vm785_vm3, %v3710_v37, 0 }
 0xc50   :  { %v5449_v54 = vpop.eup %5448 }
 0xc51   :  { %v3409_v46 = vmul.f32 %v5449_v54, %v6441_v41 }
 0xc53   :  { %v3417_v29 = vpack.c.bf16 %v3409_v46, %v3409_v46 }
 0xc54   :  { %v5451_v51 = vpop.eup %5450 }
 0xc55   :  { %5155 = vmatmul.mubr.msk.bf16.vlgmr.msra.gmra.mrb[116].mxu0 %vm294_vm2, %v3417_v29  ;;  %v3411_v0 = vmul.f32 %v5451_v51, %v6445_v52 }
 0xc56   :  { %5165 = vmatpush3.bf16.msra.mxu0 %v3715_v24  ;;  %5166 = vmatprep.mubr.msk.bf16.mxu0 %vm5499_vm1, %v5498_v48 }
 0xc57   :  { %v3419_v2 = vpack.c.bf16 %v3411_v0, %v3411_v0  ;;  %5176 = vmatprep.subr.bf16.mxu0 %v5302_v8 }
 0xc5d   :  { %5167 = vmatmul.mubr.msk.bf16.vlgmr.msra.gmra.mrb[120].mxu0 %vm294_vm2, %v3419_v2 }
 0xc5e   :  { %5177 = vmatpush3.bf16.msra.mxu0 %v5302_v8 }
 0xc5f   :  { %5178 = vmatprep.subr.bf16.mxu0 %v5303_v58 }
 0xc62   :  { %5179 = vmatpush3.bf16.msra.mxu0 %v5303_v58 }
 0xc6e   :  { %v3384_v61 = vpop.xlane.xlu1 %3383 }
 0xc6f   :  { %5452 = vrcp.f32 %v3384_v61  ;;  %v5242_v61 = vpop.permute.xlu0 %5241 }
 0xc70   :  { %v5243_v3 = vunpack.i.l.bf16 %v5242_v61 }
 0xc72   :  { %v3390_v33 = vpop.xlane.xlu1 %3389 }
 0xc73   :  { %5454 = vrcp.f32 %v3390_v33  ;;  %v5252_v33 = vpop.permute.xlu0 %5251 }
 0xc74   :  { %v5254_v55 = vunpack.i.h.bf16 %v5252_v33 }
 0xc79   :  { %v5453_v20 = vpop.eup %5452 }
 0xc7a   :  { %v3408_v41 = vmul.f32 %v5453_v20, %v6462_v7  ;;  %v5262_v20 = vpop.permute.xlu0 %5261 }
 0xc7c   :  { %v3416_v50 = vpack.c.bf16 %v3408_v41, %v3408_v41  ;;  %v5244_v41 = vunpack.i.h.bf16 %v5242_v61 }
 0xc7d   :  { %v5455_v62 = vpop.eup %5454 }
 0xc7e   :  { %5149 = vmatmul.mubr.msk.bf16.vlgmr.msra.gmra.mrb[128].mxu1 %vm294_vm2, %v3416_v50  ;;  %v3410_v52 = vmul.f32 %v5455_v62, %v6469_v1  ;;  %v3902_v62 = vsel %vm294_vm2, %v5950_v15, %v5244_v41 }
 0xc7f   :  { %5159 = vmatpush3.bf16.msra.mxu1 %v3667_v59  ;;  %5160 = vmatprep.mubr.msk.bf16.mxu1 %vm5499_vm1, %v5498_v48  ;;  %v3901_v59 = vsel %vm294_vm2, %v5952_v14, %v5243_v3 }
 0xc80   :  { %5170 = vmatprep.subr.bf16.mxu1 %v5498_v48  ;;  %v3418_v5 = vpack.c.bf16 %v3410_v52, %v3410_v52 }
 0xc82   :  { %v3396_v17 = vpop.xlane.xlu1 %3395 }
 0xc83   :  { %5456 = vrcp.f32 %v3396_v17 }
 0xc86   :  { %5161 = vmatmul.mubr.msk.bf16.vlgmr.msra.gmra.mrb[132].mxu1 %vm294_vm2, %v3418_v5  ;;  %v3758_v9 = vpop.permute.xlu1 %3757 }
 0xc87   :  { %v3763_v7 = vsel %vm785_vm3, %v3758_v9, 0  ;;  %5172 = vmatprep.mubr.msk.bf16.mxu1 %vm5499_vm1, %v5498_v48  ;;  %v3911_v9 = vsel %vm3909_vm4, %v3902_v62, %v5254_v55  ;;  %v5491_v55 = vld [vmem:[%s6783_s0] sm:$0xff] }
 0xc88   :  { %5171 = vmatpush3.bf16.msra.mxu1 %v3763_v7 }
 0xc8d   :  { %v5457_v19 = vpop.eup %5456 }
 0xc8e   :  { %v3412_v6 = vmul.f32 %v5457_v19, %v6474_v40 }
 0xc90   :  { %v3420_v47 = vpack.c.bf16 %v3412_v6, %v3412_v6 }
 0xc92   :  { %5173 = vmatmul.mubr.msk.bf16.vlgmr.msra.gmra.mrb[136].mxu1 %vm294_vm2, %v3420_v47  ;;  %v5247_v47 = vpop.permute.xlu1 %5246 }
 0xc93   :  { %v5249_v15 = vunpack.i.h.bf16 %v5247_v47 }
 0xceb   :  { %v3463_v1 = vpop.f32.mrb[108].mxu0 }
 0xcec   :  { %v5132_v16 = vpop.f32.mrb[109].mxu0 }
 0xced   :  { %v3466_v57 = vpop.f32.mrb[110].mxu0 }
 0xcee   :  { %v5133_v13 = vpop.f32.mrb[111].mxu0  ;;  %v5248_v57 = vunpack.i.l.bf16 %v5247_v47 }
 0xcf3   :  { %v3559_v27 = vpop.f32.mrb[112].mxu0 }
 0xcf4   :  { %v5144_v34 = vpop.f32.mrb[113].mxu0 }
 0xcf5   :  { %v3562_v35 = vpop.f32.mrb[114].mxu0  ;;  %v3904_v34 = vsel %vm294_vm2, %v5958_v36, %v5249_v15 }
 0xcf6   :  { %v5145_v11 = vpop.f32.mrb[115].mxu0  ;;  %v3903_v35 = vsel %vm294_vm2, %v5954_v26, %v5248_v57 }
 0xd1c   :  { %v3511_v48 = vpop.f32.mrb[124].mxu1 }
 0xd1d   :  { %v5270_v60 = vpack.i.bf16 %v3511_v48, %v3463_v1  ;;  %v5138_v40 = vpop.f32.mrb[125].mxu1  ;;  %v5257_v1 = vpop.permute.xlu1 %5256 }
 0xd1e   :  { %v3514_v30 = vpop.f32.mrb[126].mxu1  ;;  %v5259_v13 = vunpack.i.h.bf16 %v5257_v1  ;;  %v5258_v14 = vunpack.i.l.bf16 %v5257_v1 }
 0xd1f   :  { %v5139_v10 = vpop.f32.mrb[127].mxu1  ;;  %5271 = vrot.lane.b32.xlu0 %v5270_v60, %s5513_s21 }
 0xd20   :  { %v3912_v48 = vsel %vm3909_vm4, %v3903_v35, %v5258_v14  ;;  %v3913_v60 = vsel %vm3909_vm4, %v3904_v34, %v5259_v13  ;;  %v5494_v14 = vld [vmem:[%s6783_s0 + $0x30] sm:$0xff]  ;;  %v5495_v34 = vld [vmem:[%s6783_s0 + $0x20] sm:$0xff] }
 0xd21   :  { %v5267_v16 = vpop.permute.xlu1 %5266 }
 0xd23   :  { %5276 = vrot.lane.b32.xlu0 %v5275_v42, %s5512_s18 }
 0xd28   :  { %v3655_v22 = vpop.f32.mrb[116].mxu0 }
 0xd29   :  { %v5156_v23 = vpop.f32.mrb[117].mxu0 }
 0xd2a   :  { %v3658_v44 = vpop.f32.mrb[118].mxu0  ;;  %v5264_v23 = vunpack.i.h.bf16 %v5262_v20 }
 0xd2b   :  { %v5157_v39 = vpop.f32.mrb[119].mxu0  ;;  %v5263_v44 = vunpack.i.l.bf16 %v5262_v20 }
 0xd2c   :  { %v3906_v26 = vsel %vm294_vm2, %v5962_v43, %v5264_v23 }
 0xd30   :  { %v3751_v12 = vpop.f32.mrb[120].mxu0 }
 0xd31   :  { %v5168_v53 = vpop.f32.mrb[121].mxu0 }
 0xd32   :  { %v3754_v25 = vpop.f32.mrb[122].mxu0  ;;  %v3905_v53 = vsel %vm294_vm2, %v5956_v31, %v5263_v44 }
 0xd33   :  { %v5169_v32 = vpop.f32.mrb[123].mxu0 }
 0xd51   :  { %v3607_v63 = vpop.f32.mrb[128].mxu1 }
 0xd52   :  { %v5280_v18 = vpack.i.bf16 %v3607_v63, %v3559_v27  ;;  %v5150_v49 = vpop.f32.mrb[129].mxu1 }
 0xd53   :  { %v3610_v54 = vpop.f32.mrb[130].mxu1 }
 0xd54   :  { %v5151_v38 = vpop.f32.mrb[131].mxu1  ;;  %5281 = vrot.lane.b32.xlu1 %v5280_v18, %s5513_s21 }
 0xd58   :  { %5286 = vrot.lane.b32.xlu1 %v5285_v45, %s5512_s18  ;;  %v5253_v45 = vunpack.i.l.bf16 %v5252_v33 }
 0xd59   :  { %v3703_v56 = vpop.f32.mrb[132].mxu1 }
 0xd5a   :  { %v5290_v42 = vpack.i.bf16 %v3703_v56, %v3655_v22  ;;  %v5162_v46 = vpop.f32.mrb[133].mxu1  ;;  %v3910_v5 = vsel %vm3909_vm4, %v3901_v59, %v5253_v45  ;;  %v5269_v56 = vunpack.i.h.bf16 %v5267_v16 }
 0xd5b   :  { %v3706_v37 = vpop.f32.mrb[134].mxu1 }
 0xd5c   :  { %v5163_v29 = vpop.f32.mrb[135].mxu1  ;;  %5291 = vrot.lane.b32.xlu0 %v5290_v42, %s5513_s21  ;;  %v5268_v42 = vunpack.i.l.bf16 %v5267_v16  ;;  %v3908_v31 = vsel %vm294_vm2, %v5970_v4, %v5269_v56  ;;  %v4603_v4 = vld [vmem:[%s6788_s5] ss:$0 sm:$0xff] }
 0xd5e   :  { %v3907_v29 = vsel %vm294_vm2, %v5960_v28, %v5268_v42  ;;  %v5490_v28 = vld [vmem:[%s6783_s0 + $0x10] sm:$0xff] }
 0xd65   :  { %v3799_v51 = vpop.f32.mrb[136].mxu1 }
 0xd66   :  { %v5295_v24 = vpack.i.bf16 %v3799_v51, %v3751_v12  ;;  %v5174_v0 = vpop.f32.mrb[137].mxu1 }
 0xd67   :  { %v3802_v2 = vpop.f32.mrb[138].mxu1 }
 0xd68   :  { %v5175_v21 = vpop.f32.mrb[139].mxu1  ;;  %5296 = vrot.lane.b32.xlu1 %v5295_v24, %s5513_s21 }
 0xd91   :  { %v5272_v50 = vpop.permute.xlu0 %5271 }
 0xd92   :  { %v5274_v52 = vunpack.i.h.bf16 %v5272_v50  ;;  %v5273_v17 = vunpack.i.l.bf16 %v5272_v50 }
 0xd94   :  { %v3919_v7 = vsel %vm3918_vm5, %v3910_v5, %v5273_v17  ;;  %v3920_v19 = vsel %vm3918_vm5, %v3911_v9, %v5274_v52  ;;  %v5492_v52 = vld [vmem:[%s6783_s0 + $0x8] sm:$0xff]  ;;  %v5493_v9 = vld [vmem:[%s6783_s0 + $0x18] sm:$0xff] }
 0xd95   :  { %v3927_v6 = vpack.c.bf16 %v3920_v19, %v3919_v7  ;;  %v5277_v40 = vpop.permute.xlu0 %5276 }
 0xd96   :  { %v5279_v39 = vunpack.i.h.bf16 %v5277_v40  ;;  %v5278_v12 = vunpack.i.l.bf16 %v5277_v40 }
 0xd97   :  { %5180 = vmatprep.mubr.msk.bf16.mxu0 %vm52_vm0, %v3927_v6 }
 0xd98   :  { %v3914_v58 = vsel %vm3909_vm4, %v3905_v53, %v5278_v12  ;;  %v3915_v63 = vsel %vm3909_vm4, %v3906_v26, %v5279_v39 }
 0xdc6   :  { %v5282_v27 = vpop.permute.xlu1 %5281 }
 0xdc7   :  { %v5284_v11 = vunpack.i.h.bf16 %v5282_v27  ;;  %v5283_v8 = vunpack.i.l.bf16 %v5282_v27 }
 0xdc9   :  { %v3922_v30 = vsel %vm3918_vm5, %v3913_v60, %v5284_v11  ;;  %v3921_v10 = vsel %vm3918_vm5, %v3912_v48, %v5283_v8  ;;  %v5496_v60 = vld [vmem:[%s6783_s0 + $0x38] sm:$0xff] }
 0xdca   :  { %v3928_v22 = vpack.c.bf16 %v3922_v30, %v3921_v10  ;;  %v5287_v38 = vpop.permute.xlu1 %5286  ;;  %v5497_v30 = vld [vmem:[%s6783_s0 + $0x28] sm:$0xff] }
 0xdcb   :  { %v5289_v43 = vunpack.i.h.bf16 %v5287_v38  ;;  %v5288_v46 = vunpack.i.l.bf16 %v5287_v38 }
 0xdcc   :  { %5181 = vmatmul.mubr.msk.bf16.vlgmr.msra.gmra.mrb[124].mxu0 %vm52_vm0, %v3928_v22 }
 0xdcd   :  { %v3917_v0 = vsel %vm3909_vm4, %v3908_v31, %v5289_v43  ;;  %v3916_v2 = vsel %vm3909_vm4, %v3907_v29, %v5288_v46 }
 0xdce   :  { %v5292_v36 = vpop.permute.xlu0 %5291 }
 0xdcf   :  { %v5294_v25 = vunpack.i.h.bf16 %v5292_v36  ;;  %v5293_v32 = vunpack.i.l.bf16 %v5292_v36 }
 0xdd1   :  { %v3923_v18 = vsel %vm3918_vm5, %v3914_v58, %v5293_v32  ;;  %v3924_v49 = vsel %vm3918_vm5, %v3915_v63, %v5294_v25 }
 0xdd2   :  { %v3929_v54 = vpack.c.bf16 %v3924_v49, %v3923_v18 }
 0xdd4   :  { %5184 = vmatprep.mubr.msk.bf16.mxu0 %vm52_vm0, %v3929_v54 }
 0xdda   :  { %v5297_v37 = vpop.permute.xlu1 %5296 }
 0xddb   :  { %v5299_v51 = vunpack.i.h.bf16 %v5297_v37  ;;  %v5298_v24 = vunpack.i.l.bf16 %v5297_v37 }
 0xddd   :  { %v3926_v21 = vsel %vm3918_vm5, %v3917_v0, %v5299_v51  ;;  %v3925_v61 = vsel %vm3918_vm5, %v3916_v2, %v5298_v24 }
 0xdde   :  { %v3930_v33 = vpack.c.bf16 %v3926_v21, %v3925_v61 }
 0xde0   :  { %5185 = vmatmul.mubr.msk.bf16.gmra.mrb[128].mxu0 %vm52_vm0, %v3930_v33 }
 0xe9f   :  { %v5182_v20 = vpop.f32.mrb[124].mxu0 }
 0xea0   :  { %v3993_v41 = vpop.f32.mrb[125].mxu0  ;;  %v4026_v3 = vadd.f32 %v5490_v28, %v5182_v20 }
 0xea1   :  { %v4024_v45 = vadd.f32 %v5491_v55, %v3993_v41  ;;  %v5183_v50 = vpop.f32.mrb[126].mxu0 }
 0xea2   :  { %v3996_v62 = vpop.f32.mrb[127].mxu0  ;;  %v6596_v5 = vadd.f32 %v4603_v4, %v4026_v3  ;;  %v4027_v7 = vadd.f32 %v5493_v9, %v5183_v50 }
 0xea3   :  { %v6591_v59 = vadd.f32 %v4603_v4, %v4024_v45  ;;  %v4025_v17 = vadd.f32 %v5492_v52, %v3996_v62 }
 0xea4   :  { %v6607_v1 = vadd.f32 %v4603_v4, %v4027_v7  ;;  %v4055_v16 = vsel %vm52_vm0, %v6596_v5, 0.0 }
 0xea5   :  { %v6601_v19 = vadd.f32 %v4603_v4, %v4025_v17  ;;  %v4049_v6 = vsel %vm52_vm0, %v6591_v59, 0.0 }
 0xea6   :  { %4050 = vadd.xlane.f32.xlu0 %v4049_v6  ;;  %v4058_v15 = vsel %vm52_vm0, %v6607_v1, 0.0 }
 0xea7   :  { %v4052_v47 = vsel %vm52_vm0, %v6601_v19, 0.0 }
 0xea8   :  { %4053 = vadd.xlane.f32.xlu1 %v4052_v47 }
 0xeaa   :  { %4056 = vadd.xlane.f32.xlu0 %v4055_v16 }
 0xeae   :  { %4059 = vadd.xlane.f32.xlu0 %v4058_v15 }
 0xeb3   :  { %v5186_v57 = vpop.f32.mrb[128].mxu0 }
 0xeb4   :  { %v4009_v13 = vpop.f32.mrb[129].mxu0  ;;  %v4030_v27 = vadd.f32 %v5494_v14, %v5186_v57  ;;  %v5304_v57 = vld [vmem:[%s6789_s8] sm:$0xff]  }
 0xeb5   :  { %v4028_v35 = vadd.f32 %v5495_v34, %v4009_v13  ;;  %v5187_v11 = vpop.f32.mrb[130].mxu0  ;;  %5188 = vmatprep.subr.bf16.mxu1 %v5304_v57  ;;  %v5305_v13 = vld [vmem:[%s6789_s8 + $0x8] sm:$0xff]  }
 0xeb6   :  { %v4012_v8 = vpop.f32.mrb[131].mxu0  ;;  %v4031_v40 = vadd.f32 %v5496_v60, %v5187_v11  ;;  %v6627_v22 = vadd.f32 %v4603_v4, %v4030_v27  ;;  %5189 = vmatpush3.bf16.msra.mxu1 %v5304_v57 }
 0xeb7   :  { %v6619_v48 = vadd.f32 %v4603_v4, %v4028_v35  ;;  %v4029_v10 = vadd.f32 %v5497_v30, %v4012_v8  ;;  %5190 = vmatprep.subr.bf16.mxu1 %v5305_v13 }
 0xeb8   :  { %v6633_v39 = vadd.f32 %v4603_v4, %v4031_v40  ;;  %v4067_v36 = vsel %vm52_vm0, %v6627_v22, 0.0 }
 0xeb9   :  { %v6629_v23 = vadd.f32 %v4603_v4, %v4029_v10  ;;  %v4061_v44 = vsel %vm52_vm0, %v6619_v48, 0.0 }
 0xeba   :  { %4062 = vadd.xlane.f32.xlu0 %v4061_v44  ;;  %v4070_v26 = vsel %vm52_vm0, %v6633_v39, 0.0  ;;  %5191 = vmatpush3.bf16.msra.mxu1 %v5305_v13 }
 0xebb   :  { %v4064_v12 = vsel %vm52_vm0, %v6629_v23, 0.0 }
 0xebc   :  { %4065 = vadd.xlane.f32.xlu1 %v4064_v12 }
 0xebe   :  { %4068 = vadd.xlane.f32.xlu0 %v4067_v36 }
 0xec0   :  { %4071 = vadd.xlane.f32.xlu1 %v4070_v26  ;;  %v4604_v26 = vld [vmem:[%s6790_s6] ss:$0 sm:$0xff] }
 0xf33   :  { %v4051_v53 = vpop.xlane.xlu0 %4050 }
 0xf34   :  { %v4073_v25 = vmul.f32 0.03125, %v4051_v53 }
 0xf35   :  { %v4054_v32 = vpop.xlane.xlu1 %4053 }
 0xf36   :  { %v6642_v58 = vsub.f32 %v6591_v59, %v4073_v25  ;;  %v4074_v63 = vmul.f32 0.03125, %v4054_v32 }
 0xf37   :  { %v4057_v18 = vpop.xlane.xlu0 %4056 }
 0xf38   :  { %v6645_v49 = vsub.f32 %v6601_v19, %v4074_v63  ;;  %v4075_v54 = vmul.f32 0.03125, %v4057_v18  ;;  %v4089_v38 = vmul.f32 %v6642_v58, %v6642_v58 }
 0xf3a   :  { %v6650_v56 = vsub.f32 %v6596_v5, %v4075_v54  ;;  %v4097_v42 = vsel %vm52_vm0, %v4089_v38, 0.0  ;;  %v4090_v43 = vmul.f32 %v6645_v49, %v6645_v49  ;;  %v4605_v54 = vld [vmem:[%s6791_s7] ss:$0 sm:$0xff] }
 0xf3b   :  { %v4060_v46 = vpop.xlane.xlu0 %4059  ;;  %4098 = vadd.xlane.f32.xlu0 %v4097_v42 }
 0xf3c   :  { %v4076_v37 = vmul.f32 0.03125, %v4060_v46  ;;  %v4100_v31 = vsel %vm52_vm0, %v4090_v43, 0.0  ;;  %v4091_v29 = vmul.f32 %v6650_v56, %v6650_v56 }
 0xf3d   :  { %4101 = vadd.xlane.f32.xlu1 %v4100_v31 }
 0xf3e   :  { %v6659_v51 = vsub.f32 %v6607_v1, %v4076_v37  ;;  %v4103_v24 = vsel %vm52_vm0, %v4091_v29, 0.0 }
 0xf3f   :  { %4104 = vadd.xlane.f32.xlu0 %v4103_v24 }
 0xf40   :  { %v4092_v0 = vmul.f32 %v6659_v51, %v6659_v51 }
 0xf42   :  { %v4106_v2 = vsel %vm52_vm0, %v4092_v0, 0.0 }
 0xf43   :  { %4107 = vadd.xlane.f32.xlu1 %v4106_v2 }
 0xf47   :  { %v4063_v21 = vpop.xlane.xlu0 %4062 }
 0xf48   :  { %v4077_v61 = vmul.f32 0.03125, %v4063_v21 }
 0xf49   :  { %v4066_v33 = vpop.xlane.xlu1 %4065 }
 0xf4a   :  { %v6666_v20 = vsub.f32 %v6619_v48, %v4077_v61  ;;  %v4078_v4 = vmul.f32 0.03125, %v4066_v33 }
 0xf4b   :  { %v4069_v41 = vpop.xlane.xlu0 %4068 }
 0xf4c   :  { %v6669_v28 = vsub.f32 %v6629_v23, %v4078_v4  ;;  %v4079_v3 = vmul.f32 0.03125, %v4069_v41  ;;  %v4093_v55 = vmul.f32 %v6666_v20, %v6666_v20 }
 0xf4d   :  { %v4072_v45 = vpop.xlane.xlu1 %4071 }
 0xf4e   :  { %v6674_v50 = vsub.f32 %v6627_v22, %v4079_v3  ;;  %v4080_v62 = vmul.f32 0.03125, %v4072_v45  ;;  %v4109_v52 = vsel %vm52_vm0, %v4093_v55, 0.0  ;;  %v4094_v17 = vmul.f32 %v6669_v28, %v6669_v28 }
 0xf4f   :  { %4110 = vadd.xlane.f32.xlu0 %v4109_v52 }
 0xf50   :  { %v6680_v9 = vsub.f32 %v6633_v39, %v4080_v62  ;;  %v4112_v7 = vsel %vm52_vm0, %v4094_v17, 0.0  ;;  %v4095_v6 = vmul.f32 %v6674_v50, %v6674_v50 }
 0xf51   :  { %4113 = vadd.xlane.f32.xlu1 %v4112_v7 }
 0xf52   :  { %v4115_v47 = vsel %vm52_vm0, %v4095_v6, 0.0  ;;  %v4096_v16 = vmul.f32 %v6680_v9, %v6680_v9 }
 0xf53   :  { %4116 = vadd.xlane.f32.xlu0 %v4115_v47 }
 0xf54   :  { %v4118_v15 = vsel %vm52_vm0, %v4096_v16, 0.0 }
 0xf55   :  { %4119 = vadd.xlane.f32.xlu1 %v4118_v15 }
 0xfc8   :  { %v4099_v14 = vpop.xlane.xlu0 %4098 }
 0xfc9   :  { %v4121_v27 = vmul.f32 0.03125, %v4099_v14 }
 0xfca   :  { %v4102_v34 = vpop.xlane.xlu1 %4101 }
 0xfcb   :  { %v4129_v35 = vadd.f32 1e-05, %v4121_v27  ;;  %v4122_v11 = vmul.f32 0.03125, %v4102_v34 }
 0xfcc   :  { %v4105_v8 = vpop.xlane.xlu0 %4104 }
 0xfcd   :  { %5458 = vrsqrt.f32 %v4129_v35  ;;  %v4130_v60 = vadd.f32 1e-05, %v4122_v11  ;;  %v4123_v40 = vmul.f32 0.03125, %v4105_v8 }
 0xfcf   :  { %5460 = vrsqrt.f32 %v4130_v60  ;;  %v4131_v30 = vadd.f32 1e-05, %v4123_v40 }
 0xfd0   :  { %v4108_v10 = vpop.xlane.xlu1 %4107 }
 0xfd1   :  { %5462 = vrsqrt.f32 %v4131_v30  ;;  %v4124_v44 = vmul.f32 0.03125, %v4108_v10  ;;  %v5309_v10 = vld [vmem:[%s6792_s10 + $0x18] sm:$0xff]  }
 0xfd3   :  { %v4132_v12 = vadd.f32 1e-05, %v4124_v44  ;;  %v5310_v44 = vld [vmem:[%s6792_s10 + $0x20] sm:$0xff]  }
 0xfd5   :  { %5464 = vrsqrt.f32 %v4132_v12  ;;  %v5311_v12 = vld [vmem:[%s6792_s10 + $0x28] sm:$0xff]  }
 0xfd7   :  { %v5459_v36 = vpop.eup %5458 }
 0xfd8   :  { %v4145_v53 = vmul.f32 %v5459_v36, %v6642_v58  ;;  %v5312_v36 = vld [vmem:[%s6792_s10 + $0x30] sm:$0xff]  }
 0xfd9   :  { %v5461_v25 = vpop.eup %5460 }
 0xfda   :  { %v4146_v32 = vmul.f32 %v5461_v25, %v6645_v49  ;;  %v4159_v63 = vmul.f32 %v4604_v26, %v4145_v53  ;;  %v4606_v53 = vld [vmem:[%s6793_s9] ss:$0 sm:$0xff] }
 0xfdb   :  { %v5463_v18 = vpop.eup %5462 }
 0xfdc   :  { %v4147_v38 = vmul.f32 %v5463_v18, %v6650_v56  ;;  %v4111_v42 = vpop.xlane.xlu0 %4110  ;;  %v4160_v43 = vmul.f32 %v4604_v26, %v4146_v32  ;;  %v4173_v31 = vadd.f32 %v4605_v54, %v4159_v63 }
 0xfdd   :  { %v4125_v46 = vmul.f32 0.03125, %v4111_v42 }
 0xfde   :  { %v4114_v37 = vpop.xlane.xlu1 %4113  ;;  %v4174_v29 = vadd.f32 %v4605_v54, %v4160_v43  ;;  %v4161_v2 = vmul.f32 %v4604_v26, %v4147_v38 }
 0xfdf   :  { %v5465_v24 = vpop.eup %5464  ;;  %v4133_v0 = vadd.f32 1e-05, %v4125_v46  ;;  %v4126_v58 = vmul.f32 0.03125, %v4114_v37 }
 0xfe0   :  { %v4148_v49 = vmul.f32 %v5465_v24, %v6659_v51  ;;  %v4117_v21 = vpop.xlane.xlu0 %4116  ;;  %v4181_v61 = vpack.c.bf16 %v4174_v29, %v4173_v31  ;;  %v4175_v45 = vadd.f32 %v4605_v54, %v4161_v2 }
 0xfe1   :  { %5466 = vrsqrt.f32 %v4133_v0  ;;  %v4134_v33 = vadd.f32 1e-05, %v4126_v58  ;;  %v4127_v4 = vmul.f32 0.03125, %v4117_v21 }
 0xfe2   :  { %v4162_v41 = vmul.f32 %v4604_v26, %v4148_v49  ;;  %5192 = vmatprep.mubr.msk.bf16.mxu1 %vm52_vm0, %v4181_v61  ;;  %v4120_v56 = vpop.xlane.xlu1 %4119 }
 0xfe3   :  { %5468 = vrsqrt.f32 %v4134_v33  ;;  %v4135_v3 = vadd.f32 1e-05, %v4127_v4  ;;  %v4128_v55 = vmul.f32 0.03125, %v4120_v56 }
 0xfe4   :  { %v4176_v62 = vadd.f32 %v4605_v54, %v4162_v41 }
 0xfe5   :  { %5470 = vrsqrt.f32 %v4135_v3  ;;  %v4136_v52 = vadd.f32 1e-05, %v4128_v55 }
 0xfe6   :  { %v4182_v17 = vpack.c.bf16 %v4176_v62, %v4175_v45 }
 0xfe7   :  { %5472 = vrsqrt.f32 %v4136_v52 }
 0xfe8   :  { %5193 = vmatmul.mubr.msk.bf16.vlgmr.msra.gmra.mrb[140].mxu1 %vm52_vm0, %v4182_v17 }
 0xfeb   :  { %v5467_v51 = vpop.eup %5466 }
 0xfec   :  { %v4149_v7 = vmul.f32 %v5467_v51, %v6666_v20 }
 0xfed   :  { %v5469_v6 = vpop.eup %5468 }
 0xfee   :  { %v4150_v47 = vmul.f32 %v5469_v6, %v6669_v28  ;;  %v4163_v16 = vmul.f32 %v4604_v26, %v4149_v7  ;;  %v5306_v28 = vld [vmem:[%s6792_s10] sm:$0xff]  }
 0xfef   :  { %v5471_v15 = vpop.eup %5470  ;;  %5200 = vmatprep.subr.bf16.mxu0 %v5306_v28 }
 0xff0   :  { %v4151_v57 = vmul.f32 %v5471_v15, %v6674_v50  ;;  %v4164_v13 = vmul.f32 %v4604_v26, %v4150_v47  ;;  %v4177_v34 = vadd.f32 %v4605_v54, %v4163_v16  ;;  %5201 = vmatpush3.bf16.msra.mxu0 %v5306_v28  ;;  %v5307_v50 = vld [vmem:[%s6792_s10 + $0x8] sm:$0xff]  }
 0xff1   :  { %v5473_v14 = vpop.eup %5472  ;;  %5202 = vmatprep.subr.bf16.mxu0 %v5307_v50 }
 0xff2   :  { %v4152_v27 = vmul.f32 %v5473_v14, %v6680_v9  ;;  %v4178_v35 = vadd.f32 %v4605_v54, %v4164_v13  ;;  %v4165_v11 = vmul.f32 %v4604_v26, %v4151_v57  ;;  %v5308_v9 = vld [vmem:[%s6792_s10 + $0x10] sm:$0xff]  }
 0xff4   :  { %v4183_v8 = vpack.c.bf16 %v4178_v35, %v4177_v34  ;;  %v4166_v60 = vmul.f32 %v4604_v26, %v4152_v27  ;;  %v4179_v40 = vadd.f32 %v4605_v54, %v4165_v11  ;;  %5203 = vmatpush3.bf16.msra.mxu0 %v5307_v50  ;;  %v5313_v26 = vld [vmem:[%s6792_s10 + $0x38] sm:$0xff]  }
 0xff5   :  { %5204 = vmatprep.subr.bf16.mxu0 %v5308_v9 }
 0xff6   :  { %5196 = vmatprep.mubr.msk.bf16.mxu1 %vm52_vm0, %v4183_v8  ;;  %v4180_v20 = vadd.f32 %v4605_v54, %v4166_v60 }
 0xff8   :  { %v4184_v30 = vpack.c.bf16 %v4180_v20, %v4179_v40  ;;  %5205 = vmatpush3.bf16.msra.mxu0 %v5308_v9 }
 0xff9   :  { %5206 = vmatprep.subr.bf16.mxu0 %v5309_v10 }
 0xffa   :  { %5197 = vmatmul.mubr.msk.bf16.gmra.mrb[144].mxu1 %vm52_vm0, %v4184_v30 }
 0xffc   :  { %5207 = vmatpush3.bf16.msra.mxu0 %v5309_v10 }
 0xffd   :  { %5208 = vmatprep.subr.bf16.mxu0 %v5310_v44 }
0x1000   :  { %5209 = vmatpush3.bf16.msra.mxu0 %v5310_v44 }
0x1001   :  { %5210 = vmatprep.subr.bf16.mxu0 %v5311_v12 }
0x1004   :  { %5211 = vmatpush3.bf16.msra.mxu0 %v5311_v12 }
0x1005   :  { %5212 = vmatprep.subr.bf16.mxu0 %v5312_v36 }
0x1008   :  { %5213 = vmatpush3.bf16.msra.mxu0 %v5312_v36 }
0x1009   :  { %5214 = vmatprep.subr.bf16.mxu0 %v5313_v26 }
0x100c   :  { %5215 = vmatpush3.bf16.msra.mxu0 %v5313_v26 }
0x10bb   :  { %v5194_v25 = vpop.f32.mrb[140].mxu1 }
0x10bc   :  { %v4263_v32 = vadd.f32 %v5194_v25, %v4606_v53  ;;  %v4254_v63 = vpop.f32.mrb[141].mxu1 }
0x10bd   :  { %v4255_v18 = vadd.f32 %v4606_v53, %v4254_v63  ;;  %v5195_v54 = vpop.f32.mrb[142].mxu1 }
0x10be   :  { %v4295_v38 = vmul.f32 0.044715, %v4263_v32  ;;  %v4266_v42 = vadd.f32 %v5195_v54, %v4606_v53  ;;  %v4257_v43 = vpop.f32.mrb[143].mxu1  ;;  %v4287_v8 = vmul.f32 0.5, %v4263_v32 }
0x10bf   :  { %v4293_v46 = vmul.f32 0.044715, %v4255_v18  ;;  %v4258_v37 = vadd.f32 %v4606_v53, %v4257_v43  ;;  %v4285_v9 = vmul.f32 0.5, %v4255_v18 }
0x10c0   :  { %v4303_v31 = vmul.f32 %v4295_v38, %v4263_v32  ;;  %v4296_v29 = vmul.f32 0.044715, %v4266_v42  ;;  %v4288_v12 = vmul.f32 0.5, %v4266_v42 }
0x10c1   :  { %v4301_v24 = vmul.f32 %v4293_v46, %v4255_v18  ;;  %v4294_v0 = vmul.f32 0.044715, %v4258_v37 }
0x10c2   :  { %v4311_v58 = vmul.f32 %v4303_v31, %v4263_v32  ;;  %v4304_v2 = vmul.f32 %v4296_v29, %v4266_v42 }
0x10c3   :  { %v4309_v49 = vmul.f32 %v4301_v24, %v4255_v18  ;;  %v4302_v21 = vmul.f32 %v4294_v0, %v4258_v37 }
0x10c4   :  { %v4319_v61 = vadd.f32 %v4311_v58, %v4263_v32  ;;  %v4312_v33 = vmul.f32 %v4304_v2, %v4266_v42 }
0x10c5   :  { %v4310_v4 = vmul.f32 %v4302_v21, %v4258_v37  ;;  %v4317_v41 = vadd.f32 %v4309_v49, %v4255_v18 }
0x10c6   :  { %v4327_v56 = vmul.f32 0.7978846, %v4319_v61  ;;  %v4320_v3 = vadd.f32 %v4312_v33, %v4266_v42 }
0x10c7   :  { %v4318_v55 = vadd.f32 %v4310_v4, %v4258_v37  ;;  %v4325_v45 = vmul.f32 0.7978846, %v4317_v41 }
0x10c8   :  { %5474 = vtanh.f32 %v4327_v56  ;;  %v4328_v62 = vmul.f32 0.7978846, %v4320_v3 }
0x10c9   :  { %v4326_v52 = vmul.f32 0.7978846, %v4318_v55  ;;  %5476 = vtanh.f32 %v4325_v45 }
0x10ca   :  { %5478 = vtanh.f32 %v4328_v62 }
0x10cb   :  { %5480 = vtanh.f32 %v4326_v52 }
0x10cd   :  { %v5198_v17 = vpop.f32.mrb[144].mxu1 }
0x10ce   :  { %v4279_v51 = vadd.f32 %v5198_v17, %v4606_v53  ;;  %v4270_v7 = vpop.f32.mrb[145].mxu1 }
0x10cf   :  { %v4271_v6 = vadd.f32 %v4606_v53, %v4270_v7  ;;  %v5199_v47 = vpop.f32.mrb[146].mxu1 }
0x10d0   :  { %v4299_v16 = vmul.f32 0.044715, %v4279_v51  ;;  %v4282_v15 = vadd.f32 %v5199_v47, %v4606_v53  ;;  %v4273_v57 = vpop.f32.mrb[147].mxu1  ;;  %v4291_v55 = vmul.f32 0.5, %v4279_v51 }
0x10d1   :  { %v4297_v13 = vmul.f32 0.044715, %v4271_v6  ;;  %v4274_v14 = vadd.f32 %v4606_v53, %v4273_v57  ;;  %v4286_v53 = vmul.f32 0.5, %v4258_v37  ;;  %v4289_v52 = vmul.f32 0.5, %v4271_v6 }
0x10d2   :  { %v5475_v27 = vpop.eup %5474  ;;  %v4307_v34 = vmul.f32 %v4299_v16, %v4279_v51  ;;  %v4300_v35 = vmul.f32 0.044715, %v4282_v15  ;;  %v4292_v45 = vmul.f32 0.5, %v4282_v15 }
0x10d3   :  { %v5477_v11 = vpop.eup %5476  ;;  %v4305_v60 = vmul.f32 %v4297_v13, %v4271_v6  ;;  %v4298_v40 = vmul.f32 0.044715, %v4274_v14  ;;  %v4343_v20 = vadd.f32 1.0, %v5475_v27  ;;  %v4290_v17 = vmul.f32 0.5, %v4274_v14 }
0x10d4   :  { %v5479_v30 = vpop.eup %5478  ;;  %v4315_v28 = vmul.f32 %v4307_v34, %v4279_v51  ;;  %v4308_v50 = vmul.f32 %v4300_v35, %v4282_v15  ;;  %v4341_v10 = vadd.f32 1.0, %v5477_v11  ;;  %v4621_v11 = vld [vmem:[%s6794_s11] ss:$0 sm:$0xff] }
0x10d5   :  { %v5481_v44 = vpop.eup %5480  ;;  %v4313_v36 = vmul.f32 %v4305_v60, %v4271_v6  ;;  %v4306_v26 = vmul.f32 %v4298_v40, %v4274_v14  ;;  %v4344_v25 = vadd.f32 1.0, %v5479_v30  ;;  %v4351_v46 = vmul.f32 %v4343_v20, %v4287_v8 }
0x10d6   :  { %v4316_v63 = vmul.f32 %v4308_v50, %v4282_v15  ;;  %v4342_v54 = vadd.f32 1.0, %v5481_v44  ;;  %v4323_v38 = vadd.f32 %v4315_v28, %v4279_v51  ;;  %v4349_v29 = vmul.f32 %v4341_v10, %v4285_v9 }
0x10d7   :  { %v4314_v43 = vmul.f32 %v4306_v26, %v4274_v14  ;;  %v4352_v32 = vmul.f32 %v4344_v25, %v4288_v12  ;;  %v4321_v31 = vadd.f32 %v4313_v36, %v4271_v6 }
0x10d8   :  { %v4350_v24 = vmul.f32 %v4342_v54, %v4286_v53  ;;  %v4324_v0 = vadd.f32 %v4316_v63, %v4282_v15  ;;  %v4331_v58 = vmul.f32 0.7978846, %v4323_v38 }
0x10d9   :  { %v4358_v2 = vpack.c.bf16 %v4352_v32, %v4351_v46  ;;  %v4322_v18 = vadd.f32 %v4314_v43, %v4274_v14  ;;  %v4329_v49 = vmul.f32 0.7978846, %v4321_v31 }
0x10da   :  { %v4357_v21 = vpack.c.bf16 %v4350_v24, %v4349_v29  ;;  %v4332_v42 = vmul.f32 0.7978846, %v4324_v0  ;;  %5482 = vtanh.f32 %v4331_v58 }
0x10db   :  { %v4330_v61 = vmul.f32 0.7978846, %v4322_v18  ;;  %5484 = vtanh.f32 %v4329_v49 }
0x10dc   :  { %5216 = vmatprep.mubr.bf16.mxu0 %v4357_v21  ;;  %5486 = vtanh.f32 %v4332_v42 }
0x10dd   :  { %5217 = vmatmul.mubr.bf16.vlgmr.msra.gmra.mrb[132].mxu0 %v4358_v2  ;;  %5488 = vtanh.f32 %v4330_v61 }
0x10e4   :  { %v5483_v37 = vpop.eup %5482 }
0x10e5   :  { %v5485_v33 = vpop.eup %5484  ;;  %v4347_v4 = vadd.f32 1.0, %v5483_v37 }
0x10e6   :  { %v5487_v41 = vpop.eup %5486  ;;  %v4345_v56 = vadd.f32 1.0, %v5485_v33 }
0x10e7   :  { %v5489_v3 = vpop.eup %5488  ;;  %v4348_v62 = vadd.f32 1.0, %v5487_v41  ;;  %v4355_v47 = vmul.f32 %v4347_v4, %v4291_v55 }
0x10e8   :  { %v4346_v7 = vadd.f32 1.0, %v5489_v3  ;;  %v4353_v57 = vmul.f32 %v4345_v56, %v4289_v52 }
0x10e9   :  { %v4356_v16 = vmul.f32 %v4348_v62, %v4292_v45 }
0x10ea   :  { %v4354_v13 = vmul.f32 %v4346_v7, %v4290_v17 }
0x10eb   :  { %v4360_v27 = vpack.c.bf16 %v4356_v16, %v4355_v47 }
0x10ec   :  { %v4359_v34 = vpack.c.bf16 %v4354_v13, %v4353_v57 }
0x10ee   :  { %5220 = vmatprep.mubr.bf16.mxu0 %v4359_v34 }
0x10ef   :  { %5221 = vmatmul.mubr.bf16.gmra.mrb[136].mxu0 %v4360_v27 }
0x11b0   :  { %v5218_v35 = vpop.f32.mrb[132].mxu0 }
0x11b1   :  { %v4492_v51 = vadd.f32 %v5218_v35, %v6596_v5  ;;  %v4459_v15 = vpop.f32.mrb[133].mxu0 }
0x11b2   :  { %v4490_v6 = vadd.f32 %v4459_v15, %v6591_v59  ;;  %v5219_v14 = vpop.f32.mrb[134].mxu0 }
0x11b3   :  { %v4507_v8 = vadd.f32 %v4621_v11, %v4492_v51  ;;  %v4493_v60 = vadd.f32 %v5219_v14, %v6607_v1  ;;  %v4462_v40 = vpop.f32.mrb[135].mxu0 }
0x11b4   :  { %v4505_v20 = vadd.f32 %v4621_v11, %v4490_v6  ;;  %v4491_v30 = vadd.f32 %v4462_v40, %v6601_v19 }
0x11b5   :  { %4515 = vst.msk [vmem:[%s6795_s12 + $0x10] sm:$0xff] %vm52_vm0, %v4507_v8  ;;  %v4508_v28 = vadd.f32 %v4621_v11, %v4493_v60 }
0x11b6   :  { %4513 = vst.msk [vmem:[%s6795_s12] sm:$0xff] %vm52_vm0, %v4505_v20  ;;  %v4506_v59 = vadd.f32 %v4621_v11, %v4491_v30 }
0x11b7   :  { %4516 = vst.msk [vmem:[%s6795_s12 + $0x18] sm:$0xff] %vm52_vm0, %v4508_v28 }
0x11b8   :  { %4514 = vst.msk [vmem:[%s6795_s12 + $0x8] sm:$0xff] %vm52_vm0, %v4506_v59 }
0x11c2   :  { %v5222_v5 = vpop.f32.mrb[136].mxu0 }
0x11c3   :  { %v4496_v19 = vadd.f32 %v5222_v5, %v6627_v22  ;;  %v4475_v1 = vpop.f32.mrb[137].mxu0 }
0x11c4   :  { %v4494_v50 = vadd.f32 %v4475_v1, %v6619_v48  ;;  %v5223_v9 = vpop.f32.mrb[138].mxu0 }
0x11c5   :  { %v4511_v10 = vadd.f32 %v4621_v11, %v4496_v19  ;;  %v4497_v44 = vadd.f32 %v5223_v9, %v6633_v39  ;;  %v4478_v12 = vpop.f32.mrb[139].mxu0 }
0x11c6   :  { %v4509_v36 = vadd.f32 %v4621_v11, %v4494_v50  ;;  %v4495_v26 = vadd.f32 %v4478_v12, %v6629_v23 }
0x11c7   :  { %4519 = vst.msk [vmem:[%s6795_s12 + $0x30] sm:$0xff] %vm52_vm0, %v4511_v10  ;;  %v4512_v25 = vadd.f32 %v4621_v11, %v4497_v44 }
0x11c8   :  { %4517 = vst.msk [vmem:[%s6795_s12 + $0x20] sm:$0xff] %vm52_vm0, %v4509_v36  ;;  %v4510_v48 = vadd.f32 %v4621_v11, %v4495_v26 }
0x11c9   :  { %4520 = vst.msk [vmem:[%s6795_s12 + $0x38] sm:$0xff] %vm52_vm0, %v4512_v25 }
0x11ca   :  { %4518 = vst.msk [vmem:[%s6795_s12 + $0x28] sm:$0xff] %vm52_vm0, %v4510_v48 }

// kernel: multiscale_block_forward.3
= control target key start
LH: loop header
LB: loop body
LE: loop exit
PB: predicated region body
PF: predicated region fallthrough
CT: control target
= control target key end

     0   :  { %vm52_vm0 = vcmask 261120   ;;  %vm9841_vm1 = vmmov 0   ;;  %vm326_vm2 = vcmask 64512   ;;  %vm1307_vm3 = vcmask 1041408   ;;  %s9844_s26 = smov 88   ;;  %s9845_s27 = smov 120   ;;  %s12367_s0 = inlined_call_operand.vmem [shape: f32[64,32], index: 0, kind: input, shape index: {}]   ;;  %s12368_s3 = inlined_call_operand.vmem [shape: bf16[32,96], index: 3, kind: input, shape index: {}]   ;;  %s12369_s1 = inlined_call_operand.vmem [shape: f32[1,32], index: 1, kind: input, shape index: {}]   ;;  %s12370_s2 = inlined_call_operand.vmem [shape: f32[1,32], index: 2, kind: input, shape index: {}]   ;;  %s12371_s4 = inlined_call_operand.vmem [shape: bf16[32,32], index: 4, kind: input, shape index: {}]   ;;  %s12372_s5 = inlined_call_operand.vmem [shape: f32[1,32], index: 5, kind: input, shape index: {}]   ;;  %s12373_s8 = inlined_call_operand.vmem [shape: bf16[32,128], index: 8, kind: input, shape index: {}]   ;;  %s12374_s6 = inlined_call_operand.vmem [shape: f32[1,32], index: 6, kind: input, shape index: {}]   ;;  %s12375_s7 = inlined_call_operand.vmem [shape: f32[1,32], index: 7, kind: input, shape index: {}]   ;;  %s12376_s10 = inlined_call_operand.vmem [shape: bf16[128,32], index: 10, kind: input, shape index: {}]   ;;  %s12377_s9 = inlined_call_operand.vmem [shape: f32[1,128], index: 9, kind: input, shape index: {}]   ;;  %s12378_s11 = inlined_call_operand.vmem [shape: f32[1,32], index: 11, kind: input, shape index: {}]   ;;  %s12379_s12 = inlined_call_operand.vmem [shape: f32[64,32], index: 12, kind: output, shape index: {}]  }
   0x1   :  { %v42_v0 = vld [vmem:[%s12367_s0] sm:$0xff]  ;;  %v44_v1 = vld [vmem:[%s12367_s0 + $0x10] sm:$0xff]  ;;  %v43_v2 = vld [vmem:[%s12367_s0 + $0x8] sm:$0xff]  ;;  %vm1108_vm4 = vcmask 27648   ;;  %vm1303_vm5 = vcmask 31744   ;;  %s9846_s28 = smov 56  }
   0x2   :  { %v53_v3 = vsel %vm52_vm0, %v42_v0, 0.0  ;;  %v59_v4 = vsel %vm52_vm0, %v44_v1, 0.0  ;;  %v45_v5 = vld [vmem:[%s12367_s0 + $0x18] sm:$0xff]  ;;  %v56_v6 = vsel %vm52_vm0, %v43_v2, 0.0  ;;  %v46_v8 = vld [vmem:[%s12367_s0 + $0x20] sm:$0xff]  ;;  %v47_v9 = vld [vmem:[%s12367_s0 + $0x28] sm:$0xff] }
   0x3   :  { %54 = vadd.xlane.f32.xlu0 %v53_v3  ;;  %60 = vadd.xlane.f32.xlu1 %v59_v4  ;;  %v62_v7 = vsel %vm52_vm0, %v45_v5, 0.0  ;;  %v65_v10 = vsel %vm52_vm0, %v46_v8, 0.0  ;;  %v68_v11 = vsel %vm52_vm0, %v47_v9, 0.0  ;;  %v48_v12 = vld [vmem:[%s12367_s0 + $0x30] sm:$0xff]  ;;  %v49_v13 = vld [vmem:[%s12367_s0 + $0x38] sm:$0xff]  ;;  %v9514_v56 = vld [vmem:[%s12368_s3] sm:$0xff]  }
   0x4   :  { %v71_v14 = vsel %vm52_vm0, %v48_v12, 0.0  ;;  %v74_v15 = vsel %vm52_vm0, %v49_v13, 0.0  ;;  %v9515_v57 = vld [vmem:[%s12368_s3 + $0x8] sm:$0xff]   ;;  %8670 = vmatprep.subr.bf16.mxu1 %v9514_v56  ;;  %s9847_s29 = smov 80   ;;  %s9848_s30 = smov 112   ;;  %vm7559_vm6 = vcmask 130048  }
   0x5   :  { %8671 = vmatpush3.bf16.msra.mxu1 %v9514_v56  ;;  %s9849_s13 = smov 48   ;;  %s9850_s14 = smov 72   ;;  %vm7576_vm7 = vcmask 195584  }
   0x6   :  { %8672 = vmatprep.subr.bf16.mxu1 %v9515_v57  ;;  %s9851_s15 = smov 104   ;;  %s9852_s16 = smov 40  }
   0x7   :  { %57 = vadd.xlane.f32.xlu0 %v56_v6  ;;  %63 = vadd.xlane.f32.xlu1 %v62_v7  ;;  %s9853_s17 = smov 8   ;;  %s9854_s18 = smov 16  }
   0x8   :  { %s9855_s19 = smov 24  }
   0x9   :  { %8673 = vmatpush3.bf16.msra.mxu1 %v9515_v57 }
   0xb   :  { %66 = vadd.xlane.f32.xlu0 %v65_v10  ;;  %69 = vadd.xlane.f32.xlu1 %v68_v11 }
   0xf   :  { %72 = vadd.xlane.f32.xlu0 %v71_v14  ;;  %75 = vadd.xlane.f32.xlu1 %v74_v15 }
  0x90   :  { %v55_v16 = vpop.xlane.xlu0 %54  ;;  %v61_v17 = vpop.xlane.xlu1 %60 }
  0x91   :  { %v78_v18 = vmul.f32 0.03125, %v55_v16  ;;  %v80_v19 = vmul.f32 0.03125, %v61_v17 }
  0x93   :  { %v9953_v20 = vsub.f32 %v42_v0, %v78_v18  ;;  %v9955_v21 = vsub.f32 %v44_v1, %v80_v19  ;;  %v8223_v19 = vld [vmem:[%s12369_s1] ss:$0 sm:$0xff]  ;;  %s9842_s1 = smov 96  }
  0x94   :  { %v58_v22 = vpop.xlane.xlu0 %57  ;;  %v64_v23 = vpop.xlane.xlu1 %63 }
  0x95   :  { %v79_v24 = vmul.f32 0.03125, %v58_v22  ;;  %v81_v25 = vmul.f32 0.03125, %v64_v23  ;;  %v94_v26 = vmul.f32 %v9953_v20, %v9953_v20  ;;  %v96_v27 = vmul.f32 %v9955_v21, %v9955_v21 }
  0x97   :  { %v9961_v28 = vsub.f32 %v43_v2, %v79_v24  ;;  %v9963_v29 = vsub.f32 %v45_v5, %v81_v25  ;;  %v102_v30 = vsel %vm52_vm0, %v94_v26, 0.0  ;;  %v108_v33 = vsel %vm52_vm0, %v96_v27, 0.0  ;;  %v8224_v27 = vld [vmem:[%s12370_s2] ss:$0 sm:$0xff]  ;;  %s9843_s2 = smov 64  }
  0x98   :  { %103 = vadd.xlane.f32.xlu0 %v102_v30  ;;  %v67_v31 = vpop.xlane.xlu0 %66  ;;  %v70_v32 = vpop.xlane.xlu1 %69 }
  0x99   :  { %v82_v34 = vmul.f32 0.03125, %v67_v31  ;;  %v83_v35 = vmul.f32 0.03125, %v70_v32  ;;  %v95_v36 = vmul.f32 %v9961_v28, %v9961_v28  ;;  %v97_v37 = vmul.f32 %v9963_v29, %v9963_v29 }
  0x9b   :  { %v9971_v38 = vsub.f32 %v46_v8, %v82_v34  ;;  %v9973_v39 = vsub.f32 %v47_v9, %v83_v35  ;;  %v105_v40 = vsel %vm52_vm0, %v95_v36, 0.0  ;;  %v111_v43 = vsel %vm52_vm0, %v97_v37, 0.0 }
  0x9c   :  { %109 = vadd.xlane.f32.xlu0 %v108_v33  ;;  %106 = vadd.xlane.f32.xlu1 %v105_v40  ;;  %v73_v41 = vpop.xlane.xlu0 %72  ;;  %v76_v42 = vpop.xlane.xlu1 %75 }
  0x9d   :  { %v84_v44 = vmul.f32 0.03125, %v73_v41  ;;  %v85_v45 = vmul.f32 0.03125, %v76_v42  ;;  %v98_v46 = vmul.f32 %v9971_v38, %v9971_v38  ;;  %v99_v47 = vmul.f32 %v9973_v39, %v9973_v39 }
  0x9f   :  { %v9981_v48 = vsub.f32 %v48_v12, %v84_v44  ;;  %v9983_v49 = vsub.f32 %v49_v13, %v85_v45  ;;  %v114_v50 = vsel %vm52_vm0, %v98_v46, 0.0  ;;  %v117_v51 = vsel %vm52_vm0, %v99_v47, 0.0 }
  0xa0   :  { %112 = vadd.xlane.f32.xlu1 %v111_v43  ;;  %115 = vadd.xlane.f32.xlu0 %v114_v50 }
  0xa1   :  { %v100_v52 = vmul.f32 %v9981_v48, %v9981_v48  ;;  %v101_v53 = vmul.f32 %v9983_v49, %v9983_v49 }
  0xa3   :  { %v120_v54 = vsel %vm52_vm0, %v100_v52, 0.0  ;;  %v123_v55 = vsel %vm52_vm0, %v101_v53, 0.0 }
  0xa4   :  { %118 = vadd.xlane.f32.xlu1 %v117_v51  ;;  %121 = vadd.xlane.f32.xlu0 %v120_v54 }
  0xa8   :  { %124 = vadd.xlane.f32.xlu1 %v123_v55 }
 0x125   :  { %v104_v58 = vpop.xlane.xlu0 %103 }
 0x126   :  { %v126_v59 = vmul.f32 0.03125, %v104_v58 }
 0x128   :  { %v134_v60 = vadd.f32 1e-05, %v126_v59 }
 0x129   :  { %v107_v61 = vpop.xlane.xlu1 %106  ;;  %v110_v62 = vpop.xlane.xlu0 %109 }
 0x12a   :  { %9528 = vrsqrt.f32 %v134_v60  ;;  %v127_v63 = vmul.f32 0.03125, %v107_v61  ;;  %v128_v0 = vmul.f32 0.03125, %v110_v62 }
 0x12c   :  { %v135_v1 = vadd.f32 1e-05, %v127_v63  ;;  %v136_v2 = vadd.f32 1e-05, %v128_v0 }
 0x12d   :  { %v113_v3 = vpop.xlane.xlu1 %112  ;;  %v116_v4 = vpop.xlane.xlu0 %115 }
 0x12e   :  { %9530 = vrsqrt.f32 %v135_v1  ;;  %v129_v5 = vmul.f32 0.03125, %v113_v3  ;;  %v130_v6 = vmul.f32 0.03125, %v116_v4 }
 0x12f   :  { %9532 = vrsqrt.f32 %v136_v2 }
 0x130   :  { %v137_v7 = vadd.f32 1e-05, %v129_v5  ;;  %v138_v8 = vadd.f32 1e-05, %v130_v6 }
 0x131   :  { %v119_v9 = vpop.xlane.xlu1 %118  ;;  %v122_v10 = vpop.xlane.xlu0 %121 }
 0x132   :  { %9534 = vrsqrt.f32 %v137_v7  ;;  %v131_v11 = vmul.f32 0.03125, %v119_v9  ;;  %v132_v12 = vmul.f32 0.03125, %v122_v10 }
 0x133   :  { %9536 = vrsqrt.f32 %v138_v8 }
 0x134   :  { %v9529_v13 = vpop.eup %9528  ;;  %v139_v14 = vadd.f32 1e-05, %v131_v11  ;;  %v140_v15 = vadd.f32 1e-05, %v132_v12 }
 0x135   :  { %v125_v16 = vpop.xlane.xlu1 %124  ;;  %v150_v17 = vmul.f32 %v9529_v13, %v9953_v20 }
 0x136   :  { %9538 = vrsqrt.f32 %v139_v14  ;;  %v133_v18 = vmul.f32 0.03125, %v125_v16 }
 0x137   :  { %9540 = vrsqrt.f32 %v140_v15  ;;  %v164_v26 = vmul.f32 %v8223_v19, %v150_v17 }
 0x138   :  { %v9531_v22 = vpop.eup %9530  ;;  %v141_v23 = vadd.f32 1e-05, %v133_v18 }
 0x139   :  { %v9533_v24 = vpop.eup %9532  ;;  %v151_v25 = vmul.f32 %v9531_v22, %v9961_v28  ;;  %v178_v33 = vadd.f32 %v8224_v27, %v164_v26 }
 0x13a   :  { %9542 = vrsqrt.f32 %v141_v23  ;;  %v152_v20 = vmul.f32 %v9533_v24, %v9955_v21 }
 0x13b   :  { %v165_v30 = vmul.f32 %v8223_v19, %v151_v25 }
 0x13c   :  { %v9535_v31 = vpop.eup %9534  ;;  %v166_v36 = vmul.f32 %v8223_v19, %v152_v20 }
 0x13d   :  { %v9537_v32 = vpop.eup %9536  ;;  %v179_v34 = vadd.f32 %v8224_v27, %v165_v30  ;;  %v153_v35 = vmul.f32 %v9535_v31, %v9963_v29 }
 0x13e   :  { %v154_v37 = vmul.f32 %v9537_v32, %v9971_v38  ;;  %v180_v43 = vadd.f32 %v8224_v27, %v166_v36 }
 0x13f   :  { %v186_v40 = vpack.c.bf16 %v179_v34, %v178_v33  ;;  %v167_v28 = vmul.f32 %v8223_v19, %v153_v35 }
 0x140   :  { %v9539_v41 = vpop.eup %9538  ;;  %v168_v45 = vmul.f32 %v8223_v19, %v154_v37 }
 0x141   :  { %v9541_v42 = vpop.eup %9540  ;;  %8674 = vmatprep.mubr.msk.bf16.mxu1 %vm52_vm0, %v186_v40  ;;  %v181_v44 = vadd.f32 %v8224_v27, %v167_v28  ;;  %v155_v21 = vmul.f32 %v9539_v41, %v9973_v39 }
 0x142   :  { %v156_v46 = vmul.f32 %v9541_v42, %v9981_v48  ;;  %v182_v29 = vadd.f32 %v8224_v27, %v168_v45  ;;  %v12380_v48 = vmov 0.0  }
 0x143   :  { %v187_v47 = vpack.c.bf16 %v181_v44, %v180_v43  ;;  %v169_v50 = vmul.f32 %v8223_v19, %v155_v21  ;;  %8682 = vmatprep.subr.bf16.mxu1 %v12380_v48  ;;  %8694 = vmatprep.subr.bf16.mxu0 %v12380_v48 }
 0x144   :  { %v9543_v51 = vpop.eup %9542  ;;  %v170_v53 = vmul.f32 %v8223_v19, %v156_v46  ;;  %8696 = vmatprep.mubr.msk.bf16.mxu0 %vm9841_vm1, %v12380_v48 }
 0x145   :  { %8675 = vmatmul.mubr.msk.bf16.vlgmr.msra.gmra.mrb[0].mxu1 %vm52_vm0, %v187_v47  ;;  %v183_v38 = vadd.f32 %v8224_v27, %v169_v50  ;;  %v157_v52 = vmul.f32 %v9543_v51, %v9983_v49 }
 0x146   :  { %v184_v56 = vadd.f32 %v8224_v27, %v170_v53 }
 0x147   :  { %v188_v54 = vpack.c.bf16 %v183_v38, %v182_v29  ;;  %v171_v55 = vmul.f32 %v8223_v19, %v157_v52 }
 0x149   :  { %8678 = vmatprep.mubr.msk.bf16.mxu1 %vm52_vm0, %v188_v54  ;;  %v185_v57 = vadd.f32 %v8224_v27, %v171_v55 }
 0x14b   :  { %v189_v39 = vpack.c.bf16 %v185_v57, %v184_v56 }
 0x14d   :  { %8679 = vmatmul.mubr.msk.bf16.gmra.mrb[4].mxu1 %vm52_vm0, %v189_v39 }
 0x14e   :  { %8684 = vmatprep.mubr.msk.bf16.mxu1 %vm9841_vm1, %v12380_v48 }
 0x218   :  { %v8676_v49 = vpop.f32.mrb[0].mxu1 }
 0x219   :  { %v252_v58 = vpop.f32.mrb[1].mxu1  ;;  %v10029_v0 = vpack.c.bf16 %v8676_v49, %v8676_v49  ;;  %v293_v8 = vcombine.high %v8676_v49, %v8676_v49 }
 0x21a   :  { %v291_v59 = vcombine.high %v252_v58, %v252_v58  ;;  %v10023_v60 = vpack.c.bf16 %v252_v58, %v252_v58  ;;  %v8677_v61 = vpop.f32.mrb[2].mxu1 }
 0x21b   :  { %v255_v62 = vpop.f32.mrb[3].mxu1  ;;  %v10037_v5 = vpack.c.bf16 %v8677_v61, %v8677_v61  ;;  %v10049_v11 = vpack.c.bf16 %v293_v8, %v293_v8  ;;  %v294_v12 = vcombine.high %v8677_v61, %v8677_v61 }
 0x21c   :  { %v10025_v63 = vpack.c.bf16 %v291_v59, %v291_v59  ;;  %324 = vrot.lane.b32.xlu0 %v10023_v60, %s9842_s1  ;;  %v292_v1 = vcombine.high %v255_v62, %v255_v62  ;;  %v10033_v2 = vpack.c.bf16 %v255_v62, %v255_v62 }
 0x21d   :  { %v10057_v14 = vpack.c.bf16 %v294_v12, %v294_v12 }
 0x21e   :  { %374 = vrot.lane.b32.xlu1 %v10025_v63, %s9842_s1  ;;  %v10041_v9 = vpack.c.bf16 %v292_v1, %v292_v1 }
 0x220   :  { %521 = vrot.lane.b32.xlu0 %v10029_v0, %s9842_s1  ;;  %v8680_v3 = vpop.f32.mrb[4].mxu1 }
 0x221   :  { %v268_v4 = vpop.f32.mrb[5].mxu1  ;;  %v10061_v16 = vpack.c.bf16 %v8680_v3, %v8680_v3  ;;  %v297_v22 = vcombine.high %v8680_v3, %v8680_v3 }
 0x222   :  { %423 = vrot.lane.b32.xlu1 %v10033_v2, %s9842_s1  ;;  %v8681_v6 = vpop.f32.mrb[6].mxu1  ;;  %v10045_v10 = vpack.c.bf16 %v268_v4, %v268_v4  ;;  %v295_v15 = vcombine.high %v268_v4, %v268_v4 }
 0x223   :  { %v271_v7 = vpop.f32.mrb[7].mxu1  ;;  %v10069_v19 = vpack.c.bf16 %v8681_v6, %v8681_v6  ;;  %v10079_v24 = vpack.c.bf16 %v297_v22, %v297_v22  ;;  %v298_v25 = vcombine.high %v8681_v6, %v8681_v6 }
 0x224   :  { %619 = vrot.lane.b32.xlu0 %v10037_v5, %s9842_s1  ;;  %v10053_v13 = vpack.c.bf16 %v271_v7, %v271_v7  ;;  %v10065_v17 = vpack.c.bf16 %v295_v15, %v295_v15  ;;  %v296_v18 = vcombine.high %v271_v7, %v271_v7 }
 0x225   :  { %v10085_v26 = vpack.c.bf16 %v298_v25, %v298_v25 }
 0x226   :  { %472 = vrot.lane.b32.xlu1 %v10041_v9, %s9842_s1  ;;  %v10073_v23 = vpack.c.bf16 %v296_v18, %v296_v18 }
 0x228   :  { %717 = vrot.lane.b32.xlu0 %v10045_v10, %s9842_s1 }
 0x22a   :  { %570 = vrot.lane.b32.xlu1 %v10049_v11, %s9842_s1 }
 0x22c   :  { %815 = vrot.lane.b32.xlu0 %v10053_v13, %s9842_s1 }
 0x22e   :  { %668 = vrot.lane.b32.xlu1 %v10057_v14, %s9842_s1 }
 0x230   :  { %913 = vrot.lane.b32.xlu0 %v10061_v16, %s9842_s1 }
 0x232   :  { %766 = vrot.lane.b32.xlu1 %v10065_v17, %s9842_s1 }
 0x234   :  { %1011 = vrot.lane.b32.xlu0 %v10069_v19, %s9842_s1 }
 0x236   :  { %864 = vrot.lane.b32.xlu1 %v10073_v23, %s9842_s1 }
 0x238   :  { %1301 = vrot.lane.b32.xlu0 %v10023_v60, %s9843_s2 }
 0x23a   :  { %962 = vrot.lane.b32.xlu1 %v10079_v24, %s9842_s1 }
 0x23c   :  { %1399 = vrot.lane.b32.xlu0 %v10033_v2, %s9843_s2 }
 0x23e   :  { %1060 = vrot.lane.b32.xlu1 %v10085_v26, %s9842_s1 }
 0x240   :  { %1495 = vrot.lane.b32.xlu0 %v10029_v0, %s9843_s2 }
 0x242   :  { %1351 = vrot.lane.b32.xlu1 %v10025_v63, %s9843_s2 }
 0x244   :  { %1591 = vrot.lane.b32.xlu0 %v10037_v5, %s9843_s2 }
 0x246   :  { %1447 = vrot.lane.b32.xlu1 %v10041_v9, %s9843_s2 }
 0x248   :  { %1687 = vrot.lane.b32.xlu0 %v10045_v10, %s9843_s2 }
 0x24a   :  { %1543 = vrot.lane.b32.xlu1 %v10049_v11, %s9843_s2 }
 0x24e   :  { %1639 = vrot.lane.b32.xlu1 %v10057_v14, %s9843_s2 }
 0x252   :  { %1735 = vrot.lane.b32.xlu1 %v10065_v17, %s9843_s2 }
 0x256   :  { %1783 = vrot.lane.b32.xlu1 %v10053_v13, %s9843_s2 }
 0x28e   :  { %v325_v27 = vpop.permute.xlu0 %324 }
 0x28f   :  { %v331_v20 = vsel %vm326_vm2, %v325_v27, 0 }
 0x290   :  { %v375_v30 = vpop.permute.xlu1 %374  ;;  %8683 = vmatpush3.bf16.xpose.msra.mxu1 %v331_v20 }
 0x291   :  { %8688 = vmatprep.subr.bf16.mxu1 %v12380_v48  ;;  %v380_v33 = vsel %vm326_vm2, %v375_v30, 0 }
 0x292   :  { %v522_v34 = vpop.permute.xlu0 %521 }
 0x293   :  { %v527_v36 = vsel %vm326_vm2, %v522_v34, 0 }
 0x294   :  { %v424_v31 = vpop.permute.xlu1 %423 }
 0x295   :  { %v429_v32 = vsel %vm326_vm2, %v424_v31, 0 }
 0x296   :  { %8695 = vmatpush3.bf16.xpose.msra.mxu0 %v429_v32  ;;  %v620_v40 = vpop.permute.xlu0 %619 }
 0x297   :  { %8685 = vmatmul.mubr.msk.bf16.vlgmr.msra.gmra.mrb[8].mxu1 %vm326_vm2, %v10023_v60  ;;  %8706 = vmatprep.subr.bf16.mxu0 %v12380_v48  ;;  %v625_v41 = vsel %vm326_vm2, %v620_v40, 0 }
 0x298   :  { %8689 = vmatpush3.bf16.xpose.msra.mxu1 %v380_v33  ;;  %8690 = vmatprep.mubr.msk.bf16.mxu1 %vm9841_vm1, %v12380_v48  ;;  %v473_v35 = vpop.permute.xlu1 %472 }
 0x299   :  { %8700 = vmatprep.subr.bf16.mxu1 %v12380_v48  ;;  %v478_v37 = vsel %vm326_vm2, %v473_v35, 0 }
 0x29a   :  { %v718_v43 = vpop.permute.xlu0 %717 }
 0x29b   :  { %v723_v21 = vsel %vm326_vm2, %v718_v43, 0 }
 0x29c   :  { %v571_v28 = vpop.permute.xlu1 %570 }
 0x29d   :  { %8697 = vmatmul.mubr.msk.bf16.vlgmr.msra.gmra.mrb[0].mxu0 %vm326_vm2, %v10033_v2  ;;  %v576_v42 = vsel %vm326_vm2, %v571_v28, 0 }
 0x29e   :  { %8707 = vmatpush3.bf16.xpose.msra.mxu0 %v527_v36  ;;  %8708 = vmatprep.mubr.msk.bf16.mxu0 %vm9841_vm1, %v12380_v48  ;;  %v816_v46 = vpop.permute.xlu0 %815 }
 0x29f   :  { %8691 = vmatmul.mubr.msk.bf16.vlgmr.msra.gmra.mrb[12].mxu1 %vm326_vm2, %v10025_v63  ;;  %8718 = vmatprep.subr.bf16.mxu0 %v12380_v48  ;;  %v821_v50 = vsel %vm326_vm2, %v816_v46, 0 }
 0x2a0   :  { %8701 = vmatpush3.bf16.xpose.msra.mxu1 %v478_v37  ;;  %8702 = vmatprep.mubr.msk.bf16.mxu1 %vm9841_vm1, %v12380_v48  ;;  %v669_v44 = vpop.permute.xlu1 %668 }
 0x2a1   :  { %8712 = vmatprep.subr.bf16.mxu1 %v12380_v48  ;;  %v674_v45 = vsel %vm326_vm2, %v669_v44, 0 }
 0x2a2   :  { %v914_v29 = vpop.permute.xlu0 %913 }
 0x2a3   :  { %v919_v52 = vsel %vm326_vm2, %v914_v29, 0 }
 0x2a4   :  { %v767_v47 = vpop.permute.xlu1 %766 }
 0x2a5   :  { %8709 = vmatmul.mubr.msk.bf16.vlgmr.msra.gmra.mrb[4].mxu0 %vm326_vm2, %v10029_v0  ;;  %v772_v51 = vsel %vm326_vm2, %v767_v47, 0 }
 0x2a6   :  { %8719 = vmatpush3.bf16.xpose.msra.mxu0 %v625_v41  ;;  %8720 = vmatprep.mubr.msk.bf16.mxu0 %vm9841_vm1, %v12380_v48  ;;  %v1012_v54 = vpop.permute.xlu0 %1011 }
 0x2a7   :  { %8703 = vmatmul.mubr.msk.bf16.vlgmr.msra.gmra.mrb[16].mxu1 %vm326_vm2, %v10041_v9  ;;  %8730 = vmatprep.subr.bf16.mxu0 %v12380_v48  ;;  %v1017_v56 = vsel %vm326_vm2, %v1012_v54, 0 }
 0x2a8   :  { %8713 = vmatpush3.bf16.xpose.msra.mxu1 %v576_v42  ;;  %8714 = vmatprep.mubr.msk.bf16.mxu1 %vm9841_vm1, %v12380_v48  ;;  %v865_v38 = vpop.permute.xlu1 %864 }
 0x2a9   :  { %8724 = vmatprep.subr.bf16.mxu1 %v12380_v48  ;;  %v870_v53 = vsel %vm326_vm2, %v865_v38, 0 }
 0x2aa   :  { %v1302_v39 = vpop.permute.xlu0 %1301 }
 0x2ab   :  { %v1309_v58 = vsel %vm1307_vm3, %v1302_v39, 0 }
 0x2ac   :  { %v963_v55 = vpop.permute.xlu1 %962 }
 0x2ad   :  { %8721 = vmatmul.mubr.msk.bf16.vlgmr.msra.gmra.mrb[8].mxu0 %vm326_vm2, %v10037_v5  ;;  %v968_v57 = vsel %vm326_vm2, %v963_v55, 0 }
 0x2ae   :  { %8731 = vmatpush3.bf16.xpose.msra.mxu0 %v723_v21  ;;  %8732 = vmatprep.mubr.msk.bf16.mxu0 %vm9841_vm1, %v12380_v48 }
 0x2af   :  { %8715 = vmatmul.mubr.msk.bf16.vlgmr.msra.gmra.mrb[20].mxu1 %vm326_vm2, %v10049_v11  ;;  %8742 = vmatprep.subr.bf16.mxu0 %v12380_v48 }
 0x2b0   :  { %8725 = vmatpush3.bf16.xpose.msra.mxu1 %v674_v45  ;;  %8726 = vmatprep.mubr.msk.bf16.mxu1 %vm9841_vm1, %v12380_v48  ;;  %v1061_v49 = vpop.permute.xlu1 %1060 }
 0x2b1   :  { %8736 = vmatprep.subr.bf16.mxu1 %v12380_v48  ;;  %v1066_v59 = vsel %vm326_vm2, %v1061_v49, 0 }
 0x2b4   :  { %v1352_v61 = vpop.permute.xlu1 %1351 }
 0x2b5   :  { %8733 = vmatmul.mubr.msk.bf16.vlgmr.msra.gmra.mrb[12].mxu0 %vm326_vm2, %v10045_v10  ;;  %v1357_v62 = vsel %vm1307_vm3, %v1352_v61, 0 }
 0x2b6   :  { %8743 = vmatpush3.bf16.xpose.msra.mxu0 %v821_v50  ;;  %8744 = vmatprep.mubr.msk.bf16.mxu0 %vm9841_vm1, %v12380_v48 }
 0x2b7   :  { %8727 = vmatmul.mubr.msk.bf16.vlgmr.msra.gmra.mrb[24].mxu1 %vm326_vm2, %v10057_v14  ;;  %8754 = vmatprep.subr.bf16.mxu0 %v12380_v48 }
 0x2b8   :  { %8737 = vmatpush3.bf16.xpose.msra.mxu1 %v772_v51  ;;  %8738 = vmatprep.mubr.msk.bf16.mxu1 %vm9841_vm1, %v12380_v48 }
 0x2b9   :  { %8748 = vmatprep.subr.bf16.mxu1 %v12380_v48 }
 0x2bd   :  { %8745 = vmatmul.mubr.msk.bf16.vlgmr.msra.gmra.mrb[16].mxu0 %vm326_vm2, %v10053_v13 }
 0x2be   :  { %8755 = vmatpush3.bf16.xpose.msra.mxu0 %v919_v52  ;;  %8756 = vmatprep.mubr.msk.bf16.mxu0 %vm9841_vm1, %v12380_v48 }
 0x2bf   :  { %8739 = vmatmul.mubr.msk.bf16.vlgmr.msra.gmra.mrb[28].mxu1 %vm326_vm2, %v10065_v17  ;;  %8766 = vmatprep.subr.bf16.mxu0 %v12380_v48 }
 0x2c0   :  { %8749 = vmatpush3.bf16.xpose.msra.mxu1 %v870_v53  ;;  %8750 = vmatprep.mubr.msk.bf16.mxu1 %vm9841_vm1, %v12380_v48 }
 0x2c1   :  { %8760 = vmatprep.subr.bf16.mxu1 %v12380_v48 }
 0x2c5   :  { %8757 = vmatmul.mubr.msk.bf16.vlgmr.msra.gmra.mrb[20].mxu0 %vm326_vm2, %v10061_v16 }
 0x2c6   :  { %8767 = vmatpush3.bf16.xpose.msra.mxu0 %v1017_v56  ;;  %8768 = vmatprep.mubr.msk.bf16.mxu0 %vm9841_vm1, %v12380_v48 }
 0x2c7   :  { %8751 = vmatmul.mubr.msk.bf16.vlgmr.msra.gmra.mrb[32].mxu1 %vm326_vm2, %v10073_v23  ;;  %8778 = vmatprep.subr.bf16.mxu0 %v12380_v48 }
 0x2c8   :  { %8761 = vmatpush3.bf16.xpose.msra.mxu1 %v968_v57  ;;  %8762 = vmatprep.mubr.msk.bf16.mxu1 %vm9841_vm1, %v12380_v48 }
 0x2c9   :  { %8772 = vmatprep.subr.bf16.mxu1 %v12380_v48 }
 0x2cd   :  { %8769 = vmatmul.mubr.msk.bf16.vlgmr.msra.gmra.mrb[24].mxu0 %vm326_vm2, %v10069_v19 }
 0x2ce   :  { %8779 = vmatpush3.bf16.msra.mxu0 %v1309_v58  ;;  %8780 = vmatprep.mubr.msk.bf16.mxu0 %vm9841_vm1, %v12380_v48 }
 0x2cf   :  { %8763 = vmatmul.mubr.msk.bf16.vlgmr.msra.gmra.mrb[36].mxu1 %vm326_vm2, %v10079_v24  ;;  %8790 = vmatprep.subr.bf16.mxu0 %v12380_v48 }
 0x2d0   :  { %8773 = vmatpush3.bf16.xpose.msra.mxu1 %v1066_v59  ;;  %8774 = vmatprep.mubr.msk.bf16.mxu1 %vm9841_vm1, %v12380_v48 }
 0x2d1   :  { %8784 = vmatprep.subr.bf16.mxu1 %v12380_v48 }
 0x2d7   :  { %8775 = vmatmul.mubr.msk.bf16.vlgmr.msra.gmra.mrb[40].mxu1 %vm326_vm2, %v10085_v26 }
 0x2d8   :  { %8785 = vmatpush3.bf16.msra.mxu1 %v1357_v62  ;;  %8786 = vmatprep.mubr.msk.bf16.mxu1 %vm9841_vm1, %v12380_v48 }
 0x2d9   :  { %8796 = vmatprep.subr.bf16.mxu1 %v12380_v48 }
 0x36a   :  { %v10209_v1 = vpop.f32.mrb[8].mxu1 }
 0x36b   :  { %v8686_v3 = vpop.f32.mrb[9].mxu1  ;;  %v1109_v4 = vsel %vm1108_vm4, %v10209_v1, -inf }
 0x36c   :  { %1110 = vmax.xlane.f32.xlu0 %v1109_v4  ;;  %v370_v6 = vpop.f32.mrb[10].mxu1 }
 0x36d   :  { %v8687_v7 = vpop.f32.mrb[11].mxu1 }
 0x370   :  { %v10213_v8 = vpop.f32.mrb[0].mxu0 }
 0x371   :  { %v8698_v12 = vpop.f32.mrb[1].mxu0  ;;  %v1115_v15 = vsel %vm1108_vm4, %v10213_v8, -inf }
 0x372   :  { %v468_v18 = vpop.f32.mrb[2].mxu0  ;;  %1116 = vmax.xlane.f32.xlu0 %v1115_v15  ;;  %v10217_v22 = vpop.f32.mrb[12].mxu1 }
 0x373   :  { %v8692_v25 = vpop.f32.mrb[13].mxu1  ;;  %v8699_v27 = vpop.f32.mrb[3].mxu0  ;;  %v1112_v20 = vsel %vm1108_vm4, %v10217_v22, -inf }
 0x374   :  { %1113 = vmax.xlane.f32.xlu1 %v1112_v20  ;;  %v419_v30 = vpop.f32.mrb[14].mxu1 }
 0x375   :  { %v8693_v31 = vpop.f32.mrb[15].mxu1 }
 0x378   :  { %v10221_v32 = vpop.f32.mrb[4].mxu0 }
 0x379   :  { %v8710_v33 = vpop.f32.mrb[5].mxu0  ;;  %v1121_v34 = vsel %vm1108_vm4, %v10221_v32, -inf }
 0x37a   :  { %v10225_v35 = vpop.f32.mrb[16].mxu1  ;;  %1122 = vmax.xlane.f32.xlu0 %v1121_v34  ;;  %v566_v36 = vpop.f32.mrb[6].mxu0 }
 0x37b   :  { %v8704_v37 = vpop.f32.mrb[17].mxu1  ;;  %v8711_v40 = vpop.f32.mrb[7].mxu0  ;;  %v1118_v42 = vsel %vm1108_vm4, %v10225_v35, -inf }
 0x37c   :  { %v517_v28 = vpop.f32.mrb[18].mxu1 }
 0x37d   :  { %v8705_v41 = vpop.f32.mrb[19].mxu1 }
 0x37e   :  { %1119 = vmax.xlane.f32.xlu0 %v1118_v42 }
 0x380   :  { %v10229_v43 = vpop.f32.mrb[8].mxu0 }
 0x381   :  { %v8722_v44 = vpop.f32.mrb[9].mxu0  ;;  %v1127_v21 = vsel %vm1108_vm4, %v10229_v43, -inf }
 0x382   :  { %v10233_v45 = vpop.f32.mrb[20].mxu1  ;;  %1128 = vmax.xlane.f32.xlu0 %v1127_v21  ;;  %v664_v46 = vpop.f32.mrb[10].mxu0 }
 0x383   :  { %v8716_v47 = vpop.f32.mrb[21].mxu1  ;;  %v8723_v50 = vpop.f32.mrb[11].mxu0  ;;  %v1124_v51 = vsel %vm1108_vm4, %v10233_v45, -inf }
 0x384   :  { %1125 = vmax.xlane.f32.xlu1 %v1124_v51  ;;  %v615_v29 = vpop.f32.mrb[22].mxu1 }
 0x385   :  { %v8717_v38 = vpop.f32.mrb[23].mxu1 }
 0x388   :  { %v10237_v52 = vpop.f32.mrb[12].mxu0 }
 0x389   :  { %v8734_v53 = vpop.f32.mrb[13].mxu0  ;;  %v1133_v54 = vsel %vm1108_vm4, %v10237_v52, -inf }
 0x38a   :  { %v10241_v55 = vpop.f32.mrb[24].mxu1  ;;  %1134 = vmax.xlane.f32.xlu0 %v1133_v54  ;;  %v762_v56 = vpop.f32.mrb[14].mxu0 }
 0x38b   :  { %v8728_v57 = vpop.f32.mrb[25].mxu1  ;;  %v8735_v39 = vpop.f32.mrb[15].mxu0  ;;  %v1130_v49 = vsel %vm1108_vm4, %v10241_v55, -inf }
 0x38c   :  { %1131 = vmax.xlane.f32.xlu1 %v1130_v49  ;;  %v713_v58 = vpop.f32.mrb[26].mxu1  ;;  %v10277_v49 = vpop.permute.xlu0 %1399 }
 0x38d   :  { %v8729_v59 = vpop.f32.mrb[27].mxu1  ;;  %v10279_v58 = vpop.permute.xlu1 %1447 }
 0x390   :  { %v10245_v61 = vpop.f32.mrb[16].mxu0  ;;  %v10281_v59 = vpop.permute.xlu0 %1495 }
 0x391   :  { %v8746_v62 = vpop.f32.mrb[17].mxu0  ;;  %v1139_v3 = vsel %vm1108_vm4, %v10245_v61, -inf }
 0x392   :  { %v10249_v4 = vpop.f32.mrb[28].mxu1  ;;  %1140 = vmax.xlane.f32.xlu0 %v1139_v3  ;;  %v860_v6 = vpop.f32.mrb[18].mxu0 }
 0x393   :  { %v8740_v7 = vpop.f32.mrb[29].mxu1  ;;  %v8747_v12 = vpop.f32.mrb[19].mxu0  ;;  %v1136_v15 = vsel %vm1108_vm4, %v10249_v4, -inf }
 0x394   :  { %1137 = vmax.xlane.f32.xlu1 %v1136_v15  ;;  %v811_v18 = vpop.f32.mrb[30].mxu1  ;;  %v10283_v62 = vpop.permute.xlu1 %1543 }
 0x395   :  { %v8741_v25 = vpop.f32.mrb[31].mxu1  ;;  %v10285_v3 = vpop.permute.xlu0 %1591 }
 0x398   :  { %v10253_v27 = vpop.f32.mrb[20].mxu0  ;;  %v10287_v6 = vpop.permute.xlu1 %1639 }
 0x399   :  { %v8758_v20 = vpop.f32.mrb[21].mxu0  ;;  %v1145_v30 = vsel %vm1108_vm4, %v10253_v27, -inf  ;;  %v10289_v7 = vpop.permute.xlu0 %1687 }
 0x39a   :  { %v10257_v31 = vpop.f32.mrb[32].mxu1  ;;  %1146 = vmax.xlane.f32.xlu0 %v1145_v30  ;;  %v958_v33 = vpop.f32.mrb[22].mxu0 }
 0x39b   :  { %v8752_v34 = vpop.f32.mrb[33].mxu1  ;;  %v8759_v36 = vpop.f32.mrb[23].mxu0  ;;  %v1142_v56 = vsel %vm1108_vm4, %v10257_v31, -inf }
 0x39c   :  { %v909_v37 = vpop.f32.mrb[34].mxu1  ;;  %v10291_v12 = vpop.permute.xlu1 %1735 }
 0x39d   :  { %v8753_v40 = vpop.f32.mrb[35].mxu1 }
 0x3a0   :  { %v10259_v28 = vpop.f32.mrb[24].mxu0  ;;  %v10294_v20 = vpop.permute.xlu1 %1783 }
 0x3a1   :  { %v8770_v41 = vpop.f32.mrb[25].mxu0  ;;  %v1151_v42 = vsel %vm1108_vm4, %v10259_v28, -inf }
 0x3a2   :  { %v10263_v44 = vpop.f32.mrb[36].mxu1  ;;  %1152 = vmax.xlane.f32.xlu0 %v1151_v42  ;;  %v1056_v21 = vpop.f32.mrb[26].mxu0 }
 0x3a3   :  { %v8764_v46 = vpop.f32.mrb[37].mxu1  ;;  %v8771_v47 = vpop.f32.mrb[27].mxu0  ;;  %v1148_v57 = vsel %vm1108_vm4, %v10263_v44, -inf }
 0x3a4   :  { %v1007_v50 = vpop.f32.mrb[38].mxu1 }
 0x3a5   :  { %1831 = vrot.lane.b32.xlu1 %v10073_v23, %s9843_s2  ;;  %v8765_v51 = vpop.f32.mrb[39].mxu1 }
 0x3aa   :  { %v10267_v29 = vpop.f32.mrb[40].mxu1 }
 0x3ab   :  { %v8776_v38 = vpop.f32.mrb[41].mxu1  ;;  %v1154_v39 = vsel %vm1108_vm4, %v10267_v29, -inf }
 0x3ac   :  { %v1105_v53 = vpop.f32.mrb[42].mxu1 }
 0x3ad   :  { %v8777_v54 = vpop.f32.mrb[43].mxu1 }
 0x3b8   :  { %1879 = vrot.lane.b32.xlu0 %v10061_v16, %s9843_s2 }
 0x3c9   :  { %1143 = vmax.xlane.f32.xlu1 %v1142_v56 }
 0x3cd   :  { %1149 = vmax.xlane.f32.xlu1 %v1148_v57 }
 0x3d1   :  { %1155 = vmax.xlane.f32.xlu1 %v1154_v39 }
 0x3f9   :  { %v1111_v15 = vpop.xlane.xlu0 %1110 }
 0x3fa   :  { %v1157_v18 = vsub.f32 %v10209_v1, %v1111_v15 }
 0x3fc   :  { %v1173_v25 = vmul.f32 1.442695, %v1157_v18 }
 0x3fe   :  { %9544 = vpow2.f32 %v1173_v25 }
 0x3ff   :  { %v1117_v30 = vpop.xlane.xlu0 %1116 }
 0x400   :  { %v1159_v33 = vsub.f32 %v10213_v8, %v1117_v30 }
 0x401   :  { %v1114_v34 = vpop.xlane.xlu1 %1113 }
 0x402   :  { %v1177_v36 = vmul.f32 1.442695, %v1159_v33  ;;  %v1158_v37 = vsub.f32 %v10217_v22, %v1114_v34 }
 0x404   :  { %9546 = vpow2.f32 %v1177_v36  ;;  %v1175_v40 = vmul.f32 1.442695, %v1158_v37 }
 0x406   :  { %9548 = vpow2.f32 %v1175_v40 }
 0x407   :  { %v1123_v41 = vpop.xlane.xlu0 %1122 }
 0x408   :  { %v10298_v42 = vpop.eup %9544  ;;  %v1161_v21 = vsub.f32 %v10221_v32, %v1123_v41 }
 0x409   :  { %v1205_v1 = vsel %vm1108_vm4, %v10298_v42, 0.0 }
 0x40a   :  { %v1181_v46 = vmul.f32 1.442695, %v1161_v21  ;;  %1206 = vadd.xlane.f32.xlu0 %v1205_v1 }
 0x40b   :  { %v1120_v47 = vpop.xlane.xlu0 %1119 }
 0x40c   :  { %9550 = vpow2.f32 %v1181_v46  ;;  %v1160_v8 = vsub.f32 %v10225_v35, %v1120_v47 }
 0x40e   :  { %v10304_v50 = vpop.eup %9546  ;;  %v1179_v22 = vmul.f32 1.442695, %v1160_v8 }
 0x40f   :  { %v1129_v51 = vpop.xlane.xlu0 %1128  ;;  %v1211_v38 = vsel %vm1108_vm4, %v10304_v50, 0.0 }
 0x410   :  { %v10308_v53 = vpop.eup %9548  ;;  %9552 = vpow2.f32 %v1179_v22  ;;  %v1163_v32 = vsub.f32 %v10229_v43, %v1129_v51  ;;  %1212 = vadd.xlane.f32.xlu0 %v1211_v38 }
 0x411   :  { %v1126_v54 = vpop.xlane.xlu1 %1125  ;;  %v1208_v56 = vsel %vm1108_vm4, %v10308_v53, 0.0 }
 0x412   :  { %v1185_v57 = vmul.f32 1.442695, %v1163_v32  ;;  %v1162_v35 = vsub.f32 %v10233_v45, %v1126_v54  ;;  %1209 = vadd.xlane.f32.xlu1 %v1208_v56 }
 0x414   :  { %9554 = vpow2.f32 %v1185_v57  ;;  %v1183_v39 = vmul.f32 1.442695, %v1162_v35 }
 0x416   :  { %v10314_v15 = vpop.eup %9550  ;;  %9556 = vpow2.f32 %v1183_v39 }
 0x417   :  { %v1135_v18 = vpop.xlane.xlu0 %1134  ;;  %v1217_v25 = vsel %vm1108_vm4, %v10314_v15, 0.0 }
 0x418   :  { %v1165_v43 = vsub.f32 %v10237_v52, %v1135_v18  ;;  %1218 = vadd.xlane.f32.xlu0 %v1217_v25 }
 0x419   :  { %v1132_v30 = vpop.xlane.xlu1 %1131 }
 0x41a   :  { %v10319_v33 = vpop.eup %9552  ;;  %v1189_v34 = vmul.f32 1.442695, %v1165_v43  ;;  %v1164_v36 = vsub.f32 %v10241_v55, %v1132_v30 }
 0x41b   :  { %v1214_v45 = vsel %vm1108_vm4, %v10319_v33, 0.0 }
 0x41c   :  { %9558 = vpow2.f32 %v1189_v34  ;;  %v1187_v37 = vmul.f32 1.442695, %v1164_v36  ;;  %1215 = vadd.xlane.f32.xlu1 %v1214_v45 }
 0x41e   :  { %v10324_v40 = vpop.eup %9554  ;;  %9560 = vpow2.f32 %v1187_v37 }
 0x41f   :  { %v1223_v41 = vsel %vm1108_vm4, %v10324_v40, 0.0  ;;  %v1141_v32 = vpop.xlane.xlu0 %1140 }
 0x420   :  { %v10328_v52 = vpop.eup %9556  ;;  %1224 = vadd.xlane.f32.xlu0 %v1223_v41  ;;  %v1167_v54 = vsub.f32 %v10245_v61, %v1141_v32 }
 0x421   :  { %v1138_v21 = vpop.xlane.xlu1 %1137  ;;  %v1220_v1 = vsel %vm1108_vm4, %v10328_v52, 0.0 }
 0x422   :  { %v1166_v55 = vsub.f32 %v10249_v4, %v1138_v21  ;;  %1221 = vadd.xlane.f32.xlu1 %v1220_v1  ;;  %v1193_v57 = vmul.f32 1.442695, %v1167_v54 }
 0x424   :  { %v1191_v46 = vmul.f32 1.442695, %v1166_v55 }
 0x425   :  { %v10349_v18 = vpop.permute.xlu1 %1831 }
 0x426   :  { %v10333_v47 = vpop.eup %9558  ;;  %9562 = vpow2.f32 %v1191_v46 }
 0x427   :  { %v1229_v8 = vsel %vm1108_vm4, %v10333_v47, 0.0  ;;  %v1147_v56 = vpop.xlane.xlu0 %1146  ;;  %9564 = vpow2.f32 %v1193_v57 }
 0x428   :  { %v10337_v22 = vpop.eup %9560  ;;  %1230 = vadd.xlane.f32.xlu1 %v1229_v8  ;;  %v1169_v35 = vsub.f32 %v10253_v27, %v1147_v56 }
 0x429   :  { %v1226_v51 = vsel %vm1108_vm4, %v10337_v22, 0.0 }
 0x42a   :  { %v1197_v43 = vmul.f32 1.442695, %v1169_v35 }
 0x42c   :  { %1227 = vadd.xlane.f32.xlu1 %v1226_v51  ;;  %9566 = vpow2.f32 %v1197_v43 }
 0x42f   :  { %v1153_v39 = vpop.xlane.xlu0 %1152 }
 0x430   :  { %v10341_v38 = vpop.eup %9562  ;;  %v1171_v25 = vsub.f32 %v10259_v28, %v1153_v39 }
 0x431   :  { %v1232_v4 = vsel %vm1108_vm4, %v10341_v38, 0.0  ;;  %v10354_v41 = vpop.eup %9564 }
 0x432   :  { %1233 = vadd.xlane.f32.xlu0 %v1232_v4  ;;  %v1201_v30 = vmul.f32 1.442695, %v1171_v25  ;;  %v1235_v28 = vsel %vm1108_vm4, %v10354_v41, 0.0 }
 0x433   :  { %v10391_v56 = vpop.permute.xlu0 %1879 }
 0x434   :  { %9568 = vpow2.f32 %v1201_v30 }
 0x436   :  { %v10358_v21 = vpop.eup %9566 }
 0x43d   :  { %1927 = vrot.lane.b32.xlu1 %v10079_v24, %s9843_s2 }
 0x43e   :  { %v10360_v1 = vpop.eup %9568 }
 0x43f   :  { %v1247_v46 = vsel %vm1108_vm4, %v10360_v1, 0.0 }
 0x456   :  { %v1144_v34 = vpop.xlane.xlu1 %1143 }
 0x457   :  { %v1168_v36 = vsub.f32 %v10257_v31, %v1144_v34  ;;  %v1241_v31 = vsel %vm1108_vm4, %v10358_v21, 0.0 }
 0x459   :  { %v1195_v45 = vmul.f32 1.442695, %v1168_v36 }
 0x45a   :  { %v1150_v37 = vpop.xlane.xlu1 %1149 }
 0x45b   :  { %9570 = vpow2.f32 %v1195_v45  ;;  %v1170_v61 = vsub.f32 %v10263_v44, %v1150_v37  ;;  %v1405_v45 = vsel %vm1307_vm3, %v10277_v49, 0 }
 0x45d   :  { %v1199_v27 = vmul.f32 1.442695, %v1170_v61 }
 0x45e   :  { %v1156_v4 = vpop.xlane.xlu1 %1155 }
 0x45f   :  { %9572 = vpow2.f32 %v1199_v27  ;;  %v1172_v32 = vsub.f32 %v10267_v29, %v1156_v4 }
 0x461   :  { %1236 = vadd.xlane.f32.xlu1 %v1235_v28  ;;  %v1203_v54 = vmul.f32 1.442695, %v1172_v32 }
 0x463   :  { %9574 = vpow2.f32 %v1203_v54 }
 0x465   :  { %v10364_v55 = vpop.eup %9570  ;;  %1242 = vadd.xlane.f32.xlu1 %v1241_v31 }
 0x466   :  { %v1238_v44 = vsel %vm1108_vm4, %v10364_v55, 0.0 }
 0x467   :  { %1239 = vadd.xlane.f32.xlu0 %v1238_v44 }
 0x469   :  { %v10370_v8 = vpop.eup %9572  ;;  %1248 = vadd.xlane.f32.xlu1 %v1247_v46  ;;  %v1501_v46 = vsel %vm1307_vm3, %v10281_v59, 0 }
 0x46a   :  { %v1244_v51 = vsel %vm1108_vm4, %v10370_v8, 0.0 }
 0x46b   :  { %1245 = vadd.xlane.f32.xlu0 %v1244_v51 }
 0x46d   :  { %v10397_v29 = vpop.eup %9574 }
 0x46e   :  { %v1250_v25 = vsel %vm1108_vm4, %v10397_v29, 0.0 }
 0x47a   :  { %2023 = vrot.lane.b32.xlu1 %v10085_v26, %s9843_s2 }
 0x47e   :  { %2123 = vrot.lane.b32.xlu1 %v10025_v63, %s9844_s26 }
 0x481   :  { %1975 = vrot.lane.b32.xlu0 %v10069_v19, %s9843_s2 }
 0x482   :  { %2121 = vrot.lane.b32.xlu1 %v10025_v63, %s9845_s27 }
 0x486   :  { %2223 = vrot.lane.b32.xlu1 %v10041_v9, %s9844_s26 }
 0x48a   :  { %2221 = vrot.lane.b32.xlu1 %v10041_v9, %s9845_s27 }
 0x48e   :  { %2323 = vrot.lane.b32.xlu1 %v10049_v11, %s9844_s26 }
 0x492   :  { %2321 = vrot.lane.b32.xlu1 %v10049_v11, %s9845_s27 }
 0x496   :  { %2423 = vrot.lane.b32.xlu1 %v10057_v14, %s9844_s26 }
 0x497   :  { %v1207_v57 = vpop.xlane.xlu0 %1206 }
 0x498   :  { %9576 = vrcp.f32 %v1207_v57 }
 0x49a   :  { %2421 = vrot.lane.b32.xlu1 %v10057_v14, %s9845_s27 }
 0x49d   :  { %v1213_v35 = vpop.xlane.xlu0 %1212 }
 0x49e   :  { %9578 = vrcp.f32 %v1213_v35  ;;  %2523 = vrot.lane.b32.xlu1 %v10065_v17, %s9844_s26 }
 0x49f   :  { %v1210_v39 = vpop.xlane.xlu1 %1209 }
 0x4a0   :  { %9580 = vrcp.f32 %v1210_v39  ;;  %1251 = vadd.xlane.f32.xlu0 %v1250_v25 }
 0x4a2   :  { %v9577_v43 = vpop.eup %9576  ;;  %2521 = vrot.lane.b32.xlu1 %v10065_v17, %s9845_s27 }
 0x4a3   :  { %v1269_v30 = vmul.f32 %v9577_v43, %v10298_v42 }
 0x4a5   :  { %v1219_v34 = vpop.xlane.xlu0 %1218  ;;  %v1285_v36 = vpack.c.bf16 %v1269_v30, %v1269_v30 }
 0x4a6   :  { %9582 = vrcp.f32 %v1219_v34  ;;  %2623 = vrot.lane.b32.xlu1 %v10073_v23, %s9844_s26 }
 0x4a7   :  { %8781 = vmatmul.mubr.msk.bf16.vlgmr.msra.gmra.mrb[28].mxu0 %vm1303_vm5, %v1285_v36 }
 0x4a8   :  { %v9579_v37 = vpop.eup %9578  ;;  %8791 = vmatpush3.bf16.msra.mxu0 %v1405_v45  ;;  %8792 = vmatprep.mubr.msk.bf16.mxu0 %vm9841_vm1, %v12380_v48 }
 0x4a9   :  { %v1216_v61 = vpop.xlane.xlu1 %1215  ;;  %8802 = vmatprep.subr.bf16.mxu0 %v12380_v48  ;;  %v1271_v42 = vmul.f32 %v9579_v37, %v10304_v50  ;;  %v1453_v50 = vsel %vm1307_vm3, %v10279_v58, 0 }
 0x4aa   :  { %v9581_v27 = vpop.eup %9580  ;;  %9584 = vrcp.f32 %v1216_v61  ;;  %2621 = vrot.lane.b32.xlu1 %v10073_v23, %s9845_s27 }
 0x4ab   :  { %v1270_v28 = vmul.f32 %v9581_v27, %v10308_v53  ;;  %v1287_v44 = vpack.c.bf16 %v1271_v42, %v1271_v42  ;;  %v1741_v42 = vsel %vm1307_vm3, %v10291_v12, 0  ;;  %v1837_v27 = vsel %vm1307_vm3, %v10349_v18, 0 }
 0x4ad   :  { %v1225_v49 = vpop.xlane.xlu0 %1224  ;;  %v1286_v31 = vpack.c.bf16 %v1270_v28, %v1270_v28 }
 0x4ae   :  { %9586 = vrcp.f32 %v1225_v49  ;;  %2723 = vrot.lane.b32.xlu1 %v10079_v24, %s9844_s26 }
 0x4af   :  { %8787 = vmatmul.mubr.msk.bf16.vlgmr.msra.gmra.mrb[44].mxu1 %vm1303_vm5, %v1286_v31  ;;  %v1222_v51 = vpop.xlane.xlu1 %1221  ;;  %8793 = vmatmul.mubr.msk.bf16.vlgmr.msra.gmra.mrb[32].mxu0 %vm1303_vm5, %v1287_v44 }
 0x4b0   :  { %v9583_v4 = vpop.eup %9582  ;;  %8797 = vmatpush3.bf16.msra.mxu1 %v1453_v50  ;;  %9588 = vrcp.f32 %v1222_v51  ;;  %8803 = vmatpush3.bf16.msra.mxu0 %v1501_v46 }
 0x4b1   :  { %8804 = vmatprep.mubr.msk.bf16.mxu0 %vm9841_vm1, %v12380_v48  ;;  %8814 = vmatprep.subr.bf16.mxu0 %v12380_v48  ;;  %v1273_v53 = vmul.f32 %v9583_v4, %v10314_v15  ;;  %v1597_v15 = vsel %vm1307_vm3, %v10285_v3, 0 }
 0x4b2   :  { %2721 = vrot.lane.b32.xlu1 %v10079_v24, %s9845_s27  ;;  %8798 = vmatprep.mubr.msk.bf16.mxu1 %vm9841_vm1, %v12380_v48 }
 0x4b3   :  { %8808 = vmatprep.subr.bf16.mxu1 %v12380_v48  ;;  %v1289_v32 = vpack.c.bf16 %v1273_v53, %v1273_v53  ;;  %v1885_v53 = vsel %vm1307_vm3, %v10391_v56, 0 }
 0x4b4   :  { %v9585_v58 = vpop.eup %9584 }
 0x4b5   :  { %v1231_v59 = vpop.xlane.xlu1 %1230  ;;  %v1272_v54 = vmul.f32 %v9585_v58, %v10319_v33  ;;  %v1549_v33 = vsel %vm1307_vm3, %v10283_v62, 0 }
 0x4b6   :  { %9590 = vrcp.f32 %v1231_v59  ;;  %2073 = vrot.lane.b32.xlu0 %v10023_v60, %s9844_s26  ;;  %2823 = vrot.lane.b32.xlu1 %v10085_v26, %s9844_s26 }
 0x4b7   :  { %8805 = vmatmul.mubr.msk.bf16.vlgmr.msra.gmra.mrb[36].mxu0 %vm1303_vm5, %v1289_v32  ;;  %v1288_v57 = vpack.c.bf16 %v1272_v54, %v1272_v54 }
 0x4b8   :  { %v9587_v35 = vpop.eup %9586  ;;  %8815 = vmatpush3.bf16.msra.mxu0 %v1597_v15  ;;  %8816 = vmatprep.mubr.msk.bf16.mxu0 %vm9841_vm1, %v12380_v48 }
 0x4b9   :  { %8799 = vmatmul.mubr.msk.bf16.vlgmr.msra.gmra.mrb[48].mxu1 %vm1303_vm5, %v1288_v57  ;;  %v1228_v39 = vpop.xlane.xlu1 %1227  ;;  %8826 = vmatprep.subr.bf16.mxu0 %v12380_v48  ;;  %v1275_v25 = vmul.f32 %v9587_v35, %v10324_v40  ;;  %v1693_v40 = vsel %vm1307_vm3, %v10289_v7, 0 }
 0x4ba   :  { %v9589_v43 = vpop.eup %9588  ;;  %8809 = vmatpush3.bf16.msra.mxu1 %v1549_v33  ;;  %9592 = vrcp.f32 %v1228_v39  ;;  %2071 = vrot.lane.b32.xlu0 %v10023_v60, %s9845_s27 }
 0x4bb   :  { %2821 = vrot.lane.b32.xlu1 %v10085_v26, %s9845_s27  ;;  %8810 = vmatprep.mubr.msk.bf16.mxu1 %vm9841_vm1, %v12380_v48  ;;  %v1274_v62 = vmul.f32 %v9589_v43, %v10328_v52  ;;  %v1291_v3 = vpack.c.bf16 %v1275_v25, %v1275_v25  ;;  %v1645_v52 = vsel %vm1307_vm3, %v10287_v6, 0 }
 0x4bc   :  { %8820 = vmatprep.subr.bf16.mxu1 %v12380_v48 }
 0x4bd   :  { %v1290_v34 = vpack.c.bf16 %v1274_v62, %v1274_v62 }
 0x4be   :  { %2173 = vrot.lane.b32.xlu0 %v10033_v2, %s9844_s26 }
 0x4bf   :  { %3111 = vrot.lane.b32.xlu1 %v10025_v63, %s9846_s28  ;;  %8817 = vmatmul.mubr.msk.bf16.vlgmr.msra.gmra.mrb[40].mxu0 %vm1303_vm5, %v1291_v3  ;;  %v1234_v30 = vpop.xlane.xlu0 %1233 }
 0x4c0   :  { %v9591_v36 = vpop.eup %9590  ;;  %8827 = vmatpush3.bf16.msra.mxu0 %v1693_v40  ;;  %9594 = vrcp.f32 %v1234_v30  ;;  %8828 = vmatprep.mubr.msk.bf16.mxu0 %vm9841_vm1, %v12380_v48 }
 0x4c1   :  { %8811 = vmatmul.mubr.msk.bf16.vlgmr.msra.gmra.mrb[52].mxu1 %vm1303_vm5, %v1290_v34  ;;  %8838 = vmatprep.subr.bf16.mxu0 %v12380_v48  ;;  %v1277_v7 = vmul.f32 %v9591_v36, %v10333_v47  ;;  %v1789_v47 = vsel %vm1307_vm3, %v10294_v20, 0 }
 0x4c2   :  { %8821 = vmatpush3.bf16.msra.mxu1 %v1645_v52  ;;  %2171 = vrot.lane.b32.xlu0 %v10033_v2, %s9845_s27 }
 0x4c3   :  { %3207 = vrot.lane.b32.xlu1 %v10041_v9, %s9846_s28  ;;  %8822 = vmatprep.mubr.msk.bf16.mxu1 %vm9841_vm1, %v12380_v48  ;;  %v1293_v6 = vpack.c.bf16 %v1277_v7, %v1277_v7 }
 0x4c4   :  { %v9593_v45 = vpop.eup %9592  ;;  %8832 = vmatprep.subr.bf16.mxu1 %v12380_v48 }
 0x4c5   :  { %v1276_v37 = vmul.f32 %v9593_v45, %v10337_v22 }
 0x4c6   :  { %2273 = vrot.lane.b32.xlu0 %v10029_v0, %s9844_s26 }
 0x4c7   :  { %3303 = vrot.lane.b32.xlu1 %v10049_v11, %s9846_s28  ;;  %8829 = vmatmul.mubr.msk.bf16.vlgmr.msra.gmra.mrb[44].mxu0 %vm1303_vm5, %v1293_v6  ;;  %v1292_v61 = vpack.c.bf16 %v1276_v37, %v1276_v37 }
 0x4c8   :  { %8839 = vmatpush3.bf16.msra.mxu0 %v1789_v47  ;;  %8840 = vmatprep.mubr.msk.bf16.mxu0 %vm9841_vm1, %v12380_v48 }
 0x4c9   :  { %8823 = vmatmul.mubr.msk.bf16.vlgmr.msra.gmra.mrb[56].mxu1 %vm1303_vm5, %v1292_v61  ;;  %8850 = vmatprep.subr.bf16.mxu0 %v12380_v48 }
 0x4ca   :  { %v9595_v22 = vpop.eup %9594  ;;  %8833 = vmatpush3.bf16.msra.mxu1 %v1741_v42  ;;  %2271 = vrot.lane.b32.xlu0 %v10029_v0, %s9845_s27 }
 0x4cb   :  { %3399 = vrot.lane.b32.xlu1 %v10057_v14, %s9846_s28  ;;  %8834 = vmatprep.mubr.msk.bf16.mxu1 %vm9841_vm1, %v12380_v48  ;;  %v1278_v20 = vmul.f32 %v9595_v22, %v10341_v38  ;;  %v1928_v38 = vpop.permute.xlu1 %1927 }
 0x4cc   :  { %8844 = vmatprep.subr.bf16.mxu1 %v12380_v48  ;;  %v1933_v15 = vsel %vm1307_vm3, %v1928_v38, 0 }
 0x4cd   :  { %v1294_v12 = vpack.c.bf16 %v1278_v20, %v1278_v20 }
 0x4ce   :  { %2373 = vrot.lane.b32.xlu0 %v10037_v5, %s9844_s26 }
 0x4cf   :  { %3495 = vrot.lane.b32.xlu1 %v10065_v17, %s9846_s28 }
 0x4d1   :  { %8835 = vmatmul.mubr.msk.bf16.vlgmr.msra.gmra.mrb[60].mxu1 %vm1303_vm5, %v1294_v12 }
 0x4d2   :  { %8845 = vmatpush3.bf16.msra.mxu1 %v1837_v27  ;;  %2371 = vrot.lane.b32.xlu0 %v10037_v5, %s9845_s27 }
 0x4d3   :  { %3543 = vrot.lane.b32.xlu1 %v10053_v13, %s9846_s28  ;;  %8846 = vmatprep.mubr.msk.bf16.mxu1 %vm9841_vm1, %v12380_v48 }
 0x4d4   :  { %8856 = vmatprep.subr.bf16.mxu1 %v12380_v48 }
 0x4d6   :  { %2473 = vrot.lane.b32.xlu0 %v10045_v10, %s9844_s26 }
 0x4d7   :  { %3591 = vrot.lane.b32.xlu1 %v10073_v23, %s9846_s28 }
 0x4da   :  { %2471 = vrot.lane.b32.xlu0 %v10045_v10, %s9845_s27 }
 0x4de   :  { %2573 = vrot.lane.b32.xlu0 %v10053_v13, %s9844_s26 }
 0x4e2   :  { %2571 = vrot.lane.b32.xlu0 %v10053_v13, %s9845_s27 }
 0x4e6   :  { %2673 = vrot.lane.b32.xlu0 %v10061_v16, %s9844_s26 }
 0x4ea   :  { %2671 = vrot.lane.b32.xlu0 %v10061_v16, %s9845_s27 }
 0x4ee   :  { %2773 = vrot.lane.b32.xlu0 %v10069_v19, %s9844_s26  ;;  %v1237_v18 = vpop.xlane.xlu1 %1236 }
 0x4ef   :  { %9596 = vrcp.f32 %v1237_v18 }
 0x4f2   :  { %2771 = vrot.lane.b32.xlu0 %v10069_v19, %s9845_s27  ;;  %v1243_v28 = vpop.xlane.xlu1 %1242 }
 0x4f3   :  { %9598 = vrcp.f32 %v1243_v28 }
 0x4f4   :  { %v1240_v49 = vpop.xlane.xlu0 %1239 }
 0x4f5   :  { %9600 = vrcp.f32 %v1240_v49 }
 0x4f6   :  { %3063 = vrot.lane.b32.xlu0 %v10023_v60, %s9846_s28  ;;  %v1249_v31 = vpop.xlane.xlu1 %1248 }
 0x4f8   :  { %v1246_v44 = vpop.xlane.xlu0 %1245 }
 0x4f9   :  { %v9597_v46 = vpop.eup %9596  ;;  %9602 = vrcp.f32 %v1246_v44 }
 0x4fa   :  { %3159 = vrot.lane.b32.xlu0 %v10033_v2, %s9846_s28  ;;  %v1279_v50 = vmul.f32 %v9597_v46, %v10354_v41  ;;  %9604 = vrcp.f32 %v1249_v31  ;;  %v2024_v39 = vpop.permute.xlu1 %2023 }
 0x4fb   :  { %v2029_v43 = vsel %vm1307_vm3, %v2024_v39, 0 }
 0x4fc   :  { %v1295_v51 = vpack.c.bf16 %v1279_v50, %v1279_v50  ;;  %v1976_v54 = vpop.permute.xlu0 %1975 }
 0x4fd   :  { %v9599_v4 = vpop.eup %9598 }
 0x4fe   :  { %3255 = vrot.lane.b32.xlu0 %v10029_v0, %s9846_s28  ;;  %8841 = vmatmul.mubr.msk.bf16.vlgmr.msra.gmra.mrb[48].mxu0 %vm1303_vm5, %v1295_v51  ;;  %v1281_v41 = vmul.f32 %v9599_v4, %v10358_v21 }
 0x4ff   :  { %v9601_v58 = vpop.eup %9600  ;;  %8851 = vmatpush3.bf16.msra.mxu0 %v1885_v53  ;;  %8852 = vmatprep.mubr.msk.bf16.mxu0 %vm9841_vm1, %v12380_v48 }
 0x500   :  { %v1280_v59 = vmul.f32 %v9601_v58, %v10364_v55  ;;  %8862 = vmatprep.subr.bf16.mxu0 %v12380_v48  ;;  %v1297_v57 = vpack.c.bf16 %v1281_v41, %v1281_v41  ;;  %v1981_v55 = vsel %vm1307_vm3, %v1976_v54, 0 }
 0x502   :  { %3351 = vrot.lane.b32.xlu0 %v10037_v5, %s9846_s28  ;;  %v1296_v56 = vpack.c.bf16 %v1280_v59, %v1280_v59 }
 0x503   :  { %v9603_v32 = vpop.eup %9602 }
 0x504   :  { %8847 = vmatmul.mubr.msk.bf16.vlgmr.msra.gmra.mrb[64].mxu1 %vm1303_vm5, %v1296_v56  ;;  %v9605_v35 = vpop.eup %9604  ;;  %v1282_v21 = vmul.f32 %v9603_v32, %v10370_v8 }
 0x505   :  { %8857 = vmatpush3.bf16.msra.mxu1 %v1933_v15  ;;  %8858 = vmatprep.mubr.msk.bf16.mxu1 %vm9841_vm1, %v12380_v48  ;;  %v1283_v33 = vmul.f32 %v9605_v35, %v10360_v1  ;;  %v2124_v1 = vpop.permute.xlu1 %2123 }
 0x506   :  { %3447 = vrot.lane.b32.xlu0 %v10045_v10, %s9846_s28  ;;  %8853 = vmatmul.mubr.msk.bf16.vlgmr.msra.gmra.mrb[52].mxu0 %vm1303_vm5, %v1297_v57  ;;  %v1298_v25 = vpack.c.bf16 %v1282_v21, %v1282_v21  ;;  %v2129_v22 = vsel %vm326_vm2, %v2124_v1, 0 }
 0x507   :  { %8863 = vmatpush3.bf16.msra.mxu0 %v1981_v55  ;;  %8868 = vmatprep.subr.bf16.mxu1 %v12380_v48  ;;  %v1299_v62 = vpack.c.bf16 %v1283_v33, %v1283_v33 }
 0x508   :  { %8864 = vmatprep.mubr.msk.bf16.mxu0 %vm9841_vm1, %v12380_v48  ;;  %8874 = vmatprep.subr.bf16.mxu0 %v12380_v48 }
 0x509   :  { %v2122_v8 = vpop.permute.xlu1 %2121 }
 0x50c   :  { %8859 = vmatmul.mubr.msk.bf16.vlgmr.msra.gmra.mrb[68].mxu1 %vm1303_vm5, %v1298_v25 }
 0x50d   :  { %8869 = vmatpush3.bf16.msra.mxu1 %v2029_v43  ;;  %8870 = vmatprep.mubr.msk.bf16.mxu1 %vm9841_vm1, %v12380_v48  ;;  %v2224_v3 = vpop.permute.xlu1 %2223 }
 0x50e   :  { %8865 = vmatmul.mubr.msk.bf16.vlgmr.msra.gmra.mrb[56].mxu0 %vm1303_vm5, %v1299_v62  ;;  %8880 = vmatprep.subr.bf16.mxu1 %v12380_v48  ;;  %v2229_v18 = vsel %vm326_vm2, %v2224_v3, 0 }
 0x50f   :  { %8876 = vmatprep.mubr.msk.bf16.mxu0 %vm9841_vm1, %v12380_v48 }
 0x511   :  { %v2222_v40 = vpop.permute.xlu1 %2221 }
 0x515   :  { %v2324_v36 = vpop.permute.xlu1 %2323 }
 0x516   :  { %v2329_v46 = vsel %vm326_vm2, %v2324_v36, 0 }
 0x519   :  { %v2322_v6 = vpop.permute.xlu1 %2321 }
 0x51d   :  { %v2424_v12 = vpop.permute.xlu1 %2423 }
 0x51e   :  { %v2429_v58 = vsel %vm326_vm2, %v2424_v12, 0 }
 0x521   :  { %v2422_v38 = vpop.permute.xlu1 %2421 }
 0x525   :  { %v2524_v31 = vpop.permute.xlu1 %2523 }
 0x526   :  { %v2529_v15 = vsel %vm326_vm2, %v2524_v31, 0 }
 0x529   :  { %v2522_v51 = vpop.permute.xlu1 %2521 }
 0x52d   :  { %v1252_v30 = vpop.xlane.xlu0 %1251  ;;  %v2624_v41 = vpop.permute.xlu1 %2623 }
 0x52e   :  { %9606 = vrcp.f32 %v1252_v30  ;;  %v2629_v33 = vsel %vm326_vm2, %v2624_v41, 0 }
 0x531   :  { %v2074_v34 = vpop.permute.xlu0 %2073  ;;  %v2622_v54 = vpop.permute.xlu1 %2621 }
 0x532   :  { %v2079_v52 = vsel %vm326_vm2, %v2074_v34, 0 }
 0x533   :  { %8875 = vmatpush3.bf16.xpose.msra.mxu0 %v2079_v52 }
 0x534   :  { %8886 = vmatprep.subr.bf16.mxu0 %v12380_v48 }
 0x535   :  { %v2072_v7 = vpop.permute.xlu0 %2071  ;;  %v2724_v55 = vpop.permute.xlu1 %2723 }
 0x536   :  { %v2729_v1 = vsel %vm326_vm2, %v2724_v55, 0 }
 0x538   :  { %v9607_v45 = vpop.eup %9606 }
 0x539   :  { %v2174_v37 = vpop.permute.xlu0 %2173  ;;  %v1284_v47 = vmul.f32 %v9607_v45, %v10397_v29  ;;  %v2722_v25 = vpop.permute.xlu1 %2721 }
 0x53a   :  { %v2179_v61 = vsel %vm326_vm2, %v2174_v37, 0  ;;  %8877 = vmatmul.mubr.msk.bf16.vlgmr.msra.gmra.mrb[60].mxu0 %vm326_vm2, %v2072_v7 }
 0x53b   :  { %8887 = vmatpush3.bf16.xpose.msra.mxu0 %v2179_v61  ;;  %v1300_v42 = vpack.c.bf16 %v1284_v47, %v1284_v47  ;;  %8888 = vmatprep.mubr.msk.bf16.mxu0 %vm9841_vm1, %v12380_v48 }
 0x53c   :  { %8898 = vmatprep.subr.bf16.mxu0 %v12380_v48 }
 0x53d   :  { %8871 = vmatmul.mubr.msk.bf16.vlgmr.msra.gmra.mrb[72].mxu1 %vm1303_vm5, %v1300_v42  ;;  %v2172_v20 = vpop.permute.xlu0 %2171  ;;  %v2824_v3 = vpop.permute.xlu1 %2823 }
 0x53e   :  { %8881 = vmatpush3.bf16.xpose.msra.mxu1 %v2129_v22  ;;  %8882 = vmatprep.mubr.msk.bf16.mxu1 %vm9841_vm1, %v12380_v48  ;;  %v2829_v36 = vsel %vm326_vm2, %v2824_v3, 0 }
 0x53f   :  { %8892 = vmatprep.subr.bf16.mxu1 %v12380_v48 }
 0x541   :  { %v2274_v29 = vpop.permute.xlu0 %2273  ;;  %v2822_v34 = vpop.permute.xlu1 %2821 }
 0x542   :  { %v2279_v27 = vsel %vm326_vm2, %v2274_v29, 0  ;;  %8889 = vmatmul.mubr.msk.bf16.vlgmr.msra.gmra.mrb[64].mxu0 %vm326_vm2, %v2172_v20 }
 0x543   :  { %8899 = vmatpush3.bf16.xpose.msra.mxu0 %v2279_v27  ;;  %8900 = vmatprep.mubr.msk.bf16.mxu0 %vm9841_vm1, %v12380_v48 }
 0x544   :  { %8910 = vmatprep.subr.bf16.mxu0 %v12380_v48 }
 0x545   :  { %8883 = vmatmul.mubr.msk.bf16.vlgmr.msra.gmra.mrb[76].mxu1 %vm326_vm2, %v2122_v8  ;;  %v2272_v28 = vpop.permute.xlu0 %2271  ;;  %v3112_v52 = vpop.permute.xlu1 %3111 }
 0x546   :  { %8893 = vmatpush3.bf16.xpose.msra.mxu1 %v2229_v18  ;;  %8894 = vmatprep.mubr.msk.bf16.mxu1 %vm9841_vm1, %v12380_v48  ;;  %v3117_v37 = vsel %vm1307_vm3, %v3112_v52, 0 }
 0x547   :  { %8904 = vmatprep.subr.bf16.mxu1 %v12380_v48 }
 0x549   :  { %v2374_v49 = vpop.permute.xlu0 %2373 }
 0x54a   :  { %v2379_v44 = vsel %vm326_vm2, %v2374_v49, 0  ;;  %8901 = vmatmul.mubr.msk.bf16.vlgmr.msra.gmra.mrb[68].mxu0 %vm326_vm2, %v2272_v28 }
 0x54b   :  { %8911 = vmatpush3.bf16.xpose.msra.mxu0 %v2379_v44  ;;  %8912 = vmatprep.mubr.msk.bf16.mxu0 %vm9841_vm1, %v12380_v48 }
 0x54c   :  { %8922 = vmatprep.subr.bf16.mxu0 %v12380_v48 }
 0x54d   :  { %8895 = vmatmul.mubr.msk.bf16.vlgmr.msra.gmra.mrb[80].mxu1 %vm326_vm2, %v2222_v40  ;;  %v2372_v50 = vpop.permute.xlu0 %2371 }
 0x54e   :  { %8905 = vmatpush3.bf16.xpose.msra.mxu1 %v2329_v46  ;;  %8906 = vmatprep.mubr.msk.bf16.mxu1 %vm9841_vm1, %v12380_v48 }
 0x54f   :  { %8916 = vmatprep.subr.bf16.mxu1 %v12380_v48 }
 0x551   :  { %v2474_v4 = vpop.permute.xlu0 %2473 }
 0x552   :  { %v2479_v53 = vsel %vm326_vm2, %v2474_v4, 0  ;;  %8913 = vmatmul.mubr.msk.bf16.vlgmr.msra.gmra.mrb[72].mxu0 %vm326_vm2, %v2372_v50 }
 0x553   :  { %8923 = vmatpush3.bf16.xpose.msra.mxu0 %v2479_v53  ;;  %8924 = vmatprep.mubr.msk.bf16.mxu0 %vm9841_vm1, %v12380_v48 }
 0x554   :  { %8934 = vmatprep.subr.bf16.mxu0 %v12380_v48 }
 0x555   :  { %8907 = vmatmul.mubr.msk.bf16.vlgmr.msra.gmra.mrb[84].mxu1 %vm326_vm2, %v2322_v6  ;;  %v2472_v59 = vpop.permute.xlu0 %2471 }
 0x556   :  { %8917 = vmatpush3.bf16.xpose.msra.mxu1 %v2429_v58  ;;  %8918 = vmatprep.mubr.msk.bf16.mxu1 %vm9841_vm1, %v12380_v48 }
 0x557   :  { %8928 = vmatprep.subr.bf16.mxu1 %v12380_v48 }
 0x559   :  { %v2574_v56 = vpop.permute.xlu0 %2573 }
 0x55a   :  { %v2579_v32 = vsel %vm326_vm2, %v2574_v56, 0  ;;  %8925 = vmatmul.mubr.msk.bf16.vlgmr.msra.gmra.mrb[76].mxu0 %vm326_vm2, %v2472_v59 }
 0x55b   :  { %8935 = vmatpush3.bf16.xpose.msra.mxu0 %v2579_v32  ;;  %8936 = vmatprep.mubr.msk.bf16.mxu0 %vm9841_vm1, %v12380_v48 }
 0x55c   :  { %8946 = vmatprep.subr.bf16.mxu0 %v12380_v48 }
 0x55d   :  { %8919 = vmatmul.mubr.msk.bf16.vlgmr.msra.gmra.mrb[88].mxu1 %vm326_vm2, %v2422_v38  ;;  %v2572_v57 = vpop.permute.xlu0 %2571 }
 0x55e   :  { %8929 = vmatpush3.bf16.xpose.msra.mxu1 %v2529_v15  ;;  %8930 = vmatprep.mubr.msk.bf16.mxu1 %vm9841_vm1, %v12380_v48 }
 0x55f   :  { %8940 = vmatprep.subr.bf16.mxu1 %v12380_v48 }
 0x561   :  { %v2674_v35 = vpop.permute.xlu0 %2673 }
 0x562   :  { %v2679_v21 = vsel %vm326_vm2, %v2674_v35, 0  ;;  %8937 = vmatmul.mubr.msk.bf16.vlgmr.msra.gmra.mrb[80].mxu0 %vm326_vm2, %v2572_v57 }
 0x563   :  { %8947 = vmatpush3.bf16.xpose.msra.mxu0 %v2679_v21  ;;  %8948 = vmatprep.mubr.msk.bf16.mxu0 %vm9841_vm1, %v12380_v48 }
 0x564   :  { %8958 = vmatprep.subr.bf16.mxu0 %v12380_v48 }
 0x565   :  { %8931 = vmatmul.mubr.msk.bf16.vlgmr.msra.gmra.mrb[92].mxu1 %vm326_vm2, %v2522_v51  ;;  %v2672_v39 = vpop.permute.xlu0 %2671 }
 0x566   :  { %8941 = vmatpush3.bf16.xpose.msra.mxu1 %v2629_v33  ;;  %8942 = vmatprep.mubr.msk.bf16.mxu1 %vm9841_vm1, %v12380_v48 }
 0x567   :  { %8952 = vmatprep.subr.bf16.mxu1 %v12380_v48 }
 0x569   :  { %v2774_v43 = vpop.permute.xlu0 %2773 }
 0x56a   :  { %v2779_v62 = vsel %vm326_vm2, %v2774_v43, 0  ;;  %8949 = vmatmul.mubr.msk.bf16.vlgmr.msra.gmra.mrb[84].mxu0 %vm326_vm2, %v2672_v39 }
 0x56b   :  { %8959 = vmatpush3.bf16.xpose.msra.mxu0 %v2779_v62  ;;  %8960 = vmatprep.mubr.msk.bf16.mxu0 %vm9841_vm1, %v12380_v48 }
 0x56c   :  { %8970 = vmatprep.subr.bf16.mxu0 %v12380_v48 }
 0x56d   :  { %8943 = vmatmul.mubr.msk.bf16.vlgmr.msra.gmra.mrb[96].mxu1 %vm326_vm2, %v2622_v54  ;;  %v2772_v8 = vpop.permute.xlu0 %2771 }
 0x56e   :  { %8953 = vmatpush3.bf16.xpose.msra.mxu1 %v2729_v1  ;;  %8954 = vmatprep.mubr.msk.bf16.mxu1 %vm9841_vm1, %v12380_v48 }
 0x56f   :  { %8964 = vmatprep.subr.bf16.mxu1 %v12380_v48 }
 0x571   :  { %v3064_v40 = vpop.permute.xlu0 %3063 }
 0x572   :  { %v3069_v30 = vsel %vm1307_vm3, %v3064_v40, 0  ;;  %8961 = vmatmul.mubr.msk.bf16.vlgmr.msra.gmra.mrb[88].mxu0 %vm326_vm2, %v2772_v8 }
 0x573   :  { %8971 = vmatpush3.bf16.msra.mxu0 %v3069_v30  ;;  %8972 = vmatprep.mubr.msk.bf16.mxu0 %vm9841_vm1, %v12380_v48 }
 0x574   :  { %8982 = vmatprep.subr.bf16.mxu0 %v12380_v48 }
 0x575   :  { %8955 = vmatmul.mubr.msk.bf16.vlgmr.msra.gmra.mrb[100].mxu1 %vm326_vm2, %v2722_v25 }
 0x576   :  { %8965 = vmatpush3.bf16.xpose.msra.mxu1 %v2829_v36  ;;  %8966 = vmatprep.mubr.msk.bf16.mxu1 %vm9841_vm1, %v12380_v48 }
 0x577   :  { %8976 = vmatprep.subr.bf16.mxu1 %v12380_v48 }
 0x57a   :  { %v10655_v7 = vpop.f32.mrb[28].mxu0 }
 0x57b   :  { %12382 = vst [vmem:[#allocation2_spill] sm:$0xff] %v10655_v7  ;;  %v8782_v45 = vpop.f32.mrb[29].mxu0 }
 0x57c   :  { %v1348_v6 = vpop.f32.mrb[30].mxu0 }
 0x57d   :  { %v8783_v47 = vpop.f32.mrb[31].mxu0  ;;  %8967 = vmatmul.mubr.msk.bf16.vlgmr.msra.gmra.mrb[104].mxu1 %vm326_vm2, %v2822_v34 }
 0x57e   :  { %8977 = vmatpush3.bf16.msra.mxu1 %v3117_v37  ;;  %8978 = vmatprep.mubr.msk.bf16.mxu1 %vm9841_vm1, %v12380_v48 }
 0x57f   :  { %8988 = vmatprep.subr.bf16.mxu1 %v12380_v48 }
 0x582   :  { %v10662_v61 = vpop.f32.mrb[44].mxu1  ;;  %v10664_v42 = vpop.f32.mrb[32].mxu0 }
 0x583   :  { %12383 = vst [vmem:[#allocation3_spill] sm:$0xff] %v10662_v61  ;;  %12384 = vst [vmem:[#allocation4_spill] sm:$0xff] %v10664_v42  ;;  %v8788_v22 = vpop.f32.mrb[45].mxu1  ;;  %v8794_v20 = vpop.f32.mrb[33].mxu0 }
 0x584   :  { %v1396_v12 = vpop.f32.mrb[46].mxu1  ;;  %v1444_v29 = vpop.f32.mrb[34].mxu0 }
 0x585   :  { %v8789_v27 = vpop.f32.mrb[47].mxu1  ;;  %v8795_v38 = vpop.f32.mrb[35].mxu0 }
 0x58a   :  { %v10666_v18 = vpop.f32.mrb[36].mxu0 }
 0x58b   :  { %12385 = vst [vmem:[#allocation5_spill] sm:$0xff] %v10666_v18  ;;  %v8806_v28 = vpop.f32.mrb[37].mxu0 }
 0x58c   :  { %v10668_v49 = vpop.f32.mrb[48].mxu1  ;;  %v1540_v31 = vpop.f32.mrb[38].mxu0 }
 0x58d   :  { %12386 = vst [vmem:[#allocation6_spill] sm:$0xff] %v10668_v49  ;;  %v8800_v44 = vpop.f32.mrb[49].mxu1  ;;  %v8807_v46 = vpop.f32.mrb[39].mxu0 }
 0x58e   :  { %v1492_v50 = vpop.f32.mrb[50].mxu1 }
 0x58f   :  { %v8801_v51 = vpop.f32.mrb[51].mxu1 }
 0x592   :  { %v10670_v4 = vpop.f32.mrb[40].mxu0 }
 0x593   :  { %12387 = vst [vmem:[#allocation7_spill] sm:$0xff] %v10670_v4  ;;  %v8818_v53 = vpop.f32.mrb[41].mxu0 }
 0x594   :  { %v10672_v58 = vpop.f32.mrb[52].mxu1  ;;  %v1636_v59 = vpop.f32.mrb[42].mxu0 }
 0x595   :  { %12388 = vst [vmem:[#allocation8_spill] sm:$0xff] %v10672_v58  ;;  %v8812_v41 = vpop.f32.mrb[53].mxu1  ;;  %v8819_v56 = vpop.f32.mrb[43].mxu0 }
 0x596   :  { %v1588_v32 = vpop.f32.mrb[54].mxu1 }
 0x597   :  { %v8813_v54 = vpop.f32.mrb[55].mxu1 }
 0x59a   :  { %v10674_v15 = vpop.f32.mrb[44].mxu0 }
 0x59b   :  { %12389 = vst [vmem:[#allocation9_spill] sm:$0xff] %v10674_v15  ;;  %v8830_v57 = vpop.f32.mrb[45].mxu0 }
 0x59c   :  { %v10676_v35 = vpop.f32.mrb[56].mxu1  ;;  %v1732_v55 = vpop.f32.mrb[46].mxu0 }
 0x59d   :  { %12390 = vst [vmem:[#allocation10_spill] sm:$0xff] %v10676_v35  ;;  %v8824_v21 = vpop.f32.mrb[57].mxu1  ;;  %v8831_v33 = vpop.f32.mrb[47].mxu0 }
 0x59e   :  { %v1684_v39 = vpop.f32.mrb[58].mxu1 }
 0x59f   :  { %v8825_v25 = vpop.f32.mrb[59].mxu1 }
 0x5a4   :  { %v10678_v43 = vpop.f32.mrb[60].mxu1 }
 0x5a5   :  { %12391 = vst [vmem:[#allocation11_spill] sm:$0xff] %v10678_v43  ;;  %v8836_v62 = vpop.f32.mrb[61].mxu1 }
 0x5a6   :  { %v1780_v1 = vpop.f32.mrb[62].mxu1 }
 0x5a7   :  { %v8837_v8 = vpop.f32.mrb[63].mxu1 }
 0x5d1   :  { %v10680_v3 = vpop.f32.mrb[48].mxu0 }
 0x5d2   :  { %12392 = vst [vmem:[#allocation12_spill] sm:$0xff] %v10680_v3  ;;  %v8842_v40 = vpop.f32.mrb[49].mxu0 }
 0x5d3   :  { %v1828_v30 = vpop.f32.mrb[50].mxu0 }
 0x5d4   :  { %v8843_v34 = vpop.f32.mrb[51].mxu0 }
 0x5d7   :  { %v10682_v36 = vpop.f32.mrb[64].mxu1 }
 0x5d8   :  { %12393 = vst [vmem:[#allocation13_spill] sm:$0xff] %v10682_v36  ;;  %v8848_v52 = vpop.f32.mrb[65].mxu1 }
 0x5d9   :  { %v1876_v45 = vpop.f32.mrb[66].mxu1  ;;  %v10684_v6 = vpop.f32.mrb[52].mxu0 }
 0x5da   :  { %12394 = vst [vmem:[#allocation14_spill] sm:$0xff] %v10684_v6  ;;  %v8849_v37 = vpop.f32.mrb[67].mxu1  ;;  %v8854_v47 = vpop.f32.mrb[53].mxu0 }
 0x5db   :  { %v1924_v22 = vpop.f32.mrb[54].mxu0 }
 0x5dc   :  { %v8855_v20 = vpop.f32.mrb[55].mxu0 }
 0x5df   :  { %v10686_v12 = vpop.f32.mrb[68].mxu1 }
 0x5e0   :  { %12395 = vst [vmem:[#allocation15_spill] sm:$0xff] %v10686_v12  ;;  %v8860_v29 = vpop.f32.mrb[69].mxu1 }
 0x5e1   :  { %v1972_v27 = vpop.f32.mrb[70].mxu1  ;;  %v10688_v38 = vpop.f32.mrb[56].mxu0 }
 0x5e2   :  { %12396 = vst [vmem:[#allocation16_spill] sm:$0xff] %v10688_v38  ;;  %v8861_v28 = vpop.f32.mrb[71].mxu1  ;;  %v8866_v31 = vpop.f32.mrb[57].mxu0 }
 0x5e3   :  { %v2020_v44 = vpop.f32.mrb[58].mxu0 }
 0x5e4   :  { %v8867_v46 = vpop.f32.mrb[59].mxu0 }
 0x60d   :  { %v10690_v50 = vpop.f32.mrb[60].mxu0 }
 0x60e   :  { %v8878_v51 = vpop.f32.mrb[61].mxu0  ;;  %v2871_v53 = vsel %vm1108_vm4, %v10690_v50, -inf }
 0x60f   :  { %2872 = vmax.xlane.f32.xlu0 %v2871_v53  ;;  %v2118_v59 = vpop.f32.mrb[62].mxu0 }
 0x610   :  { %v10694_v41 = vpop.f32.mrb[72].mxu1  ;;  %v8879_v56 = vpop.f32.mrb[63].mxu0 }
 0x611   :  { %12397 = vst [vmem:[#allocation17_spill] sm:$0xff] %v10694_v41  ;;  %v8872_v32 = vpop.f32.mrb[73].mxu1 }
 0x612   :  { %v2068_v54 = vpop.f32.mrb[74].mxu1 }
 0x613   :  { %v8873_v57 = vpop.f32.mrb[75].mxu1 }
 0x615   :  { %v10696_v55 = vpop.f32.mrb[64].mxu0 }
 0x616   :  { %v8890_v21 = vpop.f32.mrb[65].mxu0  ;;  %v2877_v33 = vsel %vm1108_vm4, %v10696_v55, -inf }
 0x617   :  { %2878 = vmax.xlane.f32.xlu0 %v2877_v33  ;;  %v2218_v39 = vpop.f32.mrb[66].mxu0 }
 0x618   :  { %v10700_v25 = vpop.f32.mrb[76].mxu1  ;;  %v8891_v62 = vpop.f32.mrb[67].mxu0 }
 0x619   :  { %v8884_v1 = vpop.f32.mrb[77].mxu1  ;;  %v2874_v8 = vsel %vm1108_vm4, %v10700_v25, -inf }
 0x61a   :  { %2875 = vmax.xlane.f32.xlu1 %v2874_v8  ;;  %v2168_v40 = vpop.f32.mrb[78].mxu1 }
 0x61b   :  { %v8885_v30 = vpop.f32.mrb[79].mxu1 }
 0x61d   :  { %v10704_v34 = vpop.f32.mrb[68].mxu0 }
 0x61e   :  { %v8902_v52 = vpop.f32.mrb[69].mxu0  ;;  %v2883_v31 = vsel %vm1108_vm4, %v10704_v34, -inf }
 0x61f   :  { %v2318_v45 = vpop.f32.mrb[70].mxu0 }
 0x620   :  { %v10706_v37 = vpop.f32.mrb[80].mxu1  ;;  %v8903_v47 = vpop.f32.mrb[71].mxu0 }
 0x621   :  { %v8896_v22 = vpop.f32.mrb[81].mxu1  ;;  %v2880_v20 = vsel %vm1108_vm4, %v10706_v37, -inf }
 0x622   :  { %v2268_v29 = vpop.f32.mrb[82].mxu1  ;;  %2881 = vmax.xlane.f32.xlu0 %v2880_v20 }
 0x623   :  { %v8897_v27 = vpop.f32.mrb[83].mxu1 }
 0x625   :  { %v10710_v28 = vpop.f32.mrb[72].mxu0 }
 0x626   :  { %2884 = vmax.xlane.f32.xlu0 %v2883_v31  ;;  %v8914_v44 = vpop.f32.mrb[73].mxu0  ;;  %v2889_v32 = vsel %vm1108_vm4, %v10710_v28, -inf }
 0x627   :  { %v2418_v46 = vpop.f32.mrb[74].mxu0 }
 0x628   :  { %v10714_v51 = vpop.f32.mrb[84].mxu1  ;;  %v8915_v53 = vpop.f32.mrb[75].mxu0 }
 0x629   :  { %v8908_v59 = vpop.f32.mrb[85].mxu1  ;;  %v2886_v56 = vsel %vm1108_vm4, %v10714_v51, -inf }
 0x62a   :  { %2887 = vmax.xlane.f32.xlu1 %v2886_v56  ;;  %v2368_v54 = vpop.f32.mrb[86].mxu1  ;;  %2890 = vmax.xlane.f32.xlu0 %v2889_v32 }
 0x62b   :  { %v8909_v57 = vpop.f32.mrb[87].mxu1 }
 0x62d   :  { %v10720_v21 = vpop.f32.mrb[76].mxu0 }
 0x62e   :  { %v8926_v33 = vpop.f32.mrb[77].mxu0  ;;  %v2895_v39 = vsel %vm1108_vm4, %v10720_v21, -inf }
 0x62f   :  { %2896 = vmax.xlane.f32.xlu0 %v2895_v39  ;;  %v2518_v62 = vpop.f32.mrb[78].mxu0 }
 0x630   :  { %v10724_v1 = vpop.f32.mrb[88].mxu1  ;;  %v8927_v8 = vpop.f32.mrb[79].mxu0 }
 0x631   :  { %v8920_v40 = vpop.f32.mrb[89].mxu1  ;;  %v2892_v30 = vsel %vm1108_vm4, %v10724_v1, -inf }
 0x632   :  { %2893 = vmax.xlane.f32.xlu1 %v2892_v30  ;;  %v2468_v52 = vpop.f32.mrb[90].mxu1 }
 0x633   :  { %v8921_v45 = vpop.f32.mrb[91].mxu1 }
 0x635   :  { %v10728_v47 = vpop.f32.mrb[80].mxu0 }
 0x636   :  { %v8938_v22 = vpop.f32.mrb[81].mxu0  ;;  %v2901_v20 = vsel %vm1108_vm4, %v10728_v47, -inf }
 0x637   :  { %2902 = vmax.xlane.f32.xlu0 %v2901_v20  ;;  %v2618_v29 = vpop.f32.mrb[82].mxu0 }
 0x638   :  { %v10732_v27 = vpop.f32.mrb[92].mxu1  ;;  %v8939_v31 = vpop.f32.mrb[83].mxu0 }
 0x639   :  { %v8932_v44 = vpop.f32.mrb[93].mxu1  ;;  %v2898_v46 = vsel %vm1108_vm4, %v10732_v27, -inf }
 0x63a   :  { %2899 = vmax.xlane.f32.xlu1 %v2898_v46  ;;  %v2568_v53 = vpop.f32.mrb[94].mxu1 }
 0x63b   :  { %v8933_v59 = vpop.f32.mrb[95].mxu1 }
 0x63d   :  { %v10736_v56 = vpop.f32.mrb[84].mxu0 }
 0x63e   :  { %v8950_v32 = vpop.f32.mrb[85].mxu0  ;;  %v2907_v54 = vsel %vm1108_vm4, %v10736_v56, -inf }
 0x63f   :  { %2908 = vmax.xlane.f32.xlu0 %v2907_v54  ;;  %v2718_v57 = vpop.f32.mrb[86].mxu0 }
 0x640   :  { %v10740_v33 = vpop.f32.mrb[96].mxu1  ;;  %v8951_v39 = vpop.f32.mrb[87].mxu0 }
 0x641   :  { %v8944_v62 = vpop.f32.mrb[97].mxu1  ;;  %v2904_v8 = vsel %vm1108_vm4, %v10740_v33, -inf }
 0x642   :  { %2905 = vmax.xlane.f32.xlu1 %v2904_v8  ;;  %v2668_v40 = vpop.f32.mrb[98].mxu1  ;;  %v10760_v8 = vpop.permute.xlu1 %3207 }
 0x643   :  { %v8945_v30 = vpop.f32.mrb[99].mxu1  ;;  %v10762_v40 = vpop.permute.xlu0 %3159 }
 0x645   :  { %v10744_v52 = vpop.f32.mrb[88].mxu0 }
 0x646   :  { %v8962_v45 = vpop.f32.mrb[89].mxu0  ;;  %v2913_v22 = vsel %vm1108_vm4, %v10744_v52, -inf  ;;  %v10764_v30 = vpop.permute.xlu1 %3303 }
 0x647   :  { %2914 = vmax.xlane.f32.xlu0 %v2913_v22  ;;  %v2818_v20 = vpop.f32.mrb[90].mxu0  ;;  %v10766_v45 = vpop.permute.xlu0 %3255 }
 0x648   :  { %v10748_v29 = vpop.f32.mrb[100].mxu1  ;;  %v8963_v31 = vpop.f32.mrb[91].mxu0 }
 0x649   :  { %v8956_v44 = vpop.f32.mrb[101].mxu1  ;;  %v2910_v46 = vsel %vm1108_vm4, %v10748_v29, -inf }
 0x64a   :  { %2911 = vmax.xlane.f32.xlu1 %v2910_v46  ;;  %v2768_v53 = vpop.f32.mrb[102].mxu1  ;;  %v10768_v22 = vpop.permute.xlu1 %3399 }
 0x64b   :  { %v8957_v59 = vpop.f32.mrb[103].mxu1  ;;  %v10770_v20 = vpop.permute.xlu0 %3351 }
 0x64e   :  { %v10772_v31 = vpop.permute.xlu1 %3495 }
 0x64f   :  { %v10774_v44 = vpop.permute.xlu0 %3447 }
 0x650   :  { %v10752_v32 = vpop.f32.mrb[104].mxu1 }
 0x651   :  { %v8968_v54 = vpop.f32.mrb[105].mxu1  ;;  %v2916_v62 = vsel %vm1108_vm4, %v10752_v32, -inf }
 0x652   :  { %v2868_v57 = vpop.f32.mrb[106].mxu1  ;;  %v10776_v53 = vpop.permute.xlu1 %3543 }
 0x653   :  { %v8969_v39 = vpop.f32.mrb[107].mxu1 }
 0x656   :  { %v10779_v57 = vpop.permute.xlu1 %3591 }
 0x65b   :  { %3687 = vrot.lane.b32.xlu1 %v10079_v24, %s9846_s28 }
 0x65d   :  { %3639 = vrot.lane.b32.xlu0 %v10061_v16, %s9846_s28 }
 0x67f   :  { %2917 = vmax.xlane.f32.xlu1 %v2916_v62 }
 0x69c   :  { %v2873_v46 = vpop.xlane.xlu0 %2872 }
 0x69d   :  { %v2919_v59 = vsub.f32 %v10690_v50, %v2873_v46 }
 0x69f   :  { %v2935_v54 = vmul.f32 1.442695, %v2919_v59 }
 0x6a1   :  { %9608 = vpow2.f32 %v2935_v54 }
 0x6a4   :  { %v2879_v39 = vpop.xlane.xlu0 %2878 }
 0x6a5   :  { %v2921_v62 = vsub.f32 %v10696_v55, %v2879_v39 }
 0x6a7   :  { %v2939_v48 = vmul.f32 1.442695, %v2921_v62  ;;  %v2876_v3 = vpop.xlane.xlu1 %2875 }
 0x6a8   :  { %v2920_v36 = vsub.f32 %v10700_v25, %v2876_v3 }
 0x6a9   :  { %9610 = vpow2.f32 %v2939_v48 }
 0x6aa   :  { %v2937_v42 = vmul.f32 1.442695, %v2920_v36 }
 0x6ab   :  { %v10783_v49 = vpop.eup %9608 }
 0x6ac   :  { %9612 = vpow2.f32 %v2937_v42  ;;  %v2967_v38 = vsel %vm1108_vm4, %v10783_v49, 0.0 }
 0x6ad   :  { %2968 = vadd.xlane.f32.xlu0 %v2967_v38 }
 0x6af   :  { %v2882_v50 = vpop.xlane.xlu0 %2881 }
 0x6b0   :  { %v2922_v46 = vsub.f32 %v10706_v37, %v2882_v50 }
 0x6b2   :  { %v2941_v59 = vmul.f32 1.442695, %v2922_v46 }
 0x6b3   :  { %v10788_v54 = vpop.eup %9610  ;;  %v2885_v55 = vpop.xlane.xlu0 %2884 }
 0x6b4   :  { %9614 = vpow2.f32 %v2941_v59  ;;  %v2923_v39 = vsub.f32 %v10704_v34, %v2885_v55  ;;  %v2973_v48 = vsel %vm1108_vm4, %v10788_v54, 0.0 }
 0x6b5   :  { %2974 = vadd.xlane.f32.xlu0 %v2973_v48 }
 0x6b6   :  { %v10793_v3 = vpop.eup %9612  ;;  %v2943_v42 = vmul.f32 1.442695, %v2923_v39 }
 0x6b7   :  { %v2888_v36 = vpop.xlane.xlu1 %2887  ;;  %v2891_v25 = vpop.xlane.xlu0 %2890  ;;  %v2970_v38 = vsel %vm1108_vm4, %v10793_v3, 0.0 }
 0x6b8   :  { %9616 = vpow2.f32 %v2943_v42  ;;  %v2924_v37 = vsub.f32 %v10714_v51, %v2888_v36  ;;  %v2925_v62 = vsub.f32 %v10710_v28, %v2891_v25  ;;  %2971 = vadd.xlane.f32.xlu1 %v2970_v38 }
 0x6ba   :  { %v2945_v50 = vmul.f32 1.442695, %v2924_v37  ;;  %v2947_v34 = vmul.f32 1.442695, %v2925_v62 }
 0x6bc   :  { %9618 = vpow2.f32 %v2945_v50  ;;  %v2897_v46 = vpop.xlane.xlu0 %2896 }
 0x6bd   :  { %9620 = vpow2.f32 %v2947_v34  ;;  %v2927_v55 = vsub.f32 %v10720_v21, %v2897_v46 }
 0x6be   :  { %v10799_v59 = vpop.eup %9614 }
 0x6bf   :  { %v2894_v39 = vpop.xlane.xlu1 %2893  ;;  %v2976_v48 = vsel %vm1108_vm4, %v10799_v59, 0.0  ;;  %v2951_v28 = vmul.f32 1.442695, %v2927_v55 }
 0x6c0   :  { %v2926_v42 = vsub.f32 %v10724_v1, %v2894_v39  ;;  %2977 = vadd.xlane.f32.xlu1 %v2976_v48 }
 0x6c2   :  { %v10805_v51 = vpop.eup %9616  ;;  %v2949_v36 = vmul.f32 1.442695, %v2926_v42 }
 0x6c3   :  { %v2979_v25 = vsel %vm1108_vm4, %v10805_v51, 0.0 }
 0x6c4   :  { %9622 = vpow2.f32 %v2949_v36  ;;  %2980 = vadd.xlane.f32.xlu0 %v2979_v25  ;;  %v2903_v38 = vpop.xlane.xlu0 %2902 }
 0x6c5   :  { %v2929_v37 = vsub.f32 %v10728_v47, %v2903_v38  ;;  %9624 = vpow2.f32 %v2951_v28 }
 0x6c6   :  { %v10810_v21 = vpop.eup %9618 }
 0x6c7   :  { %v10812_v62 = vpop.eup %9620  ;;  %v2955_v50 = vmul.f32 1.442695, %v2929_v37  ;;  %v2900_v1 = vpop.xlane.xlu1 %2899  ;;  %v2982_v34 = vsel %vm1108_vm4, %v10810_v21, 0.0 }
 0x6c8   :  { %v2928_v46 = vsub.f32 %v10732_v27, %v2900_v1  ;;  %2983 = vadd.xlane.f32.xlu1 %v2982_v34  ;;  %v2985_v55 = vsel %vm1108_vm4, %v10812_v62, 0.0 }
 0x6c9   :  { %2986 = vadd.xlane.f32.xlu0 %v2985_v55  ;;  %9626 = vpow2.f32 %v2955_v50 }
 0x6ca   :  { %v2953_v39 = vmul.f32 1.442695, %v2928_v46 }
 0x6cc   :  { %9628 = vpow2.f32 %v2953_v39  ;;  %v2909_v47 = vpop.xlane.xlu0 %2908 }
 0x6cd   :  { %v2931_v48 = vsub.f32 %v10736_v56, %v2909_v47 }
 0x6ce   :  { %v10820_v42 = vpop.eup %9622 }
 0x6cf   :  { %v2959_v28 = vmul.f32 1.442695, %v2931_v48  ;;  %v2906_v36 = vpop.xlane.xlu1 %2905  ;;  %v2988_v25 = vsel %vm1108_vm4, %v10820_v42, 0.0  ;;  %v10824_v38 = vpop.eup %9624 }
 0x6d0   :  { %v2930_v27 = vsub.f32 %v10740_v33, %v2906_v36  ;;  %2989 = vadd.xlane.f32.xlu1 %v2988_v25  ;;  %v2991_v50 = vsel %vm1108_vm4, %v10824_v38, 0.0 }
 0x6d1   :  { %9630 = vpow2.f32 %v2959_v28 }
 0x6d2   :  { %v2957_v37 = vmul.f32 1.442695, %v2930_v27 }
 0x6d3   :  { %v10829_v1 = vpop.eup %9626 }
 0x6d4   :  { %9632 = vpow2.f32 %v2957_v37  ;;  %2992 = vadd.xlane.f32.xlu1 %v2991_v50  ;;  %v2997_v55 = vsel %vm1108_vm4, %v10829_v1, 0.0  ;;  %v2915_v27 = vpop.xlane.xlu0 %2914 }
 0x6d5   :  { %v2933_v37 = vsub.f32 %v10744_v52, %v2915_v27 }
 0x6d6   :  { %v10831_v56 = vpop.eup %9628 }
 0x6d7   :  { %v2912_v34 = vpop.xlane.xlu1 %2911  ;;  %v2994_v46 = vsel %vm1108_vm4, %v10831_v56, 0.0  ;;  %v2963_v50 = vmul.f32 1.442695, %v2933_v37 }
 0x6d8   :  { %v2932_v33 = vsub.f32 %v10748_v29, %v2912_v34  ;;  %2995 = vadd.xlane.f32.xlu0 %v2994_v46  ;;  %2998 = vadd.xlane.f32.xlu1 %v2997_v55 }
 0x6da   :  { %v2961_v39 = vmul.f32 1.442695, %v2932_v33 }
 0x6db   :  { %v10838_v47 = vpop.eup %9630  ;;  %v10855_v34 = vpop.permute.xlu1 %3687 }
 0x6dc   :  { %9634 = vpow2.f32 %v2961_v39  ;;  %v3003_v48 = vsel %vm1108_vm4, %v10838_v47, 0.0 }
 0x6dd   :  { %3004 = vadd.xlane.f32.xlu1 %v3003_v48  ;;  %9636 = vpow2.f32 %v2963_v50 }
 0x6de   :  { %v10842_v28 = vpop.eup %9632 }
 0x6df   :  { %v3000_v36 = vsel %vm1108_vm4, %v10842_v28, 0.0 }
 0x6e0   :  { %3001 = vadd.xlane.f32.xlu0 %v3000_v36 }
 0x6e6   :  { %v10846_v25 = vpop.eup %9634 }
 0x6e7   :  { %v3006_v29 = vsel %vm1108_vm4, %v10846_v25, 0.0  ;;  %v10858_v33 = vpop.eup %9636 }
 0x6e8   :  { %3007 = vadd.xlane.f32.xlu0 %v3006_v29  ;;  %v3009_v48 = vsel %vm1108_vm4, %v10858_v33, 0.0 }
 0x6ee   :  { %3783 = vrot.lane.b32.xlu1 %v10085_v26, %s9846_s28 }
 0x6fe   :  { %3735 = vrot.lane.b32.xlu0 %v10069_v19, %s9846_s28 }
 0x70c   :  { %v2918_v46 = vpop.xlane.xlu1 %2917 }
 0x70d   :  { %v2934_v55 = vsub.f32 %v10752_v32, %v2918_v46  ;;  %v10878_v32 = vpop.permute.xlu0 %3639 }
 0x70f   :  { %v2965_v39 = vmul.f32 1.442695, %v2934_v55 }
 0x711   :  { %9638 = vpow2.f32 %v2965_v39  ;;  %v3165_v39 = vsel %vm1307_vm3, %v10762_v40, 0 }
 0x712   :  { %3010 = vadd.xlane.f32.xlu1 %v3009_v48 }
 0x71b   :  { %v10862_v36 = vpop.eup %9638 }
 0x71c   :  { %v3012_v52 = vsel %vm1108_vm4, %v10862_v36, 0.0 }
 0x71d   :  { %3013 = vadd.xlane.f32.xlu0 %v3012_v52 }
 0x723   :  { %3883 = vrot.lane.b32.xlu1 %v10025_v63, %s9847_s29 }
 0x727   :  { %3881 = vrot.lane.b32.xlu1 %v10025_v63, %s9848_s30 }
 0x72b   :  { %3983 = vrot.lane.b32.xlu1 %v10041_v9, %s9847_s29 }
 0x72f   :  { %3981 = vrot.lane.b32.xlu1 %v10041_v9, %s9848_s30 }
 0x733   :  { %3833 = vrot.lane.b32.xlu0 %v10023_v60, %s9847_s29  ;;  %4083 = vrot.lane.b32.xlu1 %v10049_v11, %s9847_s29 }
 0x737   :  { %3831 = vrot.lane.b32.xlu0 %v10023_v60, %s9848_s30  ;;  %4081 = vrot.lane.b32.xlu1 %v10049_v11, %s9848_s30 }
 0x73a   :  { %v2969_v29 = vpop.xlane.xlu0 %2968 }
 0x73b   :  { %9640 = vrcp.f32 %v2969_v29  ;;  %3933 = vrot.lane.b32.xlu0 %v10033_v2, %s9847_s29  ;;  %4183 = vrot.lane.b32.xlu1 %v10057_v14, %s9847_s29 }
 0x73f   :  { %3931 = vrot.lane.b32.xlu0 %v10033_v2, %s9848_s30  ;;  %4181 = vrot.lane.b32.xlu1 %v10057_v14, %s9848_s30 }
 0x742   :  { %v2975_v27 = vpop.xlane.xlu0 %2974 }
 0x743   :  { %9642 = vrcp.f32 %v2975_v27  ;;  %4033 = vrot.lane.b32.xlu0 %v10029_v0, %s9847_s29  ;;  %4283 = vrot.lane.b32.xlu1 %v10065_v17, %s9847_s29 }
 0x745   :  { %v9641_v37 = vpop.eup %9640  ;;  %v2972_v50 = vpop.xlane.xlu1 %2971 }
 0x746   :  { %9644 = vrcp.f32 %v2972_v50  ;;  %v3031_v46 = vmul.f32 %v9641_v37, %v10783_v49  ;;  %v12398_v49 = vmov 0.0  }
 0x747   :  { %4031 = vrot.lane.b32.xlu0 %v10029_v0, %s9848_s30  ;;  %4281 = vrot.lane.b32.xlu1 %v10065_v17, %s9848_s30 }
 0x748   :  { %v3047_v55 = vpack.c.bf16 %v3031_v46, %v3031_v46  ;;  %v3261_v46 = vsel %vm1307_vm3, %v10766_v45, 0 }
 0x74a   :  { %8973 = vmatmul.mubr.msk.bf16.vlgmr.msra.gmra.mrb[92].mxu0 %vm1303_vm5, %v3047_v55 }
 0x74b   :  { %8983 = vmatpush3.bf16.msra.mxu0 %v3165_v39  ;;  %4133 = vrot.lane.b32.xlu0 %v10037_v5, %s9847_s29 }
 0x74c   :  { %4383 = vrot.lane.b32.xlu1 %v10073_v23, %s9847_s29  ;;  %8984 = vmatprep.mubr.msk.bf16.mxu0 %vm9841_vm1, %v12398_v49 }
 0x74d   :  { %v9643_v48 = vpop.eup %9642  ;;  %v2978_v52 = vpop.xlane.xlu1 %2977  ;;  %8994 = vmatprep.subr.bf16.mxu0 %v12398_v49 }
 0x74e   :  { %9646 = vrcp.f32 %v2978_v52  ;;  %v3033_v29 = vmul.f32 %v9643_v48, %v10788_v54 }
 0x74f   :  { %4131 = vrot.lane.b32.xlu0 %v10037_v5, %s9848_s30 }
 0x750   :  { %v9645_v40 = vpop.eup %9644  ;;  %4381 = vrot.lane.b32.xlu1 %v10073_v23, %s9848_s30  ;;  %v3049_v27 = vpack.c.bf16 %v3033_v29, %v3033_v29  ;;  %v3309_v29 = vsel %vm1307_vm3, %v10764_v30, 0 }
 0x751   :  { %v2981_v37 = vpop.xlane.xlu0 %2980  ;;  %v3032_v50 = vmul.f32 %v9645_v40, %v10793_v3  ;;  %v3213_v3 = vsel %vm1307_vm3, %v10760_v8, 0 }
 0x752   :  { %9648 = vrcp.f32 %v2981_v37  ;;  %8985 = vmatmul.mubr.msk.bf16.vlgmr.msra.gmra.mrb[96].mxu0 %vm1303_vm5, %v3049_v27 }
 0x753   :  { %8995 = vmatpush3.bf16.msra.mxu0 %v3261_v46  ;;  %4233 = vrot.lane.b32.xlu0 %v10045_v10, %s9847_s29  ;;  %v3048_v54 = vpack.c.bf16 %v3032_v50, %v3032_v50  ;;  %v3357_v50 = vsel %vm1307_vm3, %v10770_v20, 0  ;;  %v3405_v20 = vsel %vm1307_vm3, %v10768_v22, 0  ;;  %v3453_v22 = vsel %vm1307_vm3, %v10774_v44, 0 }
 0x754   :  { %4483 = vrot.lane.b32.xlu1 %v10079_v24, %s9847_s29  ;;  %8996 = vmatprep.mubr.msk.bf16.mxu0 %vm9841_vm1, %v12398_v49  ;;  %v3501_v44 = vsel %vm1307_vm3, %v10772_v31, 0 }
 0x755   :  { %8979 = vmatmul.mubr.msk.bf16.vlgmr.msra.gmra.mrb[108].mxu1 %vm1303_vm5, %v3048_v54  ;;  %v2984_v45 = vpop.xlane.xlu1 %2983  ;;  %9006 = vmatprep.subr.bf16.mxu0 %v12398_v49 }
 0x756   :  { %8989 = vmatpush3.bf16.msra.mxu1 %v3213_v3  ;;  %9650 = vrcp.f32 %v2984_v45  ;;  %v2987_v55 = vpop.xlane.xlu0 %2986  ;;  %8990 = vmatprep.mubr.msk.bf16.mxu1 %vm9841_vm1, %v12398_v49 }
 0x757   :  { %9652 = vrcp.f32 %v2987_v55  ;;  %4231 = vrot.lane.b32.xlu0 %v10045_v10, %s9848_s30  ;;  %9000 = vmatprep.subr.bf16.mxu1 %v12398_v49 }
 0x758   :  { %v9647_v39 = vpop.eup %9646  ;;  %4481 = vrot.lane.b32.xlu1 %v10079_v24, %s9848_s30 }
 0x759   :  { %v3034_v8 = vmul.f32 %v9647_v39, %v10799_v59 }
 0x75b   :  { %4333 = vrot.lane.b32.xlu0 %v10053_v13, %s9847_s29  ;;  %v3050_v48 = vpack.c.bf16 %v3034_v8, %v3034_v8 }
 0x75c   :  { %v9649_v52 = vpop.eup %9648  ;;  %4583 = vrot.lane.b32.xlu1 %v10085_v26, %s9847_s29 }
 0x75d   :  { %8991 = vmatmul.mubr.msk.bf16.vlgmr.msra.gmra.mrb[112].mxu1 %vm1303_vm5, %v3050_v48  ;;  %v2990_v40 = vpop.xlane.xlu1 %2989  ;;  %v3035_v27 = vmul.f32 %v9649_v52, %v10805_v51 }
 0x75e   :  { %9001 = vmatpush3.bf16.msra.mxu1 %v3309_v29  ;;  %9654 = vrcp.f32 %v2990_v40  ;;  %9002 = vmatprep.mubr.msk.bf16.mxu1 %vm9841_vm1, %v12398_v49 }
 0x75f   :  { %4331 = vrot.lane.b32.xlu0 %v10053_v13, %s9848_s30  ;;  %v3051_v59 = vpack.c.bf16 %v3035_v27, %v3035_v27  ;;  %9012 = vmatprep.subr.bf16.mxu1 %v12398_v49 }
 0x760   :  { %v9651_v37 = vpop.eup %9650  ;;  %4581 = vrot.lane.b32.xlu1 %v10085_v26, %s9848_s30 }
 0x761   :  { %v9653_v30 = vpop.eup %9652  ;;  %v2993_v51 = vpop.xlane.xlu1 %2992  ;;  %8997 = vmatmul.mubr.msk.bf16.vlgmr.msra.gmra.mrb[100].mxu0 %vm1303_vm5, %v3051_v59  ;;  %v3036_v46 = vmul.f32 %v9651_v37, %v10810_v21  ;;  %v3549_v59 = vsel %vm1307_vm3, %v10776_v53, 0 }
 0x762   :  { %9656 = vrcp.f32 %v2993_v51  ;;  %9007 = vmatpush3.bf16.msra.mxu0 %v3357_v50  ;;  %9008 = vmatprep.mubr.msk.bf16.mxu0 %vm9841_vm1, %v12398_v49  ;;  %v3037_v3 = vmul.f32 %v9653_v30, %v10812_v62  ;;  %v3597_v50 = vsel %vm1307_vm3, %v10779_v57, 0 }
 0x763   :  { %4433 = vrot.lane.b32.xlu0 %v10061_v16, %s9847_s29  ;;  %v3052_v54 = vpack.c.bf16 %v3036_v46, %v3036_v46  ;;  %9018 = vmatprep.subr.bf16.mxu0 %v12398_v49 }
 0x764   :  { %4871 = vrot.lane.b32.xlu1 %v10025_v63, %s9849_s13  ;;  %v3053_v62 = vpack.c.bf16 %v3037_v3, %v3037_v3 }
 0x765   :  { %9003 = vmatmul.mubr.msk.bf16.vlgmr.msra.gmra.mrb[116].mxu1 %vm1303_vm5, %v3052_v54  ;;  %v2999_v21 = vpop.xlane.xlu1 %2998  ;;  %v2996_v45 = vpop.xlane.xlu0 %2995 }
 0x766   :  { %9013 = vmatpush3.bf16.msra.mxu1 %v3405_v20  ;;  %9658 = vrcp.f32 %v2999_v21  ;;  %9014 = vmatprep.mubr.msk.bf16.mxu1 %vm9841_vm1, %v12398_v49 }
 0x767   :  { %9660 = vrcp.f32 %v2996_v45  ;;  %4431 = vrot.lane.b32.xlu0 %v10061_v16, %s9848_s30  ;;  %9024 = vmatprep.subr.bf16.mxu1 %v12398_v49 }
 0x768   :  { %v9655_v55 = vpop.eup %9654  ;;  %4967 = vrot.lane.b32.xlu1 %v10041_v9, %s9849_s13 }
 0x769   :  { %9009 = vmatmul.mubr.msk.bf16.vlgmr.msra.gmra.mrb[104].mxu0 %vm1303_vm5, %v3053_v62  ;;  %v3038_v39 = vmul.f32 %v9655_v55, %v10820_v42 }
 0x76a   :  { %9019 = vmatpush3.bf16.msra.mxu0 %v3453_v22  ;;  %v3005_v8 = vpop.xlane.xlu1 %3004  ;;  %9020 = vmatprep.mubr.msk.bf16.mxu0 %vm9841_vm1, %v12398_v49 }
 0x76b   :  { %4533 = vrot.lane.b32.xlu0 %v10069_v19, %s9847_s29  ;;  %v3054_v48 = vpack.c.bf16 %v3038_v39, %v3038_v39  ;;  %9030 = vmatprep.subr.bf16.mxu0 %v12398_v49  ;;  %9662 = vrcp.f32 %v3005_v8 }
 0x76c   :  { %v9657_v52 = vpop.eup %9656  ;;  %5063 = vrot.lane.b32.xlu1 %v10049_v11, %s9849_s13 }
 0x76d   :  { %9015 = vmatmul.mubr.msk.bf16.vlgmr.msra.gmra.mrb[120].mxu1 %vm1303_vm5, %v3054_v48  ;;  %v3002_v42 = vpop.xlane.xlu0 %3001  ;;  %v3039_v29 = vmul.f32 %v9657_v52, %v10824_v38 }
 0x76e   :  { %9025 = vmatpush3.bf16.msra.mxu1 %v3501_v44  ;;  %9664 = vrcp.f32 %v3002_v42  ;;  %9026 = vmatprep.mubr.msk.bf16.mxu1 %vm9841_vm1, %v12398_v49  ;;  %v3784_v45 = vpop.permute.xlu1 %3783 }
 0x76f   :  { %4531 = vrot.lane.b32.xlu0 %v10069_v19, %s9848_s30  ;;  %v3055_v40 = vpack.c.bf16 %v3039_v29, %v3039_v29  ;;  %9036 = vmatprep.subr.bf16.mxu1 %v12398_v49  ;;  %v3789_v55 = vsel %vm1307_vm3, %v3784_v45, 0 }
 0x770   :  { %v9659_v27 = vpop.eup %9658  ;;  %5159 = vrot.lane.b32.xlu1 %v10057_v14, %s9849_s13 }
 0x771   :  { %v9661_v31 = vpop.eup %9660  ;;  %9021 = vmatmul.mubr.msk.bf16.vlgmr.msra.gmra.mrb[108].mxu0 %vm1303_vm5, %v3055_v40  ;;  %v3041_v37 = vmul.f32 %v9659_v27, %v10829_v1  ;;  %v3645_v1 = vsel %vm1307_vm3, %v10878_v32, 0  ;;  %v3693_v32 = vsel %vm1307_vm3, %v10855_v34, 0 }
 0x772   :  { %9031 = vmatpush3.bf16.msra.mxu0 %v3549_v59  ;;  %v3040_v38 = vmul.f32 %v9661_v31, %v10831_v56  ;;  %9032 = vmatprep.mubr.msk.bf16.mxu0 %vm9841_vm1, %v12398_v49 }
 0x773   :  { %4823 = vrot.lane.b32.xlu0 %v10023_v60, %s9849_s13  ;;  %9042 = vmatprep.subr.bf16.mxu0 %v12398_v49  ;;  %v3057_v51 = vpack.c.bf16 %v3041_v37, %v3041_v37 }
 0x774   :  { %5255 = vrot.lane.b32.xlu1 %v10065_v17, %s9849_s13  ;;  %v3056_v30 = vpack.c.bf16 %v3040_v38, %v3040_v38 }
 0x775   :  { %v3008_v53 = vpop.xlane.xlu0 %3007  ;;  %v9663_v56 = vpop.eup %9662 }
 0x776   :  { %9027 = vmatmul.mubr.msk.bf16.vlgmr.msra.gmra.mrb[124].mxu1 %vm1303_vm5, %v3056_v30  ;;  %9666 = vrcp.f32 %v3008_v53  ;;  %v3043_v3 = vmul.f32 %v9663_v56, %v10838_v47 }
 0x777   :  { %9037 = vmatpush3.bf16.msra.mxu1 %v3597_v50  ;;  %4919 = vrot.lane.b32.xlu0 %v10033_v2, %s9849_s13 }
 0x778   :  { %v9665_v46 = vpop.eup %9664  ;;  %5303 = vrot.lane.b32.xlu1 %v10053_v13, %s9849_s13  ;;  %9038 = vmatprep.mubr.msk.bf16.mxu1 %vm9841_vm1, %v12398_v49 }
 0x779   :  { %9033 = vmatmul.mubr.msk.bf16.vlgmr.msra.gmra.mrb[112].mxu0 %vm1303_vm5, %v3057_v51  ;;  %9048 = vmatprep.subr.bf16.mxu1 %v12398_v49  ;;  %v3042_v57 = vmul.f32 %v9665_v46, %v10842_v28  ;;  %v3736_v20 = vpop.permute.xlu0 %3735  ;;  %v3059_v28 = vpack.c.bf16 %v3043_v3, %v3043_v3 }
 0x77a   :  { %9043 = vmatpush3.bf16.msra.mxu0 %v3645_v1  ;;  %9044 = vmatprep.mubr.msk.bf16.mxu0 %vm9841_vm1, %v12398_v49  ;;  %v3741_v47 = vsel %vm1307_vm3, %v3736_v20, 0 }
 0x77b   :  { %5015 = vrot.lane.b32.xlu0 %v10029_v0, %s9849_s13  ;;  %v3058_v54 = vpack.c.bf16 %v3042_v57, %v3042_v57  ;;  %9054 = vmatprep.subr.bf16.mxu0 %v12398_v49 }
 0x77c   :  { %5351 = vrot.lane.b32.xlu1 %v10073_v23, %s9849_s13 }
 0x77e   :  { %9039 = vmatmul.mubr.msk.bf16.vlgmr.msra.gmra.mrb[128].mxu1 %vm1303_vm5, %v3058_v54 }
 0x77f   :  { %9049 = vmatpush3.bf16.msra.mxu1 %v3693_v32  ;;  %5111 = vrot.lane.b32.xlu0 %v10037_v5, %s9849_s13 }
 0x780   :  { %v9667_v21 = vpop.eup %9666  ;;  %9050 = vmatprep.mubr.msk.bf16.mxu1 %vm9841_vm1, %v12398_v49  ;;  %9060 = vmatprep.subr.bf16.mxu1 %v12398_v49 }
 0x781   :  { %9045 = vmatmul.mubr.msk.bf16.vlgmr.msra.gmra.mrb[116].mxu0 %vm1303_vm5, %v3059_v28  ;;  %v3044_v34 = vmul.f32 %v9667_v21, %v10846_v25 }
 0x782   :  { %9055 = vmatpush3.bf16.msra.mxu0 %v3741_v47  ;;  %9056 = vmatprep.mubr.msk.bf16.mxu0 %vm9841_vm1, %v12398_v49 }
 0x783   :  { %5207 = vrot.lane.b32.xlu0 %v10045_v10, %s9849_s13  ;;  %v3060_v62 = vpack.c.bf16 %v3044_v34, %v3044_v34  ;;  %9066 = vmatprep.subr.bf16.mxu0 %v12398_v49 }
 0x786   :  { %9051 = vmatmul.mubr.msk.bf16.vlgmr.msra.gmra.mrb[132].mxu1 %vm1303_vm5, %v3060_v62 }
 0x787   :  { %9061 = vmatpush3.bf16.msra.mxu1 %v3789_v55  ;;  %9062 = vmatprep.mubr.msk.bf16.mxu1 %vm9841_vm1, %v12398_v49 }
 0x788   :  { %9072 = vmatprep.subr.bf16.mxu1 %v12398_v49 }
 0x79f   :  { %v3011_v25 = vpop.xlane.xlu1 %3010 }
 0x7a0   :  { %9668 = vrcp.f32 %v3011_v25 }
 0x7a3   :  { %v3884_v22 = vpop.permute.xlu1 %3883 }
 0x7a4   :  { %v3889_v56 = vsel %vm326_vm2, %v3884_v22, 0 }
 0x7a7   :  { %v3882_v39 = vpop.permute.xlu1 %3881 }
 0x7aa   :  { %v9669_v8 = vpop.eup %9668  ;;  %v3014_v48 = vpop.xlane.xlu0 %3013 }
 0x7ab   :  { %9670 = vrcp.f32 %v3014_v48  ;;  %v3984_v52 = vpop.permute.xlu1 %3983  ;;  %v3045_v44 = vmul.f32 %v9669_v8, %v10858_v33 }
 0x7ac   :  { %v3989_v54 = vsel %vm326_vm2, %v3984_v52, 0 }
 0x7ad   :  { %v3061_v42 = vpack.c.bf16 %v3045_v44, %v3045_v44 }
 0x7ae   :  { %v3834_v29 = vpop.permute.xlu0 %3833 }
 0x7af   :  { %v3839_v40 = vsel %vm326_vm2, %v3834_v29, 0  ;;  %v3982_v27 = vpop.permute.xlu1 %3981  ;;  %9057 = vmatmul.mubr.msk.bf16.vlgmr.msra.gmra.mrb[120].mxu0 %vm1303_vm5, %v3061_v42 }
 0x7b0   :  { %9067 = vmatpush3.bf16.xpose.msra.mxu0 %v3839_v40  ;;  %9068 = vmatprep.mubr.msk.bf16.mxu0 %vm9841_vm1, %v12398_v49 }
 0x7b1   :  { %9078 = vmatprep.subr.bf16.mxu0 %v12398_v49 }
 0x7b2   :  { %v3832_v31 = vpop.permute.xlu0 %3831 }
 0x7b3   :  { %v4084_v59 = vpop.permute.xlu1 %4083 }
 0x7b4   :  { %v4089_v21 = vsel %vm326_vm2, %v4084_v59, 0 }
 0x7b5   :  { %v9671_v38 = vpop.eup %9670 }
 0x7b6   :  { %v3934_v37 = vpop.permute.xlu0 %3933  ;;  %v3046_v30 = vmul.f32 %v9671_v38, %v10862_v36 }
 0x7b7   :  { %v3939_v33 = vsel %vm326_vm2, %v3934_v37, 0  ;;  %v4082_v53 = vpop.permute.xlu1 %4081  ;;  %9069 = vmatmul.mubr.msk.bf16.vlgmr.msra.gmra.mrb[124].mxu0 %vm326_vm2, %v3832_v31 }
 0x7b8   :  { %9079 = vmatpush3.bf16.xpose.msra.mxu0 %v3939_v33  ;;  %v3062_v50 = vpack.c.bf16 %v3046_v30, %v3046_v30  ;;  %9080 = vmatprep.mubr.msk.bf16.mxu0 %vm9841_vm1, %v12398_v49 }
 0x7b9   :  { %9090 = vmatprep.subr.bf16.mxu0 %v12398_v49 }
 0x7ba   :  { %9063 = vmatmul.mubr.msk.bf16.vlgmr.msra.gmra.mrb[136].mxu1 %vm1303_vm5, %v3062_v50  ;;  %v3932_v51 = vpop.permute.xlu0 %3931 }
 0x7bb   :  { %9073 = vmatpush3.bf16.xpose.msra.mxu1 %v3889_v56  ;;  %v4184_v46 = vpop.permute.xlu1 %4183  ;;  %9074 = vmatprep.mubr.msk.bf16.mxu1 %vm9841_vm1, %v12398_v49 }
 0x7bc   :  { %9084 = vmatprep.subr.bf16.mxu1 %v12398_v49  ;;  %v4189_v55 = vsel %vm326_vm2, %v4184_v46, 0 }
 0x7be   :  { %v4034_v36 = vpop.permute.xlu0 %4033 }
 0x7bf   :  { %v4039_v1 = vsel %vm326_vm2, %v4034_v36, 0  ;;  %9081 = vmatmul.mubr.msk.bf16.vlgmr.msra.gmra.mrb[128].mxu0 %vm326_vm2, %v3932_v51  ;;  %v4182_v57 = vpop.permute.xlu1 %4181 }
 0x7c0   :  { %9091 = vmatpush3.bf16.xpose.msra.mxu0 %v4039_v1  ;;  %9092 = vmatprep.mubr.msk.bf16.mxu0 %vm9841_vm1, %v12398_v49 }
 0x7c1   :  { %9102 = vmatprep.subr.bf16.mxu0 %v12398_v49 }
 0x7c2   :  { %9075 = vmatmul.mubr.msk.bf16.vlgmr.msra.gmra.mrb[140].mxu1 %vm326_vm2, %v3882_v39  ;;  %v4032_v3 = vpop.permute.xlu0 %4031 }
 0x7c3   :  { %9085 = vmatpush3.bf16.xpose.msra.mxu1 %v3989_v54  ;;  %9086 = vmatprep.mubr.msk.bf16.mxu1 %vm9841_vm1, %v12398_v49  ;;  %v4284_v20 = vpop.permute.xlu1 %4283 }
 0x7c4   :  { %9096 = vmatprep.subr.bf16.mxu1 %v12398_v49  ;;  %v4289_v52 = vsel %vm326_vm2, %v4284_v20, 0 }
 0x7c6   :  { %v4134_v32 = vpop.permute.xlu0 %4133 }
 0x7c7   :  { %v4139_v28 = vsel %vm326_vm2, %v4134_v32, 0  ;;  %9093 = vmatmul.mubr.msk.bf16.vlgmr.msra.gmra.mrb[132].mxu0 %vm326_vm2, %v4032_v3  ;;  %v4282_v34 = vpop.permute.xlu1 %4281 }
 0x7c8   :  { %9103 = vmatpush3.bf16.xpose.msra.mxu0 %v4139_v28  ;;  %9104 = vmatprep.mubr.msk.bf16.mxu0 %vm9841_vm1, %v12398_v49 }
 0x7c9   :  { %9114 = vmatprep.subr.bf16.mxu0 %v12398_v49 }
 0x7ca   :  { %9087 = vmatmul.mubr.msk.bf16.vlgmr.msra.gmra.mrb[144].mxu1 %vm326_vm2, %v3982_v27  ;;  %v4132_v47 = vpop.permute.xlu0 %4131 }
 0x7cb   :  { %9097 = vmatpush3.bf16.xpose.msra.mxu1 %v4089_v21  ;;  %9098 = vmatprep.mubr.msk.bf16.mxu1 %vm9841_vm1, %v12398_v49  ;;  %v4384_v22 = vpop.permute.xlu1 %4383 }
 0x7cc   :  { %9108 = vmatprep.subr.bf16.mxu1 %v12398_v49  ;;  %v4389_v27 = vsel %vm326_vm2, %v4384_v22, 0 }
 0x7ce   :  { %v4234_v45 = vpop.permute.xlu0 %4233 }
 0x7cf   :  { %v4239_v62 = vsel %vm326_vm2, %v4234_v45, 0  ;;  %9105 = vmatmul.mubr.msk.bf16.vlgmr.msra.gmra.mrb[136].mxu0 %vm326_vm2, %v4132_v47  ;;  %v4382_v48 = vpop.permute.xlu1 %4381 }
 0x7d0   :  { %9115 = vmatpush3.bf16.xpose.msra.mxu0 %v4239_v62  ;;  %9116 = vmatprep.mubr.msk.bf16.mxu0 %vm9841_vm1, %v12398_v49 }
 0x7d1   :  { %9126 = vmatprep.subr.bf16.mxu0 %v12398_v49 }
 0x7d2   :  { %9099 = vmatmul.mubr.msk.bf16.vlgmr.msra.gmra.mrb[148].mxu1 %vm326_vm2, %v4082_v53  ;;  %v4232_v25 = vpop.permute.xlu0 %4231 }
 0x7d3   :  { %9109 = vmatpush3.bf16.xpose.msra.mxu1 %v4189_v55  ;;  %9110 = vmatprep.mubr.msk.bf16.mxu1 %vm9841_vm1, %v12398_v49  ;;  %v4484_v29 = vpop.permute.xlu1 %4483 }
 0x7d4   :  { %9120 = vmatprep.subr.bf16.mxu1 %v12398_v49  ;;  %v4489_v30 = vsel %vm326_vm2, %v4484_v29, 0 }
 0x7d6   :  { %v4334_v39 = vpop.permute.xlu0 %4333 }
 0x7d7   :  { %v4339_v8 = vsel %vm326_vm2, %v4334_v39, 0  ;;  %9117 = vmatmul.mubr.msk.bf16.vlgmr.msra.gmra.mrb[140].mxu0 %vm326_vm2, %v4232_v25  ;;  %v4482_v59 = vpop.permute.xlu1 %4481 }
 0x7d8   :  { %9127 = vmatpush3.bf16.xpose.msra.mxu0 %v4339_v8  ;;  %9128 = vmatprep.mubr.msk.bf16.mxu0 %vm9841_vm1, %v12398_v49 }
 0x7d9   :  { %9138 = vmatprep.subr.bf16.mxu0 %v12398_v49 }
 0x7da   :  { %9111 = vmatmul.mubr.msk.bf16.vlgmr.msra.gmra.mrb[152].mxu1 %vm326_vm2, %v4182_v57  ;;  %v4332_v44 = vpop.permute.xlu0 %4331 }
 0x7db   :  { %9121 = vmatpush3.bf16.xpose.msra.mxu1 %v4289_v52  ;;  %9122 = vmatprep.mubr.msk.bf16.mxu1 %vm9841_vm1, %v12398_v49  ;;  %v4584_v53 = vpop.permute.xlu1 %4583 }
 0x7dc   :  { %9132 = vmatprep.subr.bf16.mxu1 %v12398_v49  ;;  %v4589_v46 = vsel %vm326_vm2, %v4584_v53, 0 }
 0x7de   :  { %v4434_v42 = vpop.permute.xlu0 %4433 }
 0x7df   :  { %v4439_v40 = vsel %vm326_vm2, %v4434_v42, 0  ;;  %9129 = vmatmul.mubr.msk.bf16.vlgmr.msra.gmra.mrb[144].mxu0 %vm326_vm2, %v4332_v44  ;;  %v4582_v51 = vpop.permute.xlu1 %4581 }
 0x7e0   :  { %9139 = vmatpush3.bf16.xpose.msra.mxu0 %v4439_v40  ;;  %9140 = vmatprep.mubr.msk.bf16.mxu0 %vm9841_vm1, %v12398_v49 }
 0x7e1   :  { %9150 = vmatprep.subr.bf16.mxu0 %v12398_v49 }
 0x7e2   :  { %9123 = vmatmul.mubr.msk.bf16.vlgmr.msra.gmra.mrb[156].mxu1 %vm326_vm2, %v4282_v34  ;;  %v4432_v31 = vpop.permute.xlu0 %4431 }
 0x7e3   :  { %9133 = vmatpush3.bf16.xpose.msra.mxu1 %v4389_v27  ;;  %9134 = vmatprep.mubr.msk.bf16.mxu1 %vm9841_vm1, %v12398_v49  ;;  %v4872_v36 = vpop.permute.xlu1 %4871 }
 0x7e4   :  { %9144 = vmatprep.subr.bf16.mxu1 %v12398_v49  ;;  %v4877_v1 = vsel %vm1307_vm3, %v4872_v36, 0 }
 0x7e6   :  { %v4534_v38 = vpop.permute.xlu0 %4533 }
 0x7e7   :  { %v4539_v37 = vsel %vm326_vm2, %v4534_v38, 0  ;;  %9141 = vmatmul.mubr.msk.bf16.vlgmr.msra.gmra.mrb[148].mxu0 %vm326_vm2, %v4432_v31 }
 0x7e8   :  { %9151 = vmatpush3.bf16.xpose.msra.mxu0 %v4539_v37  ;;  %9152 = vmatprep.mubr.msk.bf16.mxu0 %vm9841_vm1, %v12398_v49 }
 0x7e9   :  { %9162 = vmatprep.subr.bf16.mxu0 %v12398_v49 }
 0x7ea   :  { %9135 = vmatmul.mubr.msk.bf16.vlgmr.msra.gmra.mrb[160].mxu1 %vm326_vm2, %v4382_v48  ;;  %v4532_v33 = vpop.permute.xlu0 %4531 }
 0x7eb   :  { %9145 = vmatpush3.bf16.xpose.msra.mxu1 %v4489_v30  ;;  %9146 = vmatprep.mubr.msk.bf16.mxu1 %vm9841_vm1, %v12398_v49 }
 0x7ec   :  { %9156 = vmatprep.subr.bf16.mxu1 %v12398_v49 }
 0x7ee   :  { %v4824_v50 = vpop.permute.xlu0 %4823 }
 0x7ef   :  { %v4829_v56 = vsel %vm1307_vm3, %v4824_v50, 0  ;;  %9153 = vmatmul.mubr.msk.bf16.vlgmr.msra.gmra.mrb[152].mxu0 %vm326_vm2, %v4532_v33 }
 0x7f0   :  { %9163 = vmatpush3.bf16.msra.mxu0 %v4829_v56  ;;  %9164 = vmatprep.mubr.msk.bf16.mxu0 %vm9841_vm1, %v12398_v49 }
 0x7f1   :  { %9174 = vmatprep.subr.bf16.mxu0 %v12398_v49 }
 0x7f2   :  { %9147 = vmatmul.mubr.msk.bf16.vlgmr.msra.gmra.mrb[164].mxu1 %vm326_vm2, %v4482_v59 }
 0x7f3   :  { %9157 = vmatpush3.bf16.xpose.msra.mxu1 %v4589_v46  ;;  %9158 = vmatprep.mubr.msk.bf16.mxu1 %vm9841_vm1, %v12398_v49 }
 0x7f4   :  { %9168 = vmatprep.subr.bf16.mxu1 %v12398_v49 }
 0x7fa   :  { %9159 = vmatmul.mubr.msk.bf16.vlgmr.msra.gmra.mrb[168].mxu1 %vm326_vm2, %v4582_v51 }
 0x7fb   :  { %9169 = vmatpush3.bf16.msra.mxu1 %v4877_v1  ;;  %9170 = vmatprep.mubr.msk.bf16.mxu1 %vm9841_vm1, %v12398_v49 }
 0x7fc   :  { %9180 = vmatprep.subr.bf16.mxu1 %v12398_v49 }
 0x81d   :  { %v11144_v57 = vpop.f32.mrb[92].mxu0 }
 0x81e   :  { %v8974_v54 = vpop.f32.mrb[93].mxu0 }
 0x81f   :  { %v3108_v3 = vpop.f32.mrb[94].mxu0 }
 0x820   :  { %v8975_v32 = vpop.f32.mrb[95].mxu0 }
 0x825   :  { %v11146_v20 = vpop.f32.mrb[96].mxu0 }
 0x826   :  { %v8986_v28 = vpop.f32.mrb[97].mxu0 }
 0x827   :  { %v3204_v21 = vpop.f32.mrb[98].mxu0 }
 0x828   :  { %v11148_v47 = vpop.f32.mrb[108].mxu1  ;;  %v8987_v34 = vpop.f32.mrb[99].mxu0 }
 0x829   :  { %v8980_v45 = vpop.f32.mrb[109].mxu1 }
 0x82a   :  { %v3156_v62 = vpop.f32.mrb[110].mxu1 }
 0x82b   :  { %v8981_v55 = vpop.f32.mrb[111].mxu1 }
 0x830   :  { %v11150_v25 = vpop.f32.mrb[112].mxu1 }
 0x831   :  { %v8992_v22 = vpop.f32.mrb[113].mxu1 }
 0x832   :  { %v3252_v39 = vpop.f32.mrb[114].mxu1 }
 0x833   :  { %v8993_v8 = vpop.f32.mrb[115].mxu1 }
 0x834   :  { %v11152_v48 = vpop.f32.mrb[100].mxu0 }
 0x835   :  { %v8998_v52 = vpop.f32.mrb[101].mxu0 }
 0x836   :  { %v3300_v44 = vpop.f32.mrb[102].mxu0 }
 0x837   :  { %v8999_v42 = vpop.f32.mrb[103].mxu0 }
 0x838   :  { %v11154_v29 = vpop.f32.mrb[116].mxu1 }
 0x839   :  { %v9004_v40 = vpop.f32.mrb[117].mxu1 }
 0x83a   :  { %v3348_v27 = vpop.f32.mrb[118].mxu1 }
 0x83b   :  { %v9005_v31 = vpop.f32.mrb[119].mxu1 }
 0x83c   :  { %v11156_v59 = vpop.f32.mrb[104].mxu0 }
 0x83d   :  { %v9010_v38 = vpop.f32.mrb[105].mxu0 }
 0x83e   :  { %v3396_v37 = vpop.f32.mrb[106].mxu0 }
 0x83f   :  { %v9011_v30 = vpop.f32.mrb[107].mxu0 }
 0x840   :  { %v11158_v33 = vpop.f32.mrb[120].mxu1 }
 0x841   :  { %v9016_v53 = vpop.f32.mrb[121].mxu1 }
 0x842   :  { %v3444_v50 = vpop.f32.mrb[122].mxu1 }
 0x843   :  { %v9017_v56 = vpop.f32.mrb[123].mxu1 }
 0x844   :  { %v11160_v51 = vpop.f32.mrb[108].mxu0 }
 0x845   :  { %12399 = vst [vmem:[#allocation18_spill] sm:$0xff] %v11160_v51  ;;  %v9022_v46 = vpop.f32.mrb[109].mxu0 }
 0x846   :  { %v3492_v36 = vpop.f32.mrb[110].mxu0 }
 0x847   :  { %v9023_v1 = vpop.f32.mrb[111].mxu0 }
 0x849   :  { %v11162_v54 = vpop.f32.mrb[124].mxu1 }
 0x84a   :  { %v9028_v3 = vpop.f32.mrb[125].mxu1 }
 0x84b   :  { %v3540_v32 = vpop.f32.mrb[126].mxu1 }
 0x84c   :  { %v9029_v28 = vpop.f32.mrb[127].mxu1  ;;  %v11164_v21 = vpop.f32.mrb[112].mxu0 }
 0x84d   :  { %12400 = vst [vmem:[#allocation19_spill] sm:$0xff] %v11164_v21  ;;  %v9034_v34 = vpop.f32.mrb[113].mxu0 }
 0x84e   :  { %v3588_v45 = vpop.f32.mrb[114].mxu0 }
 0x84f   :  { %v9035_v62 = vpop.f32.mrb[115].mxu0 }
 0x851   :  { %v11166_v55 = vpop.f32.mrb[128].mxu1 }
 0x852   :  { %v9040_v22 = vpop.f32.mrb[129].mxu1 }
 0x853   :  { %v3636_v39 = vpop.f32.mrb[130].mxu1 }
 0x854   :  { %v9041_v8 = vpop.f32.mrb[131].mxu1  ;;  %v11168_v52 = vpop.f32.mrb[116].mxu0 }
 0x855   :  { %12401 = vst [vmem:[#allocation20_spill] sm:$0xff] %v11168_v52  ;;  %v9046_v44 = vpop.f32.mrb[117].mxu0 }
 0x856   :  { %v3684_v42 = vpop.f32.mrb[118].mxu0 }
 0x857   :  { %v9047_v40 = vpop.f32.mrb[119].mxu0 }
 0x859   :  { %v11170_v27 = vpop.f32.mrb[132].mxu1 }
 0x85a   :  { %12402 = vst [vmem:[#allocation21_spill] sm:$0xff] %v11170_v27  ;;  %v9052_v31 = vpop.f32.mrb[133].mxu1 }
 0x85b   :  { %v3732_v38 = vpop.f32.mrb[134].mxu1 }
 0x85c   :  { %v9053_v37 = vpop.f32.mrb[135].mxu1 }
 0x882   :  { %v11172_v30 = vpop.f32.mrb[120].mxu0 }
 0x883   :  { %12403 = vst [vmem:[#allocation22_spill] sm:$0xff] %v11172_v30  ;;  %v9058_v53 = vpop.f32.mrb[121].mxu0 }
 0x884   :  { %v3780_v50 = vpop.f32.mrb[122].mxu0 }
 0x885   :  { %v9059_v56 = vpop.f32.mrb[123].mxu0 }
 0x88a   :  { %v11174_v46 = vpop.f32.mrb[124].mxu0 }
 0x88b   :  { %v9070_v36 = vpop.f32.mrb[125].mxu0  ;;  %v4631_v1 = vsel %vm1108_vm4, %v11174_v46, -inf }
 0x88c   :  { %4632 = vmax.xlane.f32.xlu0 %v4631_v1  ;;  %v3878_v3 = vpop.f32.mrb[126].mxu0 }
 0x88d   :  { %v11178_v32 = vpop.f32.mrb[136].mxu1  ;;  %v9071_v28 = vpop.f32.mrb[127].mxu0 }
 0x88e   :  { %12404 = vst [vmem:[#allocation23_spill] sm:$0xff] %v11178_v32  ;;  %v9064_v34 = vpop.f32.mrb[137].mxu1 }
 0x88f   :  { %v3828_v45 = vpop.f32.mrb[138].mxu1 }
 0x890   :  { %v9065_v62 = vpop.f32.mrb[139].mxu1 }
 0x892   :  { %v11180_v22 = vpop.f32.mrb[128].mxu0 }
 0x893   :  { %v9082_v39 = vpop.f32.mrb[129].mxu0  ;;  %v4637_v8 = vsel %vm1108_vm4, %v11180_v22, -inf }
 0x894   :  { %4638 = vmax.xlane.f32.xlu0 %v4637_v8  ;;  %v3978_v44 = vpop.f32.mrb[130].mxu0 }
 0x895   :  { %v11184_v42 = vpop.f32.mrb[140].mxu1  ;;  %v9083_v40 = vpop.f32.mrb[131].mxu0 }
 0x896   :  { %v9076_v31 = vpop.f32.mrb[141].mxu1  ;;  %v4634_v38 = vsel %vm1108_vm4, %v11184_v42, -inf }
 0x897   :  { %4635 = vmax.xlane.f32.xlu1 %v4634_v38  ;;  %v3928_v37 = vpop.f32.mrb[142].mxu1 }
 0x898   :  { %v9077_v53 = vpop.f32.mrb[143].mxu1 }
 0x89a   :  { %v11188_v50 = vpop.f32.mrb[132].mxu0 }
 0x89b   :  { %v9094_v56 = vpop.f32.mrb[133].mxu0  ;;  %v4643_v8 = vsel %vm1108_vm4, %v11188_v50, -inf }
 0x89c   :  { %v4078_v36 = vpop.f32.mrb[134].mxu0 }
 0x89d   :  { %v11190_v1 = vpop.f32.mrb[144].mxu1  ;;  %v9095_v3 = vpop.f32.mrb[135].mxu0 }
 0x89e   :  { %v9088_v28 = vpop.f32.mrb[145].mxu1  ;;  %v4640_v34 = vsel %vm1108_vm4, %v11190_v1, -inf }
 0x89f   :  { %v4028_v45 = vpop.f32.mrb[146].mxu1  ;;  %4641 = vmax.xlane.f32.xlu0 %v4640_v34 }
 0x8a0   :  { %v9089_v62 = vpop.f32.mrb[147].mxu1 }
 0x8a2   :  { %v11194_v39 = vpop.f32.mrb[136].mxu0 }
 0x8a3   :  { %4644 = vmax.xlane.f32.xlu0 %v4643_v8  ;;  %v9106_v44 = vpop.f32.mrb[137].mxu0  ;;  %v4649_v56 = vsel %vm1108_vm4, %v11194_v39, -inf }
 0x8a4   :  { %v4178_v40 = vpop.f32.mrb[138].mxu0 }
 0x8a5   :  { %v11198_v31 = vpop.f32.mrb[148].mxu1  ;;  %v9107_v38 = vpop.f32.mrb[139].mxu0 }
 0x8a6   :  { %v9100_v37 = vpop.f32.mrb[149].mxu1  ;;  %v4646_v53 = vsel %vm1108_vm4, %v11198_v31, -inf }
 0x8a7   :  { %4647 = vmax.xlane.f32.xlu1 %v4646_v53  ;;  %v4128_v36 = vpop.f32.mrb[150].mxu1  ;;  %4650 = vmax.xlane.f32.xlu0 %v4649_v56 }
 0x8a8   :  { %v9101_v3 = vpop.f32.mrb[151].mxu1 }
 0x8aa   :  { %v11204_v28 = vpop.f32.mrb[140].mxu0 }
 0x8ab   :  { %v9118_v34 = vpop.f32.mrb[141].mxu0  ;;  %v4655_v45 = vsel %vm1108_vm4, %v11204_v28, -inf }
 0x8ac   :  { %4656 = vmax.xlane.f32.xlu0 %v4655_v45  ;;  %v4278_v62 = vpop.f32.mrb[142].mxu0 }
 0x8ad   :  { %v11208_v8 = vpop.f32.mrb[152].mxu1  ;;  %v9119_v44 = vpop.f32.mrb[143].mxu0 }
 0x8ae   :  { %v9112_v40 = vpop.f32.mrb[153].mxu1  ;;  %v4652_v38 = vsel %vm1108_vm4, %v11208_v8, -inf }
 0x8af   :  { %4653 = vmax.xlane.f32.xlu1 %v4652_v38  ;;  %v4228_v37 = vpop.f32.mrb[154].mxu1 }
 0x8b0   :  { %v9113_v53 = vpop.f32.mrb[155].mxu1 }
 0x8b2   :  { %v11212_v56 = vpop.f32.mrb[144].mxu0 }
 0x8b3   :  { %v9130_v36 = vpop.f32.mrb[145].mxu0  ;;  %v4661_v3 = vsel %vm1108_vm4, %v11212_v56, -inf }
 0x8b4   :  { %4662 = vmax.xlane.f32.xlu0 %v4661_v3  ;;  %v4378_v34 = vpop.f32.mrb[146].mxu0 }
 0x8b5   :  { %v11216_v45 = vpop.f32.mrb[156].mxu1  ;;  %v9131_v62 = vpop.f32.mrb[147].mxu0 }
 0x8b6   :  { %v9124_v6 = vpop.f32.mrb[157].mxu1  ;;  %v4658_v44 = vsel %vm1108_vm4, %v11216_v45, -inf }
 0x8b7   :  { %4659 = vmax.xlane.f32.xlu1 %v4658_v44  ;;  %v4328_v40 = vpop.f32.mrb[158].mxu1 }
 0x8b8   :  { %v9125_v38 = vpop.f32.mrb[159].mxu1 }
 0x8ba   :  { %v11220_v37 = vpop.f32.mrb[148].mxu0 }
 0x8bb   :  { %v9142_v53 = vpop.f32.mrb[149].mxu0  ;;  %v4667_v36 = vsel %vm1108_vm4, %v11220_v37, -inf }
 0x8bc   :  { %4668 = vmax.xlane.f32.xlu0 %v4667_v36  ;;  %v4478_v15 = vpop.f32.mrb[150].mxu0 }
 0x8bd   :  { %v11224_v3 = vpop.f32.mrb[160].mxu1  ;;  %v9143_v34 = vpop.f32.mrb[151].mxu0 }
 0x8be   :  { %v9136_v41 = vpop.f32.mrb[161].mxu1  ;;  %v4664_v6 = vsel %vm1108_vm4, %v11224_v3, -inf }
 0x8bf   :  { %4665 = vmax.xlane.f32.xlu1 %v4664_v6  ;;  %v4428_v62 = vpop.f32.mrb[162].mxu1 }
 0x8c0   :  { %v9137_v44 = vpop.f32.mrb[163].mxu1 }
 0x8c2   :  { %v11228_v40 = vpop.f32.mrb[152].mxu0 }
 0x8c3   :  { %v9154_v38 = vpop.f32.mrb[153].mxu0  ;;  %v4673_v53 = vsel %vm1108_vm4, %v11228_v40, -inf }
 0x8c4   :  { %4674 = vmax.xlane.f32.xlu0 %v4673_v53  ;;  %v4578_v12 = vpop.f32.mrb[154].mxu0  ;;  %v11246_v53 = vpop.permute.xlu0 %4919 }
 0x8c5   :  { %v11232_v36 = vpop.f32.mrb[164].mxu1  ;;  %v9155_v15 = vpop.f32.mrb[155].mxu0 }
 0x8c6   :  { %v9148_v4 = vpop.f32.mrb[165].mxu1  ;;  %v4670_v41 = vsel %vm1108_vm4, %v11232_v36, -inf  ;;  %v11244_v12 = vpop.permute.xlu1 %4967 }
 0x8c7   :  { %4671 = vmax.xlane.f32.xlu1 %v4670_v41  ;;  %v4528_v34 = vpop.f32.mrb[166].mxu1 }
 0x8c8   :  { %v9149_v6 = vpop.f32.mrb[167].mxu1  ;;  %v11250_v41 = vpop.permute.xlu0 %5015 }
 0x8ca   :  { %v11248_v15 = vpop.permute.xlu1 %5063 }
 0x8cc   :  { %v11254_v34 = vpop.permute.xlu0 %5111 }
 0x8cd   :  { %v11236_v62 = vpop.f32.mrb[168].mxu1 }
 0x8ce   :  { %v9160_v44 = vpop.f32.mrb[169].mxu1  ;;  %v4676_v4 = vsel %vm1108_vm4, %v11236_v62, -inf }
 0x8cf   :  { %v4628_v43 = vpop.f32.mrb[170].mxu1 }
 0x8d0   :  { %v9161_v38 = vpop.f32.mrb[171].mxu1  ;;  %v11252_v43 = vpop.permute.xlu1 %5159 }
 0x8d1   :  { %v11258_v44 = vpop.permute.xlu0 %5207 }
 0x8d4   :  { %v11256_v6 = vpop.permute.xlu1 %5255 }
 0x8d8   :  { %5447 = vrot.lane.b32.xlu1 %v10079_v24, %s9849_s13  ;;  %v11260_v18 = vpop.permute.xlu1 %5303 }
 0x8da   :  { %5399 = vrot.lane.b32.xlu0 %v10061_v16, %s9849_s13 }
 0x8dc   :  { %v11263_v35 = vpop.permute.xlu1 %5351 }
 0x8fc   :  { %4677 = vmax.xlane.f32.xlu1 %v4676_v4 }
 0x919   :  { %v4633_v38 = vpop.xlane.xlu0 %4632 }
 0x91a   :  { %v4679_v4 = vsub.f32 %v11174_v46, %v4633_v38 }
 0x91c   :  { %v4695_v7 = vmul.f32 1.442695, %v4679_v4 }
 0x91e   :  { %9672 = vpow2.f32 %v4695_v7 }
 0x921   :  { %v4639_v58 = vpop.xlane.xlu0 %4638 }
 0x922   :  { %v4681_v61 = vsub.f32 %v11180_v22, %v4639_v58 }
 0x924   :  { %v4699_v30 = vmul.f32 1.442695, %v4681_v61  ;;  %v4636_v52 = vpop.xlane.xlu1 %4635 }
 0x925   :  { %v4680_v21 = vsub.f32 %v11184_v42, %v4636_v52 }
 0x926   :  { %9674 = vpow2.f32 %v4699_v30 }
 0x927   :  { %v4697_v51 = vmul.f32 1.442695, %v4680_v21 }
 0x928   :  { %v11267_v32 = vpop.eup %9672 }
 0x929   :  { %9676 = vpow2.f32 %v4697_v51  ;;  %v4727_v27 = vsel %vm1108_vm4, %v11267_v32, 0.0 }
 0x92a   :  { %4728 = vadd.xlane.f32.xlu0 %v4727_v27 }
 0x92c   :  { %v4642_v46 = vpop.xlane.xlu0 %4641 }
 0x92d   :  { %v4682_v7 = vsub.f32 %v11190_v1, %v4642_v46 }
 0x92f   :  { %v4701_v38 = vmul.f32 1.442695, %v4682_v7 }
 0x930   :  { %v11272_v4 = vpop.eup %9674  ;;  %v4645_v58 = vpop.xlane.xlu0 %4644 }
 0x931   :  { %9678 = vpow2.f32 %v4701_v38  ;;  %v4683_v61 = vsub.f32 %v11188_v50, %v4645_v58  ;;  %v4733_v21 = vsel %vm1108_vm4, %v11272_v4, 0.0 }
 0x932   :  { %4734 = vadd.xlane.f32.xlu0 %v4733_v21 }
 0x933   :  { %v11277_v52 = vpop.eup %9676  ;;  %v4703_v51 = vmul.f32 1.442695, %v4683_v61 }
 0x934   :  { %v4648_v30 = vpop.xlane.xlu1 %4647  ;;  %v4651_v22 = vpop.xlane.xlu0 %4650  ;;  %v4730_v27 = vsel %vm1108_vm4, %v11277_v52, 0.0 }
 0x935   :  { %9680 = vpow2.f32 %v4703_v51  ;;  %v4684_v42 = vsub.f32 %v11198_v31, %v4648_v30  ;;  %v4685_v1 = vsub.f32 %v11194_v39, %v4651_v22  ;;  %4731 = vadd.xlane.f32.xlu1 %v4730_v27 }
 0x937   :  { %v4705_v46 = vmul.f32 1.442695, %v4684_v42  ;;  %v4707_v50 = vmul.f32 1.442695, %v4685_v1 }
 0x939   :  { %9682 = vpow2.f32 %v4705_v46  ;;  %v4657_v7 = vpop.xlane.xlu0 %4656 }
 0x93a   :  { %9684 = vpow2.f32 %v4707_v50  ;;  %v4687_v58 = vsub.f32 %v11204_v28, %v4657_v7 }
 0x93b   :  { %v11283_v38 = vpop.eup %9678 }
 0x93c   :  { %v4654_v61 = vpop.xlane.xlu1 %4653  ;;  %v4736_v21 = vsel %vm1108_vm4, %v11283_v38, 0.0  ;;  %v4711_v39 = vmul.f32 1.442695, %v4687_v58 }
 0x93d   :  { %v4686_v51 = vsub.f32 %v11208_v8, %v4654_v61  ;;  %4737 = vadd.xlane.f32.xlu1 %v4736_v21 }
 0x93f   :  { %v11289_v31 = vpop.eup %9680  ;;  %v4709_v30 = vmul.f32 1.442695, %v4686_v51 }
 0x940   :  { %v4739_v22 = vsel %vm1108_vm4, %v11289_v31, 0.0 }
 0x941   :  { %9686 = vpow2.f32 %v4709_v30  ;;  %4740 = vadd.xlane.f32.xlu0 %v4739_v22  ;;  %v4663_v27 = vpop.xlane.xlu0 %4662 }
 0x942   :  { %v4689_v42 = vsub.f32 %v11212_v56, %v4663_v27  ;;  %9688 = vpow2.f32 %v4711_v39 }
 0x943   :  { %v11294_v28 = vpop.eup %9682 }
 0x944   :  { %v11296_v1 = vpop.eup %9684  ;;  %v4715_v46 = vmul.f32 1.442695, %v4689_v42  ;;  %v4660_v8 = vpop.xlane.xlu1 %4659  ;;  %v4742_v50 = vsel %vm1108_vm4, %v11294_v28, 0.0 }
 0x945   :  { %v4688_v7 = vsub.f32 %v11216_v45, %v4660_v8  ;;  %4743 = vadd.xlane.f32.xlu1 %v4742_v50  ;;  %v4745_v58 = vsel %vm1108_vm4, %v11296_v1, 0.0 }
 0x946   :  { %4746 = vadd.xlane.f32.xlu0 %v4745_v58  ;;  %9690 = vpow2.f32 %v4715_v46 }
 0x947   :  { %v4713_v61 = vmul.f32 1.442695, %v4688_v7 }
 0x949   :  { %9692 = vpow2.f32 %v4713_v61  ;;  %v4669_v56 = vpop.xlane.xlu0 %4668 }
 0x94a   :  { %v4691_v21 = vsub.f32 %v11220_v37, %v4669_v56 }
 0x94b   :  { %v11304_v51 = vpop.eup %9686 }
 0x94c   :  { %v4719_v39 = vmul.f32 1.442695, %v4691_v21  ;;  %v4666_v30 = vpop.xlane.xlu1 %4665  ;;  %v4748_v22 = vsel %vm1108_vm4, %v11304_v51, 0.0  ;;  %v11308_v27 = vpop.eup %9688 }
 0x94d   :  { %v4690_v45 = vsub.f32 %v11224_v3, %v4666_v30  ;;  %4749 = vadd.xlane.f32.xlu1 %v4748_v22  ;;  %v4751_v46 = vsel %vm1108_vm4, %v11308_v27, 0.0 }
 0x94e   :  { %9694 = vpow2.f32 %v4719_v39 }
 0x94f   :  { %v4717_v42 = vmul.f32 1.442695, %v4690_v45 }
 0x950   :  { %v11313_v8 = vpop.eup %9690 }
 0x951   :  { %9696 = vpow2.f32 %v4717_v42  ;;  %4752 = vadd.xlane.f32.xlu1 %v4751_v46  ;;  %v4757_v58 = vsel %vm1108_vm4, %v11313_v8, 0.0  ;;  %v4675_v45 = vpop.xlane.xlu0 %4674 }
 0x952   :  { %v4693_v42 = vsub.f32 %v11228_v40, %v4675_v45 }
 0x953   :  { %v11315_v37 = vpop.eup %9692 }
 0x954   :  { %v4672_v50 = vpop.xlane.xlu1 %4671  ;;  %v4754_v7 = vsel %vm1108_vm4, %v11315_v37, 0.0  ;;  %v4723_v46 = vmul.f32 1.442695, %v4693_v42 }
 0x955   :  { %v4692_v3 = vsub.f32 %v11232_v36, %v4672_v50  ;;  %4755 = vadd.xlane.f32.xlu0 %v4754_v7  ;;  %4758 = vadd.xlane.f32.xlu1 %v4757_v58 }
 0x957   :  { %v4721_v61 = vmul.f32 1.442695, %v4692_v3 }
 0x958   :  { %v11322_v56 = vpop.eup %9694  ;;  %v11339_v50 = vpop.permute.xlu1 %5447 }
 0x959   :  { %9698 = vpow2.f32 %v4721_v61  ;;  %v4763_v21 = vsel %vm1108_vm4, %v11322_v56, 0.0 }
 0x95a   :  { %4764 = vadd.xlane.f32.xlu1 %v4763_v21  ;;  %9700 = vpow2.f32 %v4723_v46 }
 0x95b   :  { %v11326_v39 = vpop.eup %9696 }
 0x95c   :  { %v4760_v30 = vsel %vm1108_vm4, %v11326_v39, 0.0 }
 0x95d   :  { %4761 = vadd.xlane.f32.xlu0 %v4760_v30 }
 0x963   :  { %v11330_v22 = vpop.eup %9698 }
 0x964   :  { %v4766_v36 = vsel %vm1108_vm4, %v11330_v22, 0.0  ;;  %v11342_v3 = vpop.eup %9700 }
 0x965   :  { %4767 = vadd.xlane.f32.xlu0 %v4766_v36  ;;  %v4769_v21 = vsel %vm1108_vm4, %v11342_v3, 0.0 }
 0x96b   :  { %5543 = vrot.lane.b32.xlu1 %v10085_v26, %s9849_s13 }
 0x97b   :  { %5495 = vrot.lane.b32.xlu0 %v10069_v19, %s9849_s13 }
 0x989   :  { %v4678_v7 = vpop.xlane.xlu1 %4677 }
 0x98a   :  { %v4694_v58 = vsub.f32 %v11236_v62, %v4678_v7  ;;  %v11362_v62 = vpop.permute.xlu0 %5399 }
 0x98c   :  { %v4725_v61 = vmul.f32 1.442695, %v4694_v58 }
 0x98e   :  { %9702 = vpow2.f32 %v4725_v61  ;;  %v4925_v61 = vsel %vm1307_vm3, %v11246_v53, 0 }
 0x98f   :  { %4770 = vadd.xlane.f32.xlu1 %v4769_v21 }
 0x998   :  { %v11346_v30 = vpop.eup %9702 }
 0x999   :  { %v4772_v40 = vsel %vm1108_vm4, %v11346_v30, 0.0 }
 0x99a   :  { %4773 = vadd.xlane.f32.xlu0 %v4772_v40 }
 0x9a0   :  { %5643 = vrot.lane.b32.xlu1 %v10025_v63, %s9850_s14 }
 0x9a4   :  { %5641 = vrot.lane.b32.xlu1 %v10025_v63, %s9851_s15 }
 0x9a8   :  { %5743 = vrot.lane.b32.xlu1 %v10041_v9, %s9850_s14 }
 0x9ac   :  { %5741 = vrot.lane.b32.xlu1 %v10041_v9, %s9851_s15 }
 0x9b0   :  { %5593 = vrot.lane.b32.xlu0 %v10023_v60, %s9850_s14  ;;  %5843 = vrot.lane.b32.xlu1 %v10049_v11, %s9850_s14 }
 0x9b4   :  { %5591 = vrot.lane.b32.xlu0 %v10023_v60, %s9851_s15  ;;  %5841 = vrot.lane.b32.xlu1 %v10049_v11, %s9851_s15 }
 0x9b7   :  { %v4729_v36 = vpop.xlane.xlu0 %4728 }
 0x9b8   :  { %9704 = vrcp.f32 %v4729_v36  ;;  %5693 = vrot.lane.b32.xlu0 %v10033_v2, %s9850_s14  ;;  %5943 = vrot.lane.b32.xlu1 %v10057_v14, %s9850_s14 }
 0x9bc   :  { %5691 = vrot.lane.b32.xlu0 %v10033_v2, %s9851_s15  ;;  %5941 = vrot.lane.b32.xlu1 %v10057_v14, %s9851_s15 }
 0x9bf   :  { %v4735_v45 = vpop.xlane.xlu0 %4734 }
 0x9c0   :  { %9706 = vrcp.f32 %v4735_v45  ;;  %5793 = vrot.lane.b32.xlu0 %v10029_v0, %s9850_s14  ;;  %6043 = vrot.lane.b32.xlu1 %v10065_v17, %s9850_s14 }
 0x9c2   :  { %v9705_v42 = vpop.eup %9704  ;;  %v4732_v46 = vpop.xlane.xlu1 %4731 }
 0x9c3   :  { %9708 = vrcp.f32 %v4732_v46  ;;  %v4791_v7 = vmul.f32 %v9705_v42, %v11267_v32  ;;  %v5021_v46 = vsel %vm1307_vm3, %v11250_v41, 0 }
 0x9c4   :  { %5791 = vrot.lane.b32.xlu0 %v10029_v0, %s9851_s15  ;;  %6041 = vrot.lane.b32.xlu1 %v10065_v17, %s9851_s15 }
 0x9c5   :  { %v4807_v58 = vpack.c.bf16 %v4791_v7, %v4791_v7 }
 0x9c7   :  { %9165 = vmatmul.mubr.msk.bf16.vlgmr.msra.gmra.mrb[156].mxu0 %vm1303_vm5, %v4807_v58 }
 0x9c8   :  { %9175 = vmatpush3.bf16.msra.mxu0 %v4925_v61  ;;  %5893 = vrot.lane.b32.xlu0 %v10037_v5, %s9850_s14 }
 0x9c9   :  { %6143 = vrot.lane.b32.xlu1 %v10073_v23, %s9850_s14  ;;  %9176 = vmatprep.mubr.msk.bf16.mxu0 %vm9841_vm1, %v12398_v49 }
 0x9ca   :  { %v9707_v32 = vpop.eup %9706  ;;  %v4738_v21 = vpop.xlane.xlu1 %4737  ;;  %9186 = vmatprep.subr.bf16.mxu0 %v12398_v49 }
 0x9cb   :  { %9710 = vrcp.f32 %v4738_v21  ;;  %v4793_v40 = vmul.f32 %v9707_v32, %v11272_v4  ;;  %v5069_v21 = vsel %vm1307_vm3, %v11248_v15, 0 }
 0x9cc   :  { %5891 = vrot.lane.b32.xlu0 %v10037_v5, %s9851_s15 }
 0x9cd   :  { %v9709_v53 = vpop.eup %9708  ;;  %6141 = vrot.lane.b32.xlu1 %v10073_v23, %s9851_s15  ;;  %v4809_v36 = vpack.c.bf16 %v4793_v40, %v4793_v40 }
 0x9ce   :  { %v4741_v45 = vpop.xlane.xlu0 %4740  ;;  %v4792_v42 = vmul.f32 %v9709_v53, %v11277_v52  ;;  %v4973_v52 = vsel %vm1307_vm3, %v11244_v12, 0 }
 0x9cf   :  { %9712 = vrcp.f32 %v4741_v45  ;;  %9177 = vmatmul.mubr.msk.bf16.vlgmr.msra.gmra.mrb[160].mxu0 %vm1303_vm5, %v4809_v36  ;;  %v5117_v45 = vsel %vm1307_vm3, %v11254_v34, 0  ;;  %v5165_v34 = vsel %vm1307_vm3, %v11252_v43, 0  ;;  %v5213_v43 = vsel %vm1307_vm3, %v11258_v44, 0 }
 0x9d0   :  { %9187 = vmatpush3.bf16.msra.mxu0 %v5021_v46  ;;  %5993 = vrot.lane.b32.xlu0 %v10045_v10, %s9850_s14  ;;  %v4808_v4 = vpack.c.bf16 %v4792_v42, %v4792_v42 }
 0x9d1   :  { %6243 = vrot.lane.b32.xlu1 %v10079_v24, %s9850_s14  ;;  %9188 = vmatprep.mubr.msk.bf16.mxu0 %vm9841_vm1, %v12398_v49 }
 0x9d2   :  { %9171 = vmatmul.mubr.msk.bf16.vlgmr.msra.gmra.mrb[172].mxu1 %vm1303_vm5, %v4808_v4  ;;  %v4744_v41 = vpop.xlane.xlu1 %4743  ;;  %9198 = vmatprep.subr.bf16.mxu0 %v12398_v49 }
 0x9d3   :  { %9181 = vmatpush3.bf16.msra.mxu1 %v4973_v52  ;;  %9714 = vrcp.f32 %v4744_v41  ;;  %v4747_v7 = vpop.xlane.xlu0 %4746  ;;  %9182 = vmatprep.mubr.msk.bf16.mxu1 %vm9841_vm1, %v12398_v49 }
 0x9d4   :  { %9716 = vrcp.f32 %v4747_v7  ;;  %5991 = vrot.lane.b32.xlu0 %v10045_v10, %s9851_s15  ;;  %9192 = vmatprep.subr.bf16.mxu1 %v12398_v49 }
 0x9d5   :  { %v9711_v58 = vpop.eup %9710  ;;  %6241 = vrot.lane.b32.xlu1 %v10079_v24, %s9851_s15 }
 0x9d6   :  { %v4794_v12 = vmul.f32 %v9711_v58, %v11283_v38 }
 0x9d8   :  { %6093 = vrot.lane.b32.xlu0 %v10053_v13, %s9850_s14  ;;  %v4810_v61 = vpack.c.bf16 %v4794_v12, %v4794_v12 }
 0x9d9   :  { %v9713_v32 = vpop.eup %9712  ;;  %6343 = vrot.lane.b32.xlu1 %v10085_v26, %s9850_s14 }
 0x9da   :  { %9183 = vmatmul.mubr.msk.bf16.vlgmr.msra.gmra.mrb[176].mxu1 %vm1303_vm5, %v4810_v61  ;;  %v4750_v40 = vpop.xlane.xlu1 %4749  ;;  %v4795_v53 = vmul.f32 %v9713_v32, %v11289_v31  ;;  %v5309_v32 = vsel %vm1307_vm3, %v11260_v18, 0  ;;  %v5357_v18 = vsel %vm1307_vm3, %v11263_v35, 0 }
 0x9db   :  { %9193 = vmatpush3.bf16.msra.mxu1 %v5069_v21  ;;  %9718 = vrcp.f32 %v4750_v40  ;;  %9194 = vmatprep.mubr.msk.bf16.mxu1 %vm9841_vm1, %v12398_v49 }
 0x9dc   :  { %6091 = vrot.lane.b32.xlu0 %v10053_v13, %s9851_s15  ;;  %v4811_v38 = vpack.c.bf16 %v4795_v53, %v4795_v53  ;;  %9204 = vmatprep.subr.bf16.mxu1 %v12398_v49 }
 0x9dd   :  { %v9715_v36 = vpop.eup %9714  ;;  %6341 = vrot.lane.b32.xlu1 %v10085_v26, %s9851_s15 }
 0x9de   :  { %v9717_v15 = vpop.eup %9716  ;;  %v4753_v31 = vpop.xlane.xlu1 %4752  ;;  %9189 = vmatmul.mubr.msk.bf16.vlgmr.msra.gmra.mrb[164].mxu0 %vm1303_vm5, %v4811_v38  ;;  %v4796_v42 = vmul.f32 %v9715_v36, %v11294_v28  ;;  %v5453_v36 = vsel %vm1307_vm3, %v11339_v50, 0 }
 0x9df   :  { %9720 = vrcp.f32 %v4753_v31  ;;  %9199 = vmatpush3.bf16.msra.mxu0 %v5117_v45  ;;  %9200 = vmatprep.mubr.msk.bf16.mxu0 %vm9841_vm1, %v12398_v49  ;;  %v4797_v4 = vmul.f32 %v9717_v15, %v11296_v1 }
 0x9e0   :  { %6193 = vrot.lane.b32.xlu0 %v10061_v16, %s9850_s14  ;;  %v4812_v46 = vpack.c.bf16 %v4796_v42, %v4796_v42  ;;  %9210 = vmatprep.subr.bf16.mxu0 %v12398_v49 }
 0x9e1   :  { %6631 = vrot.lane.b32.xlu1 %v10025_v63, %s9852_s16  ;;  %v4813_v1 = vpack.c.bf16 %v4797_v4, %v4797_v4 }
 0x9e2   :  { %9195 = vmatmul.mubr.msk.bf16.vlgmr.msra.gmra.mrb[180].mxu1 %vm1303_vm5, %v4812_v46  ;;  %v4759_v28 = vpop.xlane.xlu1 %4758  ;;  %v4756_v52 = vpop.xlane.xlu0 %4755 }
 0x9e3   :  { %9205 = vmatpush3.bf16.msra.mxu1 %v5165_v34  ;;  %9722 = vrcp.f32 %v4759_v28  ;;  %9206 = vmatprep.mubr.msk.bf16.mxu1 %vm9841_vm1, %v12398_v49 }
 0x9e4   :  { %9724 = vrcp.f32 %v4756_v52  ;;  %6191 = vrot.lane.b32.xlu0 %v10061_v16, %s9851_s15  ;;  %9216 = vmatprep.subr.bf16.mxu1 %v12398_v49 }
 0x9e5   :  { %v9719_v63 = vpop.eup %9718  ;;  %6727 = vrot.lane.b32.xlu1 %v10041_v9, %s9852_s16  ;;  %v5261_v9 = vsel %vm1307_vm3, %v11256_v6, 0 }
 0x9e6   :  { %9201 = vmatmul.mubr.msk.bf16.vlgmr.msra.gmra.mrb[168].mxu0 %vm1303_vm5, %v4813_v1  ;;  %v4798_v41 = vmul.f32 %v9719_v63, %v11304_v51 }
 0x9e7   :  { %9211 = vmatpush3.bf16.msra.mxu0 %v5213_v43  ;;  %v4765_v7 = vpop.xlane.xlu1 %4764  ;;  %9212 = vmatprep.mubr.msk.bf16.mxu0 %vm9841_vm1, %v12398_v49 }
 0x9e8   :  { %6293 = vrot.lane.b32.xlu0 %v10069_v19, %s9850_s14  ;;  %v4814_v58 = vpack.c.bf16 %v4798_v41, %v4798_v41  ;;  %9222 = vmatprep.subr.bf16.mxu0 %v12398_v49  ;;  %9726 = vrcp.f32 %v4765_v7 }
 0x9e9   :  { %v9721_v12 = vpop.eup %9720  ;;  %6823 = vrot.lane.b32.xlu1 %v10049_v11, %s9852_s16 }
 0x9ea   :  { %9207 = vmatmul.mubr.msk.bf16.vlgmr.msra.gmra.mrb[184].mxu1 %vm1303_vm5, %v4814_v58  ;;  %v4762_v44 = vpop.xlane.xlu0 %4761  ;;  %v4799_v51 = vmul.f32 %v9721_v12, %v11308_v27 }
 0x9eb   :  { %9217 = vmatpush3.bf16.msra.mxu1 %v5261_v9  ;;  %9728 = vrcp.f32 %v4762_v44  ;;  %9218 = vmatprep.mubr.msk.bf16.mxu1 %vm9841_vm1, %v12398_v49  ;;  %v5544_v50 = vpop.permute.xlu1 %5543 }
 0x9ec   :  { %6291 = vrot.lane.b32.xlu0 %v10069_v19, %s9851_s15  ;;  %v4815_v61 = vpack.c.bf16 %v4799_v51, %v4799_v51  ;;  %9228 = vmatprep.subr.bf16.mxu1 %v12398_v49 }
 0x9ed   :  { %v9723_v11 = vpop.eup %9722  ;;  %6919 = vrot.lane.b32.xlu1 %v10057_v14, %s9852_s16 }
 0x9ee   :  { %v9725_v6 = vpop.eup %9724  ;;  %9213 = vmatmul.mubr.msk.bf16.vlgmr.msra.gmra.mrb[172].mxu0 %vm1303_vm5, %v4815_v61  ;;  %v4801_v21 = vmul.f32 %v9723_v11, %v11313_v8 }
 0x9ef   :  { %9223 = vmatpush3.bf16.msra.mxu0 %v5309_v32  ;;  %v4800_v27 = vmul.f32 %v9725_v6, %v11315_v37  ;;  %9224 = vmatprep.mubr.msk.bf16.mxu0 %vm9841_vm1, %v12398_v49 }
 0x9f0   :  { %6583 = vrot.lane.b32.xlu0 %v10023_v60, %s9852_s16  ;;  %9234 = vmatprep.subr.bf16.mxu0 %v12398_v49  ;;  %v4817_v37 = vpack.c.bf16 %v4801_v21, %v4801_v21  ;;  %v5405_v60 = vsel %vm1307_vm3, %v11362_v62, 0 }
 0x9f1   :  { %v4816_v14 = vpack.c.bf16 %v4800_v27, %v4800_v27 }
 0x9f2   :  { %v4768_v40 = vpop.xlane.xlu0 %4767  ;;  %v9727_v53 = vpop.eup %9726 }
 0x9f3   :  { %9219 = vmatmul.mubr.msk.bf16.vlgmr.msra.gmra.mrb[188].mxu1 %vm1303_vm5, %v4816_v14  ;;  %9730 = vrcp.f32 %v4768_v40  ;;  %v4803_v8 = vmul.f32 %v9727_v53, %v11322_v56 }
 0x9f4   :  { %9229 = vmatpush3.bf16.msra.mxu1 %v5357_v18  ;;  %6679 = vrot.lane.b32.xlu0 %v10033_v2, %s9852_s16 }
 0x9f5   :  { %v9729_v38 = vpop.eup %9728  ;;  %9230 = vmatprep.mubr.msk.bf16.mxu1 %vm9841_vm1, %v12398_v49  ;;  %9240 = vmatprep.subr.bf16.mxu1 %v12398_v49 }
 0x9f6   :  { %9225 = vmatmul.mubr.msk.bf16.vlgmr.msra.gmra.mrb[176].mxu0 %vm1303_vm5, %v4817_v37  ;;  %v4802_v35 = vmul.f32 %v9729_v38, %v11326_v39  ;;  %v5496_v62 = vpop.permute.xlu0 %5495  ;;  %v4819_v39 = vpack.c.bf16 %v4803_v8, %v4803_v8 }
 0x9f7   :  { %9235 = vmatpush3.bf16.msra.mxu0 %v5405_v60  ;;  %9236 = vmatprep.mubr.msk.bf16.mxu0 %vm9841_vm1, %v12398_v49 }
 0x9f8   :  { %6775 = vrot.lane.b32.xlu0 %v10029_v0, %s9852_s16  ;;  %v4818_v2 = vpack.c.bf16 %v4802_v35, %v4802_v35  ;;  %9246 = vmatprep.subr.bf16.mxu0 %v12398_v49  ;;  %v5501_v0 = vsel %vm1307_vm3, %v5496_v62, 0 }
 0x9fb   :  { %9231 = vmatmul.mubr.msk.bf16.vlgmr.msra.gmra.mrb[192].mxu1 %vm1303_vm5, %v4818_v2 }
 0x9fc   :  { %9241 = vmatpush3.bf16.msra.mxu1 %v5453_v36  ;;  %6871 = vrot.lane.b32.xlu0 %v10037_v5, %s9852_s16  ;;  %v5549_v5 = vsel %vm1307_vm3, %v5544_v50, 0 }
 0x9fd   :  { %v9731_v15 = vpop.eup %9730  ;;  %9242 = vmatprep.mubr.msk.bf16.mxu1 %vm9841_vm1, %v12398_v49  ;;  %9252 = vmatprep.subr.bf16.mxu1 %v12398_v49 }
 0x9fe   :  { %9237 = vmatmul.mubr.msk.bf16.vlgmr.msra.gmra.mrb[180].mxu0 %vm1303_vm5, %v4819_v39  ;;  %v4804_v56 = vmul.f32 %v9731_v15, %v11330_v22 }
 0x9ff   :  { %9247 = vmatpush3.bf16.msra.mxu0 %v5501_v0  ;;  %9248 = vmatprep.mubr.msk.bf16.mxu0 %vm9841_vm1, %v12398_v49 }
 0xa00   :  { %v4820_v45 = vpack.c.bf16 %v4804_v56, %v4804_v56  ;;  %9258 = vmatprep.subr.bf16.mxu0 %v12398_v49 }
 0xa03   :  { %9243 = vmatmul.mubr.msk.bf16.vlgmr.msra.gmra.mrb[196].mxu1 %vm1303_vm5, %v4820_v45 }
 0xa04   :  { %9253 = vmatpush3.bf16.msra.mxu1 %v5549_v5  ;;  %9254 = vmatprep.mubr.msk.bf16.mxu1 %vm9841_vm1, %v12398_v49 }
 0xa05   :  { %9264 = vmatprep.subr.bf16.mxu1 %v12398_v49 }
 0xa1c   :  { %v4771_v31 = vpop.xlane.xlu1 %4770 }
 0xa1d   :  { %9732 = vrcp.f32 %v4771_v31 }
 0xa20   :  { %v5644_v22 = vpop.permute.xlu1 %5643 }
 0xa21   :  { %v5649_v61 = vsel %vm326_vm2, %v5644_v22, 0 }
 0xa24   :  { %v5642_v42 = vpop.permute.xlu1 %5641 }
 0xa27   :  { %v9733_v46 = vpop.eup %9732  ;;  %v4774_v4 = vpop.xlane.xlu0 %4773 }
 0xa28   :  { %9734 = vrcp.f32 %v4774_v4  ;;  %v5744_v34 = vpop.permute.xlu1 %5743  ;;  %v4805_v28 = vmul.f32 %v9733_v46, %v11342_v3 }
 0xa29   :  { %v5749_v21 = vsel %vm326_vm2, %v5744_v34, 0 }
 0xa2a   :  { %v4821_v52 = vpack.c.bf16 %v4805_v28, %v4805_v28 }
 0xa2b   :  { %v5594_v1 = vpop.permute.xlu0 %5593 }
 0xa2c   :  { %v5599_v63 = vsel %vm326_vm2, %v5594_v1, 0  ;;  %v5742_v43 = vpop.permute.xlu1 %5741  ;;  %9249 = vmatmul.mubr.msk.bf16.vlgmr.msra.gmra.mrb[184].mxu0 %vm1303_vm5, %v4821_v52 }
 0xa2d   :  { %9259 = vmatpush3.bf16.xpose.msra.mxu0 %v5599_v63  ;;  %9260 = vmatprep.mubr.msk.bf16.mxu0 %vm9841_vm1, %v12398_v49 }
 0xa2e   :  { %9270 = vmatprep.subr.bf16.mxu0 %v12398_v49 }
 0xa2f   :  { %v5592_v41 = vpop.permute.xlu0 %5591 }
 0xa30   :  { %v5844_v7 = vpop.permute.xlu1 %5843 }
 0xa31   :  { %v5849_v37 = vsel %vm326_vm2, %v5844_v7, 0 }
 0xa32   :  { %v9735_v58 = vpop.eup %9734 }
 0xa33   :  { %v5694_v12 = vpop.permute.xlu0 %5693  ;;  %v4806_v9 = vmul.f32 %v9735_v58, %v11346_v30 }
 0xa34   :  { %v5699_v3 = vsel %vm326_vm2, %v5694_v12, 0  ;;  %v5842_v44 = vpop.permute.xlu1 %5841  ;;  %9261 = vmatmul.mubr.msk.bf16.vlgmr.msra.gmra.mrb[188].mxu0 %vm326_vm2, %v5592_v41 }
 0xa35   :  { %9271 = vmatpush3.bf16.xpose.msra.mxu0 %v5699_v3  ;;  %v4822_v51 = vpack.c.bf16 %v4806_v9, %v4806_v9  ;;  %9272 = vmatprep.mubr.msk.bf16.mxu0 %vm9841_vm1, %v12398_v49 }
 0xa36   :  { %9282 = vmatprep.subr.bf16.mxu0 %v12398_v49 }
 0xa37   :  { %9255 = vmatmul.mubr.msk.bf16.vlgmr.msra.gmra.mrb[200].mxu1 %vm1303_vm5, %v4822_v51  ;;  %v5692_v11 = vpop.permute.xlu0 %5691 }
 0xa38   :  { %9265 = vmatpush3.bf16.xpose.msra.mxu1 %v5649_v61  ;;  %v5944_v6 = vpop.permute.xlu1 %5943  ;;  %9266 = vmatprep.mubr.msk.bf16.mxu1 %vm9841_vm1, %v12398_v49 }
 0xa39   :  { %9276 = vmatprep.subr.bf16.mxu1 %v12398_v49  ;;  %v5949_v8 = vsel %vm326_vm2, %v5944_v6, 0 }
 0xa3b   :  { %v5794_v30 = vpop.permute.xlu0 %5793 }
 0xa3c   :  { %v5799_v32 = vsel %vm326_vm2, %v5794_v30, 0  ;;  %9273 = vmatmul.mubr.msk.bf16.vlgmr.msra.gmra.mrb[192].mxu0 %vm326_vm2, %v5692_v11  ;;  %v5942_v27 = vpop.permute.xlu1 %5941 }
 0xa3d   :  { %9283 = vmatpush3.bf16.xpose.msra.mxu0 %v5799_v32  ;;  %9284 = vmatprep.mubr.msk.bf16.mxu0 %vm9841_vm1, %v12398_v49 }
 0xa3e   :  { %9294 = vmatprep.subr.bf16.mxu0 %v12398_v49 }
 0xa3f   :  { %9267 = vmatmul.mubr.msk.bf16.vlgmr.msra.gmra.mrb[204].mxu1 %vm326_vm2, %v5642_v42  ;;  %v5792_v14 = vpop.permute.xlu0 %5791 }
 0xa40   :  { %9277 = vmatpush3.bf16.xpose.msra.mxu1 %v5749_v21  ;;  %9278 = vmatprep.mubr.msk.bf16.mxu1 %vm9841_vm1, %v12398_v49  ;;  %v6044_v18 = vpop.permute.xlu1 %6043 }
 0xa41   :  { %9288 = vmatprep.subr.bf16.mxu1 %v12398_v49  ;;  %v6049_v56 = vsel %vm326_vm2, %v6044_v18, 0 }
 0xa43   :  { %v5894_v40 = vpop.permute.xlu0 %5893 }
 0xa44   :  { %v5899_v53 = vsel %vm326_vm2, %v5894_v40, 0  ;;  %9285 = vmatmul.mubr.msk.bf16.vlgmr.msra.gmra.mrb[196].mxu0 %vm326_vm2, %v5792_v14  ;;  %v6042_v60 = vpop.permute.xlu1 %6041 }
 0xa45   :  { %9295 = vmatpush3.bf16.xpose.msra.mxu0 %v5899_v53  ;;  %9296 = vmatprep.mubr.msk.bf16.mxu0 %vm9841_vm1, %v12398_v49 }
 0xa46   :  { %9306 = vmatprep.subr.bf16.mxu0 %v12398_v49 }
 0xa47   :  { %9279 = vmatmul.mubr.msk.bf16.vlgmr.msra.gmra.mrb[208].mxu1 %vm326_vm2, %v5742_v43  ;;  %v5892_v38 = vpop.permute.xlu0 %5891 }
 0xa48   :  { %9289 = vmatpush3.bf16.xpose.msra.mxu1 %v5849_v37  ;;  %9290 = vmatprep.mubr.msk.bf16.mxu1 %vm9841_vm1, %v12398_v49  ;;  %v6144_v62 = vpop.permute.xlu1 %6143 }
 0xa49   :  { %9300 = vmatprep.subr.bf16.mxu1 %v12398_v49  ;;  %v6149_v22 = vsel %vm326_vm2, %v6144_v62, 0 }
 0xa4b   :  { %v5994_v35 = vpop.permute.xlu0 %5993 }
 0xa4c   :  { %v5999_v2 = vsel %vm326_vm2, %v5994_v35, 0  ;;  %9297 = vmatmul.mubr.msk.bf16.vlgmr.msra.gmra.mrb[200].mxu0 %vm326_vm2, %v5892_v38  ;;  %v6142_v0 = vpop.permute.xlu1 %6141 }
 0xa4d   :  { %9307 = vmatpush3.bf16.xpose.msra.mxu0 %v5999_v2  ;;  %9308 = vmatprep.mubr.msk.bf16.mxu0 %vm9841_vm1, %v12398_v49 }
 0xa4e   :  { %9318 = vmatprep.subr.bf16.mxu0 %v12398_v49 }
 0xa4f   :  { %9291 = vmatmul.mubr.msk.bf16.vlgmr.msra.gmra.mrb[212].mxu1 %vm326_vm2, %v5842_v44  ;;  %v5992_v36 = vpop.permute.xlu0 %5991 }
 0xa50   :  { %9301 = vmatpush3.bf16.xpose.msra.mxu1 %v5949_v8  ;;  %9302 = vmatprep.mubr.msk.bf16.mxu1 %vm9841_vm1, %v12398_v49  ;;  %v6244_v5 = vpop.permute.xlu1 %6243 }
 0xa51   :  { %9312 = vmatprep.subr.bf16.mxu1 %v12398_v49  ;;  %v6249_v28 = vsel %vm326_vm2, %v6244_v5, 0 }
 0xa53   :  { %v6094_v39 = vpop.permute.xlu0 %6093 }
 0xa54   :  { %v6099_v15 = vsel %vm326_vm2, %v6094_v39, 0  ;;  %9309 = vmatmul.mubr.msk.bf16.vlgmr.msra.gmra.mrb[204].mxu0 %vm326_vm2, %v5992_v36  ;;  %v6242_v46 = vpop.permute.xlu1 %6241 }
 0xa55   :  { %9319 = vmatpush3.bf16.xpose.msra.mxu0 %v6099_v15  ;;  %9320 = vmatprep.mubr.msk.bf16.mxu0 %vm9841_vm1, %v12398_v49 }
 0xa56   :  { %9330 = vmatprep.subr.bf16.mxu0 %v12398_v49 }
 0xa57   :  { %9303 = vmatmul.mubr.msk.bf16.vlgmr.msra.gmra.mrb[216].mxu1 %vm326_vm2, %v5942_v27  ;;  %v6092_v50 = vpop.permute.xlu0 %6091 }
 0xa58   :  { %9313 = vmatpush3.bf16.xpose.msra.mxu1 %v6049_v56  ;;  %9314 = vmatprep.mubr.msk.bf16.mxu1 %vm9841_vm1, %v12398_v49  ;;  %v6344_v1 = vpop.permute.xlu1 %6343 }
 0xa59   :  { %9324 = vmatprep.subr.bf16.mxu1 %v12398_v49  ;;  %v6349_v7 = vsel %vm326_vm2, %v6344_v1, 0 }
 0xa5b   :  { %v6194_v45 = vpop.permute.xlu0 %6193 }
 0xa5c   :  { %v6199_v31 = vsel %vm326_vm2, %v6194_v45, 0  ;;  %9321 = vmatmul.mubr.msk.bf16.vlgmr.msra.gmra.mrb[208].mxu0 %vm326_vm2, %v6092_v50  ;;  %v6342_v41 = vpop.permute.xlu1 %6341 }
 0xa5d   :  { %9331 = vmatpush3.bf16.xpose.msra.mxu0 %v6199_v31  ;;  %9332 = vmatprep.mubr.msk.bf16.mxu0 %vm9841_vm1, %v12398_v49 }
 0xa5e   :  { %9342 = vmatprep.subr.bf16.mxu0 %v12398_v49 }
 0xa5f   :  { %9315 = vmatmul.mubr.msk.bf16.vlgmr.msra.gmra.mrb[220].mxu1 %vm326_vm2, %v6042_v60  ;;  %v6192_v42 = vpop.permute.xlu0 %6191 }
 0xa60   :  { %9325 = vmatpush3.bf16.xpose.msra.mxu1 %v6149_v22  ;;  %9326 = vmatprep.mubr.msk.bf16.mxu1 %vm9841_vm1, %v12398_v49  ;;  %v6632_v58 = vpop.permute.xlu1 %6631 }
 0xa61   :  { %9336 = vmatprep.subr.bf16.mxu1 %v12398_v49  ;;  %v6637_v12 = vsel %vm1307_vm3, %v6632_v58, 0 }
 0xa63   :  { %v6294_v4 = vpop.permute.xlu0 %6293 }
 0xa64   :  { %v6299_v34 = vsel %vm326_vm2, %v6294_v4, 0  ;;  %9333 = vmatmul.mubr.msk.bf16.vlgmr.msra.gmra.mrb[212].mxu0 %vm326_vm2, %v6192_v42 }
 0xa65   :  { %9343 = vmatpush3.bf16.xpose.msra.mxu0 %v6299_v34  ;;  %9344 = vmatprep.mubr.msk.bf16.mxu0 %vm9841_vm1, %v12398_v49 }
 0xa66   :  { %9354 = vmatprep.subr.bf16.mxu0 %v12398_v49 }
 0xa67   :  { %9327 = vmatmul.mubr.msk.bf16.vlgmr.msra.gmra.mrb[224].mxu1 %vm326_vm2, %v6142_v0  ;;  %v6292_v52 = vpop.permute.xlu0 %6291 }
 0xa68   :  { %9337 = vmatpush3.bf16.xpose.msra.mxu1 %v6249_v28  ;;  %9338 = vmatprep.mubr.msk.bf16.mxu1 %vm9841_vm1, %v12398_v49 }
 0xa69   :  { %9348 = vmatprep.subr.bf16.mxu1 %v12398_v49 }
 0xa6b   :  { %v6584_v63 = vpop.permute.xlu0 %6583 }
 0xa6c   :  { %v6589_v43 = vsel %vm1307_vm3, %v6584_v63, 0  ;;  %9345 = vmatmul.mubr.msk.bf16.vlgmr.msra.gmra.mrb[216].mxu0 %vm326_vm2, %v6292_v52 }
 0xa6d   :  { %9355 = vmatpush3.bf16.msra.mxu0 %v6589_v43  ;;  %9356 = vmatprep.mubr.msk.bf16.mxu0 %vm9841_vm1, %v12398_v49 }
 0xa6e   :  { %9366 = vmatprep.subr.bf16.mxu0 %v12398_v49 }
 0xa6f   :  { %9339 = vmatmul.mubr.msk.bf16.vlgmr.msra.gmra.mrb[228].mxu1 %vm326_vm2, %v6242_v46 }
 0xa70   :  { %9349 = vmatpush3.bf16.xpose.msra.mxu1 %v6349_v7  ;;  %9350 = vmatprep.mubr.msk.bf16.mxu1 %vm9841_vm1, %v12398_v49 }
 0xa71   :  { %9360 = vmatprep.subr.bf16.mxu1 %v12398_v49 }
 0xa77   :  { %9351 = vmatmul.mubr.msk.bf16.vlgmr.msra.gmra.mrb[232].mxu1 %vm326_vm2, %v6342_v41 }
 0xa78   :  { %9361 = vmatpush3.bf16.msra.mxu1 %v6637_v12  ;;  %9362 = vmatprep.mubr.msk.bf16.mxu1 %vm9841_vm1, %v12398_v49 }
 0xa79   :  { %9372 = vmatprep.subr.bf16.mxu1 %v12398_v49 }
 0xa9a   :  { %v11620_v9 = vpop.f32.mrb[156].mxu0 }
 0xa9b   :  { %v9166_v3 = vpop.f32.mrb[157].mxu0 }
 0xa9c   :  { %v4868_v44 = vpop.f32.mrb[158].mxu0 }
 0xa9d   :  { %v9167_v51 = vpop.f32.mrb[159].mxu0 }
 0xaa2   :  { %v11622_v61 = vpop.f32.mrb[160].mxu0 }
 0xaa3   :  { %v9178_v11 = vpop.f32.mrb[161].mxu0 }
 0xaa4   :  { %v4964_v6 = vpop.f32.mrb[162].mxu0 }
 0xaa5   :  { %v11624_v30 = vpop.f32.mrb[172].mxu1  ;;  %v9179_v32 = vpop.f32.mrb[163].mxu0 }
 0xaa6   :  { %v9172_v27 = vpop.f32.mrb[173].mxu1 }
 0xaa7   :  { %v4916_v21 = vpop.f32.mrb[174].mxu1 }
 0xaa8   :  { %v9173_v14 = vpop.f32.mrb[175].mxu1 }
 0xaad   :  { %v11626_v40 = vpop.f32.mrb[176].mxu1 }
 0xaae   :  { %v9184_v18 = vpop.f32.mrb[177].mxu1 }
 0xaaf   :  { %v5012_v53 = vpop.f32.mrb[178].mxu1 }
 0xab0   :  { %v9185_v37 = vpop.f32.mrb[179].mxu1 }
 0xab1   :  { %v11628_v38 = vpop.f32.mrb[164].mxu0 }
 0xab2   :  { %v9190_v60 = vpop.f32.mrb[165].mxu0 }
 0xab3   :  { %v5060_v35 = vpop.f32.mrb[166].mxu0 }
 0xab4   :  { %v9191_v2 = vpop.f32.mrb[167].mxu0 }
 0xab5   :  { %v11630_v8 = vpop.f32.mrb[180].mxu1 }
 0xab6   :  { %v9196_v36 = vpop.f32.mrb[181].mxu1 }
 0xab7   :  { %v5108_v62 = vpop.f32.mrb[182].mxu1 }
 0xab8   :  { %v9197_v39 = vpop.f32.mrb[183].mxu1 }
 0xab9   :  { %v11632_v15 = vpop.f32.mrb[168].mxu0 }
 0xaba   :  { %v9202_v0 = vpop.f32.mrb[169].mxu0 }
 0xabb   :  { %v5156_v56 = vpop.f32.mrb[170].mxu0 }
 0xabc   :  { %v9203_v50 = vpop.f32.mrb[171].mxu0 }
 0xabd   :  { %v11634_v45 = vpop.f32.mrb[184].mxu1 }
 0xabe   :  { %v9208_v5 = vpop.f32.mrb[185].mxu1 }
 0xabf   :  { %v5204_v31 = vpop.f32.mrb[186].mxu1 }
 0xac0   :  { %v9209_v22 = vpop.f32.mrb[187].mxu1 }
 0xac1   :  { %v11636_v42 = vpop.f32.mrb[172].mxu0 }
 0xac2   :  { %v9214_v46 = vpop.f32.mrb[173].mxu0 }
 0xac3   :  { %v5252_v4 = vpop.f32.mrb[174].mxu0 }
 0xac4   :  { %v9215_v34 = vpop.f32.mrb[175].mxu0 }
 0xac6   :  { %v11638_v28 = vpop.f32.mrb[188].mxu1 }
 0xac7   :  { %v9220_v52 = vpop.f32.mrb[189].mxu1 }
 0xac8   :  { %v5300_v1 = vpop.f32.mrb[190].mxu1 }
 0xac9   :  { %v9221_v63 = vpop.f32.mrb[191].mxu1  ;;  %v11640_v43 = vpop.f32.mrb[176].mxu0 }
 0xaca   :  { %v9226_v41 = vpop.f32.mrb[177].mxu0 }
 0xacb   :  { %v5348_v7 = vpop.f32.mrb[178].mxu0 }
 0xacc   :  { %v9227_v58 = vpop.f32.mrb[179].mxu0 }
 0xace   :  { %v11642_v12 = vpop.f32.mrb[192].mxu1 }
 0xacf   :  { %v9232_v3 = vpop.f32.mrb[193].mxu1 }
 0xad0   :  { %v5396_v44 = vpop.f32.mrb[194].mxu1 }
 0xad1   :  { %v9233_v51 = vpop.f32.mrb[195].mxu1  ;;  %v11644_v11 = vpop.f32.mrb[180].mxu0 }
 0xad2   :  { %v9238_v6 = vpop.f32.mrb[181].mxu0 }
 0xad3   :  { %v5444_v32 = vpop.f32.mrb[182].mxu0 }
 0xad4   :  { %v9239_v27 = vpop.f32.mrb[183].mxu0 }
 0xad6   :  { %v11646_v21 = vpop.f32.mrb[196].mxu1 }
 0xad7   :  { %v9244_v14 = vpop.f32.mrb[197].mxu1 }
 0xad8   :  { %v5492_v18 = vpop.f32.mrb[198].mxu1 }
 0xad9   :  { %v9245_v53 = vpop.f32.mrb[199].mxu1 }
 0xaff   :  { %v11648_v37 = vpop.f32.mrb[184].mxu0 }
 0xb00   :  { %v9250_v60 = vpop.f32.mrb[185].mxu0 }
 0xb01   :  { %v5540_v35 = vpop.f32.mrb[186].mxu0 }
 0xb02   :  { %v9251_v2 = vpop.f32.mrb[187].mxu0 }
 0xb07   :  { %v11650_v36 = vpop.f32.mrb[188].mxu0 }
 0xb08   :  { %v9262_v62 = vpop.f32.mrb[189].mxu0  ;;  %v6391_v39 = vsel %vm1108_vm4, %v11650_v36, -inf }
 0xb09   :  { %6392 = vmax.xlane.f32.xlu0 %v6391_v39  ;;  %v5638_v0 = vpop.f32.mrb[190].mxu0 }
 0xb0a   :  { %v11654_v56 = vpop.f32.mrb[200].mxu1  ;;  %v9263_v50 = vpop.f32.mrb[191].mxu0 }
 0xb0b   :  { %v9256_v5 = vpop.f32.mrb[201].mxu1 }
 0xb0c   :  { %v5588_v31 = vpop.f32.mrb[202].mxu1 }
 0xb0d   :  { %v9257_v22 = vpop.f32.mrb[203].mxu1 }
 0xb0f   :  { %v11656_v46 = vpop.f32.mrb[192].mxu0 }
 0xb10   :  { %v9274_v4 = vpop.f32.mrb[193].mxu0  ;;  %v6397_v34 = vsel %vm1108_vm4, %v11656_v46, -inf }
 0xb11   :  { %6398 = vmax.xlane.f32.xlu0 %v6397_v34  ;;  %v5738_v52 = vpop.f32.mrb[194].mxu0 }
 0xb12   :  { %v11660_v1 = vpop.f32.mrb[204].mxu1  ;;  %v9275_v63 = vpop.f32.mrb[195].mxu0 }
 0xb13   :  { %v9268_v41 = vpop.f32.mrb[205].mxu1  ;;  %v6394_v7 = vsel %vm1108_vm4, %v11660_v1, -inf }
 0xb14   :  { %6395 = vmax.xlane.f32.xlu1 %v6394_v7  ;;  %v5688_v58 = vpop.f32.mrb[206].mxu1 }
 0xb15   :  { %v9269_v3 = vpop.f32.mrb[207].mxu1 }
 0xb17   :  { %v11664_v44 = vpop.f32.mrb[196].mxu0 }
 0xb18   :  { %v9286_v51 = vpop.f32.mrb[197].mxu0  ;;  %v6403_v2 = vsel %vm1108_vm4, %v11664_v44, -inf }
 0xb19   :  { %v5838_v6 = vpop.f32.mrb[198].mxu0 }
 0xb1a   :  { %v11666_v32 = vpop.f32.mrb[208].mxu1  ;;  %v9287_v27 = vpop.f32.mrb[199].mxu0 }
 0xb1b   :  { %v9280_v14 = vpop.f32.mrb[209].mxu1  ;;  %v6400_v18 = vsel %vm1108_vm4, %v11666_v32, -inf }
 0xb1c   :  { %v5788_v53 = vpop.f32.mrb[210].mxu1  ;;  %6401 = vmax.xlane.f32.xlu0 %v6400_v18 }
 0xb1d   :  { %v9281_v60 = vpop.f32.mrb[211].mxu1 }
 0xb1f   :  { %v11670_v35 = vpop.f32.mrb[200].mxu0 }
 0xb20   :  { %6404 = vmax.xlane.f32.xlu0 %v6403_v2  ;;  %v9298_v62 = vpop.f32.mrb[201].mxu0  ;;  %v6409_v22 = vsel %vm1108_vm4, %v11670_v35, -inf }
 0xb21   :  { %v5938_v39 = vpop.f32.mrb[202].mxu0 }
 0xb22   :  { %v11674_v0 = vpop.f32.mrb[212].mxu1  ;;  %v9299_v50 = vpop.f32.mrb[203].mxu0 }
 0xb23   :  { %v9292_v5 = vpop.f32.mrb[213].mxu1  ;;  %v6406_v31 = vsel %vm1108_vm4, %v11674_v0, -inf }
 0xb24   :  { %6407 = vmax.xlane.f32.xlu1 %v6406_v31  ;;  %v5888_v4 = vpop.f32.mrb[214].mxu1  ;;  %6410 = vmax.xlane.f32.xlu0 %v6409_v22 }
 0xb25   :  { %v9293_v34 = vpop.f32.mrb[215].mxu1 }
 0xb27   :  { %v11680_v52 = vpop.f32.mrb[204].mxu0 }
 0xb28   :  { %v9310_v63 = vpop.f32.mrb[205].mxu0  ;;  %v6415_v41 = vsel %vm1108_vm4, %v11680_v52, -inf }
 0xb29   :  { %6416 = vmax.xlane.f32.xlu0 %v6415_v41  ;;  %v6038_v7 = vpop.f32.mrb[206].mxu0 }
 0xb2a   :  { %v11684_v58 = vpop.f32.mrb[216].mxu1  ;;  %v9311_v3 = vpop.f32.mrb[207].mxu0 }
 0xb2b   :  { %v9304_v51 = vpop.f32.mrb[217].mxu1  ;;  %v6412_v6 = vsel %vm1108_vm4, %v11684_v58, -inf }
 0xb2c   :  { %6413 = vmax.xlane.f32.xlu1 %v6412_v6  ;;  %v5988_v27 = vpop.f32.mrb[218].mxu1 }
 0xb2d   :  { %v9305_v14 = vpop.f32.mrb[219].mxu1 }
 0xb2f   :  { %v11688_v18 = vpop.f32.mrb[208].mxu0 }
 0xb30   :  { %v9322_v53 = vpop.f32.mrb[209].mxu0  ;;  %v6421_v60 = vsel %vm1108_vm4, %v11688_v18, -inf }
 0xb31   :  { %6422 = vmax.xlane.f32.xlu0 %v6421_v60  ;;  %v6138_v2 = vpop.f32.mrb[210].mxu0 }
 0xb32   :  { %v11692_v62 = vpop.f32.mrb[220].mxu1  ;;  %v9323_v39 = vpop.f32.mrb[211].mxu0 }
 0xb33   :  { %v9316_v50 = vpop.f32.mrb[221].mxu1  ;;  %v6418_v5 = vsel %vm1108_vm4, %v11692_v62, -inf }
 0xb34   :  { %6419 = vmax.xlane.f32.xlu1 %v6418_v5  ;;  %v6088_v31 = vpop.f32.mrb[222].mxu1 }
 0xb35   :  { %v9317_v22 = vpop.f32.mrb[223].mxu1 }
 0xb37   :  { %v11696_v4 = vpop.f32.mrb[212].mxu0 }
 0xb38   :  { %v9334_v34 = vpop.f32.mrb[213].mxu0  ;;  %v6427_v63 = vsel %vm1108_vm4, %v11696_v4, -inf }
 0xb39   :  { %6428 = vmax.xlane.f32.xlu0 %v6427_v63  ;;  %v6238_v41 = vpop.f32.mrb[214].mxu0 }
 0xb3a   :  { %v11700_v7 = vpop.f32.mrb[224].mxu1  ;;  %v9335_v3 = vpop.f32.mrb[215].mxu0 }
 0xb3b   :  { %v9328_v51 = vpop.f32.mrb[225].mxu1  ;;  %v6424_v6 = vsel %vm1108_vm4, %v11700_v7, -inf }
 0xb3c   :  { %6425 = vmax.xlane.f32.xlu1 %v6424_v6  ;;  %v6188_v27 = vpop.f32.mrb[226].mxu1 }
 0xb3d   :  { %v9329_v14 = vpop.f32.mrb[227].mxu1 }
 0xb3e   :  { %v11724_v14 = vpop.permute.xlu0 %6679 }
 0xb3f   :  { %v11704_v53 = vpop.f32.mrb[216].mxu0 }
 0xb40   :  { %v9346_v60 = vpop.f32.mrb[217].mxu0  ;;  %v6433_v2 = vsel %vm1108_vm4, %v11704_v53, -inf }
 0xb41   :  { %6434 = vmax.xlane.f32.xlu0 %v6433_v2  ;;  %v6338_v39 = vpop.f32.mrb[218].mxu0  ;;  %v11728_v2 = vpop.permute.xlu1 %6727 }
 0xb42   :  { %v11708_v50 = vpop.f32.mrb[228].mxu1  ;;  %v9347_v5 = vpop.f32.mrb[219].mxu0 }
 0xb43   :  { %v9340_v31 = vpop.f32.mrb[229].mxu1  ;;  %v6430_v22 = vsel %vm1108_vm4, %v11708_v50, -inf  ;;  %v11726_v60 = vpop.permute.xlu0 %6775 }
 0xb44   :  { %6431 = vmax.xlane.f32.xlu1 %v6430_v22  ;;  %v6288_v34 = vpop.f32.mrb[230].mxu1 }
 0xb45   :  { %v9341_v63 = vpop.f32.mrb[231].mxu1 }
 0xb4a   :  { %v11712_v41 = vpop.f32.mrb[232].mxu1 }
 0xb4b   :  { %v9352_v3 = vpop.f32.mrb[233].mxu1  ;;  %v6436_v27 = vsel %vm1108_vm4, %v11712_v41, -inf }
 0xb4c   :  { %v6388_v51 = vpop.f32.mrb[234].mxu1 }
 0xb4d   :  { %v9353_v6 = vpop.f32.mrb[235].mxu1 }
 0xb55   :  { %7015 = vrot.lane.b32.xlu1 %v10065_v17, %s9852_s16  ;;  %v11730_v17 = vpop.permute.xlu0 %6871 }
 0xb57   :  { %6967 = vrot.lane.b32.xlu0 %v10045_v10, %s9852_s16  ;;  %v11732_v10 = vpop.permute.xlu1 %6823 }
 0xb59   :  { %7063 = vrot.lane.b32.xlu1 %v10053_v13, %s9852_s16 }
 0xb5d   :  { %7111 = vrot.lane.b32.xlu1 %v10073_v23, %s9852_s16  ;;  %v11735_v23 = vpop.permute.xlu1 %6919 }
 0xb81   :  { %6437 = vmax.xlane.f32.xlu1 %v6436_v27 }
 0xb96   :  { %v6393_v39 = vpop.xlane.xlu0 %6392 }
 0xb97   :  { %v6439_v13 = vsub.f32 %v11650_v36, %v6393_v39 }
 0xb99   :  { %v6455_v5 = vmul.f32 1.442695, %v6439_v13 }
 0xb9b   :  { %9736 = vpow2.f32 %v6455_v5 }
 0xb9e   :  { %v6399_v31 = vpop.xlane.xlu0 %6398 }
 0xb9f   :  { %v6441_v22 = vsub.f32 %v11656_v46, %v6399_v31 }
 0xba1   :  { %v6459_v34 = vmul.f32 1.442695, %v6441_v22  ;;  %v6396_v63 = vpop.xlane.xlu1 %6395 }
 0xba2   :  { %v6440_v3 = vsub.f32 %v11660_v1, %v6396_v63 }
 0xba3   :  { %9738 = vpow2.f32 %v6459_v34 }
 0xba4   :  { %v6457_v51 = vmul.f32 1.442695, %v6440_v3 }
 0xba5   :  { %v11739_v6 = vpop.eup %9736 }
 0xba6   :  { %9740 = vpow2.f32 %v6457_v51  ;;  %v6487_v27 = vsel %vm1108_vm4, %v11739_v6, 0.0 }
 0xba7   :  { %6488 = vadd.xlane.f32.xlu0 %v6487_v27 }
 0xba9   :  { %v6402_v36 = vpop.xlane.xlu0 %6401 }
 0xbaa   :  { %v6442_v39 = vsub.f32 %v11666_v32, %v6402_v36 }
 0xbac   :  { %v6461_v13 = vmul.f32 1.442695, %v6442_v39 }
 0xbad   :  { %v11744_v5 = vpop.eup %9738  ;;  %v6405_v46 = vpop.xlane.xlu0 %6404 }
 0xbae   :  { %9742 = vpow2.f32 %v6461_v13  ;;  %v6443_v31 = vsub.f32 %v11664_v44, %v6405_v46  ;;  %v6493_v1 = vsel %vm1108_vm4, %v11744_v5, 0.0 }
 0xbaf   :  { %6494 = vadd.xlane.f32.xlu0 %v6493_v1 }
 0xbb0   :  { %v11749_v22 = vpop.eup %9740  ;;  %v6463_v34 = vmul.f32 1.442695, %v6443_v31 }
 0xbb1   :  { %v6408_v63 = vpop.xlane.xlu1 %6407  ;;  %v6411_v3 = vpop.xlane.xlu0 %6410  ;;  %v6490_v51 = vsel %vm1108_vm4, %v11749_v22, 0.0 }
 0xbb2   :  { %9744 = vpow2.f32 %v6463_v34  ;;  %v6444_v32 = vsub.f32 %v11674_v0, %v6408_v63  ;;  %v6445_v27 = vsub.f32 %v11670_v35, %v6411_v3  ;;  %6491 = vadd.xlane.f32.xlu1 %v6490_v51 }
 0xbb4   :  { %v6465_v36 = vmul.f32 1.442695, %v6444_v32  ;;  %v6467_v44 = vmul.f32 1.442695, %v6445_v27 }
 0xbb6   :  { %9746 = vpow2.f32 %v6465_v36  ;;  %v6417_v39 = vpop.xlane.xlu0 %6416 }
 0xbb7   :  { %9748 = vpow2.f32 %v6467_v44  ;;  %v6447_v46 = vsub.f32 %v11680_v52, %v6417_v39 }
 0xbb8   :  { %v11755_v13 = vpop.eup %9742 }
 0xbb9   :  { %v6414_v31 = vpop.xlane.xlu1 %6413  ;;  %v6496_v1 = vsel %vm1108_vm4, %v11755_v13, 0.0  ;;  %v6471_v35 = vmul.f32 1.442695, %v6447_v46 }
 0xbba   :  { %v6446_v34 = vsub.f32 %v11684_v58, %v6414_v31  ;;  %6497 = vadd.xlane.f32.xlu1 %v6496_v1 }
 0xbbc   :  { %v11761_v0 = vpop.eup %9744  ;;  %v6469_v63 = vmul.f32 1.442695, %v6446_v34 }
 0xbbd   :  { %v6499_v3 = vsel %vm1108_vm4, %v11761_v0, 0.0 }
 0xbbe   :  { %9750 = vpow2.f32 %v6469_v63  ;;  %6500 = vadd.xlane.f32.xlu0 %v6499_v3  ;;  %v6423_v51 = vpop.xlane.xlu0 %6422 }
 0xbbf   :  { %v6449_v32 = vsub.f32 %v11688_v18, %v6423_v51  ;;  %9752 = vpow2.f32 %v6471_v35 }
 0xbc0   :  { %v11766_v52 = vpop.eup %9746 }
 0xbc1   :  { %v11768_v27 = vpop.eup %9748  ;;  %v6475_v36 = vmul.f32 1.442695, %v6449_v32  ;;  %v6420_v58 = vpop.xlane.xlu1 %6419  ;;  %v6502_v44 = vsel %vm1108_vm4, %v11766_v52, 0.0 }
 0xbc2   :  { %v6448_v39 = vsub.f32 %v11692_v62, %v6420_v58  ;;  %6503 = vadd.xlane.f32.xlu1 %v6502_v44  ;;  %v6505_v46 = vsel %vm1108_vm4, %v11768_v27, 0.0 }
 0xbc3   :  { %6506 = vadd.xlane.f32.xlu0 %v6505_v46  ;;  %9754 = vpow2.f32 %v6475_v36 }
 0xbc4   :  { %v6473_v31 = vmul.f32 1.442695, %v6448_v39 }
 0xbc6   :  { %9756 = vpow2.f32 %v6473_v31  ;;  %v6429_v39 = vpop.xlane.xlu0 %6428 }
 0xbc7   :  { %v6451_v46 = vsub.f32 %v11696_v4, %v6429_v39 }
 0xbc8   :  { %v11775_v18 = vpop.eup %9750 }
 0xbc9   :  { %v6426_v1 = vpop.xlane.xlu1 %6425  ;;  %v6508_v34 = vsel %vm1108_vm4, %v11775_v18, 0.0  ;;  %v11779_v35 = vpop.eup %9752 }
 0xbca   :  { %v6450_v63 = vsub.f32 %v11700_v7, %v6426_v1  ;;  %6509 = vadd.xlane.f32.xlu1 %v6508_v34  ;;  %v6511_v3 = vsel %vm1108_vm4, %v11779_v35, 0.0  ;;  %v6479_v1 = vmul.f32 1.442695, %v6451_v46 }
 0xbcc   :  { %v6477_v62 = vmul.f32 1.442695, %v6450_v63 }
 0xbcd   :  { %v11784_v51 = vpop.eup %9754 }
 0xbce   :  { %9758 = vpow2.f32 %v6477_v62  ;;  %6512 = vadd.xlane.f32.xlu1 %v6511_v3  ;;  %v6517_v58 = vsel %vm1108_vm4, %v11784_v51, 0.0  ;;  %v6435_v31 = vpop.xlane.xlu0 %6434 }
 0xbcf   :  { %v6453_v34 = vsub.f32 %v11704_v53, %v6435_v31  ;;  %9760 = vpow2.f32 %v6479_v1 }
 0xbd0   :  { %v11786_v32 = vpop.eup %9756 }
 0xbd1   :  { %v6514_v36 = vsel %vm1108_vm4, %v11786_v32, 0.0  ;;  %v6432_v63 = vpop.xlane.xlu1 %6431  ;;  %v6483_v62 = vmul.f32 1.442695, %v6453_v34 }
 0xbd2   :  { %6515 = vadd.xlane.f32.xlu0 %v6514_v36  ;;  %6518 = vadd.xlane.f32.xlu1 %v6517_v58  ;;  %v6452_v3 = vsub.f32 %v11708_v50, %v6432_v63 }
 0xbd3   :  { %9762 = vpow2.f32 %v6483_v62 }
 0xbd4   :  { %v6481_v36 = vmul.f32 1.442695, %v6452_v3  ;;  %v6829_v3 = vsel %vm1307_vm3, %v11732_v10, 0 }
 0xbd5   :  { %v11803_v58 = vpop.permute.xlu1 %7015 }
 0xbd6   :  { %9764 = vpow2.f32 %v6481_v36 }
 0xbd8   :  { %v11792_v7 = vpop.eup %9758 }
 0xbd9   :  { %v6520_v44 = vsel %vm1108_vm4, %v11792_v7, 0.0 }
 0xbda   :  { %6521 = vadd.xlane.f32.xlu0 %v6520_v44  ;;  %v11807_v44 = vpop.permute.xlu1 %7063 }
 0xbde   :  { %v11813_v53 = vpop.permute.xlu1 %7111 }
 0xbe3   :  { %7207 = vrot.lane.b32.xlu1 %v10079_v24, %s9852_s16  ;;  %v11805_v24 = vpop.eup %9760 }
 0xbe4   :  { %v11811_v4 = vpop.eup %9762 }
 0xbe5   :  { %v6529_v50 = vsel %vm1108_vm4, %v11811_v4, 0.0  ;;  %v11817_v39 = vpop.eup %9764 }
 0xbe6   :  { %v6526_v31 = vsel %vm1108_vm4, %v11817_v39, 0.0 }
 0xbf0   :  { %7159 = vrot.lane.b32.xlu0 %v10061_v16, %s9852_s16  ;;  %v6523_v16 = vsel %vm1108_vm4, %v11805_v24, 0.0 }
 0xc07   :  { %6524 = vadd.xlane.f32.xlu1 %v6523_v16 }
 0xc0b   :  { %6530 = vadd.xlane.f32.xlu1 %v6529_v50 }
 0xc0e   :  { %v6438_v46 = vpop.xlane.xlu1 %6437 }
 0xc0f   :  { %v6454_v1 = vsub.f32 %v11712_v41, %v6438_v46  ;;  %6527 = vadd.xlane.f32.xlu0 %v6526_v31  ;;  %v12408_v46 = vld [vmem:[#allocation19_spill] sm:$0xff] }
 0xc11   :  { %v6485_v34 = vmul.f32 1.442695, %v6454_v1 }
 0xc13   :  { %9766 = vpow2.f32 %v6485_v34 }
 0xc1c   :  { %7303 = vrot.lane.b32.xlu1 %v10085_v26, %s9852_s16  ;;  %v11836_v26 = vpop.permute.xlu0 %6967 }
 0xc1d   :  { %v11824_v63 = vpop.eup %9766 }
 0xc1e   :  { %v6532_v62 = vsel %vm1108_vm4, %v11824_v63, 0.0 }
 0xc1f   :  { %6533 = vadd.xlane.f32.xlu0 %v6532_v62 }
 0xc20   :  { %7369 = vrot.lane.b32.xlu1 %v11148_v47, %s9853_s17 }
 0xc24   :  { %7373 = vrot.lane.b32.xlu1 %v11150_v25, %s9853_s17 }
 0xc28   :  { %7377 = vrot.lane.b32.xlu1 %v11154_v29, %s9853_s17 }
 0xc2c   :  { %7381 = vrot.lane.b32.xlu1 %v11158_v33, %s9853_s17 }
 0xc30   :  { %7433 = vrot.lane.b32.xlu1 %v11624_v30, %s9854_s18  ;;  %v12405_v30 = vld [vmem:[#allocation21_spill] sm:$0xff] }
 0xc34   :  { %7437 = vrot.lane.b32.xlu1 %v11626_v40, %s9854_s18  ;;  %v6489_v41 = vpop.xlane.xlu0 %6488 }
 0xc35   :  { %9768 = vrcp.f32 %v6489_v41  ;;  %7255 = vrot.lane.b32.xlu0 %v10069_v19, %s9852_s16  ;;  %v12410_v41 = vld [vmem:[#allocation22_spill] sm:$0xff] }
 0xc38   :  { %7441 = vrot.lane.b32.xlu1 %v11630_v8, %s9854_s18 }
 0xc39   :  { %7367 = vrot.lane.b32.xlu0 %v11144_v57, %s9853_s17  ;;  %v6685_v57 = vsel %vm1307_vm3, %v11724_v14, 0  ;;  %v12406_v14 = vld [vmem:[#allocation23_spill] sm:$0xff] }
 0xc3c   :  { %7445 = vrot.lane.b32.xlu1 %v11634_v45, %s9854_s18  ;;  %v6495_v47 = vpop.xlane.xlu0 %6494  ;;  %v6781_v45 = vsel %vm1307_vm3, %v11726_v60, 0 }
 0xc3d   :  { %9770 = vrcp.f32 %v6495_v47  ;;  %7371 = vrot.lane.b32.xlu0 %v11146_v20, %s9853_s17 }
 0xc3f   :  { %v9769_v25 = vpop.eup %9768  ;;  %v6492_v29 = vpop.xlane.xlu1 %6491 }
 0xc40   :  { %v6551_v33 = vmul.f32 %v9769_v25, %v11739_v6  ;;  %9772 = vrcp.f32 %v6492_v29  ;;  %7385 = vrot.lane.b32.xlu1 %v11162_v54, %s9853_s17  ;;  %v7021_v29 = vsel %vm1307_vm3, %v11803_v58, 0  ;;  %v7069_v58 = vsel %vm1307_vm3, %v11807_v44, 0 }
 0xc41   :  { %7375 = vrot.lane.b32.xlu0 %v11152_v48, %s9853_s17 }
 0xc42   :  { %v6567_v19 = vpack.c.bf16 %v6551_v33, %v6551_v33 }
 0xc44   :  { %7389 = vrot.lane.b32.xlu1 %v11166_v55, %s9853_s17  ;;  %9357 = vmatmul.mubr.msk.bf16.vlgmr.msra.gmra.mrb[220].mxu0 %vm1303_vm5, %v6567_v19 }
 0xc45   :  { %9367 = vmatpush3.bf16.msra.mxu0 %v6685_v57  ;;  %7379 = vrot.lane.b32.xlu0 %v11156_v59, %s9853_s17 }
 0xc46   :  { %9368 = vmatprep.mubr.msk.bf16.mxu0 %vm9841_vm1, %v12398_v49  ;;  %9378 = vmatprep.subr.bf16.mxu0 %v12398_v49 }
 0xc47   :  { %v9771_v20 = vpop.eup %9770  ;;  %v6498_v48 = vpop.xlane.xlu1 %6497 }
 0xc48   :  { %v6553_v54 = vmul.f32 %v9771_v20, %v11744_v5  ;;  %9774 = vrcp.f32 %v6498_v48  ;;  %7393 = vrot.lane.b32.xlu1 %v12405_v30, %s9853_s17  ;;  %v7117_v48 = vsel %vm1307_vm3, %v11813_v53, 0 }
 0xc49   :  { %7431 = vrot.lane.b32.xlu0 %v11620_v9, %s9854_s18  ;;  %v6733_v9 = vsel %vm1307_vm3, %v11728_v2, 0 }
 0xc4a   :  { %v9773_v55 = vpop.eup %9772  ;;  %v6569_v40 = vpack.c.bf16 %v6553_v54, %v6553_v54 }
 0xc4b   :  { %v6552_v59 = vmul.f32 %v9773_v55, %v11749_v22  ;;  %v6501_v8 = vpop.xlane.xlu0 %6500 }
 0xc4c   :  { %9776 = vrcp.f32 %v6501_v8  ;;  %7397 = vrot.lane.b32.xlu1 %v12406_v14, %s9853_s17  ;;  %9369 = vmatmul.mubr.msk.bf16.vlgmr.msra.gmra.mrb[224].mxu0 %vm1303_vm5, %v6569_v40  ;;  %v12411_v14 = vld [vmem:[#allocation3_spill] sm:$0xff] }
 0xc4d   :  { %9379 = vmatpush3.bf16.msra.mxu0 %v6781_v45  ;;  %7435 = vrot.lane.b32.xlu0 %v11622_v61, %s9854_s18  ;;  %v6568_v6 = vpack.c.bf16 %v6552_v59, %v6552_v59 }
 0xc4e   :  { %9380 = vmatprep.mubr.msk.bf16.mxu0 %vm9841_vm1, %v12398_v49  ;;  %9390 = vmatprep.subr.bf16.mxu0 %v12398_v49 }
 0xc4f   :  { %9363 = vmatmul.mubr.msk.bf16.vlgmr.msra.gmra.mrb[236].mxu1 %vm1303_vm5, %v6568_v6  ;;  %v6504_v60 = vpop.xlane.xlu1 %6503 }
 0xc50   :  { %9373 = vmatpush3.bf16.msra.mxu1 %v6733_v9  ;;  %9778 = vrcp.f32 %v6504_v60  ;;  %v6507_v5 = vpop.xlane.xlu0 %6506  ;;  %7449 = vrot.lane.b32.xlu1 %v11638_v28, %s9854_s18 }
 0xc51   :  { %9780 = vrcp.f32 %v6507_v5  ;;  %7439 = vrot.lane.b32.xlu0 %v11628_v38, %s9854_s18  ;;  %9374 = vmatprep.mubr.msk.bf16.mxu1 %vm9841_vm1, %v12398_v49 }
 0xc52   :  { %v9775_v61 = vpop.eup %9774  ;;  %9384 = vmatprep.subr.bf16.mxu1 %v12398_v49 }
 0xc53   :  { %v6554_v2 = vmul.f32 %v9775_v61, %v11755_v13 }
 0xc54   :  { %7453 = vrot.lane.b32.xlu1 %v11642_v12, %s9854_s18  ;;  %v12407_v12 = vld [vmem:[#allocation18_spill] sm:$0xff] }
 0xc55   :  { %7443 = vrot.lane.b32.xlu0 %v11632_v15, %s9854_s18  ;;  %v6570_v22 = vpack.c.bf16 %v6554_v2, %v6554_v2 }
 0xc56   :  { %v9777_v28 = vpop.eup %9776 }
 0xc57   :  { %v6555_v38 = vmul.f32 %v9777_v28, %v11761_v0  ;;  %9375 = vmatmul.mubr.msk.bf16.vlgmr.msra.gmra.mrb[240].mxu1 %vm1303_vm5, %v6570_v22  ;;  %v6510_v36 = vpop.xlane.xlu1 %6509  ;;  %v6877_v0 = vsel %vm1307_vm3, %v11730_v17, 0  ;;  %v6925_v17 = vsel %vm1307_vm3, %v11735_v23, 0  ;;  %v6973_v23 = vsel %vm1307_vm3, %v11836_v26, 0  ;;  %v12412_v22 = vld [vmem:[#allocation8_spill] sm:$0xff] }
 0xc58   :  { %9385 = vmatpush3.bf16.msra.mxu1 %v6829_v3  ;;  %9782 = vrcp.f32 %v6510_v36  ;;  %7457 = vrot.lane.b32.xlu1 %v11646_v21, %s9854_s18 }
 0xc59   :  { %7383 = vrot.lane.b32.xlu0 %v12407_v12, %s9853_s17  ;;  %v6571_v13 = vpack.c.bf16 %v6555_v38, %v6555_v38  ;;  %9386 = vmatprep.mubr.msk.bf16.mxu1 %vm9841_vm1, %v12398_v49 }
 0xc5a   :  { %v9779_v15 = vpop.eup %9778  ;;  %9396 = vmatprep.subr.bf16.mxu1 %v12398_v49 }
 0xc5b   :  { %v9781_v10 = vpop.eup %9780  ;;  %v6556_v16 = vmul.f32 %v9779_v15, %v11766_v52  ;;  %v6513_v50 = vpop.xlane.xlu1 %6512  ;;  %9381 = vmatmul.mubr.msk.bf16.vlgmr.msra.gmra.mrb[228].mxu0 %vm1303_vm5, %v6571_v13  ;;  %v12413_v13 = vld [vmem:[#allocation10_spill] sm:$0xff] }
 0xc5c   :  { %9784 = vrcp.f32 %v6513_v50  ;;  %9391 = vmatpush3.bf16.msra.mxu0 %v6877_v0  ;;  %7461 = vrot.lane.b32.xlu1 %v11654_v56, %s9854_s18  ;;  %v6557_v21 = vmul.f32 %v9781_v10, %v11768_v27  ;;  %v12409_v56 = vld [vmem:[#allocation20_spill] sm:$0xff] }
 0xc5d   :  { %7387 = vrot.lane.b32.xlu0 %v12408_v46, %s9853_s17  ;;  %v6572_v31 = vpack.c.bf16 %v6556_v16, %v6556_v16  ;;  %9392 = vmatprep.mubr.msk.bf16.mxu0 %vm9841_vm1, %v12398_v49 }
 0xc5e   :  { %9402 = vmatprep.subr.bf16.mxu0 %v12398_v49  ;;  %v6573_v27 = vpack.c.bf16 %v6557_v21, %v6557_v21 }
 0xc5f   :  { %9387 = vmatmul.mubr.msk.bf16.vlgmr.msra.gmra.mrb[244].mxu1 %vm1303_vm5, %v6572_v31  ;;  %v6519_v52 = vpop.xlane.xlu1 %6518  ;;  %v6516_v1 = vpop.xlane.xlu0 %6515  ;;  %v12414_v31 = vld [vmem:[#allocation2_spill] sm:$0xff] }
 0xc60   :  { %9397 = vmatpush3.bf16.msra.mxu1 %v6925_v17  ;;  %9786 = vrcp.f32 %v6519_v52  ;;  %9398 = vmatprep.mubr.msk.bf16.mxu1 %vm9841_vm1, %v12398_v49 }
 0xc61   :  { %9788 = vrcp.f32 %v6516_v1  ;;  %7391 = vrot.lane.b32.xlu0 %v12409_v56, %s9853_s17  ;;  %9408 = vmatprep.subr.bf16.mxu1 %v12398_v49 }
 0xc62   :  { %v9783_v34 = vpop.eup %9782 }
 0xc63   :  { %v6558_v62 = vmul.f32 %v9783_v34, %v11775_v18  ;;  %9393 = vmatmul.mubr.msk.bf16.vlgmr.msra.gmra.mrb[232].mxu0 %vm1303_vm5, %v6573_v27  ;;  %v7208_v53 = vpop.permute.xlu1 %7207 }
 0xc64   :  { %9403 = vmatpush3.bf16.msra.mxu0 %v6973_v23  ;;  %9404 = vmatprep.mubr.msk.bf16.mxu0 %vm9841_vm1, %v12398_v49  ;;  %v12415_v23 = vld [vmem:[#allocation5_spill] sm:$0xff] }
 0xc65   :  { %7395 = vrot.lane.b32.xlu0 %v12410_v41, %s9853_s17  ;;  %v6574_v47 = vpack.c.bf16 %v6558_v62, %v6558_v62  ;;  %9414 = vmatprep.subr.bf16.mxu0 %v12398_v49 }
 0xc66   :  { %v9785_v25 = vpop.eup %9784 }
 0xc67   :  { %v6559_v26 = vmul.f32 %v9785_v25, %v11779_v35  ;;  %9399 = vmatmul.mubr.msk.bf16.vlgmr.msra.gmra.mrb[248].mxu1 %vm1303_vm5, %v6574_v47  ;;  %v6522_v18 = vpop.xlane.xlu0 %6521  ;;  %v12416_v25 = vld [vmem:[#allocation11_spill] sm:$0xff] }
 0xc68   :  { %9409 = vmatpush3.bf16.msra.mxu1 %v7021_v29  ;;  %9790 = vrcp.f32 %v6522_v18  ;;  %9410 = vmatprep.mubr.msk.bf16.mxu1 %vm9841_vm1, %v12398_v49 }
 0xc69   :  { %7447 = vrot.lane.b32.xlu0 %v11636_v42, %s9854_s18  ;;  %v6575_v33 = vpack.c.bf16 %v6559_v26, %v6559_v26  ;;  %9420 = vmatprep.subr.bf16.mxu1 %v12398_v49 }
 0xc6a   :  { %v9787_v19 = vpop.eup %9786 }
 0xc6b   :  { %v9789_v57 = vpop.eup %9788  ;;  %9405 = vmatmul.mubr.msk.bf16.vlgmr.msra.gmra.mrb[236].mxu0 %vm1303_vm5, %v6575_v33  ;;  %v6561_v20 = vmul.f32 %v9787_v19, %v11784_v51  ;;  %v7160_v44 = vpop.permute.xlu0 %7159 }
 0xc6c   :  { %v6560_v35 = vmul.f32 %v9789_v57, %v11786_v32  ;;  %9415 = vmatpush3.bf16.msra.mxu0 %v7069_v58  ;;  %9416 = vmatprep.mubr.msk.bf16.mxu0 %vm9841_vm1, %v12398_v49  ;;  %v7165_v51 = vsel %vm1307_vm3, %v7160_v44, 0  ;;  %v12418_v58 = vld [vmem:[#allocation15_spill] sm:$0xff] }
 0xc6d   :  { %7451 = vrot.lane.b32.xlu0 %v11640_v43, %s9854_s18  ;;  %9426 = vmatprep.subr.bf16.mxu0 %v12398_v49  ;;  %v6577_v32 = vpack.c.bf16 %v6561_v20, %v6561_v20 }
 0xc6e   :  { %v6576_v42 = vpack.c.bf16 %v6560_v35, %v6560_v35 }
 0xc70   :  { %9411 = vmatmul.mubr.msk.bf16.vlgmr.msra.gmra.mrb[252].mxu1 %vm1303_vm5, %v6576_v42 }
 0xc71   :  { %9421 = vmatpush3.bf16.msra.mxu1 %v7117_v48  ;;  %7455 = vrot.lane.b32.xlu0 %v11644_v11, %s9854_s18  ;;  %v7213_v11 = vsel %vm1307_vm3, %v7208_v53, 0  ;;  %v12419_v48 = vld [vmem:[#allocation17_spill] sm:$0xff] }
 0xc72   :  { %v9791_v54 = vpop.eup %9790  ;;  %9422 = vmatprep.mubr.msk.bf16.mxu1 %vm9841_vm1, %v12398_v49  ;;  %9432 = vmatprep.subr.bf16.mxu1 %v12398_v49  ;;  %v12420_v53 = vld [vmem:[#allocation9_spill] sm:$0xff] }
 0xc73   :  { %v6562_v43 = vmul.f32 %v9791_v54, %v11792_v7  ;;  %9417 = vmatmul.mubr.msk.bf16.vlgmr.msra.gmra.mrb[240].mxu0 %vm1303_vm5, %v6577_v32 }
 0xc74   :  { %9427 = vmatpush3.bf16.msra.mxu0 %v7165_v51  ;;  %9428 = vmatprep.mubr.msk.bf16.mxu0 %vm9841_vm1, %v12398_v49 }
 0xc75   :  { %v6578_v30 = vpack.c.bf16 %v6562_v43, %v6562_v43  ;;  %7459 = vrot.lane.b32.xlu0 %v11648_v37, %s9854_s18  ;;  %9438 = vmatprep.subr.bf16.mxu0 %v12398_v49 }
 0xc78   :  { %9423 = vmatmul.mubr.msk.bf16.vlgmr.msra.gmra.mrb[0].mxu1 %vm1303_vm5, %v6578_v30 }
 0xc79   :  { %9433 = vmatpush3.bf16.msra.mxu1 %v7213_v11  ;;  %9434 = vmatprep.mubr.msk.bf16.mxu1 %vm9841_vm1, %v12398_v49 }
 0xc7a   :  { %9444 = vmatprep.subr.bf16.mxu1 %v12398_v49 }
 0xc94   :  { %v6525_v7 = vpop.xlane.xlu1 %6524 }
 0xc95   :  { %9792 = vrcp.f32 %v6525_v7 }
 0xc98   :  { %v6531_v55 = vpop.xlane.xlu1 %6530 }
 0xc9c   :  { %v7304_v40 = vpop.permute.xlu1 %7303  ;;  %v6528_v59 = vpop.xlane.xlu0 %6527 }
 0xc9d   :  { %9794 = vrcp.f32 %v6528_v59  ;;  %v7309_v38 = vsel %vm1307_vm3, %v7304_v40, 0 }
 0xc9e   :  { %9796 = vrcp.f32 %v6531_v55 }
 0xc9f   :  { %v9793_v8 = vpop.eup %9792 }
 0xca0   :  { %v6563_v37 = vmul.f32 %v9793_v8, %v11805_v24  ;;  %v7370_v45 = vpop.permute.xlu1 %7369 }
 0xca1   :  { %v11981_v6 = vsel %vm326_vm2, %v12411_v14, %v7370_v45 }
 0xca2   :  { %v6579_v9 = vpack.c.bf16 %v6563_v37, %v6563_v37  ;;  %v12421_v37 = vld [vmem:[#allocation14_spill] sm:$0xff] }
 0xca4   :  { %v11983_v60 = vpop.permute.xlu1 %7373  ;;  %9429 = vmatmul.mubr.msk.bf16.vlgmr.msra.gmra.mrb[244].mxu0 %vm1303_vm5, %v6579_v9  ;;  %v12422_v9 = vld [vmem:[#allocation16_spill] sm:$0xff] }
 0xca5   :  { %9440 = vmatprep.mubr.msk.bf16.mxu0 %vm9841_vm1, %v12398_v49 }
 0xca7   :  { %v9795_v5 = vpop.eup %9794 }
 0xca8   :  { %v6564_v61 = vmul.f32 %v9795_v5, %v11817_v39  ;;  %v7378_v2 = vpop.permute.xlu1 %7377  ;;  %v9797_v3 = vpop.eup %9796 }
 0xca9   :  { %v11991_v24 = vsel %vm326_vm2, %v12412_v22, %v7378_v2  ;;  %v6565_v39 = vmul.f32 %v9797_v3, %v11811_v4 }
 0xcaa   :  { %v6580_v28 = vpack.c.bf16 %v6564_v61, %v6564_v61 }
 0xcab   :  { %v6581_v50 = vpack.c.bf16 %v6565_v39, %v6565_v39 }
 0xcac   :  { %v7382_v36 = vpop.permute.xlu1 %7381  ;;  %9435 = vmatmul.mubr.msk.bf16.vlgmr.msra.gmra.mrb[4].mxu1 %vm1303_vm5, %v6580_v28  ;;  %v6534_v12 = vpop.xlane.xlu0 %6533 }
 0xcad   :  { %v11997_v15 = vsel %vm326_vm2, %v12413_v13, %v7382_v36  ;;  %9445 = vmatpush3.bf16.msra.mxu1 %v7309_v38  ;;  %9798 = vrcp.f32 %v6534_v12  ;;  %9446 = vmatprep.mubr.msk.bf16.mxu1 %vm9841_vm1, %v12398_v49 }
 0xcb0   :  { %v12002_v10 = vpop.permute.xlu1 %7433  ;;  %v7256_v0 = vpop.permute.xlu0 %7255 }
 0xcb1   :  { %v7261_v16 = vsel %vm1307_vm3, %v7256_v0, 0 }
 0xcb2   :  { %9439 = vmatpush3.bf16.msra.mxu0 %v7261_v16 }
 0xcb4   :  { %v12005_v21 = vpop.permute.xlu1 %7437  ;;  %v7368_v46 = vpop.permute.xlu0 %7367 }
 0xcb5   :  { %v12009_v17 = vsel %vm326_vm2, %v12414_v31, %v7368_v46  ;;  %9441 = vmatmul.mubr.msk.bf16.vlgmr.msra.gmra.mrb[248].mxu0 %vm1303_vm5, %v6581_v50 }
 0xcb7   :  { %v9799_v52 = vpop.eup %9798 }
 0xcb8   :  { %v6566_v49 = vmul.f32 %v9799_v52, %v11824_v63  ;;  %v12013_v4 = vpop.permute.xlu1 %7441  ;;  %v12015_v1 = vpop.permute.xlu0 %7371  ;;  %v12417_v63 = vld [vmem:[#allocation7_spill] sm:$0xff] }
 0xcba   :  { %v6582_v56 = vpack.c.bf16 %v6566_v49, %v6566_v49 }
 0xcbc   :  { %v12017_v27 = vpop.permute.xlu1 %7445  ;;  %9447 = vmatmul.mubr.msk.bf16.vlgmr.msra.gmra.mrb[8].mxu1 %vm1303_vm5, %v6582_v56  ;;  %v7376_v34 = vpop.permute.xlu0 %7375 }
 0xcbd   :  { %v12022_v62 = vsel %vm326_vm2, %v12415_v23, %v7376_v34 }
 0xcc0   :  { %v7386_v41 = vpop.permute.xlu1 %7385  ;;  %v7380_v47 = vpop.permute.xlu0 %7379 }
 0xcc1   :  { %v12026_v29 = vsel %vm326_vm2, %v12416_v25, %v7386_v41  ;;  %v12030_v26 = vsel %vm326_vm2, %v12417_v63, %v7380_v47  ;;  %v9516_v41 = vld [vmem:[%s12371_s4] sm:$0xff]  }
 0xcc2   :  { %9450 = vmatprep.subr.bf16.mxu0 %v9516_v41 }
 0xcc3   :  { %9451 = vmatpush3.bf16.msra.mxu0 %v9516_v41 }
 0xcc4   :  { %v12032_v18 = vpop.permute.xlu1 %7389  ;;  %v12034_v33 = vpop.permute.xlu0 %7431 }
 0xcc8   :  { %v7394_v19 = vpop.permute.xlu1 %7393  ;;  %v12036_v57 = vpop.permute.xlu0 %7435 }
 0xcc9   :  { %v7556_v35 = vsel %vm326_vm2, %v12418_v58, %v7394_v19  ;;  %v9517_v58 = vld [vmem:[%s12371_s4 + $0x8] sm:$0xff]  }
 0xcca   :  { %9452 = vmatprep.subr.bf16.mxu0 %v9517_v58 }
 0xccb   :  { %9453 = vmatpush3.bf16.msra.mxu0 %v9517_v58 }
 0xccc   :  { %v7398_v20 = vpop.permute.xlu1 %7397  ;;  %v12040_v42 = vpop.permute.xlu0 %7439 }
 0xccd   :  { %v7558_v44 = vsel %vm326_vm2, %v12419_v48, %v7398_v20 }
 0xcd0   :  { %v12044_v32 = vpop.permute.xlu1 %7449  ;;  %v12046_v54 = vpop.permute.xlu0 %7443 }
 0xcd4   :  { %v12048_v43 = vpop.permute.xlu1 %7453  ;;  %v7384_v51 = vpop.permute.xlu0 %7383 }
 0xcd5   :  { %v12052_v30 = vsel %vm326_vm2, %v12420_v53, %v7384_v51 }
 0xcd8   :  { %v7458_v11 = vpop.permute.xlu1 %7457  ;;  %v12054_v7 = vpop.permute.xlu0 %7387 }
 0xcd9   :  { %v12057_v55 = vsel %vm7559_vm6, %v7556_v35, %v7458_v11 }
 0xcdc   :  { %v7462_v40 = vpop.permute.xlu1 %7461  ;;  %v7392_v59 = vpop.permute.xlu0 %7391 }
 0xcdd   :  { %v12060_v8 = vsel %vm7559_vm6, %v7558_v44, %v7462_v40  ;;  %v7555_v45 = vsel %vm326_vm2, %v12421_v37, %v7392_v59 }
 0xce0   :  { %v7396_v14 = vpop.permute.xlu0 %7395 }
 0xce1   :  { %v7557_v5 = vsel %vm326_vm2, %v12422_v9, %v7396_v14 }
 0xce4   :  { %v12066_v61 = vpop.permute.xlu0 %7447 }
 0xce8   :  { %v12068_v2 = vpop.permute.xlu0 %7451 }
 0xcec   :  { %v7456_v22 = vpop.permute.xlu0 %7455 }
 0xced   :  { %v12071_v28 = vsel %vm7559_vm6, %v7555_v45, %v7456_v22 }
 0xcf0   :  { %v7460_v3 = vpop.permute.xlu0 %7459 }
 0xcf1   :  { %v12074_v38 = vsel %vm7559_vm6, %v7557_v5, %v7460_v3 }
 0xd17   :  { %v6625_v36 = vpop.f32.mrb[220].mxu0 }
 0xd18   :  { %7495 = vrot.lane.b32.xlu0 %v6625_v36, %s9855_s19  ;;  %v9358_v12 = vpop.f32.mrb[221].mxu0 }
 0xd19   :  { %v6628_v13 = vpop.f32.mrb[222].mxu0 }
 0xd1a   :  { %v9359_v39 = vpop.f32.mrb[223].mxu0 }
 0xd1f   :  { %v6721_v0 = vpop.f32.mrb[224].mxu0 }
 0xd20   :  { %7499 = vrot.lane.b32.xlu0 %v6721_v0, %s9855_s19  ;;  %v9370_v16 = vpop.f32.mrb[225].mxu0 }
 0xd21   :  { %v6724_v50 = vpop.f32.mrb[226].mxu0 }
 0xd22   :  { %v6673_v46 = vpop.f32.mrb[236].mxu1  ;;  %v9371_v31 = vpop.f32.mrb[227].mxu0 }
 0xd23   :  { %v9364_v52 = vpop.f32.mrb[237].mxu1  ;;  %7497 = vrot.lane.b32.xlu1 %v6673_v46, %s9855_s19 }
 0xd24   :  { %v6676_v49 = vpop.f32.mrb[238].mxu1 }
 0xd25   :  { %v9365_v56 = vpop.f32.mrb[239].mxu1 }
 0xd2a   :  { %v6769_v34 = vpop.f32.mrb[240].mxu1 }
 0xd2b   :  { %v9376_v23 = vpop.f32.mrb[241].mxu1  ;;  %7501 = vrot.lane.b32.xlu1 %v6769_v34, %s9855_s19 }
 0xd2c   :  { %v6772_v47 = vpop.f32.mrb[242].mxu1 }
 0xd2d   :  { %v9377_v25 = vpop.f32.mrb[243].mxu1 }
 0xd2e   :  { %v6817_v63 = vpop.f32.mrb[228].mxu0 }
 0xd2f   :  { %7503 = vrot.lane.b32.xlu0 %v6817_v63, %s9855_s19  ;;  %v9382_v19 = vpop.f32.mrb[229].mxu0 }
 0xd30   :  { %v6820_v35 = vpop.f32.mrb[230].mxu0 }
 0xd31   :  { %v9383_v20 = vpop.f32.mrb[231].mxu0 }
 0xd32   :  { %v6865_v48 = vpop.f32.mrb[244].mxu1 }
 0xd33   :  { %v9388_v44 = vpop.f32.mrb[245].mxu1  ;;  %7505 = vrot.lane.b32.xlu1 %v6865_v48, %s9855_s19 }
 0xd34   :  { %v6868_v51 = vpop.f32.mrb[246].mxu1 }
 0xd35   :  { %v9389_v53 = vpop.f32.mrb[247].mxu1 }
 0xd36   :  { %v6913_v11 = vpop.f32.mrb[232].mxu0 }
 0xd37   :  { %7507 = vrot.lane.b32.xlu0 %v6913_v11, %s9855_s19  ;;  %v9394_v40 = vpop.f32.mrb[233].mxu0 }
 0xd38   :  { %v6916_v59 = vpop.f32.mrb[234].mxu0 }
 0xd39   :  { %v9395_v37 = vpop.f32.mrb[235].mxu0 }
 0xd3a   :  { %v6961_v45 = vpop.f32.mrb[248].mxu1 }
 0xd3b   :  { %v9400_v14 = vpop.f32.mrb[249].mxu1  ;;  %7509 = vrot.lane.b32.xlu1 %v6961_v45, %s9855_s19 }
 0xd3c   :  { %v6964_v9 = vpop.f32.mrb[250].mxu1  ;;  %v7561_v14 = vsel %vm7559_vm6, %v11981_v6, %v12002_v10 }
 0xd3d   :  { %v9401_v5 = vpop.f32.mrb[251].mxu1  ;;  %v7560_v9 = vsel %vm7559_vm6, %v12009_v17, %v12034_v33 }
 0xd3e   :  { %v7009_v22 = vpop.f32.mrb[236].mxu0 }
 0xd3f   :  { %7511 = vrot.lane.b32.xlu0 %v7009_v22, %s9855_s19  ;;  %v9406_v3 = vpop.f32.mrb[237].mxu0 }
 0xd40   :  { %v7012_v36 = vpop.f32.mrb[238].mxu0 }
 0xd41   :  { %v9407_v12 = vpop.f32.mrb[239].mxu0 }
 0xd43   :  { %v7057_v13 = vpop.f32.mrb[252].mxu1 }
 0xd44   :  { %7513 = vrot.lane.b32.xlu1 %v7057_v13, %s9855_s19  ;;  %v9412_v39 = vpop.f32.mrb[253].mxu1  ;;  %v12423_v13 = vld [vmem:[#allocation6_spill] sm:$0xff] }
 0xd45   :  { %v7060_v0 = vpop.f32.mrb[254].mxu1  ;;  %v7546_v39 = vsel %vm326_vm2, %v12423_v13, %v11983_v60  ;;  %v7565_v60 = vsel %vm7559_vm6, %v11991_v24, %v12013_v4 }
 0xd46   :  { %v9413_v16 = vpop.f32.mrb[255].mxu1  ;;  %v7105_v50 = vpop.f32.mrb[240].mxu0  ;;  %v12424_v0 = vld [vmem:[#allocation4_spill] sm:$0xff]  ;;  %v7563_v6 = vsel %vm7559_vm6, %v7546_v39, %v12005_v21  ;;  %v7564_v21 = vsel %vm7559_vm6, %v12022_v62, %v12040_v42 }
 0xd47   :  { %7515 = vrot.lane.b32.xlu0 %v7105_v50, %s9855_s19  ;;  %v9418_v46 = vpop.f32.mrb[241].mxu0  ;;  %v7545_v16 = vsel %vm326_vm2, %v12424_v0, %v12015_v1  ;;  %v9834_v0 = vld [vmem:[%s12367_s0 + $0x8] sm:$0xff] }
 0xd48   :  { %v7108_v31 = vpop.f32.mrb[242].mxu0  ;;  %v7562_v10 = vsel %vm7559_vm6, %v7545_v16, %v12036_v57 }
 0xd49   :  { %v9419_v52 = vpop.f32.mrb[243].mxu0 }
 0xd4b   :  { %v7153_v49 = vpop.f32.mrb[0].mxu1 }
 0xd4c   :  { %7517 = vrot.lane.b32.xlu1 %v7153_v49, %s9855_s19  ;;  %v9424_v56 = vpop.f32.mrb[1].mxu1 }
 0xd4d   :  { %v7156_v34 = vpop.f32.mrb[2].mxu1 }
 0xd4e   :  { %v9425_v23 = vpop.f32.mrb[3].mxu1 }
 0xd4f   :  { %v7567_v23 = vsel %vm7559_vm6, %v11997_v15, %v12017_v27  ;;  %v7568_v15 = vsel %vm7559_vm6, %v12052_v30, %v12066_v61 }
 0xd77   :  { %v7201_v41 = vpop.f32.mrb[244].mxu0 }
 0xd78   :  { %7519 = vrot.lane.b32.xlu0 %v7201_v41, %s9855_s19  ;;  %v9430_v47 = vpop.f32.mrb[245].mxu0  ;;  %v7566_v41 = vsel %vm7559_vm6, %v12030_v26, %v12046_v54 }
 0xd79   :  { %v7204_v25 = vpop.f32.mrb[246].mxu0 }
 0xd7a   :  { %v9431_v63 = vpop.f32.mrb[247].mxu0 }
 0xd7b   :  { %v7569_v63 = vsel %vm7559_vm6, %v12026_v29, %v12044_v32 }
 0xd7f   :  { %v7249_v19 = vpop.f32.mrb[4].mxu1 }
 0xd80   :  { %7521 = vrot.lane.b32.xlu1 %v7249_v19, %s9855_s19  ;;  %v9436_v58 = vpop.f32.mrb[5].mxu1 }
 0xd81   :  { %v7252_v35 = vpop.f32.mrb[6].mxu1 }
 0xd82   :  { %v9437_v20 = vpop.f32.mrb[7].mxu1  ;;  %v12425_v35 = vld [vmem:[#allocation13_spill] sm:$0xff] }
 0xd83   :  { %v7554_v20 = vsel %vm326_vm2, %v12425_v35, %v12032_v18 }
 0xd84   :  { %v7571_v29 = vsel %vm7559_vm6, %v7554_v20, %v12048_v43 }
 0xd88   :  { %v7297_v48 = vpop.f32.mrb[248].mxu0 }
 0xd89   :  { %7523 = vrot.lane.b32.xlu0 %v7297_v48, %s9855_s19  ;;  %v9442_v44 = vpop.f32.mrb[249].mxu0  ;;  %v12426_v48 = vld [vmem:[#allocation12_spill] sm:$0xff] }
 0xd8a   :  { %v7300_v51 = vpop.f32.mrb[250].mxu0  ;;  %v7496_v45 = vpop.permute.xlu0 %7495  ;;  %v7553_v44 = vsel %vm326_vm2, %v12426_v48, %v12054_v7 }
 0xd8b   :  { %v9443_v53 = vpop.f32.mrb[251].mxu0  ;;  %v7577_v22 = vsel %vm7576_vm7, %v7560_v9, %v7496_v45  ;;  %v7570_v32 = vsel %vm7559_vm6, %v7553_v44, %v12068_v2 }
 0xd8f   :  { %v7345_v11 = vpop.f32.mrb[8].mxu1 }
 0xd90   :  { %7525 = vrot.lane.b32.xlu1 %v7345_v11, %s9855_s19  ;;  %v9448_v40 = vpop.f32.mrb[9].mxu1 }
 0xd91   :  { %v7348_v59 = vpop.f32.mrb[10].mxu1 }
 0xd92   :  { %v9449_v37 = vpop.f32.mrb[11].mxu1  ;;  %v7500_v12 = vpop.permute.xlu0 %7499 }
 0xd93   :  { %v7579_v33 = vsel %vm7576_vm7, %v7562_v10, %v7500_v12  ;;  %v9835_v10 = vld [vmem:[%s12367_s0 + $0x18] sm:$0xff] }
 0xd95   :  { %v7498_v5 = vpop.permute.xlu1 %7497 }
 0xd96   :  { %v7578_v3 = vsel %vm7576_vm7, %v7561_v14, %v7498_v5 }
 0xd97   :  { %v7609_v36 = vcombine.low %v7577_v22, %v7578_v3 }
 0xd9d   :  { %v7502_v17 = vpop.permute.xlu1 %7501 }
 0xd9e   :  { %v7580_v50 = vsel %vm7576_vm7, %v7563_v6, %v7502_v17 }
 0xd9f   :  { %v7610_v46 = vcombine.low %v7579_v33, %v7580_v50 }
 0xda1   :  { %v7625_v31 = vpack.c.bf16 %v7610_v46, %v7609_v36  ;;  %v7504_v52 = vpop.permute.xlu0 %7503 }
 0xda2   :  { %v7581_v57 = vsel %vm7576_vm7, %v7564_v21, %v7504_v52 }
 0xda3   :  { %9454 = vmatprep.mubr.msk.bf16.mxu0 %vm52_vm0, %v7625_v31 }
 0xda5   :  { %v7506_v1 = vpop.permute.xlu1 %7505 }
 0xda6   :  { %v7582_v49 = vsel %vm7576_vm7, %v7565_v60, %v7506_v1 }
 0xda7   :  { %v7611_v56 = vcombine.low %v7581_v57, %v7582_v49  ;;  %v9836_v57 = vld [vmem:[%s12367_s0 + $0x30] sm:$0xff] }
 0xda9   :  { %v7508_v34 = vpop.permute.xlu0 %7507 }
 0xdaa   :  { %v7583_v4 = vsel %vm7576_vm7, %v7566_v41, %v7508_v34 }
 0xdad   :  { %v7510_v24 = vpop.permute.xlu1 %7509 }
 0xdae   :  { %v7584_v62 = vsel %vm7576_vm7, %v7567_v23, %v7510_v24 }
 0xdaf   :  { %v7612_v42 = vcombine.low %v7583_v4, %v7584_v62  ;;  %v9838_v4 = vld [vmem:[%s12367_s0 + $0x38] sm:$0xff] }
 0xdb1   :  { %v7626_v47 = vpack.c.bf16 %v7612_v42, %v7611_v56  ;;  %v7512_v25 = vpop.permute.xlu0 %7511  ;;  %v9837_v56 = vld [vmem:[%s12367_s0 + $0x20] sm:$0xff]  ;;  %v9839_v42 = vld [vmem:[%s12367_s0 + $0x28] sm:$0xff] }
 0xdb2   :  { %v7585_v26 = vsel %vm7576_vm7, %v7568_v15, %v7512_v25 }
 0xdb3   :  { %9455 = vmatmul.mubr.msk.bf16.vlgmr.msra.gmra.mrb[252].mxu0 %vm52_vm0, %v7626_v47 }
 0xdb6   :  { %v7514_v27 = vpop.permute.xlu1 %7513 }
 0xdb7   :  { %v7586_v54 = vsel %vm7576_vm7, %v7569_v63, %v7514_v27 }
 0xdb8   :  { %v7613_v19 = vcombine.low %v7585_v26, %v7586_v54 }
 0xdb9   :  { %v7516_v58 = vpop.permute.xlu0 %7515 }
 0xdba   :  { %v7587_v61 = vsel %vm7576_vm7, %v7570_v32, %v7516_v58 }
 0xdbe   :  { %v7518_v30 = vpop.permute.xlu1 %7517 }
 0xdbf   :  { %v7588_v51 = vsel %vm7576_vm7, %v7571_v29, %v7518_v30 }
 0xdc0   :  { %v7614_v53 = vcombine.low %v7587_v61, %v7588_v51 }
 0xdc2   :  { %v7627_v11 = vpack.c.bf16 %v7614_v53, %v7613_v19 }
 0xdc4   :  { %9458 = vmatprep.mubr.msk.bf16.mxu0 %vm52_vm0, %v7627_v11 }
 0xdea   :  { %v7520_v18 = vpop.permute.xlu0 %7519 }
 0xdeb   :  { %v7589_v7 = vsel %vm7576_vm7, %v12071_v28, %v7520_v18  ;;  %v8365_v28 = vld [vmem:[%s12372_s5] ss:$0 sm:$0xff] }
 0xdf2   :  { %v7522_v40 = vpop.permute.xlu1 %7521 }
 0xdf3   :  { %v7590_v43 = vsel %vm7576_vm7, %v12057_v55, %v7522_v40  ;;  %v9832_v55 = vld [vmem:[%s12367_s0 + $0x10] sm:$0xff] }
 0xdf4   :  { %v7615_v59 = vcombine.low %v7589_v7, %v7590_v43 }
 0xdfb   :  { %v7524_v37 = vpop.permute.xlu0 %7523 }
 0xdfc   :  { %v7591_v45 = vsel %vm7576_vm7, %v12074_v38, %v7524_v37  ;;  %v9833_v38 = vld [vmem:[%s12367_s0] sm:$0xff] }
 0xe02   :  { %v7526_v2 = vpop.permute.xlu1 %7525 }
 0xe03   :  { %v7592_v14 = vsel %vm7576_vm7, %v12060_v8, %v7526_v2 }
 0xe04   :  { %v7616_v9 = vcombine.low %v7591_v45, %v7592_v14  ;;  %v9518_v14 = vld [vmem:[%s12373_s8] sm:$0xff]  }
 0xe05   :  { %9462 = vmatprep.subr.bf16.mxu1 %v9518_v14 }
 0xe06   :  { %v7628_v5 = vpack.c.bf16 %v7616_v9, %v7615_v59  ;;  %9463 = vmatpush3.bf16.msra.mxu1 %v9518_v14  ;;  %v9519_v9 = vld [vmem:[%s12373_s8 + $0x8] sm:$0xff]  }
 0xe07   :  { %9464 = vmatprep.subr.bf16.mxu1 %v9519_v9 }
 0xe08   :  { %9459 = vmatmul.mubr.msk.bf16.gmra.mrb[0].mxu0 %vm52_vm0, %v7628_v5 }
 0xe0a   :  { %9465 = vmatpush3.bf16.msra.mxu1 %v9519_v9 }
 0xe86   :  { %v9456_v22 = vpop.f32.mrb[252].mxu0 }
 0xe87   :  { %v7691_v3 = vpop.f32.mrb[253].mxu0  ;;  %v7724_v36 = vadd.f32 %v9832_v55, %v9456_v22 }
 0xe88   :  { %v7722_v8 = vadd.f32 %v9833_v38, %v7691_v3  ;;  %v9457_v12 = vpop.f32.mrb[254].mxu0 }
 0xe89   :  { %v7694_v13 = vpop.f32.mrb[255].mxu0  ;;  %v12180_v6 = vadd.f32 %v8365_v28, %v7724_v36  ;;  %v7725_v17 = vadd.f32 %v9835_v10, %v9457_v12 }
 0xe8a   :  { %v12175_v39 = vadd.f32 %v8365_v28, %v7722_v8  ;;  %v7723_v16 = vadd.f32 %v9834_v0, %v7694_v13 }
 0xe8b   :  { %v12191_v31 = vadd.f32 %v8365_v28, %v7725_v17  ;;  %v7753_v52 = vsel %vm52_vm0, %v12180_v6, 0.0 }
 0xe8c   :  { %v12185_v33 = vadd.f32 %v8365_v28, %v7723_v16  ;;  %v7747_v50 = vsel %vm52_vm0, %v12175_v39, 0.0 }
 0xe8d   :  { %7748 = vadd.xlane.f32.xlu0 %v7747_v50  ;;  %v7756_v60 = vsel %vm52_vm0, %v12191_v31, 0.0 }
 0xe8e   :  { %v7750_v46 = vsel %vm52_vm0, %v12185_v33, 0.0 }
 0xe8f   :  { %7751 = vadd.xlane.f32.xlu1 %v7750_v46 }
 0xe91   :  { %7754 = vadd.xlane.f32.xlu0 %v7753_v52 }
 0xe95   :  { %7757 = vadd.xlane.f32.xlu0 %v7756_v60 }
 0xedb   :  { %v9460_v21 = vpop.f32.mrb[0].mxu0 }
 0xedc   :  { %v7707_v1 = vpop.f32.mrb[1].mxu0  ;;  %v7728_v49 = vadd.f32 %v9836_v57, %v9460_v21 }
 0xedd   :  { %v7726_v34 = vadd.f32 %v9837_v56, %v7707_v1  ;;  %v9461_v23 = vpop.f32.mrb[2].mxu0 }
 0xede   :  { %v7710_v41 = vpop.f32.mrb[3].mxu0  ;;  %v7729_v62 = vadd.f32 %v9838_v4, %v9461_v23  ;;  %v12211_v25 = vadd.f32 %v8365_v28, %v7728_v49 }
 0xedf   :  { %v12203_v24 = vadd.f32 %v8365_v28, %v7726_v34  ;;  %v7727_v47 = vadd.f32 %v9839_v42, %v7710_v41 }
 0xee0   :  { %v12217_v27 = vadd.f32 %v8365_v28, %v7729_v62  ;;  %v7765_v54 = vsel %vm52_vm0, %v12211_v25, 0.0 }
 0xee1   :  { %v12213_v63 = vadd.f32 %v8365_v28, %v7727_v47  ;;  %v7759_v15 = vsel %vm52_vm0, %v12203_v24, 0.0 }
 0xee2   :  { %7760 = vadd.xlane.f32.xlu0 %v7759_v15  ;;  %v7768_v19 = vsel %vm52_vm0, %v12217_v27, 0.0 }
 0xee3   :  { %v7762_v26 = vsel %vm52_vm0, %v12213_v63, 0.0 }
 0xee4   :  { %7763 = vadd.xlane.f32.xlu1 %v7762_v26 }
 0xee6   :  { %7766 = vadd.xlane.f32.xlu0 %v7765_v54 }
 0xee8   :  { %7769 = vadd.xlane.f32.xlu1 %v7768_v19  ;;  %v8366_v19 = vld [vmem:[%s12374_s6] ss:$0 sm:$0xff] }
 0xf1a   :  { %v7749_v58 = vpop.xlane.xlu0 %7748 }
 0xf1b   :  { %v7771_v35 = vmul.f32 0.03125, %v7749_v58 }
 0xf1c   :  { %v7752_v20 = vpop.xlane.xlu1 %7751 }
 0xf1d   :  { %v12226_v48 = vsub.f32 %v12175_v39, %v7771_v35  ;;  %v7772_v44 = vmul.f32 0.03125, %v7752_v20 }
 0xf1e   :  { %v7755_v29 = vpop.xlane.xlu0 %7754 }
 0xf1f   :  { %v12229_v32 = vsub.f32 %v12185_v33, %v7772_v44  ;;  %v7773_v30 = vmul.f32 0.03125, %v7755_v29  ;;  %v7787_v61 = vmul.f32 %v12226_v48, %v12226_v48 }
 0xf21   :  { %v12234_v51 = vsub.f32 %v12180_v6, %v7773_v30  ;;  %v7795_v53 = vsel %vm52_vm0, %v7787_v61, 0.0  ;;  %v7788_v11 = vmul.f32 %v12229_v32, %v12229_v32  ;;  %v8367_v30 = vld [vmem:[%s12375_s7] ss:$0 sm:$0xff] }
 0xf22   :  { %7796 = vadd.xlane.f32.xlu0 %v7795_v53  ;;  %v7758_v18 = vpop.xlane.xlu0 %7757 }
 0xf23   :  { %v7774_v40 = vmul.f32 0.03125, %v7758_v18  ;;  %v7798_v7 = vsel %vm52_vm0, %v7788_v11, 0.0  ;;  %v7789_v43 = vmul.f32 %v12234_v51, %v12234_v51 }
 0xf24   :  { %7799 = vadd.xlane.f32.xlu1 %v7798_v7 }
 0xf25   :  { %v12243_v59 = vsub.f32 %v12191_v31, %v7774_v40  ;;  %v7801_v37 = vsel %vm52_vm0, %v7789_v43, 0.0 }
 0xf26   :  { %7802 = vadd.xlane.f32.xlu0 %v7801_v37 }
 0xf27   :  { %v7790_v2 = vmul.f32 %v12243_v59, %v12243_v59 }
 0xf29   :  { %v7804_v45 = vsel %vm52_vm0, %v7790_v2, 0.0 }
 0xf2a   :  { %7805 = vadd.xlane.f32.xlu1 %v7804_v45 }
 0xf6f   :  { %v7761_v5 = vpop.xlane.xlu0 %7760 }
 0xf70   :  { %v7775_v22 = vmul.f32 0.03125, %v7761_v5 }
 0xf71   :  { %v7764_v28 = vpop.xlane.xlu1 %7763 }
 0xf72   :  { %v12256_v3 = vsub.f32 %v12203_v24, %v7775_v22  ;;  %v7776_v55 = vmul.f32 0.03125, %v7764_v28 }
 0xf73   :  { %v7767_v36 = vpop.xlane.xlu0 %7766 }
 0xf74   :  { %v12259_v38 = vsub.f32 %v12213_v63, %v7776_v55  ;;  %v7777_v8 = vmul.f32 0.03125, %v7767_v36  ;;  %v7791_v12 = vmul.f32 %v12256_v3, %v12256_v3 }
 0xf75   :  { %v7770_v13 = vpop.xlane.xlu1 %7769 }
 0xf76   :  { %v12264_v0 = vsub.f32 %v12211_v25, %v7777_v8  ;;  %v7778_v16 = vmul.f32 0.03125, %v7770_v13  ;;  %v7807_v10 = vsel %vm52_vm0, %v7791_v12, 0.0  ;;  %v7792_v17 = vmul.f32 %v12259_v38, %v12259_v38 }
 0xf77   :  { %7808 = vadd.xlane.f32.xlu0 %v7807_v10 }
 0xf78   :  { %v12270_v50 = vsub.f32 %v12217_v27, %v7778_v16  ;;  %v7810_v46 = vsel %vm52_vm0, %v7792_v17, 0.0  ;;  %v7793_v52 = vmul.f32 %v12264_v0, %v12264_v0 }
 0xf79   :  { %7811 = vadd.xlane.f32.xlu1 %v7810_v46 }
 0xf7a   :  { %v7813_v60 = vsel %vm52_vm0, %v7793_v52, 0.0  ;;  %v7794_v21 = vmul.f32 %v12270_v50, %v12270_v50 }
 0xf7b   :  { %7814 = vadd.xlane.f32.xlu0 %v7813_v60 }
 0xf7c   :  { %v7816_v1 = vsel %vm52_vm0, %v7794_v21, 0.0 }
 0xf7d   :  { %7817 = vadd.xlane.f32.xlu1 %v7816_v1 }
 0xfaf   :  { %v7797_v57 = vpop.xlane.xlu0 %7796 }
 0xfb0   :  { %v7819_v49 = vmul.f32 0.03125, %v7797_v57 }
 0xfb1   :  { %v7800_v56 = vpop.xlane.xlu1 %7799 }
 0xfb2   :  { %v7827_v34 = vadd.f32 1e-05, %v7819_v49  ;;  %v7820_v23 = vmul.f32 0.03125, %v7800_v56 }
 0xfb3   :  { %v7803_v41 = vpop.xlane.xlu0 %7802 }
 0xfb4   :  { %9800 = vrsqrt.f32 %v7827_v34  ;;  %v7828_v4 = vadd.f32 1e-05, %v7820_v23  ;;  %v7821_v62 = vmul.f32 0.03125, %v7803_v41 }
 0xfb6   :  { %9802 = vrsqrt.f32 %v7828_v4  ;;  %v7829_v42 = vadd.f32 1e-05, %v7821_v62 }
 0xfb7   :  { %v7806_v47 = vpop.xlane.xlu1 %7805 }
 0xfb8   :  { %9804 = vrsqrt.f32 %v7829_v42  ;;  %v7822_v15 = vmul.f32 0.03125, %v7806_v47  ;;  %v9523_v47 = vld [vmem:[%s12376_s10 + $0x18] sm:$0xff]  }
 0xfba   :  { %v7830_v26 = vadd.f32 1e-05, %v7822_v15  ;;  %v9524_v15 = vld [vmem:[%s12376_s10 + $0x20] sm:$0xff]  }
 0xfbc   :  { %9806 = vrsqrt.f32 %v7830_v26  ;;  %v9525_v26 = vld [vmem:[%s12376_s10 + $0x28] sm:$0xff]  }
 0xfbe   :  { %v9801_v54 = vpop.eup %9800 }
 0xfbf   :  { %v7843_v58 = vmul.f32 %v9801_v54, %v12226_v48  ;;  %v9526_v54 = vld [vmem:[%s12376_s10 + $0x30] sm:$0xff]  }
 0xfc0   :  { %v9803_v35 = vpop.eup %9802 }
 0xfc1   :  { %v7844_v20 = vmul.f32 %v9803_v35, %v12229_v32  ;;  %v7857_v44 = vmul.f32 %v8366_v19, %v7843_v58  ;;  %v8368_v58 = vld [vmem:[%s12377_s9] ss:$0 sm:$0xff] }
 0xfc2   :  { %v9805_v29 = vpop.eup %9804 }
 0xfc3   :  { %v7845_v61 = vmul.f32 %v9805_v29, %v12234_v51  ;;  %v7858_v53 = vmul.f32 %v8366_v19, %v7844_v20  ;;  %v7871_v11 = vadd.f32 %v8367_v30, %v7857_v44 }
 0xfc5   :  { %v7872_v18 = vadd.f32 %v8367_v30, %v7858_v53  ;;  %v7859_v7 = vmul.f32 %v8366_v19, %v7845_v61 }
 0xfc6   :  { %v9807_v40 = vpop.eup %9806 }
 0xfc7   :  { %v7846_v43 = vmul.f32 %v9807_v40, %v12243_v59  ;;  %v7879_v37 = vpack.c.bf16 %v7872_v18, %v7871_v11  ;;  %v7873_v32 = vadd.f32 %v8367_v30, %v7859_v7 }
 0xfc9   :  { %v7860_v48 = vmul.f32 %v8366_v19, %v7846_v43  ;;  %9466 = vmatprep.mubr.msk.bf16.mxu1 %vm52_vm0, %v7879_v37 }
 0xfcb   :  { %v7874_v2 = vadd.f32 %v8367_v30, %v7860_v48 }
 0xfcd   :  { %v7880_v45 = vpack.c.bf16 %v7874_v2, %v7873_v32 }
 0xfcf   :  { %9467 = vmatmul.mubr.msk.bf16.vlgmr.msra.gmra.mrb[12].mxu1 %vm52_vm0, %v7880_v45 }
0x1004   :  { %v7809_v14 = vpop.xlane.xlu0 %7808 }
0x1005   :  { %v7823_v9 = vmul.f32 0.03125, %v7809_v14 }
0x1006   :  { %v7812_v5 = vpop.xlane.xlu1 %7811 }
0x1007   :  { %v7831_v51 = vadd.f32 1e-05, %v7823_v9  ;;  %v7824_v22 = vmul.f32 0.03125, %v7812_v5 }
0x1008   :  { %v7815_v28 = vpop.xlane.xlu0 %7814 }
0x1009   :  { %9808 = vrsqrt.f32 %v7831_v51  ;;  %v7832_v55 = vadd.f32 1e-05, %v7824_v22  ;;  %v7825_v36 = vmul.f32 0.03125, %v7815_v28 }
0x100a   :  { %v7818_v8 = vpop.xlane.xlu1 %7817 }
0x100b   :  { %9810 = vrsqrt.f32 %v7832_v55  ;;  %v7833_v59 = vadd.f32 1e-05, %v7825_v36  ;;  %v7826_v12 = vmul.f32 0.03125, %v7818_v8 }
0x100d   :  { %9812 = vrsqrt.f32 %v7833_v59  ;;  %v7834_v13 = vadd.f32 1e-05, %v7826_v12 }
0x100f   :  { %9814 = vrsqrt.f32 %v7834_v13 }
0x1013   :  { %v9809_v16 = vpop.eup %9808 }
0x1014   :  { %v7847_v10 = vmul.f32 %v9809_v16, %v12256_v3 }
0x1015   :  { %v9811_v17 = vpop.eup %9810 }
0x1016   :  { %v7848_v46 = vmul.f32 %v9811_v17, %v12259_v38  ;;  %v7861_v52 = vmul.f32 %v8366_v19, %v7847_v10  ;;  %v9520_v38 = vld [vmem:[%s12376_s10] sm:$0xff]  }
0x1017   :  { %v9813_v60 = vpop.eup %9812  ;;  %9474 = vmatprep.subr.bf16.mxu0 %v9520_v38 }
0x1018   :  { %v7849_v21 = vmul.f32 %v9813_v60, %v12264_v0  ;;  %v7862_v1 = vmul.f32 %v8366_v19, %v7848_v46  ;;  %v7875_v34 = vadd.f32 %v8367_v30, %v7861_v52  ;;  %9475 = vmatpush3.bf16.msra.mxu0 %v9520_v38  ;;  %v9521_v0 = vld [vmem:[%s12376_s10 + $0x8] sm:$0xff]  }
0x1019   :  { %v9815_v57 = vpop.eup %9814  ;;  %9476 = vmatprep.subr.bf16.mxu0 %v9521_v0 }
0x101a   :  { %v7863_v49 = vmul.f32 %v8366_v19, %v7849_v21  ;;  %v7850_v56 = vmul.f32 %v9815_v57, %v12270_v50  ;;  %v7876_v23 = vadd.f32 %v8367_v30, %v7862_v1  ;;  %v9522_v50 = vld [vmem:[%s12376_s10 + $0x10] sm:$0xff]  }
0x101c   :  { %v7864_v41 = vmul.f32 %v8366_v19, %v7850_v56  ;;  %v7881_v4 = vpack.c.bf16 %v7876_v23, %v7875_v34  ;;  %v7877_v62 = vadd.f32 %v8367_v30, %v7863_v49  ;;  %9477 = vmatpush3.bf16.msra.mxu0 %v9521_v0  ;;  %v9527_v19 = vld [vmem:[%s12376_s10 + $0x38] sm:$0xff]  }
0x101d   :  { %9478 = vmatprep.subr.bf16.mxu0 %v9522_v50 }
0x101e   :  { %v7878_v42 = vadd.f32 %v8367_v30, %v7864_v41  ;;  %9470 = vmatprep.mubr.msk.bf16.mxu1 %vm52_vm0, %v7881_v4 }
0x1020   :  { %v7882_v3 = vpack.c.bf16 %v7878_v42, %v7877_v62  ;;  %9479 = vmatpush3.bf16.msra.mxu0 %v9522_v50 }
0x1021   :  { %9480 = vmatprep.subr.bf16.mxu0 %v9523_v47 }
0x1022   :  { %9471 = vmatmul.mubr.msk.bf16.gmra.mrb[16].mxu1 %vm52_vm0, %v7882_v3 }
0x1024   :  { %9481 = vmatpush3.bf16.msra.mxu0 %v9523_v47 }
0x1025   :  { %9482 = vmatprep.subr.bf16.mxu0 %v9524_v15 }
0x1028   :  { %9483 = vmatpush3.bf16.msra.mxu0 %v9524_v15 }
0x1029   :  { %9484 = vmatprep.subr.bf16.mxu0 %v9525_v26 }
0x102c   :  { %9485 = vmatpush3.bf16.msra.mxu0 %v9525_v26 }
0x102d   :  { %9486 = vmatprep.subr.bf16.mxu0 %v9526_v54 }
0x1030   :  { %9487 = vmatpush3.bf16.msra.mxu0 %v9526_v54 }
0x1031   :  { %9488 = vmatprep.subr.bf16.mxu0 %v9527_v19 }
0x1034   :  { %9489 = vmatpush3.bf16.msra.mxu0 %v9527_v19 }
0x10a2   :  { %v9468_v35 = vpop.f32.mrb[12].mxu1 }
0x10a3   :  { %v7961_v20 = vadd.f32 %v9468_v35, %v8368_v58  ;;  %v7952_v44 = vpop.f32.mrb[13].mxu1 }
0x10a4   :  { %v7953_v29 = vadd.f32 %v8368_v58, %v7952_v44  ;;  %v9469_v30 = vpop.f32.mrb[14].mxu1 }
0x10a5   :  { %v7993_v61 = vmul.f32 0.044715, %v7961_v20  ;;  %v7964_v53 = vadd.f32 %v9469_v30, %v8368_v58  ;;  %v7955_v11 = vpop.f32.mrb[15].mxu1  ;;  %v7985_v60 = vmul.f32 0.5, %v7961_v20 }
0x10a6   :  { %v7991_v18 = vmul.f32 0.044715, %v7953_v29  ;;  %v7956_v40 = vadd.f32 %v8368_v58, %v7955_v11  ;;  %v7983_v57 = vmul.f32 0.5, %v7953_v29 }
0x10a7   :  { %v8001_v7 = vmul.f32 %v7993_v61, %v7961_v20  ;;  %v7994_v43 = vmul.f32 0.044715, %v7964_v53  ;;  %v7986_v21 = vmul.f32 0.5, %v7964_v53 }
0x10a8   :  { %v7999_v37 = vmul.f32 %v7991_v18, %v7953_v29  ;;  %v7992_v48 = vmul.f32 0.044715, %v7956_v40  ;;  %v7984_v49 = vmul.f32 0.5, %v7956_v40 }
0x10a9   :  { %v8009_v32 = vmul.f32 %v8001_v7, %v7961_v20  ;;  %v8002_v2 = vmul.f32 %v7994_v43, %v7964_v53 }
0x10aa   :  { %v8007_v45 = vmul.f32 %v7999_v37, %v7953_v29  ;;  %v8000_v14 = vmul.f32 %v7992_v48, %v7956_v40 }
0x10ab   :  { %v8017_v9 = vadd.f32 %v8009_v32, %v7961_v20  ;;  %v8010_v5 = vmul.f32 %v8002_v2, %v7964_v53 }
0x10ac   :  { %v8008_v51 = vmul.f32 %v8000_v14, %v7956_v40  ;;  %v8015_v22 = vadd.f32 %v8007_v45, %v7953_v29 }
0x10ad   :  { %v8025_v28 = vmul.f32 0.7978846, %v8017_v9  ;;  %v8018_v55 = vadd.f32 %v8010_v5, %v7964_v53 }
0x10ae   :  { %v8016_v36 = vadd.f32 %v8008_v51, %v7956_v40  ;;  %v8023_v8 = vmul.f32 0.7978846, %v8015_v22 }
0x10af   :  { %9816 = vtanh.f32 %v8025_v28  ;;  %v8026_v59 = vmul.f32 0.7978846, %v8018_v55 }
0x10b0   :  { %v8024_v12 = vmul.f32 0.7978846, %v8016_v36  ;;  %9818 = vtanh.f32 %v8023_v8 }
0x10b1   :  { %9820 = vtanh.f32 %v8026_v59 }
0x10b2   :  { %9822 = vtanh.f32 %v8024_v12 }
0x10b9   :  { %v9817_v13 = vpop.eup %9816 }
0x10ba   :  { %v9819_v16 = vpop.eup %9818  ;;  %v8041_v10 = vadd.f32 1.0, %v9817_v13 }
0x10bb   :  { %v9821_v17 = vpop.eup %9820  ;;  %v8039_v46 = vadd.f32 1.0, %v9819_v16 }
0x10bc   :  { %v9823_v52 = vpop.eup %9822  ;;  %v8042_v1 = vadd.f32 1.0, %v9821_v17  ;;  %v8049_v34 = vmul.f32 %v8041_v10, %v7985_v60 }
0x10bd   :  { %v8040_v56 = vadd.f32 1.0, %v9823_v52  ;;  %v8047_v41 = vmul.f32 %v8039_v46, %v7983_v57  ;;  %v8383_v57 = vld [vmem:[%s12378_s11] ss:$0 sm:$0xff] }
0x10be   :  { %v8050_v23 = vmul.f32 %v8042_v1, %v7986_v21 }
0x10bf   :  { %v8048_v4 = vmul.f32 %v8040_v56, %v7984_v49 }
0x10c0   :  { %v8056_v62 = vpack.c.bf16 %v8050_v23, %v8049_v34 }
0x10c1   :  { %v8055_v42 = vpack.c.bf16 %v8048_v4, %v8047_v41 }
0x10c3   :  { %9490 = vmatprep.mubr.bf16.mxu0 %v8055_v42 }
0x10c4   :  { %9491 = vmatmul.mubr.bf16.vlgmr.msra.gmra.mrb[4].mxu0 %v8056_v62 }
0x10f5   :  { %v9472_v3 = vpop.f32.mrb[16].mxu1 }
0x10f6   :  { %v7977_v38 = vadd.f32 %v9472_v3, %v8368_v58  ;;  %v7968_v0 = vpop.f32.mrb[17].mxu1 }
0x10f7   :  { %v7969_v50 = vadd.f32 %v8368_v58, %v7968_v0  ;;  %v9473_v47 = vpop.f32.mrb[18].mxu1 }
0x10f8   :  { %v7997_v15 = vmul.f32 0.044715, %v7977_v38  ;;  %v7980_v26 = vadd.f32 %v9473_v47, %v8368_v58  ;;  %v7971_v54 = vpop.f32.mrb[19].mxu1  ;;  %v7989_v36 = vmul.f32 0.5, %v7977_v38 }
0x10f9   :  { %v7995_v19 = vmul.f32 0.044715, %v7969_v50  ;;  %v7972_v35 = vadd.f32 %v8368_v58, %v7971_v54  ;;  %v7987_v12 = vmul.f32 0.5, %v7969_v50 }
0x10fa   :  { %v8005_v20 = vmul.f32 %v7997_v15, %v7977_v38  ;;  %v7998_v44 = vmul.f32 0.044715, %v7980_v26  ;;  %v7990_v8 = vmul.f32 0.5, %v7980_v26 }
0x10fb   :  { %v8003_v29 = vmul.f32 %v7995_v19, %v7969_v50  ;;  %v7996_v30 = vmul.f32 0.044715, %v7972_v35  ;;  %v7988_v13 = vmul.f32 0.5, %v7972_v35 }
0x10fc   :  { %v8013_v61 = vmul.f32 %v8005_v20, %v7977_v38  ;;  %v8006_v53 = vmul.f32 %v7998_v44, %v7980_v26 }
0x10fd   :  { %v8011_v11 = vmul.f32 %v8003_v29, %v7969_v50  ;;  %v8004_v18 = vmul.f32 %v7996_v30, %v7972_v35 }
0x10fe   :  { %v8021_v40 = vadd.f32 %v8013_v61, %v7977_v38  ;;  %v8014_v7 = vmul.f32 %v8006_v53, %v7980_v26 }
0x10ff   :  { %v8012_v43 = vmul.f32 %v8004_v18, %v7972_v35  ;;  %v8019_v37 = vadd.f32 %v8011_v11, %v7969_v50 }
0x1100   :  { %v8029_v48 = vmul.f32 0.7978846, %v8021_v40  ;;  %v8022_v32 = vadd.f32 %v8014_v7, %v7980_v26 }
0x1101   :  { %v8020_v2 = vadd.f32 %v8012_v43, %v7972_v35  ;;  %v8027_v45 = vmul.f32 0.7978846, %v8019_v37 }
0x1102   :  { %9824 = vtanh.f32 %v8029_v48  ;;  %v8030_v14 = vmul.f32 0.7978846, %v8022_v32 }
0x1103   :  { %v8028_v9 = vmul.f32 0.7978846, %v8020_v2  ;;  %9826 = vtanh.f32 %v8027_v45 }
0x1104   :  { %9828 = vtanh.f32 %v8030_v14 }
0x1105   :  { %9830 = vtanh.f32 %v8028_v9 }
0x110c   :  { %v9825_v58 = vpop.eup %9824 }
0x110d   :  { %v9827_v5 = vpop.eup %9826  ;;  %v8045_v51 = vadd.f32 1.0, %v9825_v58 }
0x110e   :  { %v9829_v22 = vpop.eup %9828  ;;  %v8043_v28 = vadd.f32 1.0, %v9827_v5 }
0x110f   :  { %v9831_v55 = vpop.eup %9830  ;;  %v8046_v59 = vadd.f32 1.0, %v9829_v22  ;;  %v8053_v10 = vmul.f32 %v8045_v51, %v7989_v36 }
0x1110   :  { %v8044_v16 = vadd.f32 1.0, %v9831_v55  ;;  %v8051_v46 = vmul.f32 %v8043_v28, %v7987_v12 }
0x1111   :  { %v8054_v17 = vmul.f32 %v8046_v59, %v7990_v8 }
0x1112   :  { %v8052_v52 = vmul.f32 %v8044_v16, %v7988_v13 }
0x1113   :  { %v8058_v60 = vpack.c.bf16 %v8054_v17, %v8053_v10 }
0x1114   :  { %v8057_v21 = vpack.c.bf16 %v8052_v52, %v8051_v46 }
0x1116   :  { %9494 = vmatprep.mubr.bf16.mxu0 %v8057_v21 }
0x1117   :  { %9495 = vmatmul.mubr.bf16.gmra.mrb[8].mxu0 %v8058_v60 }
0x1197   :  { %v9492_v1 = vpop.f32.mrb[4].mxu0 }
0x1198   :  { %v8190_v49 = vadd.f32 %v9492_v1, %v12180_v6  ;;  %v8157_v56 = vpop.f32.mrb[5].mxu0 }
0x1199   :  { %v8188_v34 = vadd.f32 %v8157_v56, %v12175_v39  ;;  %v9493_v23 = vpop.f32.mrb[6].mxu0 }
0x119a   :  { %v8205_v41 = vadd.f32 %v8383_v57, %v8190_v49  ;;  %v8191_v4 = vadd.f32 %v9493_v23, %v12191_v31  ;;  %v8160_v62 = vpop.f32.mrb[7].mxu0 }
0x119b   :  { %v8203_v42 = vadd.f32 %v8383_v57, %v8188_v34  ;;  %v8189_v3 = vadd.f32 %v8160_v62, %v12185_v33 }
0x119c   :  { %8213 = vst.msk [vmem:[%s12379_s12 + $0x10] sm:$0xff] %vm52_vm0, %v8205_v41  ;;  %v8206_v38 = vadd.f32 %v8383_v57, %v8191_v4 }
0x119d   :  { %8211 = vst.msk [vmem:[%s12379_s12] sm:$0xff] %vm52_vm0, %v8203_v42  ;;  %v8204_v39 = vadd.f32 %v8383_v57, %v8189_v3 }
0x119e   :  { %8214 = vst.msk [vmem:[%s12379_s12 + $0x18] sm:$0xff] %vm52_vm0, %v8206_v38 }
0x119f   :  { %8212 = vst.msk [vmem:[%s12379_s12 + $0x8] sm:$0xff] %vm52_vm0, %v8204_v39 }
0x11ea   :  { %v9496_v6 = vpop.f32.mrb[8].mxu0 }
0x11eb   :  { %v8194_v33 = vadd.f32 %v9496_v6, %v12211_v25  ;;  %v8173_v31 = vpop.f32.mrb[9].mxu0 }
0x11ec   :  { %v8192_v0 = vadd.f32 %v8173_v31, %v12203_v24  ;;  %v9497_v50 = vpop.f32.mrb[10].mxu0 }
0x11ed   :  { %v8209_v47 = vadd.f32 %v8383_v57, %v8194_v33  ;;  %v8195_v15 = vadd.f32 %v9497_v50, %v12217_v27  ;;  %v8176_v26 = vpop.f32.mrb[11].mxu0 }
0x11ee   :  { %v8207_v54 = vadd.f32 %v8383_v57, %v8192_v0  ;;  %v8193_v19 = vadd.f32 %v8176_v26, %v12213_v63 }
0x11ef   :  { %8217 = vst.msk [vmem:[%s12379_s12 + $0x30] sm:$0xff] %vm52_vm0, %v8209_v47  ;;  %v8210_v35 = vadd.f32 %v8383_v57, %v8195_v15 }
0x11f0   :  { %8215 = vst.msk [vmem:[%s12379_s12 + $0x20] sm:$0xff] %vm52_vm0, %v8207_v54  ;;  %v8208_v24 = vadd.f32 %v8383_v57, %v8193_v19 }
0x11f1   :  { %8218 = vst.msk [vmem:[%s12379_s12 + $0x38] sm:$0xff] %vm52_vm0, %v8210_v35 }
0x11f2   :  { %8216 = vst.msk [vmem:[%s12379_s12 + $0x28] sm:$0xff] %vm52_vm0, %v8208_v24 }

</bundles_post_ra>
